<compile_context>
chip_gen: v6e
topology: v6e:2x2x1
jax: 0.10.0
libtpu: 0.0.40
codegen_flags: <defaults>
</compile_context>

<pallas_src>
import math

import jax
import jax.numpy as jnp
from jax.experimental import pallas as pl
from jax.experimental.pallas import tpu as pltpu


# ------------------------------ Pallas kernel -------------------------------

def upsample_kernel(xt_ref, w_ref, o_ref):
    """Fused 3x3 conv (bias=False) + PixelShuffle(2) for one row tile.

    xt_ref: (1, 1, th+2, C, Wp)  bf16  padded input rows (1-row halo each side)
    w_ref:  (3, 3, Cout, C)      bf16  conv weights; output channels permuted
                                       so row g*Cq + cq holds original channel
                                       4*cq + g, with g = 2*ry + rx
    o_ref:  (1, Cq, 2*th, 2*W)   f32   pixel-shuffled output tile
    """
    th2, C, Wp = xt_ref.shape[2], xt_ref.shape[3], xt_ref.shape[4]
    th, W = th2 - 2, Wp - 2
    Cout = w_ref.shape[2]
    Cq = Cout // 4

    # Exact 0/1 lane-interleave matrices: p0 scatters column w -> lane 2w,
    # p1 -> lane 2w+1.  Built from iota (no HBM traffic, no extra VMEM blocks);
    # the interleave runs on the MXU, which is idle in this HBM-bound kernel.
    # (For very large W one would additionally tile the W axis so these stay
    #  small; not needed at the sizes exercised here.)
    lane = jax.lax.broadcasted_iota(jnp.int32, (W, 2 * W), 1)
    src = jax.lax.broadcasted_iota(jnp.int32, (W, 2 * W), 0)
    p0 = (lane == 2 * src).astype(jnp.float32)
    p1 = (lane == 2 * src + 1).astype(jnp.float32)

    for hh in range(th):                    # static unroll; th kept small by wrapper
        # --- 3x3 conv for one output row: 9 (Cout,C)@(C,W) MXU dots --------
        acc = jnp.zeros((Cout, W), jnp.float32)
        for ky in range(3):
            row = xt_ref[0, 0, hh + ky, :, :]            # (C, Wp), one slab load
            for kx in range(3):
                tap = row[:, kx:kx + W]                  # shifted view, (C, W)
                acc = acc + jnp.dot(w_ref[ky, kx], tap,
                                    preferred_element_type=jnp.float32)

        # --- fused PixelShuffle(2): store lane-dense (Cq, 2W) output rows ---
        for ry in range(2):
            a = acc[(2 * ry + 0) * Cq:(2 * ry + 1) * Cq, :]   # rx = 0 group
            b = acc[(2 * ry + 1) * Cq:(2 * ry + 2) * Cq, :]   # rx = 1 group
            out_row = (jnp.dot(a, p0, preferred_element_type=jnp.float32)
                       + jnp.dot(b, p1, preferred_element_type=jnp.float32))
            o_ref[0, :, 2 * hh + ry, :] = out_row.astype(o_ref.dtype)


# ------------------------------- JAX wrapper --------------------------------

def _pick_rows_per_step(H, W, C, Cout, *, block_budget=16 * 2**20, row_cap=32):
    """Conv-output rows per grid step: must divide H, keep 2*t a multiple of 8
    (unless t == H), and keep the double-buffered block footprint in budget."""
    Cq = Cout // 4

    def fits(t):
        in_b = (t + 2) * C * (W + 2) * 2           # bf16 input block
        out_b = Cq * (2 * t) * (2 * W) * 4         # f32 output block
        return 2 * (in_b + out_b) <= block_budget  # double-buffered by Pallas

    cands = [t for t in range(1, H + 1)
             if H % t == 0 and (t == H or t % 4 == 0) and t <= row_cap]
    good = [t for t in cands if fits(t)]
    if good:
        return max(good)
    return min(cands) if cands else H


def upsample_forward_pallas(x, w, *, upscale=2, compute_dtype=jnp.bfloat16):
    """Pallas implementation of UpSample.forward (Conv2d 3x3 -> PixelShuffle(2)).

    x: (B, C, H, W) float32
    w: (2*C, C, 3, 3) float32 conv weight (bias=False)
    returns (B, 2*C // upscale**2, H*upscale, W*upscale) float32
    """
    assert upscale == 2, "kernel is specialized for PixelShuffle(2)"
    B, C, H, W = x.shape
    Cout = w.shape[0]
    assert w.shape == (Cout, C, 3, 3) and Cout == 2 * C and Cout % 4 == 0
    r = upscale
    Cq = Cout // (r * r)
    Wp = W + 2

    th = _pick_rows_per_step(H, W, C, Cout)
    n_t = H // th

    # ---- wrapper-side prep: layout plumbing only (~1x input bytes) ----------
    # Padded (B, n_t, th+2, C, Wp) layout: the kernel reads each conv row as a
    # single contiguous (C, Wp) slab, and each row tile carries its own 1-row
    # halo so the BlockSpec blocks never overlap (no in-HBM im2col).
    xt = jnp.transpose(x.astype(compute_dtype), (0, 2, 1, 3))     # (B, H, C, W)
    xt = jnp.pad(xt, ((0, 0), (1, 1), (0, 0), (1, 1)))            # (B, H+2, C, Wp)
    if n_t == 1:
        xtiles = xt[:, None]                                      # (B, 1, H+2, C, Wp)
    else:
        rows = (jnp.arange(n_t)[:, None] * th
                + jnp.arange(th + 2)[None, :]).reshape(-1)
        xtiles = jnp.take(xt, rows, axis=1).reshape(B, n_t, th + 2, C, Wp)

    # Permute output channels so PixelShuffle group g = 2*ry + rx is contiguous
    # (row g*Cq + cq holds original channel 4*cq + g), then pack as
    # (ky, kx, Cout, C) so w_ref[ky, kx] is one (Cout, C) MXU operand.
    perm = (4 * jnp.arange(Cq)[None, :] + jnp.arange(4)[:, None]).reshape(-1)
    w_packed = jnp.transpose(w[perm].astype(compute_dtype), (2, 3, 0, 1))

    return pl.pallas_call(
        upsample_kernel,
        out_shape=jax.ShapeDtypeStruct((B, Cq, r * H, r * W), jnp.float32),
        grid=(B, n_t),
        in_specs=[
            pl.BlockSpec((1, 1, th + 2, C, Wp), lambda b, i: (b, i, 0, 0, 0)),
            # Constant index map -> packed weights stay resident in VMEM.
            pl.BlockSpec((3, 3, Cout, C), lambda b, i: (0, 0, 0, 0)),
        ],
        out_specs=pl.BlockSpec((1, Cq, r * th, r * W), lambda b, i: (b, 0, i, 0)),
        compiler_params=pltpu.CompilerParams(
            dimension_semantics=("parallel", "parallel"),
            vmem_limit_bytes=48 * 2**20),
    )(xtiles, w_packed)


# ------------------------- pure-JAX reference (check) -----------------------

def upsample_reference(x, w, *, upscale=2):
    y = jax.lax.conv_general_dilated(
        x, w, (1, 1), ((1, 1), (1, 1)),
        dimension_numbers=("NCHW", "OIHW", "NCHW"),
        precision=jax.lax.Precision.HIGHEST)
    B, C2, H, W = y.shape
    r = upscale
    y = y.reshape(B, C2 // (r * r), r, r, H, W)
    y = jnp.transpose(y, (0, 1, 4, 2, 5, 3))
    return y.reshape(B, C2 // (r * r), H * r, W * r)


# ----------------------------------- main ------------------------------------

if __name__ == "__main__":
    B, C, H, W = 2, 4, 16, 16          # channels=4 -> conv out 8 -> shuffle 2

    key = jax.random.PRNGKey(0)
    kw, kx = jax.random.split(key)

    # Deterministic synthetic parameters (bias=False).
    w = jax.random.normal(kw, (2 * C, C, 3, 3), jnp.float32) / math.sqrt(9 * C)
    x = jax.random.normal(kx, (B, C, H, W), jnp.float32)

    out = jax.block_until_ready(upsample_forward_pallas(x, w))

    # Reference evaluated on the same bf16-rounded operands the kernel consumes
    # (the kernel uses bf16 inputs/weights with f32 accumulation).
    xb = x.astype(jnp.bfloat16).astype(jnp.float32)
    wb = w.astype(jnp.bfloat16).astype(jnp.float32)
    ref = upsample_reference(xb, wb)

    assert out.shape == ref.shape == (B, (2 * C) // 4, 2 * H, 2 * W), out.shape
    max_err = float(jnp.max(jnp.abs(out - ref)))
    assert jnp.allclose(out, ref, rtol=1e-2, atol=1e-2), max_err

    print("KERNEL_OK")
</pallas_src>

<mosaic_0001>
module attributes {stable_mosaic.version = 11 : i64} {
  func.func @upsample_kernel(%arg0: i32, %arg1: i32, %arg2: memref<1x1x18x4x18xbf16, #tpu.memory_space<vmem>>, %arg3: memref<3x3x8x4xbf16, #tpu.memory_space<vmem>>, %arg4: memref<1x2x32x32xf32, #tpu.memory_space<vmem>>) attributes {dimension_semantics = [#tpu.dimension_semantics<parallel>, #tpu.dimension_semantics<parallel>], iteration_bounds = array<i64: 2, 1>, scalar_prefetch = 0 : i64, scratch_operands = 0 : i64, tpu.core_type = #tpu.core_type<tc>, window_params = [{transform_indices = @transform_0, window_bounds = array<i64: 1, 1, 18, 4, 18>}, {pipeline_mode = #tpu.pipeline_mode<synchronous>, transform_indices = @transform_1, window_bounds = array<i64: 3, 3, 8, 4>}, {transform_indices = @transform_2, window_bounds = array<i64: 1, 2, 32, 32>}]} {
    %0 = tpu.iota {dimensions = array<i32: 1>} : vector<16x32xi32>
    %1 = tpu.iota {dimensions = array<i32: 0>} : vector<16x32xi32>
    %c2_i32 = arith.constant 2 : i32
    %2 = vector.broadcast %c2_i32 : i32 to vector<16x32xi32>
    %3 = arith.muli %2, %1 : vector<16x32xi32>
    %4 = arith.cmpi eq, %0, %3 : vector<16x32xi32>
    %5 = arith.extui %4 : vector<16x32xi1> to vector<16x32xi32>
    %6 = arith.sitofp %5 : vector<16x32xi32> to vector<16x32xf32>
    %c2_i32_0 = arith.constant 2 : i32
    %7 = vector.broadcast %c2_i32_0 : i32 to vector<16x32xi32>
    %8 = arith.muli %7, %1 : vector<16x32xi32>
    %c1_i32 = arith.constant 1 : i32
    %9 = vector.broadcast %c1_i32 : i32 to vector<16x32xi32>
    %10 = arith.addi %8, %9 : vector<16x32xi32>
    %11 = arith.cmpi eq, %0, %10 : vector<16x32xi32>
    %12 = arith.extui %11 : vector<16x32xi1> to vector<16x32xi32>
    %13 = arith.sitofp %12 : vector<16x32xi32> to vector<16x32xf32>
    %cst = arith.constant 0.000000e+00 : f32
    %14 = vector.broadcast %cst : f32 to vector<8x16xf32>
    %c0 = arith.constant 0 : index
    %c0_1 = arith.constant 0 : index
    %c0_2 = arith.constant 0 : index
    %c0_3 = arith.constant 0 : index
    %c0_4 = arith.constant 0 : index
    %15 = vector.load %arg2[%c0, %c0_1, %c0_2, %c0_3, %c0_4] : memref<1x1x18x4x18xbf16, #tpu.memory_space<vmem>>, vector<1x1x1x4x18xbf16>
    %16 = vector.shape_cast %15 : vector<1x1x1x4x18xbf16> to vector<4x18xbf16>
    %17 = vector.extract_strided_slice %16 {offsets = [0, 0], sizes = [4, 16], strides = [1, 1]} : vector<4x18xbf16> to vector<4x16xbf16>
    %c0_5 = arith.constant 0 : index
    %c0_6 = arith.constant 0 : index
    %c0_7 = arith.constant 0 : index
    %c0_8 = arith.constant 0 : index
    %18 = vector.load %arg3[%c0_5, %c0_6, %c0_7, %c0_8] : memref<3x3x8x4xbf16, #tpu.memory_space<vmem>>, vector<1x1x8x4xbf16>
    %19 = vector.shape_cast %18 : vector<1x1x8x4xbf16> to vector<8x4xbf16>
    %cst_9 = arith.constant dense<0.000000e+00> : vector<8x16xf32>
    %20 = tpu.matmul %19, %17, %cst_9 {dimension_numbers = #tpu.dot_dimension_numbers<[1], [0], [0], [1], [0, 0, 1, 1], [], []>} : vector<8x4xbf16>, vector<4x16xbf16>, vector<8x16xf32> -> vector<8x16xf32>
    %21 = arith.addf %14, %20 : vector<8x16xf32>
    %22 = vector.extract_strided_slice %16 {offsets = [0, 1], sizes = [4, 16], strides = [1, 1]} : vector<4x18xbf16> to vector<4x16xbf16>
    %c0_10 = arith.constant 0 : index
    %c1 = arith.constant 1 : index
    %c0_11 = arith.constant 0 : index
    %c0_12 = arith.constant 0 : index
    %23 = vector.load %arg3[%c0_10, %c1, %c0_11, %c0_12] : memref<3x3x8x4xbf16, #tpu.memory_space<vmem>>, vector<1x1x8x4xbf16>
    %24 = vector.shape_cast %23 : vector<1x1x8x4xbf16> to vector<8x4xbf16>
    %cst_13 = arith.constant dense<0.000000e+00> : vector<8x16xf32>
    %25 = tpu.matmul %24, %22, %cst_13 {dimension_numbers = #tpu.dot_dimension_numbers<[1], [0], [0], [1], [0, 0, 1, 1], [], []>} : vector<8x4xbf16>, vector<4x16xbf16>, vector<8x16xf32> -> vector<8x16xf32>
    %26 = arith.addf %21, %25 : vector<8x16xf32>
    %27 = vector.extract_strided_slice %16 {offsets = [0, 2], sizes = [4, 16], strides = [1, 1]} : vector<4x18xbf16> to vector<4x16xbf16>
    %c0_14 = arith.constant 0 : index
    %c2 = arith.constant 2 : index
    %c0_15 = arith.constant 0 : index
    %c0_16 = arith.constant 0 : index
    %28 = vector.load %arg3[%c0_14, %c2, %c0_15, %c0_16] : memref<3x3x8x4xbf16, #tpu.memory_space<vmem>>, vector<1x1x8x4xbf16>
    %29 = vector.shape_cast %28 : vector<1x1x8x4xbf16> to vector<8x4xbf16>
    %cst_17 = arith.constant dense<0.000000e+00> : vector<8x16xf32>
    %30 = tpu.matmul %29, %27, %cst_17 {dimension_numbers = #tpu.dot_dimension_numbers<[1], [0], [0], [1], [0, 0, 1, 1], [], []>} : vector<8x4xbf16>, vector<4x16xbf16>, vector<8x16xf32> -> vector<8x16xf32>
    %31 = arith.addf %26, %30 : vector<8x16xf32>
    %c0_18 = arith.constant 0 : index
    %c0_19 = arith.constant 0 : index
    %c1_20 = arith.constant 1 : index
    %c0_21 = arith.constant 0 : index
    %c0_22 = arith.constant 0 : index
    %32 = vector.load %arg2[%c0_18, %c0_19, %c1_20, %c0_21, %c0_22] : memref<1x1x18x4x18xbf16, #tpu.memory_space<vmem>>, vector<1x1x1x4x18xbf16>
    %33 = vector.shape_cast %32 : vector<1x1x1x4x18xbf16> to vector<4x18xbf16>
    %34 = vector.extract_strided_slice %33 {offsets = [0, 0], sizes = [4, 16], strides = [1, 1]} : vector<4x18xbf16> to vector<4x16xbf16>
    %c1_23 = arith.constant 1 : index
    %c0_24 = arith.constant 0 : index
    %c0_25 = arith.constant 0 : index
    %c0_26 = arith.constant 0 : index
    %35 = vector.load %arg3[%c1_23, %c0_24, %c0_25, %c0_26] : memref<3x3x8x4xbf16, #tpu.memory_space<vmem>>, vector<1x1x8x4xbf16>
    %36 = vector.shape_cast %35 : vector<1x1x8x4xbf16> to vector<8x4xbf16>
    %cst_27 = arith.constant dense<0.000000e+00> : vector<8x16xf32>
    %37 = tpu.matmul %36, %34, %cst_27 {dimension_numbers = #tpu.dot_dimension_numbers<[1], [0], [0], [1], [0, 0, 1, 1], [], []>} : vector<8x4xbf16>, vector<4x16xbf16>, vector<8x16xf32> -> vector<8x16xf32>
    %38 = arith.addf %31, %37 : vector<8x16xf32>
    %39 = vector.extract_strided_slice %33 {offsets = [0, 1], sizes = [4, 16], strides = [1, 1]} : vector<4x18xbf16> to vector<4x16xbf16>
    %c1_28 = arith.constant 1 : index
    %c1_29 = arith.constant 1 : index
    %c0_30 = arith.constant 0 : index
    %c0_31 = arith.constant 0 : index
    %40 = vector.load %arg3[%c1_28, %c1_29, %c0_30, %c0_31] : memref<3x3x8x4xbf16, #tpu.memory_space<vmem>>, vector<1x1x8x4xbf16>
    %41 = vector.shape_cast %40 : vector<1x1x8x4xbf16> to vector<8x4xbf16>
    %cst_32 = arith.constant dense<0.000000e+00> : vector<8x16xf32>
    %42 = tpu.matmul %41, %39, %cst_32 {dimension_numbers = #tpu.dot_dimension_numbers<[1], [0], [0], [1], [0, 0, 1, 1], [], []>} : vector<8x4xbf16>, vector<4x16xbf16>, vector<8x16xf32> -> vector<8x16xf32>
    %43 = arith.addf %38, %42 : vector<8x16xf32>
    %44 = vector.extract_strided_slice %33 {offsets = [0, 2], sizes = [4, 16], strides = [1, 1]} : vector<4x18xbf16> to vector<4x16xbf16>
    %c1_33 = arith.constant 1 : index
    %c2_34 = arith.constant 2 : index
    %c0_35 = arith.constant 0 : index
    %c0_36 = arith.constant 0 : index
    %45 = vector.load %arg3[%c1_33, %c2_34, %c0_35, %c0_36] : memref<3x3x8x4xbf16, #tpu.memory_space<vmem>>, vector<1x1x8x4xbf16>
    %46 = vector.shape_cast %45 : vector<1x1x8x4xbf16> to vector<8x4xbf16>
    %cst_37 = arith.constant dense<0.000000e+00> : vector<8x16xf32>
    %47 = tpu.matmul %46, %44, %cst_37 {dimension_numbers = #tpu.dot_dimension_numbers<[1], [0], [0], [1], [0, 0, 1, 1], [], []>} : vector<8x4xbf16>, vector<4x16xbf16>, vector<8x16xf32> -> vector<8x16xf32>
    %48 = arith.addf %43, %47 : vector<8x16xf32>
    %c0_38 = arith.constant 0 : index
    %c0_39 = arith.constant 0 : index
    %c2_40 = arith.constant 2 : index
    %c0_41 = arith.constant 0 : index
    %c0_42 = arith.constant 0 : index
    %49 = vector.load %arg2[%c0_38, %c0_39, %c2_40, %c0_41, %c0_42] : memref<1x1x18x4x18xbf16, #tpu.memory_space<vmem>>, vector<1x1x1x4x18xbf16>
    %50 = vector.shape_cast %49 : vector<1x1x1x4x18xbf16> to vector<4x18xbf16>
    %51 = vector.extract_strided_slice %50 {offsets = [0, 0], sizes = [4, 16], strides = [1, 1]} : vector<4x18xbf16> to vector<4x16xbf16>
    %c2_43 = arith.constant 2 : index
    %c0_44 = arith.constant 0 : index
    %c0_45 = arith.constant 0 : index
    %c0_46 = arith.constant 0 : index
    %52 = vector.load %arg3[%c2_43, %c0_44, %c0_45, %c0_46] : memref<3x3x8x4xbf16, #tpu.memory_space<vmem>>, vector<1x1x8x4xbf16>
    %53 = vector.shape_cast %52 : vector<1x1x8x4xbf16> to vector<8x4xbf16>
    %cst_47 = arith.constant dense<0.000000e+00> : vector<8x16xf32>
    %54 = tpu.matmul %53, %51, %cst_47 {dimension_numbers = #tpu.dot_dimension_numbers<[1], [0], [0], [1], [0, 0, 1, 1], [], []>} : vector<8x4xbf16>, vector<4x16xbf16>, vector<8x16xf32> -> vector<8x16xf32>
    %55 = arith.addf %48, %54 : vector<8x16xf32>
    %56 = vector.extract_strided_slice %50 {offsets = [0, 1], sizes = [4, 16], strides = [1, 1]} : vector<4x18xbf16> to vector<4x16xbf16>
    %c2_48 = arith.constant 2 : index
    %c1_49 = arith.constant 1 : index
    %c0_50 = arith.constant 0 : index
    %c0_51 = arith.constant 0 : index
    %57 = vector.load %arg3[%c2_48, %c1_49, %c0_50, %c0_51] : memref<3x3x8x4xbf16, #tpu.memory_space<vmem>>, vector<1x1x8x4xbf16>
    %58 = vector.shape_cast %57 : vector<1x1x8x4xbf16> to vector<8x4xbf16>
    %cst_52 = arith.constant dense<0.000000e+00> : vector<8x16xf32>
    %59 = tpu.matmul %58, %56, %cst_52 {dimension_numbers = #tpu.dot_dimension_numbers<[1], [0], [0], [1], [0, 0, 1, 1], [], []>} : vector<8x4xbf16>, vector<4x16xbf16>, vector<8x16xf32> -> vector<8x16xf32>
    %60 = arith.addf %55, %59 : vector<8x16xf32>
    %61 = vector.extract_strided_slice %50 {offsets = [0, 2], sizes = [4, 16], strides = [1, 1]} : vector<4x18xbf16> to vector<4x16xbf16>
    %c2_53 = arith.constant 2 : index
    %c2_54 = arith.constant 2 : index
    %c0_55 = arith.constant 0 : index
    %c0_56 = arith.constant 0 : index
    %62 = vector.load %arg3[%c2_53, %c2_54, %c0_55, %c0_56] : memref<3x3x8x4xbf16, #tpu.memory_space<vmem>>, vector<1x1x8x4xbf16>
    %63 = vector.shape_cast %62 : vector<1x1x8x4xbf16> to vector<8x4xbf16>
    %cst_57 = arith.constant dense<0.000000e+00> : vector<8x16xf32>
    %64 = tpu.matmul %63, %61, %cst_57 {dimension_numbers = #tpu.dot_dimension_numbers<[1], [0], [0], [1], [0, 0, 1, 1], [], []>} : vector<8x4xbf16>, vector<4x16xbf16>, vector<8x16xf32> -> vector<8x16xf32>
    %65 = arith.addf %60, %64 : vector<8x16xf32>
    %66 = vector.extract_strided_slice %65 {offsets = [0, 0], sizes = [2, 16], strides = [1, 1]} : vector<8x16xf32> to vector<2x16xf32>
    %67 = vector.extract_strided_slice %65 {offsets = [2, 0], sizes = [2, 16], strides = [1, 1]} : vector<8x16xf32> to vector<2x16xf32>
    %cst_58 = arith.constant dense<0.000000e+00> : vector<2x32xf32>
    %68 = tpu.matmul %66, %6, %cst_58 {dimension_numbers = #tpu.dot_dimension_numbers<[1], [0], [0], [1], [0, 0, 1, 1], [], []>} : vector<2x16xf32>, vector<16x32xf32>, vector<2x32xf32> -> vector<2x32xf32>
    %cst_59 = arith.constant dense<0.000000e+00> : vector<2x32xf32>
    %69 = tpu.matmul %67, %13, %cst_59 {dimension_numbers = #tpu.dot_dimension_numbers<[1], [0], [0], [1], [0, 0, 1, 1], [], []>} : vector<2x16xf32>, vector<16x32xf32>, vector<2x32xf32> -> vector<2x32xf32>
    %70 = arith.addf %68, %69 : vector<2x32xf32>
    %c0_60 = arith.constant 0 : index
    %c0_61 = arith.constant 0 : index
    %c0_62 = arith.constant 0 : index
    %c0_63 = arith.constant 0 : index
    %71 = vector.load %arg4[%c0_60, %c0_61, %c0_62, %c0_63] : memref<1x2x32x32xf32, #tpu.memory_space<vmem>>, vector<1x2x1x32xf32>
    %72 = vector.shape_cast %71 : vector<1x2x1x32xf32> to vector<2x32xf32>
    %73 = vector.shape_cast %70 : vector<2x32xf32> to vector<1x2x1x32xf32>
    tpu.vector_store %arg4[%c0_60, %c0_61, %c0_62, %c0_63], %73 {strides = array<i32>} : memref<1x2x32x32xf32, #tpu.memory_space<vmem>>, vector<1x2x1x32xf32>,
    %74 = vector.extract_strided_slice %65 {offsets = [4, 0], sizes = [2, 16], strides = [1, 1]} : vector<8x16xf32> to vector<2x16xf32>
    %75 = vector.extract_strided_slice %65 {offsets = [6, 0], sizes = [2, 16], strides = [1, 1]} : vector<8x16xf32> to vector<2x16xf32>
    %cst_64 = arith.constant dense<0.000000e+00> : vector<2x32xf32>
    %76 = tpu.matmul %74, %6, %cst_64 {dimension_numbers = #tpu.dot_dimension_numbers<[1], [0], [0], [1], [0, 0, 1, 1], [], []>} : vector<2x16xf32>, vector<16x32xf32>, vector<2x32xf32> -> vector<2x32xf32>
    %cst_65 = arith.constant dense<0.000000e+00> : vector<2x32xf32>
    %77 = tpu.matmul %75, %13, %cst_65 {dimension_numbers = #tpu.dot_dimension_numbers<[1], [0], [0], [1], [0, 0, 1, 1], [], []>} : vector<2x16xf32>, vector<16x32xf32>, vector<2x32xf32> -> vector<2x32xf32>
    %78 = arith.addf %76, %77 : vector<2x32xf32>
    %c0_66 = arith.constant 0 : index
    %c0_67 = arith.constant 0 : index
    %c1_68 = arith.constant 1 : index
    %c0_69 = arith.constant 0 : index
    %79 = vector.load %arg4[%c0_66, %c0_67, %c1_68, %c0_69] : memref<1x2x32x32xf32, #tpu.memory_space<vmem>>, vector<1x2x1x32xf32>
    %80 = vector.shape_cast %79 : vector<1x2x1x32xf32> to vector<2x32xf32>
    %81 = vector.shape_cast %78 : vector<2x32xf32> to vector<1x2x1x32xf32>
    tpu.vector_store %arg4[%c0_66, %c0_67, %c1_68, %c0_69], %81 {strides = array<i32>} : memref<1x2x32x32xf32, #tpu.memory_space<vmem>>, vector<1x2x1x32xf32>,
    %cst_70 = arith.constant 0.000000e+00 : f32
    %82 = vector.broadcast %cst_70 : f32 to vector<8x16xf32>
    %c0_71 = arith.constant 0 : index
    %c0_72 = arith.constant 0 : index
    %c1_73 = arith.constant 1 : index
    %c0_74 = arith.constant 0 : index
    %c0_75 = arith.constant 0 : index
    %83 = vector.load %arg2[%c0_71, %c0_72, %c1_73, %c0_74, %c0_75] : memref<1x1x18x4x18xbf16, #tpu.memory_space<vmem>>, vector<1x1x1x4x18xbf16>
    %84 = vector.shape_cast %83 : vector<1x1x1x4x18xbf16> to vector<4x18xbf16>
    %85 = vector.extract_strided_slice %84 {offsets = [0, 0], sizes = [4, 16], strides = [1, 1]} : vector<4x18xbf16> to vector<4x16xbf16>
    %c0_76 = arith.constant 0 : index
    %c0_77 = arith.constant 0 : index
    %c0_78 = arith.constant 0 : index
    %c0_79 = arith.constant 0 : index
    %86 = vector.load %arg3[%c0_76, %c0_77, %c0_78, %c0_79] : memref<3x3x8x4xbf16, #tpu.memory_space<vmem>>, vector<1x1x8x4xbf16>
    %87 = vector.shape_cast %86 : vector<1x1x8x4xbf16> to vector<8x4xbf16>
    %cst_80 = arith.constant dense<0.000000e+00> : vector<8x16xf32>
    %88 = tpu.matmul %87, %85, %cst_80 {dimension_numbers = #tpu.dot_dimension_numbers<[1], [0], [0], [1], [0, 0, 1, 1], [], []>} : vector<8x4xbf16>, vector<4x16xbf16>, vector<8x16xf32> -> vector<8x16xf32>
    %89 = arith.addf %82, %88 : vector<8x16xf32>
    %90 = vector.extract_strided_slice %84 {offsets = [0, 1], sizes = [4, 16], strides = [1, 1]} : vector<4x18xbf16> to vector<4x16xbf16>
    %c0_81 = arith.constant 0 : index
    %c1_82 = arith.constant 1 : index
    %c0_83 = arith.constant 0 : index
    %c0_84 = arith.constant 0 : index
    %91 = vector.load %arg3[%c0_81, %c1_82, %c0_83, %c0_84] : memref<3x3x8x4xbf16, #tpu.memory_space<vmem>>, vector<1x1x8x4xbf16>
    %92 = vector.shape_cast %91 : vector<1x1x8x4xbf16> to vector<8x4xbf16>
    %cst_85 = arith.constant dense<0.000000e+00> : vector<8x16xf32>
    %93 = tpu.matmul %92, %90, %cst_85 {dimension_numbers = #tpu.dot_dimension_numbers<[1], [0], [0], [1], [0, 0, 1, 1], [], []>} : vector<8x4xbf16>, vector<4x16xbf16>, vector<8x16xf32> -> vector<8x16xf32>
    %94 = arith.addf %89, %93 : vector<8x16xf32>
    %95 = vector.extract_strided_slice %84 {offsets = [0, 2], sizes = [4, 16], strides = [1, 1]} : vector<4x18xbf16> to vector<4x16xbf16>
    %c0_86 = arith.constant 0 : index
    %c2_87 = arith.constant 2 : index
    %c0_88 = arith.constant 0 : index
    %c0_89 = arith.constant 0 : index
    %96 = vector.load %arg3[%c0_86, %c2_87, %c0_88, %c0_89] : memref<3x3x8x4xbf16, #tpu.memory_space<vmem>>, vector<1x1x8x4xbf16>
    %97 = vector.shape_cast %96 : vector<1x1x8x4xbf16> to vector<8x4xbf16>
    %cst_90 = arith.constant dense<0.000000e+00> : vector<8x16xf32>
    %98 = tpu.matmul %97, %95, %cst_90 {dimension_numbers = #tpu.dot_dimension_numbers<[1], [0], [0], [1], [0, 0, 1, 1], [], []>} : vector<8x4xbf16>, vector<4x16xbf16>, vector<8x16xf32> -> vector<8x16xf32>
    %99 = arith.addf %94, %98 : vector<8x16xf32>
    %c0_91 = arith.constant 0 : index
    %c0_92 = arith.constant 0 : index
    %c2_93 = arith.constant 2 : index
    %c0_94 = arith.constant 0 : index
    %c0_95 = arith.constant 0 : index
    %100 = vector.load %arg2[%c0_91, %c0_92, %c2_93, %c0_94, %c0_95] : memref<1x1x18x4x18xbf16, #tpu.memory_space<vmem>>, vector<1x1x1x4x18xbf16>
    %101 = vector.shape_cast %100 : vector<1x1x1x4x18xbf16> to vector<4x18xbf16>
    %102 = vector.extract_strided_slice %101 {offsets = [0, 0], sizes = [4, 16], strides = [1, 1]} : vector<4x18xbf16> to vector<4x16xbf16>
    %c1_96 = arith.constant 1 : index
    %c0_97 = arith.constant 0 : index
    %c0_98 = arith.constant 0 : index
    %c0_99 = arith.constant 0 : index
    %103 = vector.load %arg3[%c1_96, %c0_97, %c0_98, %c0_99] : memref<3x3x8x4xbf16, #tpu.memory_space<vmem>>, vector<1x1x8x4xbf16>
    %104 = vector.shape_cast %103 : vector<1x1x8x4xbf16> to vector<8x4xbf16>
    %cst_100 = arith.constant dense<0.000000e+00> : vector<8x16xf32>
    %105 = tpu.matmul %104, %102, %cst_100 {dimension_numbers = #tpu.dot_dimension_numbers<[1], [0], [0], [1], [0, 0, 1, 1], [], []>} : vector<8x4xbf16>, vector<4x16xbf16>, vector<8x16xf32> -> vector<8x16xf32>
    %106 = arith.addf %99, %105 : vector<8x16xf32>
    %107 = vector.extract_strided_slice %101 {offsets = [0, 1], sizes = [4, 16], strides = [1, 1]} : vector<4x18xbf16> to vector<4x16xbf16>
    %c1_101 = arith.constant 1 : index
    %c1_102 = arith.constant 1 : index
    %c0_103 = arith.constant 0 : index
    %c0_104 = arith.constant 0 : index
    %108 = vector.load %arg3[%c1_101, %c1_102, %c0_103, %c0_104] : memref<3x3x8x4xbf16, #tpu.memory_space<vmem>>, vector<1x1x8x4xbf16>
    %109 = vector.shape_cast %108 : vector<1x1x8x4xbf16> to vector<8x4xbf16>
    %cst_105 = arith.constant dense<0.000000e+00> : vector<8x16xf32>
    %110 = tpu.matmul %109, %107, %cst_105 {dimension_numbers = #tpu.dot_dimension_numbers<[1], [0], [0], [1], [0, 0, 1, 1], [], []>} : vector<8x4xbf16>, vector<4x16xbf16>, vector<8x16xf32> -> vector<8x16xf32>
    %111 = arith.addf %106, %110 : vector<8x16xf32>
    %112 = vector.extract_strided_slice %101 {offsets = [0, 2], sizes = [4, 16], strides = [1, 1]} : vector<4x18xbf16> to vector<4x16xbf16>
    %c1_106 = arith.constant 1 : index
    %c2_107 = arith.constant 2 : index
    %c0_108 = arith.constant 0 : index
    %c0_109 = arith.constant 0 : index
    %113 = vector.load %arg3[%c1_106, %c2_107, %c0_108, %c0_109] : memref<3x3x8x4xbf16, #tpu.memory_space<vmem>>, vector<1x1x8x4xbf16>
    %114 = vector.shape_cast %113 : vector<1x1x8x4xbf16> to vector<8x4xbf16>
    %cst_110 = arith.constant dense<0.000000e+00> : vector<8x16xf32>
    %115 = tpu.matmul %114, %112, %cst_110 {dimension_numbers = #tpu.dot_dimension_numbers<[1], [0], [0], [1], [0, 0, 1, 1], [], []>} : vector<8x4xbf16>, vector<4x16xbf16>, vector<8x16xf32> -> vector<8x16xf32>
    %116 = arith.addf %111, %115 : vector<8x16xf32>
    %c0_111 = arith.constant 0 : index
    %c0_112 = arith.constant 0 : index
    %c3 = arith.constant 3 : index
    %c0_113 = arith.constant 0 : index
    %c0_114 = arith.constant 0 : index
    %117 = vector.load %arg2[%c0_111, %c0_112, %c3, %c0_113, %c0_114] : memref<1x1x18x4x18xbf16, #tpu.memory_space<vmem>>, vector<1x1x1x4x18xbf16>
    %118 = vector.shape_cast %117 : vector<1x1x1x4x18xbf16> to vector<4x18xbf16>
    %119 = vector.extract_strided_slice %118 {offsets = [0, 0], sizes = [4, 16], strides = [1, 1]} : vector<4x18xbf16> to vector<4x16xbf16>
    %c2_115 = arith.constant 2 : index
    %c0_116 = arith.constant 0 : index
    %c0_117 = arith.constant 0 : index
    %c0_118 = arith.constant 0 : index
    %120 = vector.load %arg3[%c2_115, %c0_116, %c0_117, %c0_118] : memref<3x3x8x4xbf16, #tpu.memory_space<vmem>>, vector<1x1x8x4xbf16>
    %121 = vector.shape_cast %120 : vector<1x1x8x4xbf16> to vector<8x4xbf16>
    %cst_119 = arith.constant dense<0.000000e+00> : vector<8x16xf32>
    %122 = tpu.matmul %121, %119, %cst_119 {dimension_numbers = #tpu.dot_dimension_numbers<[1], [0], [0], [1], [0, 0, 1, 1], [], []>} : vector<8x4xbf16>, vector<4x16xbf16>, vector<8x16xf32> -> vector<8x16xf32>
    %123 = arith.addf %116, %122 : vector<8x16xf32>
    %124 = vector.extract_strided_slice %118 {offsets = [0, 1], sizes = [4, 16], strides = [1, 1]} : vector<4x18xbf16> to vector<4x16xbf16>
    %c2_120 = arith.constant 2 : index
    %c1_121 = arith.constant 1 : index
    %c0_122 = arith.constant 0 : index
    %c0_123 = arith.constant 0 : index
    %125 = vector.load %arg3[%c2_120, %c1_121, %c0_122, %c0_123] : memref<3x3x8x4xbf16, #tpu.memory_space<vmem>>, vector<1x1x8x4xbf16>
    %126 = vector.shape_cast %125 : vector<1x1x8x4xbf16> to vector<8x4xbf16>
    %cst_124 = arith.constant dense<0.000000e+00> : vector<8x16xf32>
    %127 = tpu.matmul %126, %124, %cst_124 {dimension_numbers = #tpu.dot_dimension_numbers<[1], [0], [0], [1], [0, 0, 1, 1], [], []>} : vector<8x4xbf16>, vector<4x16xbf16>, vector<8x16xf32> -> vector<8x16xf32>
    %128 = arith.addf %123, %127 : vector<8x16xf32>
    %129 = vector.extract_strided_slice %118 {offsets = [0, 2], sizes = [4, 16], strides = [1, 1]} : vector<4x18xbf16> to vector<4x16xbf16>
    %c2_125 = arith.constant 2 : index
    %c2_126 = arith.constant 2 : index
    %c0_127 = arith.constant 0 : index
    %c0_128 = arith.constant 0 : index
    %130 = vector.load %arg3[%c2_125, %c2_126, %c0_127, %c0_128] : memref<3x3x8x4xbf16, #tpu.memory_space<vmem>>, vector<1x1x8x4xbf16>
    %131 = vector.shape_cast %130 : vector<1x1x8x4xbf16> to vector<8x4xbf16>
    %cst_129 = arith.constant dense<0.000000e+00> : vector<8x16xf32>
    %132 = tpu.matmul %131, %129, %cst_129 {dimension_numbers = #tpu.dot_dimension_numbers<[1], [0], [0], [1], [0, 0, 1, 1], [], []>} : vector<8x4xbf16>, vector<4x16xbf16>, vector<8x16xf32> -> vector<8x16xf32>
    %133 = arith.addf %128, %132 : vector<8x16xf32>
    %134 = vector.extract_strided_slice %133 {offsets = [0, 0], sizes = [2, 16], strides = [1, 1]} : vector<8x16xf32> to vector<2x16xf32>
    %135 = vector.extract_strided_slice %133 {offsets = [2, 0], sizes = [2, 16], strides = [1, 1]} : vector<8x16xf32> to vector<2x16xf32>
    %cst_130 = arith.constant dense<0.000000e+00> : vector<2x32xf32>
    %136 = tpu.matmul %134, %6, %cst_130 {dimension_numbers = #tpu.dot_dimension_numbers<[1], [0], [0], [1], [0, 0, 1, 1], [], []>} : vector<2x16xf32>, vector<16x32xf32>, vector<2x32xf32> -> vector<2x32xf32>
    %cst_131 = arith.constant dense<0.000000e+00> : vector<2x32xf32>
    %137 = tpu.matmul %135, %13, %cst_131 {dimension_numbers = #tpu.dot_dimension_numbers<[1], [0], [0], [1], [0, 0, 1, 1], [], []>} : vector<2x16xf32>, vector<16x32xf32>, vector<2x32xf32> -> vector<2x32xf32>
    %138 = arith.addf %136, %137 : vector<2x32xf32>
    %c0_132 = arith.constant 0 : index
    %c0_133 = arith.constant 0 : index
    %c2_134 = arith.constant 2 : index
    %c0_135 = arith.constant 0 : index
    %139 = vector.load %arg4[%c0_132, %c0_133, %c2_134, %c0_135] : memref<1x2x32x32xf32, #tpu.memory_space<vmem>>, vector<1x2x1x32xf32>
    %140 = vector.shape_cast %139 : vector<1x2x1x32xf32> to vector<2x32xf32>
    %141 = vector.shape_cast %138 : vector<2x32xf32> to vector<1x2x1x32xf32>
    tpu.vector_store %arg4[%c0_132, %c0_133, %c2_134, %c0_135], %141 {strides = array<i32>} : memref<1x2x32x32xf32, #tpu.memory_space<vmem>>, vector<1x2x1x32xf32>,
    %142 = vector.extract_strided_slice %133 {offsets = [4, 0], sizes = [2, 16], strides = [1, 1]} : vector<8x16xf32> to vector<2x16xf32>
    %143 = vector.extract_strided_slice %133 {offsets = [6, 0], sizes = [2, 16], strides = [1, 1]} : vector<8x16xf32> to vector<2x16xf32>
    %cst_136 = arith.constant dense<0.000000e+00> : vector<2x32xf32>
    %144 = tpu.matmul %142, %6, %cst_136 {dimension_numbers = #tpu.dot_dimension_numbers<[1], [0], [0], [1], [0, 0, 1, 1], [], []>} : vector<2x16xf32>, vector<16x32xf32>, vector<2x32xf32> -> vector<2x32xf32>
    %cst_137 = arith.constant dense<0.000000e+00> : vector<2x32xf32>
    %145 = tpu.matmul %143, %13, %cst_137 {dimension_numbers = #tpu.dot_dimension_numbers<[1], [0], [0], [1], [0, 0, 1, 1], [], []>} : vector<2x16xf32>, vector<16x32xf32>, vector<2x32xf32> -> vector<2x32xf32>
    %146 = arith.addf %144, %145 : vector<2x32xf32>
    %c0_138 = arith.constant 0 : index
    %c0_139 = arith.constant 0 : index
    %c3_140 = arith.constant 3 : index
    %c0_141 = arith.constant 0 : index
    %147 = vector.load %arg4[%c0_138, %c0_139, %c3_140, %c0_141] : memref<1x2x32x32xf32, #tpu.memory_space<vmem>>, vector<1x2x1x32xf32>
    %148 = vector.shape_cast %147 : vector<1x2x1x32xf32> to vector<2x32xf32>
    %149 = vector.shape_cast %146 : vector<2x32xf32> to vector<1x2x1x32xf32>
    tpu.vector_store %arg4[%c0_138, %c0_139, %c3_140, %c0_141], %149 {strides = array<i32>} : memref<1x2x32x32xf32, #tpu.memory_space<vmem>>, vector<1x2x1x32xf32>,
    %cst_142 = arith.constant 0.000000e+00 : f32
    %150 = vector.broadcast %cst_142 : f32 to vector<8x16xf32>
    %c0_143 = arith.constant 0 : index
    %c0_144 = arith.constant 0 : index
    %c2_145 = arith.constant 2 : index
    %c0_146 = arith.constant 0 : index
    %c0_147 = arith.constant 0 : index
    %151 = vector.load %arg2[%c0_143, %c0_144, %c2_145, %c0_146, %c0_147] : memref<1x1x18x4x18xbf16, #tpu.memory_space<vmem>>, vector<1x1x1x4x18xbf16>
    %152 = vector.shape_cast %151 : vector<1x1x1x4x18xbf16> to vector<4x18xbf16>
    %153 = vector.extract_strided_slice %152 {offsets = [0, 0], sizes = [4, 16], strides = [1, 1]} : vector<4x18xbf16> to vector<4x16xbf16>
    %c0_148 = arith.constant 0 : index
    %c0_149 = arith.constant 0 : index
    %c0_150 = arith.constant 0 : index
    %c0_151 = arith.constant 0 : index
    %154 = vector.load %arg3[%c0_148, %c0_149, %c0_150, %c0_151] : memref<3x3x8x4xbf16, #tpu.memory_space<vmem>>, vector<1x1x8x4xbf16>
    %155 = vector.shape_cast %154 : vector<1x1x8x4xbf16> to vector<8x4xbf16>
    %cst_152 = arith.constant dense<0.000000e+00> : vector<8x16xf32>
    %156 = tpu.matmul %155, %153, %cst_152 {dimension_numbers = #tpu.dot_dimension_numbers<[1], [0], [0], [1], [0, 0, 1, 1], [], []>} : vector<8x4xbf16>, vector<4x16xbf16>, vector<8x16xf32> -> vector<8x16xf32>
    %157 = arith.addf %150, %156 : vector<8x16xf32>
    %158 = vector.extract_strided_slice %152 {offsets = [0, 1], sizes = [4, 16], strides = [1, 1]} : vector<4x18xbf16> to vector<4x16xbf16>
    %c0_153 = arith.constant 0 : index
    %c1_154 = arith.constant 1 : index
    %c0_155 = arith.constant 0 : index
    %c0_156 = arith.constant 0 : index
    %159 = vector.load %arg3[%c0_153, %c1_154, %c0_155, %c0_156] : memref<3x3x8x4xbf16, #tpu.memory_space<vmem>>, vector<1x1x8x4xbf16>
    %160 = vector.shape_cast %159 : vector<1x1x8x4xbf16> to vector<8x4xbf16>
    %cst_157 = arith.constant dense<0.000000e+00> : vector<8x16xf32>
    %161 = tpu.matmul %160, %158, %cst_157 {dimension_numbers = #tpu.dot_dimension_numbers<[1], [0], [0], [1], [0, 0, 1, 1], [], []>} : vector<8x4xbf16>, vector<4x16xbf16>, vector<8x16xf32> -> vector<8x16xf32>
    %162 = arith.addf %157, %161 : vector<8x16xf32>
    %163 = vector.extract_strided_slice %152 {offsets = [0, 2], sizes = [4, 16], strides = [1, 1]} : vector<4x18xbf16> to vector<4x16xbf16>
    %c0_158 = arith.constant 0 : index
    %c2_159 = arith.constant 2 : index
    %c0_160 = arith.constant 0 : index
    %c0_161 = arith.constant 0 : index
    %164 = vector.load %arg3[%c0_158, %c2_159, %c0_160, %c0_161] : memref<3x3x8x4xbf16, #tpu.memory_space<vmem>>, vector<1x1x8x4xbf16>
    %165 = vector.shape_cast %164 : vector<1x1x8x4xbf16> to vector<8x4xbf16>
    %cst_162 = arith.constant dense<0.000000e+00> : vector<8x16xf32>
    %166 = tpu.matmul %165, %163, %cst_162 {dimension_numbers = #tpu.dot_dimension_numbers<[1], [0], [0], [1], [0, 0, 1, 1], [], []>} : vector<8x4xbf16>, vector<4x16xbf16>, vector<8x16xf32> -> vector<8x16xf32>
    %167 = arith.addf %162, %166 : vector<8x16xf32>
    %c0_163 = arith.constant 0 : index
    %c0_164 = arith.constant 0 : index
    %c3_165 = arith.constant 3 : index
    %c0_166 = arith.constant 0 : index
    %c0_167 = arith.constant 0 : index
    %168 = vector.load %arg2[%c0_163, %c0_164, %c3_165, %c0_166, %c0_167] : memref<1x1x18x4x18xbf16, #tpu.memory_space<vmem>>, vector<1x1x1x4x18xbf16>
    %169 = vector.shape_cast %168 : vector<1x1x1x4x18xbf16> to vector<4x18xbf16>
    %170 = vector.extract_strided_slice %169 {offsets = [0, 0], sizes = [4, 16], strides = [1, 1]} : vector<4x18xbf16> to vector<4x16xbf16>
    %c1_168 = arith.constant 1 : index
    %c0_169 = arith.constant 0 : index
    %c0_170 = arith.constant 0 : index
    %c0_171 = arith.constant 0 : index
    %171 = vector.load %arg3[%c1_168, %c0_169, %c0_170, %c0_171] : memref<3x3x8x4xbf16, #tpu.memory_space<vmem>>, vector<1x1x8x4xbf16>
    %172 = vector.shape_cast %171 : vector<1x1x8x4xbf16> to vector<8x4xbf16>
    %cst_172 = arith.constant dense<0.000000e+00> : vector<8x16xf32>
    %173 = tpu.matmul %172, %170, %cst_172 {dimension_numbers = #tpu.dot_dimension_numbers<[1], [0], [0], [1], [0, 0, 1, 1], [], []>} : vector<8x4xbf16>, vector<4x16xbf16>, vector<8x16xf32> -> vector<8x16xf32>
    %174 = arith.addf %167, %173 : vector<8x16xf32>
    %175 = vector.extract_strided_slice %169 {offsets = [0, 1], sizes = [4, 16], strides = [1, 1]} : vector<4x18xbf16> to vector<4x16xbf16>
    %c1_173 = arith.constant 1 : index
    %c1_174 = arith.constant 1 : index
    %c0_175 = arith.constant 0 : index
    %c0_176 = arith.constant 0 : index
    %176 = vector.load %arg3[%c1_173, %c1_174, %c0_175, %c0_176] : memref<3x3x8x4xbf16, #tpu.memory_space<vmem>>, vector<1x1x8x4xbf16>
    %177 = vector.shape_cast %176 : vector<1x1x8x4xbf16> to vector<8x4xbf16>
    %cst_177 = arith.constant dense<0.000000e+00> : vector<8x16xf32>
    %178 = tpu.matmul %177, %175, %cst_177 {dimension_numbers = #tpu.dot_dimension_numbers<[1], [0], [0], [1], [0, 0, 1, 1], [], []>} : vector<8x4xbf16>, vector<4x16xbf16>, vector<8x16xf32> -> vector<8x16xf32>
    %179 = arith.addf %174, %178 : vector<8x16xf32>
    %180 = vector.extract_strided_slice %169 {offsets = [0, 2], sizes = [4, 16], strides = [1, 1]} : vector<4x18xbf16> to vector<4x16xbf16>
    %c1_178 = arith.constant 1 : index
    %c2_179 = arith.constant 2 : index
    %c0_180 = arith.constant 0 : index
    %c0_181 = arith.constant 0 : index
    %181 = vector.load %arg3[%c1_178, %c2_179, %c0_180, %c0_181] : memref<3x3x8x4xbf16, #tpu.memory_space<vmem>>, vector<1x1x8x4xbf16>
    %182 = vector.shape_cast %181 : vector<1x1x8x4xbf16> to vector<8x4xbf16>
    %cst_182 = arith.constant dense<0.000000e+00> : vector<8x16xf32>
    %183 = tpu.matmul %182, %180, %cst_182 {dimension_numbers = #tpu.dot_dimension_numbers<[1], [0], [0], [1], [0, 0, 1, 1], [], []>} : vector<8x4xbf16>, vector<4x16xbf16>, vector<8x16xf32> -> vector<8x16xf32>
    %184 = arith.addf %179, %183 : vector<8x16xf32>
    %c0_183 = arith.constant 0 : index
    %c0_184 = arith.constant 0 : index
    %c4 = arith.constant 4 : index
    %c0_185 = arith.constant 0 : index
    %c0_186 = arith.constant 0 : index
    %185 = vector.load %arg2[%c0_183, %c0_184, %c4, %c0_185, %c0_186] : memref<1x1x18x4x18xbf16, #tpu.memory_space<vmem>>, vector<1x1x1x4x18xbf16>
    %186 = vector.shape_cast %185 : vector<1x1x1x4x18xbf16> to vector<4x18xbf16>
    %187 = vector.extract_strided_slice %186 {offsets = [0, 0], sizes = [4, 16], strides = [1, 1]} : vector<4x18xbf16> to vector<4x16xbf16>
    %c2_187 = arith.constant 2 : index
    %c0_188 = arith.constant 0 : index
    %c0_189 = arith.constant 0 : index
    %c0_190 = arith.constant 0 : index
    %188 = vector.load %arg3[%c2_187, %c0_188, %c0_189, %c0_190] : memref<3x3x8x4xbf16, #tpu.memory_space<vmem>>, vector<1x1x8x4xbf16>
    %189 = vector.shape_cast %188 : vector<1x1x8x4xbf16> to vector<8x4xbf16>
    %cst_191 = arith.constant dense<0.000000e+00> : vector<8x16xf32>
    %190 = tpu.matmul %189, %187, %cst_191 {dimension_numbers = #tpu.dot_dimension_numbers<[1], [0], [0], [1], [0, 0, 1, 1], [], []>} : vector<8x4xbf16>, vector<4x16xbf16>, vector<8x16xf32> -> vector<8x16xf32>
    %191 = arith.addf %184, %190 : vector<8x16xf32>
    %192 = vector.extract_strided_slice %186 {offsets = [0, 1], sizes = [4, 16], strides = [1, 1]} : vector<4x18xbf16> to vector<4x16xbf16>
    %c2_192 = arith.constant 2 : index
    %c1_193 = arith.constant 1 : index
    %c0_194 = arith.constant 0 : index
    %c0_195 = arith.constant 0 : index
    %193 = vector.load %arg3[%c2_192, %c1_193, %c0_194, %c0_195] : memref<3x3x8x4xbf16, #tpu.memory_space<vmem>>, vector<1x1x8x4xbf16>
    %194 = vector.shape_cast %193 : vector<1x1x8x4xbf16> to vector<8x4xbf16>
    %cst_196 = arith.constant dense<0.000000e+00> : vector<8x16xf32>
    %195 = tpu.matmul %194, %192, %cst_196 {dimension_numbers = #tpu.dot_dimension_numbers<[1], [0], [0], [1], [0, 0, 1, 1], [], []>} : vector<8x4xbf16>, vector<4x16xbf16>, vector<8x16xf32> -> vector<8x16xf32>
    %196 = arith.addf %191, %195 : vector<8x16xf32>
    %197 = vector.extract_strided_slice %186 {offsets = [0, 2], sizes = [4, 16], strides = [1, 1]} : vector<4x18xbf16> to vector<4x16xbf16>
    %c2_197 = arith.constant 2 : index
    %c2_198 = arith.constant 2 : index
    %c0_199 = arith.constant 0 : index
    %c0_200 = arith.constant 0 : index
    %198 = vector.load %arg3[%c2_197, %c2_198, %c0_199, %c0_200] : memref<3x3x8x4xbf16, #tpu.memory_space<vmem>>, vector<1x1x8x4xbf16>
    %199 = vector.shape_cast %198 : vector<1x1x8x4xbf16> to vector<8x4xbf16>
    %cst_201 = arith.constant dense<0.000000e+00> : vector<8x16xf32>
    %200 = tpu.matmul %199, %197, %cst_201 {dimension_numbers = #tpu.dot_dimension_numbers<[1], [0], [0], [1], [0, 0, 1, 1], [], []>} : vector<8x4xbf16>, vector<4x16xbf16>, vector<8x16xf32> -> vector<8x16xf32>
    %201 = arith.addf %196, %200 : vector<8x16xf32>
    %202 = vector.extract_strided_slice %201 {offsets = [0, 0], sizes = [2, 16], strides = [1, 1]} : vector<8x16xf32> to vector<2x16xf32>
    %203 = vector.extract_strided_slice %201 {offsets = [2, 0], sizes = [2, 16], strides = [1, 1]} : vector<8x16xf32> to vector<2x16xf32>
    %cst_202 = arith.constant dense<0.000000e+00> : vector<2x32xf32>
    %204 = tpu.matmul %202, %6, %cst_202 {dimension_numbers = #tpu.dot_dimension_numbers<[1], [0], [0], [1], [0, 0, 1, 1], [], []>} : vector<2x16xf32>, vector<16x32xf32>, vector<2x32xf32> -> vector<2x32xf32>
    %cst_203 = arith.constant dense<0.000000e+00> : vector<2x32xf32>
    %205 = tpu.matmul %203, %13, %cst_203 {dimension_numbers = #tpu.dot_dimension_numbers<[1], [0], [0], [1], [0, 0, 1, 1], [], []>} : vector<2x16xf32>, vector<16x32xf32>, vector<2x32xf32> -> vector<2x32xf32>
    %206 = arith.addf %204, %205 : vector<2x32xf32>
    %c0_204 = arith.constant 0 : index
    %c0_205 = arith.constant 0 : index
    %c4_206 = arith.constant 4 : index
    %c0_207 = arith.constant 0 : index
    %207 = vector.load %arg4[%c0_204, %c0_205, %c4_206, %c0_207] : memref<1x2x32x32xf32, #tpu.memory_space<vmem>>, vector<1x2x1x32xf32>
    %208 = vector.shape_cast %207 : vector<1x2x1x32xf32> to vector<2x32xf32>
    %209 = vector.shape_cast %206 : vector<2x32xf32> to vector<1x2x1x32xf32>
    tpu.vector_store %arg4[%c0_204, %c0_205, %c4_206, %c0_207], %209 {strides = array<i32>} : memref<1x2x32x32xf32, #tpu.memory_space<vmem>>, vector<1x2x1x32xf32>,
    %210 = vector.extract_strided_slice %201 {offsets = [4, 0], sizes = [2, 16], strides = [1, 1]} : vector<8x16xf32> to vector<2x16xf32>
    %211 = vector.extract_strided_slice %201 {offsets = [6, 0], sizes = [2, 16], strides = [1, 1]} : vector<8x16xf32> to vector<2x16xf32>
    %cst_208 = arith.constant dense<0.000000e+00> : vector<2x32xf32>
    %212 = tpu.matmul %210, %6, %cst_208 {dimension_numbers = #tpu.dot_dimension_numbers<[1], [0], [0], [1], [0, 0, 1, 1], [], []>} : vector<2x16xf32>, vector<16x32xf32>, vector<2x32xf32> -> vector<2x32xf32>
    %cst_209 = arith.constant dense<0.000000e+00> : vector<2x32xf32>
    %213 = tpu.matmul %211, %13, %cst_209 {dimension_numbers = #tpu.dot_dimension_numbers<[1], [0], [0], [1], [0, 0, 1, 1], [], []>} : vector<2x16xf32>, vector<16x32xf32>, vector<2x32xf32> -> vector<2x32xf32>
    %214 = arith.addf %212, %213 : vector<2x32xf32>
    %c0_210 = arith.constant 0 : index
    %c0_211 = arith.constant 0 : index
    %c5 = arith.constant 5 : index
    %c0_212 = arith.constant 0 : index
    %215 = vector.load %arg4[%c0_210, %c0_211, %c5, %c0_212] : memref<1x2x32x32xf32, #tpu.memory_space<vmem>>, vector<1x2x1x32xf32>
    %216 = vector.shape_cast %215 : vector<1x2x1x32xf32> to vector<2x32xf32>
    %217 = vector.shape_cast %214 : vector<2x32xf32> to vector<1x2x1x32xf32>
    tpu.vector_store %arg4[%c0_210, %c0_211, %c5, %c0_212], %217 {strides = array<i32>} : memref<1x2x32x32xf32, #tpu.memory_space<vmem>>, vector<1x2x1x32xf32>,
    %cst_213 = arith.constant 0.000000e+00 : f32
    %218 = vector.broadcast %cst_213 : f32 to vector<8x16xf32>
    %c0_214 = arith.constant 0 : index
    %c0_215 = arith.constant 0 : index
    %c3_216 = arith.constant 3 : index
    %c0_217 = arith.constant 0 : index
    %c0_218 = arith.constant 0 : index
    %219 = vector.load %arg2[%c0_214, %c0_215, %c3_216, %c0_217, %c0_218] : memref<1x1x18x4x18xbf16, #tpu.memory_space<vmem>>, vector<1x1x1x4x18xbf16>
    %220 = vector.shape_cast %219 : vector<1x1x1x4x18xbf16> to vector<4x18xbf16>
    %221 = vector.extract_strided_slice %220 {offsets = [0, 0], sizes = [4, 16], strides = [1, 1]} : vector<4x18xbf16> to vector<4x16xbf16>
    %c0_219 = arith.constant 0 : index
    %c0_220 = arith.constant 0 : index
    %c0_221 = arith.constant 0 : index
    %c0_222 = arith.constant 0 : index
    %222 = vector.load %arg3[%c0_219, %c0_220, %c0_221, %c0_222] : memref<3x3x8x4xbf16, #tpu.memory_space<vmem>>, vector<1x1x8x4xbf16>
    %223 = vector.shape_cast %222 : vector<1x1x8x4xbf16> to vector<8x4xbf16>
    %cst_223 = arith.constant dense<0.000000e+00> : vector<8x16xf32>
    %224 = tpu.matmul %223, %221, %cst_223 {dimension_numbers = #tpu.dot_dimension_numbers<[1], [0], [0], [1], [0, 0, 1, 1], [], []>} : vector<8x4xbf16>, vector<4x16xbf16>, vector<8x16xf32> -> vector<8x16xf32>
    %225 = arith.addf %218, %224 : vector<8x16xf32>
    %226 = vector.extract_strided_slice %220 {offsets = [0, 1], sizes = [4, 16], strides = [1, 1]} : vector<4x18xbf16> to vector<4x16xbf16>
    %c0_224 = arith.constant 0 : index
    %c1_225 = arith.constant 1 : index
    %c0_226 = arith.constant 0 : index
    %c0_227 = arith.constant 0 : index
    %227 = vector.load %arg3[%c0_224, %c1_225, %c0_226, %c0_227] : memref<3x3x8x4xbf16, #tpu.memory_space<vmem>>, vector<1x1x8x4xbf16>
    %228 = vector.shape_cast %227 : vector<1x1x8x4xbf16> to vector<8x4xbf16>
    %cst_228 = arith.constant dense<0.000000e+00> : vector<8x16xf32>
    %229 = tpu.matmul %228, %226, %cst_228 {dimension_numbers = #tpu.dot_dimension_numbers<[1], [0], [0], [1], [0, 0, 1, 1], [], []>} : vector<8x4xbf16>, vector<4x16xbf16>, vector<8x16xf32> -> vector<8x16xf32>
    %230 = arith.addf %225, %229 : vector<8x16xf32>
    %231 = vector.extract_strided_slice %220 {offsets = [0, 2], sizes = [4, 16], strides = [1, 1]} : vector<4x18xbf16> to vector<4x16xbf16>
    %c0_229 = arith.constant 0 : index
    %c2_230 = arith.constant 2 : index
    %c0_231 = arith.constant 0 : index
    %c0_232 = arith.constant 0 : index
    %232 = vector.load %arg3[%c0_229, %c2_230, %c0_231, %c0_232] : memref<3x3x8x4xbf16, #tpu.memory_space<vmem>>, vector<1x1x8x4xbf16>
    %233 = vector.shape_cast %232 : vector<1x1x8x4xbf16> to vector<8x4xbf16>
    %cst_233 = arith.constant dense<0.000000e+00> : vector<8x16xf32>
    %234 = tpu.matmul %233, %231, %cst_233 {dimension_numbers = #tpu.dot_dimension_numbers<[1], [0], [0], [1], [0, 0, 1, 1], [], []>} : vector<8x4xbf16>, vector<4x16xbf16>, vector<8x16xf32> -> vector<8x16xf32>
    %235 = arith.addf %230, %234 : vector<8x16xf32>
    %c0_234 = arith.constant 0 : index
    %c0_235 = arith.constant 0 : index
    %c4_236 = arith.constant 4 : index
    %c0_237 = arith.constant 0 : index
    %c0_238 = arith.constant 0 : index
    %236 = vector.load %arg2[%c0_234, %c0_235, %c4_236, %c0_237, %c0_238] : memref<1x1x18x4x18xbf16, #tpu.memory_space<vmem>>, vector<1x1x1x4x18xbf16>
    %237 = vector.shape_cast %236 : vector<1x1x1x4x18xbf16> to vector<4x18xbf16>
    %238 = vector.extract_strided_slice %237 {offsets = [0, 0], sizes = [4, 16], strides = [1, 1]} : vector<4x18xbf16> to vector<4x16xbf16>
    %c1_239 = arith.constant 1 : index
    %c0_240 = arith.constant 0 : index
    %c0_241 = arith.constant 0 : index
    %c0_242 = arith.constant 0 : index
    %239 = vector.load %arg3[%c1_239, %c0_240, %c0_241, %c0_242] : memref<3x3x8x4xbf16, #tpu.memory_space<vmem>>, vector<1x1x8x4xbf16>
    %240 = vector.shape_cast %239 : vector<1x1x8x4xbf16> to vector<8x4xbf16>
    %cst_243 = arith.constant dense<0.000000e+00> : vector<8x16xf32>
    %241 = tpu.matmul %240, %238, %cst_243 {dimension_numbers = #tpu.dot_dimension_numbers<[1], [0], [0], [1], [0, 0, 1, 1], [], []>} : vector<8x4xbf16>, vector<4x16xbf16>, vector<8x16xf32> -> vector<8x16xf32>
    %242 = arith.addf %235, %241 : vector<8x16xf32>
    %243 = vector.extract_strided_slice %237 {offsets = [0, 1], sizes = [4, 16], strides = [1, 1]} : vector<4x18xbf16> to vector<4x16xbf16>
    %c1_244 = arith.constant 1 : index
    %c1_245 = arith.constant 1 : index
    %c0_246 = arith.constant 0 : index
    %c0_247 = arith.constant 0 : index
    %244 = vector.load %arg3[%c1_244, %c1_245, %c0_246, %c0_247] : memref<3x3x8x4xbf16, #tpu.memory_space<vmem>>, vector<1x1x8x4xbf16>
    %245 = vector.shape_cast %244 : vector<1x1x8x4xbf16> to vector<8x4xbf16>
    %cst_248 = arith.constant dense<0.000000e+00> : vector<8x16xf32>
    %246 = tpu.matmul %245, %243, %cst_248 {dimension_numbers = #tpu.dot_dimension_numbers<[1], [0], [0], [1], [0, 0, 1, 1], [], []>} : vector<8x4xbf16>, vector<4x16xbf16>, vector<8x16xf32> -> vector<8x16xf32>
    %247 = arith.addf %242, %246 : vector<8x16xf32>
    %248 = vector.extract_strided_slice %237 {offsets = [0, 2], sizes = [4, 16], strides = [1, 1]} : vector<4x18xbf16> to vector<4x16xbf16>
    %c1_249 = arith.constant 1 : index
    %c2_250 = arith.constant 2 : index
    %c0_251 = arith.constant 0 : index
    %c0_252 = arith.constant 0 : index
    %249 = vector.load %arg3[%c1_249, %c2_250, %c0_251, %c0_252] : memref<3x3x8x4xbf16, #tpu.memory_space<vmem>>, vector<1x1x8x4xbf16>
    %250 = vector.shape_cast %249 : vector<1x1x8x4xbf16> to vector<8x4xbf16>
    %cst_253 = arith.constant dense<0.000000e+00> : vector<8x16xf32>
    %251 = tpu.matmul %250, %248, %cst_253 {dimension_numbers = #tpu.dot_dimension_numbers<[1], [0], [0], [1], [0, 0, 1, 1], [], []>} : vector<8x4xbf16>, vector<4x16xbf16>, vector<8x16xf32> -> vector<8x16xf32>
    %252 = arith.addf %247, %251 : vector<8x16xf32>
    %c0_254 = arith.constant 0 : index
    %c0_255 = arith.constant 0 : index
    %c5_256 = arith.constant 5 : index
    %c0_257 = arith.constant 0 : index
    %c0_258 = arith.constant 0 : index
    %253 = vector.load %arg2[%c0_254, %c0_255, %c5_256, %c0_257, %c0_258] : memref<1x1x18x4x18xbf16, #tpu.memory_space<vmem>>, vector<1x1x1x4x18xbf16>
    %254 = vector.shape_cast %253 : vector<1x1x1x4x18xbf16> to vector<4x18xbf16>
    %255 = vector.extract_strided_slice %254 {offsets = [0, 0], sizes = [4, 16], strides = [1, 1]} : vector<4x18xbf16> to vector<4x16xbf16>
    %c2_259 = arith.constant 2 : index
    %c0_260 = arith.constant 0 : index
    %c0_261 = arith.constant 0 : index
    %c0_262 = arith.constant 0 : index
    %256 = vector.load %arg3[%c2_259, %c0_260, %c0_261, %c0_262] : memref<3x3x8x4xbf16, #tpu.memory_space<vmem>>, vector<1x1x8x4xbf16>
    %257 = vector.shape_cast %256 : vector<1x1x8x4xbf16> to vector<8x4xbf16>
    %cst_263 = arith.constant dense<0.000000e+00> : vector<8x16xf32>
    %258 = tpu.matmul %257, %255, %cst_263 {dimension_numbers = #tpu.dot_dimension_numbers<[1], [0], [0], [1], [0, 0, 1, 1], [], []>} : vector<8x4xbf16>, vector<4x16xbf16>, vector<8x16xf32> -> vector<8x16xf32>
    %259 = arith.addf %252, %258 : vector<8x16xf32>
    %260 = vector.extract_strided_slice %254 {offsets = [0, 1], sizes = [4, 16], strides = [1, 1]} : vector<4x18xbf16> to vector<4x16xbf16>
    %c2_264 = arith.constant 2 : index
    %c1_265 = arith.constant 1 : index
    %c0_266 = arith.constant 0 : index
    %c0_267 = arith.constant 0 : index
    %261 = vector.load %arg3[%c2_264, %c1_265, %c0_266, %c0_267] : memref<3x3x8x4xbf16, #tpu.memory_space<vmem>>, vector<1x1x8x4xbf16>
    %262 = vector.shape_cast %261 : vector<1x1x8x4xbf16> to vector<8x4xbf16>
    %cst_268 = arith.constant dense<0.000000e+00> : vector<8x16xf32>
    %263 = tpu.matmul %262, %260, %cst_268 {dimension_numbers = #tpu.dot_dimension_numbers<[1], [0], [0], [1], [0, 0, 1, 1], [], []>} : vector<8x4xbf16>, vector<4x16xbf16>, vector<8x16xf32> -> vector<8x16xf32>
    %264 = arith.addf %259, %263 : vector<8x16xf32>
    %265 = vector.extract_strided_slice %254 {offsets = [0, 2], sizes = [4, 16], strides = [1, 1]} : vector<4x18xbf16> to vector<4x16xbf16>
    %c2_269 = arith.constant 2 : index
    %c2_270 = arith.constant 2 : index
    %c0_271 = arith.constant 0 : index
    %c0_272 = arith.constant 0 : index
    %266 = vector.load %arg3[%c2_269, %c2_270, %c0_271, %c0_272] : memref<3x3x8x4xbf16, #tpu.memory_space<vmem>>, vector<1x1x8x4xbf16>
    %267 = vector.shape_cast %266 : vector<1x1x8x4xbf16> to vector<8x4xbf16>
    %cst_273 = arith.constant dense<0.000000e+00> : vector<8x16xf32>
    %268 = tpu.matmul %267, %265, %cst_273 {dimension_numbers = #tpu.dot_dimension_numbers<[1], [0], [0], [1], [0, 0, 1, 1], [], []>} : vector<8x4xbf16>, vector<4x16xbf16>, vector<8x16xf32> -> vector<8x16xf32>
    %269 = arith.addf %264, %268 : vector<8x16xf32>
    %270 = vector.extract_strided_slice %269 {offsets = [0, 0], sizes = [2, 16], strides = [1, 1]} : vector<8x16xf32> to vector<2x16xf32>
    %271 = vector.extract_strided_slice %269 {offsets = [2, 0], sizes = [2, 16], strides = [1, 1]} : vector<8x16xf32> to vector<2x16xf32>
    %cst_274 = arith.constant dense<0.000000e+00> : vector<2x32xf32>
    %272 = tpu.matmul %270, %6, %cst_274 {dimension_numbers = #tpu.dot_dimension_numbers<[1], [0], [0], [1], [0, 0, 1, 1], [], []>} : vector<2x16xf32>, vector<16x32xf32>, vector<2x32xf32> -> vector<2x32xf32>
    %cst_275 = arith.constant dense<0.000000e+00> : vector<2x32xf32>
    %273 = tpu.matmul %271, %13, %cst_275 {dimension_numbers = #tpu.dot_dimension_numbers<[1], [0], [0], [1], [0, 0, 1, 1], [], []>} : vector<2x16xf32>, vector<16x32xf32>, vector<2x32xf32> -> vector<2x32xf32>
    %274 = arith.addf %272, %273 : vector<2x32xf32>
    %c0_276 = arith.constant 0 : index
    %c0_277 = arith.constant 0 : index
    %c6 = arith.constant 6 : index
    %c0_278 = arith.constant 0 : index
    %275 = vector.load %arg4[%c0_276, %c0_277, %c6, %c0_278] : memref<1x2x32x32xf32, #tpu.memory_space<vmem>>, vector<1x2x1x32xf32>
    %276 = vector.shape_cast %275 : vector<1x2x1x32xf32> to vector<2x32xf32>
    %277 = vector.shape_cast %274 : vector<2x32xf32> to vector<1x2x1x32xf32>
    tpu.vector_store %arg4[%c0_276, %c0_277, %c6, %c0_278], %277 {strides = array<i32>} : memref<1x2x32x32xf32, #tpu.memory_space<vmem>>, vector<1x2x1x32xf32>,
    %278 = vector.extract_strided_slice %269 {offsets = [4, 0], sizes = [2, 16], strides = [1, 1]} : vector<8x16xf32> to vector<2x16xf32>
    %279 = vector.extract_strided_slice %269 {offsets = [6, 0], sizes = [2, 16], strides = [1, 1]} : vector<8x16xf32> to vector<2x16xf32>
    %cst_279 = arith.constant dense<0.000000e+00> : vector<2x32xf32>
    %280 = tpu.matmul %278, %6, %cst_279 {dimension_numbers = #tpu.dot_dimension_numbers<[1], [0], [0], [1], [0, 0, 1, 1], [], []>} : vector<2x16xf32>, vector<16x32xf32>, vector<2x32xf32> -> vector<2x32xf32>
    %cst_280 = arith.constant dense<0.000000e+00> : vector<2x32xf32>
    %281 = tpu.matmul %279, %13, %cst_280 {dimension_numbers = #tpu.dot_dimension_numbers<[1], [0], [0], [1], [0, 0, 1, 1], [], []>} : vector<2x16xf32>, vector<16x32xf32>, vector<2x32xf32> -> vector<2x32xf32>
    %282 = arith.addf %280, %281 : vector<2x32xf32>
    %c0_281 = arith.constant 0 : index
    %c0_282 = arith.constant 0 : index
    %c7 = arith.constant 7 : index
    %c0_283 = arith.constant 0 : index
    %283 = vector.load %arg4[%c0_281, %c0_282, %c7, %c0_283] : memref<1x2x32x32xf32, #tpu.memory_space<vmem>>, vector<1x2x1x32xf32>
    %284 = vector.shape_cast %283 : vector<1x2x1x32xf32> to vector<2x32xf32>
    %285 = vector.shape_cast %282 : vector<2x32xf32> to vector<1x2x1x32xf32>
    tpu.vector_store %arg4[%c0_281, %c0_282, %c7, %c0_283], %285 {strides = array<i32>} : memref<1x2x32x32xf32, #tpu.memory_space<vmem>>, vector<1x2x1x32xf32>,
    %cst_284 = arith.constant 0.000000e+00 : f32
    %286 = vector.broadcast %cst_284 : f32 to vector<8x16xf32>
    %c0_285 = arith.constant 0 : index
    %c0_286 = arith.constant 0 : index
    %c4_287 = arith.constant 4 : index
    %c0_288 = arith.constant 0 : index
    %c0_289 = arith.constant 0 : index
    %287 = vector.load %arg2[%c0_285, %c0_286, %c4_287, %c0_288, %c0_289] : memref<1x1x18x4x18xbf16, #tpu.memory_space<vmem>>, vector<1x1x1x4x18xbf16>
    %288 = vector.shape_cast %287 : vector<1x1x1x4x18xbf16> to vector<4x18xbf16>
    %289 = vector.extract_strided_slice %288 {offsets = [0, 0], sizes = [4, 16], strides = [1, 1]} : vector<4x18xbf16> to vector<4x16xbf16>
    %c0_290 = arith.constant 0 : index
    %c0_291 = arith.constant 0 : index
    %c0_292 = arith.constant 0 : index
    %c0_293 = arith.constant 0 : index
    %290 = vector.load %arg3[%c0_290, %c0_291, %c0_292, %c0_293] : memref<3x3x8x4xbf16, #tpu.memory_space<vmem>>, vector<1x1x8x4xbf16>
    %291 = vector.shape_cast %290 : vector<1x1x8x4xbf16> to vector<8x4xbf16>
    %cst_294 = arith.constant dense<0.000000e+00> : vector<8x16xf32>
    %292 = tpu.matmul %291, %289, %cst_294 {dimension_numbers = #tpu.dot_dimension_numbers<[1], [0], [0], [1], [0, 0, 1, 1], [], []>} : vector<8x4xbf16>, vector<4x16xbf16>, vector<8x16xf32> -> vector<8x16xf32>
    %293 = arith.addf %286, %292 : vector<8x16xf32>
    %294 = vector.extract_strided_slice %288 {offsets = [0, 1], sizes = [4, 16], strides = [1, 1]} : vector<4x18xbf16> to vector<4x16xbf16>
    %c0_295 = arith.constant 0 : index
    %c1_296 = arith.constant 1 : index
    %c0_297 = arith.constant 0 : index
    %c0_298 = arith.constant 0 : index
    %295 = vector.load %arg3[%c0_295, %c1_296, %c0_297, %c0_298] : memref<3x3x8x4xbf16, #tpu.memory_space<vmem>>, vector<1x1x8x4xbf16>
    %296 = vector.shape_cast %295 : vector<1x1x8x4xbf16> to vector<8x4xbf16>
    %cst_299 = arith.constant dense<0.000000e+00> : vector<8x16xf32>
    %297 = tpu.matmul %296, %294, %cst_299 {dimension_numbers = #tpu.dot_dimension_numbers<[1], [0], [0], [1], [0, 0, 1, 1], [], []>} : vector<8x4xbf16>, vector<4x16xbf16>, vector<8x16xf32> -> vector<8x16xf32>
    %298 = arith.addf %293, %297 : vector<8x16xf32>
    %299 = vector.extract_strided_slice %288 {offsets = [0, 2], sizes = [4, 16], strides = [1, 1]} : vector<4x18xbf16> to vector<4x16xbf16>
    %c0_300 = arith.constant 0 : index
    %c2_301 = arith.constant 2 : index
    %c0_302 = arith.constant 0 : index
    %c0_303 = arith.constant 0 : index
    %300 = vector.load %arg3[%c0_300, %c2_301, %c0_302, %c0_303] : memref<3x3x8x4xbf16, #tpu.memory_space<vmem>>, vector<1x1x8x4xbf16>
    %301 = vector.shape_cast %300 : vector<1x1x8x4xbf16> to vector<8x4xbf16>
    %cst_304 = arith.constant dense<0.000000e+00> : vector<8x16xf32>
    %302 = tpu.matmul %301, %299, %cst_304 {dimension_numbers = #tpu.dot_dimension_numbers<[1], [0], [0], [1], [0, 0, 1, 1], [], []>} : vector<8x4xbf16>, vector<4x16xbf16>, vector<8x16xf32> -> vector<8x16xf32>
    %303 = arith.addf %298, %302 : vector<8x16xf32>
    %c0_305 = arith.constant 0 : index
    %c0_306 = arith.constant 0 : index
    %c5_307 = arith.constant 5 : index
    %c0_308 = arith.constant 0 : index
    %c0_309 = arith.constant 0 : index
    %304 = vector.load %arg2[%c0_305, %c0_306, %c5_307, %c0_308, %c0_309] : memref<1x1x18x4x18xbf16, #tpu.memory_space<vmem>>, vector<1x1x1x4x18xbf16>
    %305 = vector.shape_cast %304 : vector<1x1x1x4x18xbf16> to vector<4x18xbf16>
    %306 = vector.extract_strided_slice %305 {offsets = [0, 0], sizes = [4, 16], strides = [1, 1]} : vector<4x18xbf16> to vector<4x16xbf16>
    %c1_310 = arith.constant 1 : index
    %c0_311 = arith.constant 0 : index
    %c0_312 = arith.constant 0 : index
    %c0_313 = arith.constant 0 : index
    %307 = vector.load %arg3[%c1_310, %c0_311, %c0_312, %c0_313] : memref<3x3x8x4xbf16, #tpu.memory_space<vmem>>, vector<1x1x8x4xbf16>
    %308 = vector.shape_cast %307 : vector<1x1x8x4xbf16> to vector<8x4xbf16>
    %cst_314 = arith.constant dense<0.000000e+00> : vector<8x16xf32>
    %309 = tpu.matmul %308, %306, %cst_314 {dimension_numbers = #tpu.dot_dimension_numbers<[1], [0], [0], [1], [0, 0, 1, 1], [], []>} : vector<8x4xbf16>, vector<4x16xbf16>, vector<8x16xf32> -> vector<8x16xf32>
    %310 = arith.addf %303, %309 : vector<8x16xf32>
    %311 = vector.extract_strided_slice %305 {offsets = [0, 1], sizes = [4, 16], strides = [1, 1]} : vector<4x18xbf16> to vector<4x16xbf16>
    %c1_315 = arith.constant 1 : index
    %c1_316 = arith.constant 1 : index
    %c0_317 = arith.constant 0 : index
    %c0_318 = arith.constant 0 : index
    %312 = vector.load %arg3[%c1_315, %c1_316, %c0_317, %c0_318] : memref<3x3x8x4xbf16, #tpu.memory_space<vmem>>, vector<1x1x8x4xbf16>
    %313 = vector.shape_cast %312 : vector<1x1x8x4xbf16> to vector<8x4xbf16>
    %cst_319 = arith.constant dense<0.000000e+00> : vector<8x16xf32>
    %314 = tpu.matmul %313, %311, %cst_319 {dimension_numbers = #tpu.dot_dimension_numbers<[1], [0], [0], [1], [0, 0, 1, 1], [], []>} : vector<8x4xbf16>, vector<4x16xbf16>, vector<8x16xf32> -> vector<8x16xf32>
    %315 = arith.addf %310, %314 : vector<8x16xf32>
    %316 = vector.extract_strided_slice %305 {offsets = [0, 2], sizes = [4, 16], strides = [1, 1]} : vector<4x18xbf16> to vector<4x16xbf16>
    %c1_320 = arith.constant 1 : index
    %c2_321 = arith.constant 2 : index
    %c0_322 = arith.constant 0 : index
    %c0_323 = arith.constant 0 : index
    %317 = vector.load %arg3[%c1_320, %c2_321, %c0_322, %c0_323] : memref<3x3x8x4xbf16, #tpu.memory_space<vmem>>, vector<1x1x8x4xbf16>
    %318 = vector.shape_cast %317 : vector<1x1x8x4xbf16> to vector<8x4xbf16>
    %cst_324 = arith.constant dense<0.000000e+00> : vector<8x16xf32>
    %319 = tpu.matmul %318, %316, %cst_324 {dimension_numbers = #tpu.dot_dimension_numbers<[1], [0], [0], [1], [0, 0, 1, 1], [], []>} : vector<8x4xbf16>, vector<4x16xbf16>, vector<8x16xf32> -> vector<8x16xf32>
    %320 = arith.addf %315, %319 : vector<8x16xf32>
    %c0_325 = arith.constant 0 : index
    %c0_326 = arith.constant 0 : index
    %c6_327 = arith.constant 6 : index
    %c0_328 = arith.constant 0 : index
    %c0_329 = arith.constant 0 : index
    %321 = vector.load %arg2[%c0_325, %c0_326, %c6_327, %c0_328, %c0_329] : memref<1x1x18x4x18xbf16, #tpu.memory_space<vmem>>, vector<1x1x1x4x18xbf16>
    %322 = vector.shape_cast %321 : vector<1x1x1x4x18xbf16> to vector<4x18xbf16>
    %323 = vector.extract_strided_slice %322 {offsets = [0, 0], sizes = [4, 16], strides = [1, 1]} : vector<4x18xbf16> to vector<4x16xbf16>
    %c2_330 = arith.constant 2 : index
    %c0_331 = arith.constant 0 : index
    %c0_332 = arith.constant 0 : index
    %c0_333 = arith.constant 0 : index
    %324 = vector.load %arg3[%c2_330, %c0_331, %c0_332, %c0_333] : memref<3x3x8x4xbf16, #tpu.memory_space<vmem>>, vector<1x1x8x4xbf16>
    %325 = vector.shape_cast %324 : vector<1x1x8x4xbf16> to vector<8x4xbf16>
    %cst_334 = arith.constant dense<0.000000e+00> : vector<8x16xf32>
    %326 = tpu.matmul %325, %323, %cst_334 {dimension_numbers = #tpu.dot_dimension_numbers<[1], [0], [0], [1], [0, 0, 1, 1], [], []>} : vector<8x4xbf16>, vector<4x16xbf16>, vector<8x16xf32> -> vector<8x16xf32>
    %327 = arith.addf %320, %326 : vector<8x16xf32>
    %328 = vector.extract_strided_slice %322 {offsets = [0, 1], sizes = [4, 16], strides = [1, 1]} : vector<4x18xbf16> to vector<4x16xbf16>
    %c2_335 = arith.constant 2 : index
    %c1_336 = arith.constant 1 : index
    %c0_337 = arith.constant 0 : index
    %c0_338 = arith.constant 0 : index
    %329 = vector.load %arg3[%c2_335, %c1_336, %c0_337, %c0_338] : memref<3x3x8x4xbf16, #tpu.memory_space<vmem>>, vector<1x1x8x4xbf16>
    %330 = vector.shape_cast %329 : vector<1x1x8x4xbf16> to vector<8x4xbf16>
    %cst_339 = arith.constant dense<0.000000e+00> : vector<8x16xf32>
    %331 = tpu.matmul %330, %328, %cst_339 {dimension_numbers = #tpu.dot_dimension_numbers<[1], [0], [0], [1], [0, 0, 1, 1], [], []>} : vector<8x4xbf16>, vector<4x16xbf16>, vector<8x16xf32> -> vector<8x16xf32>
    %332 = arith.addf %327, %331 : vector<8x16xf32>
    %333 = vector.extract_strided_slice %322 {offsets = [0, 2], sizes = [4, 16], strides = [1, 1]} : vector<4x18xbf16> to vector<4x16xbf16>
    %c2_340 = arith.constant 2 : index
    %c2_341 = arith.constant 2 : index
    %c0_342 = arith.constant 0 : index
    %c0_343 = arith.constant 0 : index
    %334 = vector.load %arg3[%c2_340, %c2_341, %c0_342, %c0_343] : memref<3x3x8x4xbf16, #tpu.memory_space<vmem>>, vector<1x1x8x4xbf16>
    %335 = vector.shape_cast %334 : vector<1x1x8x4xbf16> to vector<8x4xbf16>
    %cst_344 = arith.constant dense<0.000000e+00> : vector<8x16xf32>
    %336 = tpu.matmul %335, %333, %cst_344 {dimension_numbers = #tpu.dot_dimension_numbers<[1], [0], [0], [1], [0, 0, 1, 1], [], []>} : vector<8x4xbf16>, vector<4x16xbf16>, vector<8x16xf32> -> vector<8x16xf32>
    %337 = arith.addf %332, %336 : vector<8x16xf32>
    %338 = vector.extract_strided_slice %337 {offsets = [0, 0], sizes = [2, 16], strides = [1, 1]} : vector<8x16xf32> to vector<2x16xf32>
    %339 = vector.extract_strided_slice %337 {offsets = [2, 0], sizes = [2, 16], strides = [1, 1]} : vector<8x16xf32> to vector<2x16xf32>
    %cst_345 = arith.constant dense<0.000000e+00> : vector<2x32xf32>
    %340 = tpu.matmul %338, %6, %cst_345 {dimension_numbers = #tpu.dot_dimension_numbers<[1], [0], [0], [1], [0, 0, 1, 1], [], []>} : vector<2x16xf32>, vector<16x32xf32>, vector<2x32xf32> -> vector<2x32xf32>
    %cst_346 = arith.constant dense<0.000000e+00> : vector<2x32xf32>
    %341 = tpu.matmul %339, %13, %cst_346 {dimension_numbers = #tpu.dot_dimension_numbers<[1], [0], [0], [1], [0, 0, 1, 1], [], []>} : vector<2x16xf32>, vector<16x32xf32>, vector<2x32xf32> -> vector<2x32xf32>
    %342 = arith.addf %340, %341 : vector<2x32xf32>
    %c0_347 = arith.constant 0 : index
    %c0_348 = arith.constant 0 : index
    %c8 = arith.constant 8 : index
    %c0_349 = arith.constant 0 : index
    %343 = vector.load %arg4[%c0_347, %c0_348, %c8, %c0_349] : memref<1x2x32x32xf32, #tpu.memory_space<vmem>>, vector<1x2x1x32xf32>
    %344 = vector.shape_cast %343 : vector<1x2x1x32xf32> to vector<2x32xf32>
    %345 = vector.shape_cast %342 : vector<2x32xf32> to vector<1x2x1x32xf32>
    tpu.vector_store %arg4[%c0_347, %c0_348, %c8, %c0_349], %345 {strides = array<i32>} : memref<1x2x32x32xf32, #tpu.memory_space<vmem>>, vector<1x2x1x32xf32>,
    %346 = vector.extract_strided_slice %337 {offsets = [4, 0], sizes = [2, 16], strides = [1, 1]} : vector<8x16xf32> to vector<2x16xf32>
    %347 = vector.extract_strided_slice %337 {offsets = [6, 0], sizes = [2, 16], strides = [1, 1]} : vector<8x16xf32> to vector<2x16xf32>
    %cst_350 = arith.constant dense<0.000000e+00> : vector<2x32xf32>
    %348 = tpu.matmul %346, %6, %cst_350 {dimension_numbers = #tpu.dot_dimension_numbers<[1], [0], [0], [1], [0, 0, 1, 1], [], []>} : vector<2x16xf32>, vector<16x32xf32>, vector<2x32xf32> -> vector<2x32xf32>
    %cst_351 = arith.constant dense<0.000000e+00> : vector<2x32xf32>
    %349 = tpu.matmul %347, %13, %cst_351 {dimension_numbers = #tpu.dot_dimension_numbers<[1], [0], [0], [1], [0, 0, 1, 1], [], []>} : vector<2x16xf32>, vector<16x32xf32>, vector<2x32xf32> -> vector<2x32xf32>
    %350 = arith.addf %348, %349 : vector<2x32xf32>
    %c0_352 = arith.constant 0 : index
    %c0_353 = arith.constant 0 : index
    %c9 = arith.constant 9 : index
    %c0_354 = arith.constant 0 : index
    %351 = vector.load %arg4[%c0_352, %c0_353, %c9, %c0_354] : memref<1x2x32x32xf32, #tpu.memory_space<vmem>>, vector<1x2x1x32xf32>
    %352 = vector.shape_cast %351 : vector<1x2x1x32xf32> to vector<2x32xf32>
    %353 = vector.shape_cast %350 : vector<2x32xf32> to vector<1x2x1x32xf32>
    tpu.vector_store %arg4[%c0_352, %c0_353, %c9, %c0_354], %353 {strides = array<i32>} : memref<1x2x32x32xf32, #tpu.memory_space<vmem>>, vector<1x2x1x32xf32>,
    %cst_355 = arith.constant 0.000000e+00 : f32
    %354 = vector.broadcast %cst_355 : f32 to vector<8x16xf32>
    %c0_356 = arith.constant 0 : index
    %c0_357 = arith.constant 0 : index
    %c5_358 = arith.constant 5 : index
    %c0_359 = arith.constant 0 : index
    %c0_360 = arith.constant 0 : index
    %355 = vector.load %arg2[%c0_356, %c0_357, %c5_358, %c0_359, %c0_360] : memref<1x1x18x4x18xbf16, #tpu.memory_space<vmem>>, vector<1x1x1x4x18xbf16>
    %356 = vector.shape_cast %355 : vector<1x1x1x4x18xbf16> to vector<4x18xbf16>
    %357 = vector.extract_strided_slice %356 {offsets = [0, 0], sizes = [4, 16], strides = [1, 1]} : vector<4x18xbf16> to vector<4x16xbf16>
    %c0_361 = arith.constant 0 : index
    %c0_362 = arith.constant 0 : index
    %c0_363 = arith.constant 0 : index
    %c0_364 = arith.constant 0 : index
    %358 = vector.load %arg3[%c0_361, %c0_362, %c0_363, %c0_364] : memref<3x3x8x4xbf16, #tpu.memory_space<vmem>>, vector<1x1x8x4xbf16>
    %359 = vector.shape_cast %358 : vector<1x1x8x4xbf16> to vector<8x4xbf16>
    %cst_365 = arith.constant dense<0.000000e+00> : vector<8x16xf32>
    %360 = tpu.matmul %359, %357, %cst_365 {dimension_numbers = #tpu.dot_dimension_numbers<[1], [0], [0], [1], [0, 0, 1, 1], [], []>} : vector<8x4xbf16>, vector<4x16xbf16>, vector<8x16xf32> -> vector<8x16xf32>
    %361 = arith.addf %354, %360 : vector<8x16xf32>
    %362 = vector.extract_strided_slice %356 {offsets = [0, 1], sizes = [4, 16], strides = [1, 1]} : vector<4x18xbf16> to vector<4x16xbf16>
    %c0_366 = arith.constant 0 : index
    %c1_367 = arith.constant 1 : index
    %c0_368 = arith.constant 0 : index
    %c0_369 = arith.constant 0 : index
    %363 = vector.load %arg3[%c0_366, %c1_367, %c0_368, %c0_369] : memref<3x3x8x4xbf16, #tpu.memory_space<vmem>>, vector<1x1x8x4xbf16>
    %364 = vector.shape_cast %363 : vector<1x1x8x4xbf16> to vector<8x4xbf16>
    %cst_370 = arith.constant dense<0.000000e+00> : vector<8x16xf32>
    %365 = tpu.matmul %364, %362, %cst_370 {dimension_numbers = #tpu.dot_dimension_numbers<[1], [0], [0], [1], [0, 0, 1, 1], [], []>} : vector<8x4xbf16>, vector<4x16xbf16>, vector<8x16xf32> -> vector<8x16xf32>
    %366 = arith.addf %361, %365 : vector<8x16xf32>
    %367 = vector.extract_strided_slice %356 {offsets = [0, 2], sizes = [4, 16], strides = [1, 1]} : vector<4x18xbf16> to vector<4x16xbf16>
    %c0_371 = arith.constant 0 : index
    %c2_372 = arith.constant 2 : index
    %c0_373 = arith.constant 0 : index
    %c0_374 = arith.constant 0 : index
    %368 = vector.load %arg3[%c0_371, %c2_372, %c0_373, %c0_374] : memref<3x3x8x4xbf16, #tpu.memory_space<vmem>>, vector<1x1x8x4xbf16>
    %369 = vector.shape_cast %368 : vector<1x1x8x4xbf16> to vector<8x4xbf16>
    %cst_375 = arith.constant dense<0.000000e+00> : vector<8x16xf32>
    %370 = tpu.matmul %369, %367, %cst_375 {dimension_numbers = #tpu.dot_dimension_numbers<[1], [0], [0], [1], [0, 0, 1, 1], [], []>} : vector<8x4xbf16>, vector<4x16xbf16>, vector<8x16xf32> -> vector<8x16xf32>
    %371 = arith.addf %366, %370 : vector<8x16xf32>
    %c0_376 = arith.constant 0 : index
    %c0_377 = arith.constant 0 : index
    %c6_378 = arith.constant 6 : index
    %c0_379 = arith.constant 0 : index
    %c0_380 = arith.constant 0 : index
    %372 = vector.load %arg2[%c0_376, %c0_377, %c6_378, %c0_379, %c0_380] : memref<1x1x18x4x18xbf16, #tpu.memory_space<vmem>>, vector<1x1x1x4x18xbf16>
    %373 = vector.shape_cast %372 : vector<1x1x1x4x18xbf16> to vector<4x18xbf16>
    %374 = vector.extract_strided_slice %373 {offsets = [0, 0], sizes = [4, 16], strides = [1, 1]} : vector<4x18xbf16> to vector<4x16xbf16>
    %c1_381 = arith.constant 1 : index
    %c0_382 = arith.constant 0 : index
    %c0_383 = arith.constant 0 : index
    %c0_384 = arith.constant 0 : index
    %375 = vector.load %arg3[%c1_381, %c0_382, %c0_383, %c0_384] : memref<3x3x8x4xbf16, #tpu.memory_space<vmem>>, vector<1x1x8x4xbf16>
    %376 = vector.shape_cast %375 : vector<1x1x8x4xbf16> to vector<8x4xbf16>
    %cst_385 = arith.constant dense<0.000000e+00> : vector<8x16xf32>
    %377 = tpu.matmul %376, %374, %cst_385 {dimension_numbers = #tpu.dot_dimension_numbers<[1], [0], [0], [1], [0, 0, 1, 1], [], []>} : vector<8x4xbf16>, vector<4x16xbf16>, vector<8x16xf32> -> vector<8x16xf32>
    %378 = arith.addf %371, %377 : vector<8x16xf32>
    %379 = vector.extract_strided_slice %373 {offsets = [0, 1], sizes = [4, 16], strides = [1, 1]} : vector<4x18xbf16> to vector<4x16xbf16>
    %c1_386 = arith.constant 1 : index
    %c1_387 = arith.constant 1 : index
    %c0_388 = arith.constant 0 : index
    %c0_389 = arith.constant 0 : index
    %380 = vector.load %arg3[%c1_386, %c1_387, %c0_388, %c0_389] : memref<3x3x8x4xbf16, #tpu.memory_space<vmem>>, vector<1x1x8x4xbf16>
    %381 = vector.shape_cast %380 : vector<1x1x8x4xbf16> to vector<8x4xbf16>
    %cst_390 = arith.constant dense<0.000000e+00> : vector<8x16xf32>
    %382 = tpu.matmul %381, %379, %cst_390 {dimension_numbers = #tpu.dot_dimension_numbers<[1], [0], [0], [1], [0, 0, 1, 1], [], []>} : vector<8x4xbf16>, vector<4x16xbf16>, vector<8x16xf32> -> vector<8x16xf32>
    %383 = arith.addf %378, %382 : vector<8x16xf32>
    %384 = vector.extract_strided_slice %373 {offsets = [0, 2], sizes = [4, 16], strides = [1, 1]} : vector<4x18xbf16> to vector<4x16xbf16>
    %c1_391 = arith.constant 1 : index
    %c2_392 = arith.constant 2 : index
    %c0_393 = arith.constant 0 : index
    %c0_394 = arith.constant 0 : index
    %385 = vector.load %arg3[%c1_391, %c2_392, %c0_393, %c0_394] : memref<3x3x8x4xbf16, #tpu.memory_space<vmem>>, vector<1x1x8x4xbf16>
    %386 = vector.shape_cast %385 : vector<1x1x8x4xbf16> to vector<8x4xbf16>
    %cst_395 = arith.constant dense<0.000000e+00> : vector<8x16xf32>
    %387 = tpu.matmul %386, %384, %cst_395 {dimension_numbers = #tpu.dot_dimension_numbers<[1], [0], [0], [1], [0, 0, 1, 1], [], []>} : vector<8x4xbf16>, vector<4x16xbf16>, vector<8x16xf32> -> vector<8x16xf32>
    %388 = arith.addf %383, %387 : vector<8x16xf32>
    %c0_396 = arith.constant 0 : index
    %c0_397 = arith.constant 0 : index
    %c7_398 = arith.constant 7 : index
    %c0_399 = arith.constant 0 : index
    %c0_400 = arith.constant 0 : index
    %389 = vector.load %arg2[%c0_396, %c0_397, %c7_398, %c0_399, %c0_400] : memref<1x1x18x4x18xbf16, #tpu.memory_space<vmem>>, vector<1x1x1x4x18xbf16>
    %390 = vector.shape_cast %389 : vector<1x1x1x4x18xbf16> to vector<4x18xbf16>
    %391 = vector.extract_strided_slice %390 {offsets = [0, 0], sizes = [4, 16], strides = [1, 1]} : vector<4x18xbf16> to vector<4x16xbf16>
    %c2_401 = arith.constant 2 : index
    %c0_402 = arith.constant 0 : index
    %c0_403 = arith.constant 0 : index
    %c0_404 = arith.constant 0 : index
    %392 = vector.load %arg3[%c2_401, %c0_402, %c0_403, %c0_404] : memref<3x3x8x4xbf16, #tpu.memory_space<vmem>>, vector<1x1x8x4xbf16>
    %393 = vector.shape_cast %392 : vector<1x1x8x4xbf16> to vector<8x4xbf16>
    %cst_405 = arith.constant dense<0.000000e+00> : vector<8x16xf32>
    %394 = tpu.matmul %393, %391, %cst_405 {dimension_numbers = #tpu.dot_dimension_numbers<[1], [0], [0], [1], [0, 0, 1, 1], [], []>} : vector<8x4xbf16>, vector<4x16xbf16>, vector<8x16xf32> -> vector<8x16xf32>
    %395 = arith.addf %388, %394 : vector<8x16xf32>
    %396 = vector.extract_strided_slice %390 {offsets = [0, 1], sizes = [4, 16], strides = [1, 1]} : vector<4x18xbf16> to vector<4x16xbf16>
    %c2_406 = arith.constant 2 : index
    %c1_407 = arith.constant 1 : index
    %c0_408 = arith.constant 0 : index
    %c0_409 = arith.constant 0 : index
    %397 = vector.load %arg3[%c2_406, %c1_407, %c0_408, %c0_409] : memref<3x3x8x4xbf16, #tpu.memory_space<vmem>>, vector<1x1x8x4xbf16>
    %398 = vector.shape_cast %397 : vector<1x1x8x4xbf16> to vector<8x4xbf16>
    %cst_410 = arith.constant dense<0.000000e+00> : vector<8x16xf32>
    %399 = tpu.matmul %398, %396, %cst_410 {dimension_numbers = #tpu.dot_dimension_numbers<[1], [0], [0], [1], [0, 0, 1, 1], [], []>} : vector<8x4xbf16>, vector<4x16xbf16>, vector<8x16xf32> -> vector<8x16xf32>
    %400 = arith.addf %395, %399 : vector<8x16xf32>
    %401 = vector.extract_strided_slice %390 {offsets = [0, 2], sizes = [4, 16], strides = [1, 1]} : vector<4x18xbf16> to vector<4x16xbf16>
    %c2_411 = arith.constant 2 : index
    %c2_412 = arith.constant 2 : index
    %c0_413 = arith.constant 0 : index
    %c0_414 = arith.constant 0 : index
    %402 = vector.load %arg3[%c2_411, %c2_412, %c0_413, %c0_414] : memref<3x3x8x4xbf16, #tpu.memory_space<vmem>>, vector<1x1x8x4xbf16>
    %403 = vector.shape_cast %402 : vector<1x1x8x4xbf16> to vector<8x4xbf16>
    %cst_415 = arith.constant dense<0.000000e+00> : vector<8x16xf32>
    %404 = tpu.matmul %403, %401, %cst_415 {dimension_numbers = #tpu.dot_dimension_numbers<[1], [0], [0], [1], [0, 0, 1, 1], [], []>} : vector<8x4xbf16>, vector<4x16xbf16>, vector<8x16xf32> -> vector<8x16xf32>
    %405 = arith.addf %400, %404 : vector<8x16xf32>
    %406 = vector.extract_strided_slice %405 {offsets = [0, 0], sizes = [2, 16], strides = [1, 1]} : vector<8x16xf32> to vector<2x16xf32>
    %407 = vector.extract_strided_slice %405 {offsets = [2, 0], sizes = [2, 16], strides = [1, 1]} : vector<8x16xf32> to vector<2x16xf32>
    %cst_416 = arith.constant dense<0.000000e+00> : vector<2x32xf32>
    %408 = tpu.matmul %406, %6, %cst_416 {dimension_numbers = #tpu.dot_dimension_numbers<[1], [0], [0], [1], [0, 0, 1, 1], [], []>} : vector<2x16xf32>, vector<16x32xf32>, vector<2x32xf32> -> vector<2x32xf32>
    %cst_417 = arith.constant dense<0.000000e+00> : vector<2x32xf32>
    %409 = tpu.matmul %407, %13, %cst_417 {dimension_numbers = #tpu.dot_dimension_numbers<[1], [0], [0], [1], [0, 0, 1, 1], [], []>} : vector<2x16xf32>, vector<16x32xf32>, vector<2x32xf32> -> vector<2x32xf32>
    %410 = arith.addf %408, %409 : vector<2x32xf32>
    %c0_418 = arith.constant 0 : index
    %c0_419 = arith.constant 0 : index
    %c10 = arith.constant 10 : index
    %c0_420 = arith.constant 0 : index
    %411 = vector.load %arg4[%c0_418, %c0_419, %c10, %c0_420] : memref<1x2x32x32xf32, #tpu.memory_space<vmem>>, vector<1x2x1x32xf32>
    %412 = vector.shape_cast %411 : vector<1x2x1x32xf32> to vector<2x32xf32>
    %413 = vector.shape_cast %410 : vector<2x32xf32> to vector<1x2x1x32xf32>
    tpu.vector_store %arg4[%c0_418, %c0_419, %c10, %c0_420], %413 {strides = array<i32>} : memref<1x2x32x32xf32, #tpu.memory_space<vmem>>, vector<1x2x1x32xf32>,
    %414 = vector.extract_strided_slice %405 {offsets = [4, 0], sizes = [2, 16], strides = [1, 1]} : vector<8x16xf32> to vector<2x16xf32>
    %415 = vector.extract_strided_slice %405 {offsets = [6, 0], sizes = [2, 16], strides = [1, 1]} : vector<8x16xf32> to vector<2x16xf32>
    %cst_421 = arith.constant dense<0.000000e+00> : vector<2x32xf32>
    %416 = tpu.matmul %414, %6, %cst_421 {dimension_numbers = #tpu.dot_dimension_numbers<[1], [0], [0], [1], [0, 0, 1, 1], [], []>} : vector<2x16xf32>, vector<16x32xf32>, vector<2x32xf32> -> vector<2x32xf32>
    %cst_422 = arith.constant dense<0.000000e+00> : vector<2x32xf32>
    %417 = tpu.matmul %415, %13, %cst_422 {dimension_numbers = #tpu.dot_dimension_numbers<[1], [0], [0], [1], [0, 0, 1, 1], [], []>} : vector<2x16xf32>, vector<16x32xf32>, vector<2x32xf32> -> vector<2x32xf32>
    %418 = arith.addf %416, %417 : vector<2x32xf32>
    %c0_423 = arith.constant 0 : index
    %c0_424 = arith.constant 0 : index
    %c11 = arith.constant 11 : index
    %c0_425 = arith.constant 0 : index
    %419 = vector.load %arg4[%c0_423, %c0_424, %c11, %c0_425] : memref<1x2x32x32xf32, #tpu.memory_space<vmem>>, vector<1x2x1x32xf32>
    %420 = vector.shape_cast %419 : vector<1x2x1x32xf32> to vector<2x32xf32>
    %421 = vector.shape_cast %418 : vector<2x32xf32> to vector<1x2x1x32xf32>
    tpu.vector_store %arg4[%c0_423, %c0_424, %c11, %c0_425], %421 {strides = array<i32>} : memref<1x2x32x32xf32, #tpu.memory_space<vmem>>, vector<1x2x1x32xf32>,
    %cst_426 = arith.constant 0.000000e+00 : f32
    %422 = vector.broadcast %cst_426 : f32 to vector<8x16xf32>
    %c0_427 = arith.constant 0 : index
    %c0_428 = arith.constant 0 : index
    %c6_429 = arith.constant 6 : index
    %c0_430 = arith.constant 0 : index
    %c0_431 = arith.constant 0 : index
    %423 = vector.load %arg2[%c0_427, %c0_428, %c6_429, %c0_430, %c0_431] : memref<1x1x18x4x18xbf16, #tpu.memory_space<vmem>>, vector<1x1x1x4x18xbf16>
    %424 = vector.shape_cast %423 : vector<1x1x1x4x18xbf16> to vector<4x18xbf16>
    %425 = vector.extract_strided_slice %424 {offsets = [0, 0], sizes = [4, 16], strides = [1, 1]} : vector<4x18xbf16> to vector<4x16xbf16>
    %c0_432 = arith.constant 0 : index
    %c0_433 = arith.constant 0 : index
    %c0_434 = arith.constant 0 : index
    %c0_435 = arith.constant 0 : index
    %426 = vector.load %arg3[%c0_432, %c0_433, %c0_434, %c0_435] : memref<3x3x8x4xbf16, #tpu.memory_space<vmem>>, vector<1x1x8x4xbf16>
    %427 = vector.shape_cast %426 : vector<1x1x8x4xbf16> to vector<8x4xbf16>
    %cst_436 = arith.constant dense<0.000000e+00> : vector<8x16xf32>
    %428 = tpu.matmul %427, %425, %cst_436 {dimension_numbers = #tpu.dot_dimension_numbers<[1], [0], [0], [1], [0, 0, 1, 1], [], []>} : vector<8x4xbf16>, vector<4x16xbf16>, vector<8x16xf32> -> vector<8x16xf32>
    %429 = arith.addf %422, %428 : vector<8x16xf32>
    %430 = vector.extract_strided_slice %424 {offsets = [0, 1], sizes = [4, 16], strides = [1, 1]} : vector<4x18xbf16> to vector<4x16xbf16>
    %c0_437 = arith.constant 0 : index
    %c1_438 = arith.constant 1 : index
    %c0_439 = arith.constant 0 : index
    %c0_440 = arith.constant 0 : index
    %431 = vector.load %arg3[%c0_437, %c1_438, %c0_439, %c0_440] : memref<3x3x8x4xbf16, #tpu.memory_space<vmem>>, vector<1x1x8x4xbf16>
    %432 = vector.shape_cast %431 : vector<1x1x8x4xbf16> to vector<8x4xbf16>
    %cst_441 = arith.constant dense<0.000000e+00> : vector<8x16xf32>
    %433 = tpu.matmul %432, %430, %cst_441 {dimension_numbers = #tpu.dot_dimension_numbers<[1], [0], [0], [1], [0, 0, 1, 1], [], []>} : vector<8x4xbf16>, vector<4x16xbf16>, vector<8x16xf32> -> vector<8x16xf32>
    %434 = arith.addf %429, %433 : vector<8x16xf32>
    %435 = vector.extract_strided_slice %424 {offsets = [0, 2], sizes = [4, 16], strides = [1, 1]} : vector<4x18xbf16> to vector<4x16xbf16>
    %c0_442 = arith.constant 0 : index
    %c2_443 = arith.constant 2 : index
    %c0_444 = arith.constant 0 : index
    %c0_445 = arith.constant 0 : index
    %436 = vector.load %arg3[%c0_442, %c2_443, %c0_444, %c0_445] : memref<3x3x8x4xbf16, #tpu.memory_space<vmem>>, vector<1x1x8x4xbf16>
    %437 = vector.shape_cast %436 : vector<1x1x8x4xbf16> to vector<8x4xbf16>
    %cst_446 = arith.constant dense<0.000000e+00> : vector<8x16xf32>
    %438 = tpu.matmul %437, %435, %cst_446 {dimension_numbers = #tpu.dot_dimension_numbers<[1], [0], [0], [1], [0, 0, 1, 1], [], []>} : vector<8x4xbf16>, vector<4x16xbf16>, vector<8x16xf32> -> vector<8x16xf32>
    %439 = arith.addf %434, %438 : vector<8x16xf32>
    %c0_447 = arith.constant 0 : index
    %c0_448 = arith.constant 0 : index
    %c7_449 = arith.constant 7 : index
    %c0_450 = arith.constant 0 : index
    %c0_451 = arith.constant 0 : index
    %440 = vector.load %arg2[%c0_447, %c0_448, %c7_449, %c0_450, %c0_451] : memref<1x1x18x4x18xbf16, #tpu.memory_space<vmem>>, vector<1x1x1x4x18xbf16>
    %441 = vector.shape_cast %440 : vector<1x1x1x4x18xbf16> to vector<4x18xbf16>
    %442 = vector.extract_strided_slice %441 {offsets = [0, 0], sizes = [4, 16], strides = [1, 1]} : vector<4x18xbf16> to vector<4x16xbf16>
    %c1_452 = arith.constant 1 : index
    %c0_453 = arith.constant 0 : index
    %c0_454 = arith.constant 0 : index
    %c0_455 = arith.constant 0 : index
    %443 = vector.load %arg3[%c1_452, %c0_453, %c0_454, %c0_455] : memref<3x3x8x4xbf16, #tpu.memory_space<vmem>>, vector<1x1x8x4xbf16>
    %444 = vector.shape_cast %443 : vector<1x1x8x4xbf16> to vector<8x4xbf16>
    %cst_456 = arith.constant dense<0.000000e+00> : vector<8x16xf32>
    %445 = tpu.matmul %444, %442, %cst_456 {dimension_numbers = #tpu.dot_dimension_numbers<[1], [0], [0], [1], [0, 0, 1, 1], [], []>} : vector<8x4xbf16>, vector<4x16xbf16>, vector<8x16xf32> -> vector<8x16xf32>
    %446 = arith.addf %439, %445 : vector<8x16xf32>
    %447 = vector.extract_strided_slice %441 {offsets = [0, 1], sizes = [4, 16], strides = [1, 1]} : vector<4x18xbf16> to vector<4x16xbf16>
    %c1_457 = arith.constant 1 : index
    %c1_458 = arith.constant 1 : index
    %c0_459 = arith.constant 0 : index
    %c0_460 = arith.constant 0 : index
    %448 = vector.load %arg3[%c1_457, %c1_458, %c0_459, %c0_460] : memref<3x3x8x4xbf16, #tpu.memory_space<vmem>>, vector<1x1x8x4xbf16>
    %449 = vector.shape_cast %448 : vector<1x1x8x4xbf16> to vector<8x4xbf16>
    %cst_461 = arith.constant dense<0.000000e+00> : vector<8x16xf32>
    %450 = tpu.matmul %449, %447, %cst_461 {dimension_numbers = #tpu.dot_dimension_numbers<[1], [0], [0], [1], [0, 0, 1, 1], [], []>} : vector<8x4xbf16>, vector<4x16xbf16>, vector<8x16xf32> -> vector<8x16xf32>
    %451 = arith.addf %446, %450 : vector<8x16xf32>
    %452 = vector.extract_strided_slice %441 {offsets = [0, 2], sizes = [4, 16], strides = [1, 1]} : vector<4x18xbf16> to vector<4x16xbf16>
    %c1_462 = arith.constant 1 : index
    %c2_463 = arith.constant 2 : index
    %c0_464 = arith.constant 0 : index
    %c0_465 = arith.constant 0 : index
    %453 = vector.load %arg3[%c1_462, %c2_463, %c0_464, %c0_465] : memref<3x3x8x4xbf16, #tpu.memory_space<vmem>>, vector<1x1x8x4xbf16>
    %454 = vector.shape_cast %453 : vector<1x1x8x4xbf16> to vector<8x4xbf16>
    %cst_466 = arith.constant dense<0.000000e+00> : vector<8x16xf32>
    %455 = tpu.matmul %454, %452, %cst_466 {dimension_numbers = #tpu.dot_dimension_numbers<[1], [0], [0], [1], [0, 0, 1, 1], [], []>} : vector<8x4xbf16>, vector<4x16xbf16>, vector<8x16xf32> -> vector<8x16xf32>
    %456 = arith.addf %451, %455 : vector<8x16xf32>
    %c0_467 = arith.constant 0 : index
    %c0_468 = arith.constant 0 : index
    %c8_469 = arith.constant 8 : index
    %c0_470 = arith.constant 0 : index
    %c0_471 = arith.constant 0 : index
    %457 = vector.load %arg2[%c0_467, %c0_468, %c8_469, %c0_470, %c0_471] : memref<1x1x18x4x18xbf16, #tpu.memory_space<vmem>>, vector<1x1x1x4x18xbf16>
    %458 = vector.shape_cast %457 : vector<1x1x1x4x18xbf16> to vector<4x18xbf16>
    %459 = vector.extract_strided_slice %458 {offsets = [0, 0], sizes = [4, 16], strides = [1, 1]} : vector<4x18xbf16> to vector<4x16xbf16>
    %c2_472 = arith.constant 2 : index
    %c0_473 = arith.constant 0 : index
    %c0_474 = arith.constant 0 : index
    %c0_475 = arith.constant 0 : index
    %460 = vector.load %arg3[%c2_472, %c0_473, %c0_474, %c0_475] : memref<3x3x8x4xbf16, #tpu.memory_space<vmem>>, vector<1x1x8x4xbf16>
    %461 = vector.shape_cast %460 : vector<1x1x8x4xbf16> to vector<8x4xbf16>
    %cst_476 = arith.constant dense<0.000000e+00> : vector<8x16xf32>
    %462 = tpu.matmul %461, %459, %cst_476 {dimension_numbers = #tpu.dot_dimension_numbers<[1], [0], [0], [1], [0, 0, 1, 1], [], []>} : vector<8x4xbf16>, vector<4x16xbf16>, vector<8x16xf32> -> vector<8x16xf32>
    %463 = arith.addf %456, %462 : vector<8x16xf32>
    %464 = vector.extract_strided_slice %458 {offsets = [0, 1], sizes = [4, 16], strides = [1, 1]} : vector<4x18xbf16> to vector<4x16xbf16>
    %c2_477 = arith.constant 2 : index
    %c1_478 = arith.constant 1 : index
    %c0_479 = arith.constant 0 : index
    %c0_480 = arith.constant 0 : index
    %465 = vector.load %arg3[%c2_477, %c1_478, %c0_479, %c0_480] : memref<3x3x8x4xbf16, #tpu.memory_space<vmem>>, vector<1x1x8x4xbf16>
    %466 = vector.shape_cast %465 : vector<1x1x8x4xbf16> to vector<8x4xbf16>
    %cst_481 = arith.constant dense<0.000000e+00> : vector<8x16xf32>
    %467 = tpu.matmul %466, %464, %cst_481 {dimension_numbers = #tpu.dot_dimension_numbers<[1], [0], [0], [1], [0, 0, 1, 1], [], []>} : vector<8x4xbf16>, vector<4x16xbf16>, vector<8x16xf32> -> vector<8x16xf32>
    %468 = arith.addf %463, %467 : vector<8x16xf32>
    %469 = vector.extract_strided_slice %458 {offsets = [0, 2], sizes = [4, 16], strides = [1, 1]} : vector<4x18xbf16> to vector<4x16xbf16>
    %c2_482 = arith.constant 2 : index
    %c2_483 = arith.constant 2 : index
    %c0_484 = arith.constant 0 : index
    %c0_485 = arith.constant 0 : index
    %470 = vector.load %arg3[%c2_482, %c2_483, %c0_484, %c0_485] : memref<3x3x8x4xbf16, #tpu.memory_space<vmem>>, vector<1x1x8x4xbf16>
    %471 = vector.shape_cast %470 : vector<1x1x8x4xbf16> to vector<8x4xbf16>
    %cst_486 = arith.constant dense<0.000000e+00> : vector<8x16xf32>
    %472 = tpu.matmul %471, %469, %cst_486 {dimension_numbers = #tpu.dot_dimension_numbers<[1], [0], [0], [1], [0, 0, 1, 1], [], []>} : vector<8x4xbf16>, vector<4x16xbf16>, vector<8x16xf32> -> vector<8x16xf32>
    %473 = arith.addf %468, %472 : vector<8x16xf32>
    %474 = vector.extract_strided_slice %473 {offsets = [0, 0], sizes = [2, 16], strides = [1, 1]} : vector<8x16xf32> to vector<2x16xf32>
    %475 = vector.extract_strided_slice %473 {offsets = [2, 0], sizes = [2, 16], strides = [1, 1]} : vector<8x16xf32> to vector<2x16xf32>
    %cst_487 = arith.constant dense<0.000000e+00> : vector<2x32xf32>
    %476 = tpu.matmul %474, %6, %cst_487 {dimension_numbers = #tpu.dot_dimension_numbers<[1], [0], [0], [1], [0, 0, 1, 1], [], []>} : vector<2x16xf32>, vector<16x32xf32>, vector<2x32xf32> -> vector<2x32xf32>
    %cst_488 = arith.constant dense<0.000000e+00> : vector<2x32xf32>
    %477 = tpu.matmul %475, %13, %cst_488 {dimension_numbers = #tpu.dot_dimension_numbers<[1], [0], [0], [1], [0, 0, 1, 1], [], []>} : vector<2x16xf32>, vector<16x32xf32>, vector<2x32xf32> -> vector<2x32xf32>
    %478 = arith.addf %476, %477 : vector<2x32xf32>
    %c0_489 = arith.constant 0 : index
    %c0_490 = arith.constant 0 : index
    %c12 = arith.constant 12 : index
    %c0_491 = arith.constant 0 : index
    %479 = vector.load %arg4[%c0_489, %c0_490, %c12, %c0_491] : memref<1x2x32x32xf32, #tpu.memory_space<vmem>>, vector<1x2x1x32xf32>
    %480 = vector.shape_cast %479 : vector<1x2x1x32xf32> to vector<2x32xf32>
    %481 = vector.shape_cast %478 : vector<2x32xf32> to vector<1x2x1x32xf32>
    tpu.vector_store %arg4[%c0_489, %c0_490, %c12, %c0_491], %481 {strides = array<i32>} : memref<1x2x32x32xf32, #tpu.memory_space<vmem>>, vector<1x2x1x32xf32>,
    %482 = vector.extract_strided_slice %473 {offsets = [4, 0], sizes = [2, 16], strides = [1, 1]} : vector<8x16xf32> to vector<2x16xf32>
    %483 = vector.extract_strided_slice %473 {offsets = [6, 0], sizes = [2, 16], strides = [1, 1]} : vector<8x16xf32> to vector<2x16xf32>
    %cst_492 = arith.constant dense<0.000000e+00> : vector<2x32xf32>
    %484 = tpu.matmul %482, %6, %cst_492 {dimension_numbers = #tpu.dot_dimension_numbers<[1], [0], [0], [1], [0, 0, 1, 1], [], []>} : vector<2x16xf32>, vector<16x32xf32>, vector<2x32xf32> -> vector<2x32xf32>
    %cst_493 = arith.constant dense<0.000000e+00> : vector<2x32xf32>
    %485 = tpu.matmul %483, %13, %cst_493 {dimension_numbers = #tpu.dot_dimension_numbers<[1], [0], [0], [1], [0, 0, 1, 1], [], []>} : vector<2x16xf32>, vector<16x32xf32>, vector<2x32xf32> -> vector<2x32xf32>
    %486 = arith.addf %484, %485 : vector<2x32xf32>
    %c0_494 = arith.constant 0 : index
    %c0_495 = arith.constant 0 : index
    %c13 = arith.constant 13 : index
    %c0_496 = arith.constant 0 : index
    %487 = vector.load %arg4[%c0_494, %c0_495, %c13, %c0_496] : memref<1x2x32x32xf32, #tpu.memory_space<vmem>>, vector<1x2x1x32xf32>
    %488 = vector.shape_cast %487 : vector<1x2x1x32xf32> to vector<2x32xf32>
    %489 = vector.shape_cast %486 : vector<2x32xf32> to vector<1x2x1x32xf32>
    tpu.vector_store %arg4[%c0_494, %c0_495, %c13, %c0_496], %489 {strides = array<i32>} : memref<1x2x32x32xf32, #tpu.memory_space<vmem>>, vector<1x2x1x32xf32>,
    %cst_497 = arith.constant 0.000000e+00 : f32
    %490 = vector.broadcast %cst_497 : f32 to vector<8x16xf32>
    %c0_498 = arith.constant 0 : index
    %c0_499 = arith.constant 0 : index
    %c7_500 = arith.constant 7 : index
    %c0_501 = arith.constant 0 : index
    %c0_502 = arith.constant 0 : index
    %491 = vector.load %arg2[%c0_498, %c0_499, %c7_500, %c0_501, %c0_502] : memref<1x1x18x4x18xbf16, #tpu.memory_space<vmem>>, vector<1x1x1x4x18xbf16>
    %492 = vector.shape_cast %491 : vector<1x1x1x4x18xbf16> to vector<4x18xbf16>
    %493 = vector.extract_strided_slice %492 {offsets = [0, 0], sizes = [4, 16], strides = [1, 1]} : vector<4x18xbf16> to vector<4x16xbf16>
    %c0_503 = arith.constant 0 : index
    %c0_504 = arith.constant 0 : index
    %c0_505 = arith.constant 0 : index
    %c0_506 = arith.constant 0 : index
    %494 = vector.load %arg3[%c0_503, %c0_504, %c0_505, %c0_506] : memref<3x3x8x4xbf16, #tpu.memory_space<vmem>>, vector<1x1x8x4xbf16>
    %495 = vector.shape_cast %494 : vector<1x1x8x4xbf16> to vector<8x4xbf16>
    %cst_507 = arith.constant dense<0.000000e+00> : vector<8x16xf32>
    %496 = tpu.matmul %495, %493, %cst_507 {dimension_numbers = #tpu.dot_dimension_numbers<[1], [0], [0], [1], [0, 0, 1, 1], [], []>} : vector<8x4xbf16>, vector<4x16xbf16>, vector<8x16xf32> -> vector<8x16xf32>
    %497 = arith.addf %490, %496 : vector<8x16xf32>
    %498 = vector.extract_strided_slice %492 {offsets = [0, 1], sizes = [4, 16], strides = [1, 1]} : vector<4x18xbf16> to vector<4x16xbf16>
    %c0_508 = arith.constant 0 : index
    %c1_509 = arith.constant 1 : index
    %c0_510 = arith.constant 0 : index
    %c0_511 = arith.constant 0 : index
    %499 = vector.load %arg3[%c0_508, %c1_509, %c0_510, %c0_511] : memref<3x3x8x4xbf16, #tpu.memory_space<vmem>>, vector<1x1x8x4xbf16>
    %500 = vector.shape_cast %499 : vector<1x1x8x4xbf16> to vector<8x4xbf16>
    %cst_512 = arith.constant dense<0.000000e+00> : vector<8x16xf32>
    %501 = tpu.matmul %500, %498, %cst_512 {dimension_numbers = #tpu.dot_dimension_numbers<[1], [0], [0], [1], [0, 0, 1, 1], [], []>} : vector<8x4xbf16>, vector<4x16xbf16>, vector<8x16xf32> -> vector<8x16xf32>
    %502 = arith.addf %497, %501 : vector<8x16xf32>
    %503 = vector.extract_strided_slice %492 {offsets = [0, 2], sizes = [4, 16], strides = [1, 1]} : vector<4x18xbf16> to vector<4x16xbf16>
    %c0_513 = arith.constant 0 : index
    %c2_514 = arith.constant 2 : index
    %c0_515 = arith.constant 0 : index
    %c0_516 = arith.constant 0 : index
    %504 = vector.load %arg3[%c0_513, %c2_514, %c0_515, %c0_516] : memref<3x3x8x4xbf16, #tpu.memory_space<vmem>>, vector<1x1x8x4xbf16>
    %505 = vector.shape_cast %504 : vector<1x1x8x4xbf16> to vector<8x4xbf16>
    %cst_517 = arith.constant dense<0.000000e+00> : vector<8x16xf32>
    %506 = tpu.matmul %505, %503, %cst_517 {dimension_numbers = #tpu.dot_dimension_numbers<[1], [0], [0], [1], [0, 0, 1, 1], [], []>} : vector<8x4xbf16>, vector<4x16xbf16>, vector<8x16xf32> -> vector<8x16xf32>
    %507 = arith.addf %502, %506 : vector<8x16xf32>
    %c0_518 = arith.constant 0 : index
    %c0_519 = arith.constant 0 : index
    %c8_520 = arith.constant 8 : index
    %c0_521 = arith.constant 0 : index
    %c0_522 = arith.constant 0 : index
    %508 = vector.load %arg2[%c0_518, %c0_519, %c8_520, %c0_521, %c0_522] : memref<1x1x18x4x18xbf16, #tpu.memory_space<vmem>>, vector<1x1x1x4x18xbf16>
    %509 = vector.shape_cast %508 : vector<1x1x1x4x18xbf16> to vector<4x18xbf16>
    %510 = vector.extract_strided_slice %509 {offsets = [0, 0], sizes = [4, 16], strides = [1, 1]} : vector<4x18xbf16> to vector<4x16xbf16>
    %c1_523 = arith.constant 1 : index
    %c0_524 = arith.constant 0 : index
    %c0_525 = arith.constant 0 : index
    %c0_526 = arith.constant 0 : index
    %511 = vector.load %arg3[%c1_523, %c0_524, %c0_525, %c0_526] : memref<3x3x8x4xbf16, #tpu.memory_space<vmem>>, vector<1x1x8x4xbf16>
    %512 = vector.shape_cast %511 : vector<1x1x8x4xbf16> to vector<8x4xbf16>
    %cst_527 = arith.constant dense<0.000000e+00> : vector<8x16xf32>
    %513 = tpu.matmul %512, %510, %cst_527 {dimension_numbers = #tpu.dot_dimension_numbers<[1], [0], [0], [1], [0, 0, 1, 1], [], []>} : vector<8x4xbf16>, vector<4x16xbf16>, vector<8x16xf32> -> vector<8x16xf32>
    %514 = arith.addf %507, %513 : vector<8x16xf32>
    %515 = vector.extract_strided_slice %509 {offsets = [0, 1], sizes = [4, 16], strides = [1, 1]} : vector<4x18xbf16> to vector<4x16xbf16>
    %c1_528 = arith.constant 1 : index
    %c1_529 = arith.constant 1 : index
    %c0_530 = arith.constant 0 : index
    %c0_531 = arith.constant 0 : index
    %516 = vector.load %arg3[%c1_528, %c1_529, %c0_530, %c0_531] : memref<3x3x8x4xbf16, #tpu.memory_space<vmem>>, vector<1x1x8x4xbf16>
    %517 = vector.shape_cast %516 : vector<1x1x8x4xbf16> to vector<8x4xbf16>
    %cst_532 = arith.constant dense<0.000000e+00> : vector<8x16xf32>
    %518 = tpu.matmul %517, %515, %cst_532 {dimension_numbers = #tpu.dot_dimension_numbers<[1], [0], [0], [1], [0, 0, 1, 1], [], []>} : vector<8x4xbf16>, vector<4x16xbf16>, vector<8x16xf32> -> vector<8x16xf32>
    %519 = arith.addf %514, %518 : vector<8x16xf32>
    %520 = vector.extract_strided_slice %509 {offsets = [0, 2], sizes = [4, 16], strides = [1, 1]} : vector<4x18xbf16> to vector<4x16xbf16>
    %c1_533 = arith.constant 1 : index
    %c2_534 = arith.constant 2 : index
    %c0_535 = arith.constant 0 : index
    %c0_536 = arith.constant 0 : index
    %521 = vector.load %arg3[%c1_533, %c2_534, %c0_535, %c0_536] : memref<3x3x8x4xbf16, #tpu.memory_space<vmem>>, vector<1x1x8x4xbf16>
    %522 = vector.shape_cast %521 : vector<1x1x8x4xbf16> to vector<8x4xbf16>
    %cst_537 = arith.constant dense<0.000000e+00> : vector<8x16xf32>
    %523 = tpu.matmul %522, %520, %cst_537 {dimension_numbers = #tpu.dot_dimension_numbers<[1], [0], [0], [1], [0, 0, 1, 1], [], []>} : vector<8x4xbf16>, vector<4x16xbf16>, vector<8x16xf32> -> vector<8x16xf32>
    %524 = arith.addf %519, %523 : vector<8x16xf32>
    %c0_538 = arith.constant 0 : index
    %c0_539 = arith.constant 0 : index
    %c9_540 = arith.constant 9 : index
    %c0_541 = arith.constant 0 : index
    %c0_542 = arith.constant 0 : index
    %525 = vector.load %arg2[%c0_538, %c0_539, %c9_540, %c0_541, %c0_542] : memref<1x1x18x4x18xbf16, #tpu.memory_space<vmem>>, vector<1x1x1x4x18xbf16>
    %526 = vector.shape_cast %525 : vector<1x1x1x4x18xbf16> to vector<4x18xbf16>
    %527 = vector.extract_strided_slice %526 {offsets = [0, 0], sizes = [4, 16], strides = [1, 1]} : vector<4x18xbf16> to vector<4x16xbf16>
    %c2_543 = arith.constant 2 : index
    %c0_544 = arith.constant 0 : index
    %c0_545 = arith.constant 0 : index
    %c0_546 = arith.constant 0 : index
    %528 = vector.load %arg3[%c2_543, %c0_544, %c0_545, %c0_546] : memref<3x3x8x4xbf16, #tpu.memory_space<vmem>>, vector<1x1x8x4xbf16>
    %529 = vector.shape_cast %528 : vector<1x1x8x4xbf16> to vector<8x4xbf16>
    %cst_547 = arith.constant dense<0.000000e+00> : vector<8x16xf32>
    %530 = tpu.matmul %529, %527, %cst_547 {dimension_numbers = #tpu.dot_dimension_numbers<[1], [0], [0], [1], [0, 0, 1, 1], [], []>} : vector<8x4xbf16>, vector<4x16xbf16>, vector<8x16xf32> -> vector<8x16xf32>
    %531 = arith.addf %524, %530 : vector<8x16xf32>
    %532 = vector.extract_strided_slice %526 {offsets = [0, 1], sizes = [4, 16], strides = [1, 1]} : vector<4x18xbf16> to vector<4x16xbf16>
    %c2_548 = arith.constant 2 : index
    %c1_549 = arith.constant 1 : index
    %c0_550 = arith.constant 0 : index
    %c0_551 = arith.constant 0 : index
    %533 = vector.load %arg3[%c2_548, %c1_549, %c0_550, %c0_551] : memref<3x3x8x4xbf16, #tpu.memory_space<vmem>>, vector<1x1x8x4xbf16>
    %534 = vector.shape_cast %533 : vector<1x1x8x4xbf16> to vector<8x4xbf16>
    %cst_552 = arith.constant dense<0.000000e+00> : vector<8x16xf32>
    %535 = tpu.matmul %534, %532, %cst_552 {dimension_numbers = #tpu.dot_dimension_numbers<[1], [0], [0], [1], [0, 0, 1, 1], [], []>} : vector<8x4xbf16>, vector<4x16xbf16>, vector<8x16xf32> -> vector<8x16xf32>
    %536 = arith.addf %531, %535 : vector<8x16xf32>
    %537 = vector.extract_strided_slice %526 {offsets = [0, 2], sizes = [4, 16], strides = [1, 1]} : vector<4x18xbf16> to vector<4x16xbf16>
    %c2_553 = arith.constant 2 : index
    %c2_554 = arith.constant 2 : index
    %c0_555 = arith.constant 0 : index
    %c0_556 = arith.constant 0 : index
    %538 = vector.load %arg3[%c2_553, %c2_554, %c0_555, %c0_556] : memref<3x3x8x4xbf16, #tpu.memory_space<vmem>>, vector<1x1x8x4xbf16>
    %539 = vector.shape_cast %538 : vector<1x1x8x4xbf16> to vector<8x4xbf16>
    %cst_557 = arith.constant dense<0.000000e+00> : vector<8x16xf32>
    %540 = tpu.matmul %539, %537, %cst_557 {dimension_numbers = #tpu.dot_dimension_numbers<[1], [0], [0], [1], [0, 0, 1, 1], [], []>} : vector<8x4xbf16>, vector<4x16xbf16>, vector<8x16xf32> -> vector<8x16xf32>
    %541 = arith.addf %536, %540 : vector<8x16xf32>
    %542 = vector.extract_strided_slice %541 {offsets = [0, 0], sizes = [2, 16], strides = [1, 1]} : vector<8x16xf32> to vector<2x16xf32>
    %543 = vector.extract_strided_slice %541 {offsets = [2, 0], sizes = [2, 16], strides = [1, 1]} : vector<8x16xf32> to vector<2x16xf32>
    %cst_558 = arith.constant dense<0.000000e+00> : vector<2x32xf32>
    %544 = tpu.matmul %542, %6, %cst_558 {dimension_numbers = #tpu.dot_dimension_numbers<[1], [0], [0], [1], [0, 0, 1, 1], [], []>} : vector<2x16xf32>, vector<16x32xf32>, vector<2x32xf32> -> vector<2x32xf32>
    %cst_559 = arith.constant dense<0.000000e+00> : vector<2x32xf32>
    %545 = tpu.matmul %543, %13, %cst_559 {dimension_numbers = #tpu.dot_dimension_numbers<[1], [0], [0], [1], [0, 0, 1, 1], [], []>} : vector<2x16xf32>, vector<16x32xf32>, vector<2x32xf32> -> vector<2x32xf32>
    %546 = arith.addf %544, %545 : vector<2x32xf32>
    %c0_560 = arith.constant 0 : index
    %c0_561 = arith.constant 0 : index
    %c14 = arith.constant 14 : index
    %c0_562 = arith.constant 0 : index
    %547 = vector.load %arg4[%c0_560, %c0_561, %c14, %c0_562] : memref<1x2x32x32xf32, #tpu.memory_space<vmem>>, vector<1x2x1x32xf32>
    %548 = vector.shape_cast %547 : vector<1x2x1x32xf32> to vector<2x32xf32>
    %549 = vector.shape_cast %546 : vector<2x32xf32> to vector<1x2x1x32xf32>
    tpu.vector_store %arg4[%c0_560, %c0_561, %c14, %c0_562], %549 {strides = array<i32>} : memref<1x2x32x32xf32, #tpu.memory_space<vmem>>, vector<1x2x1x32xf32>,
    %550 = vector.extract_strided_slice %541 {offsets = [4, 0], sizes = [2, 16], strides = [1, 1]} : vector<8x16xf32> to vector<2x16xf32>
    %551 = vector.extract_strided_slice %541 {offsets = [6, 0], sizes = [2, 16], strides = [1, 1]} : vector<8x16xf32> to vector<2x16xf32>
    %cst_563 = arith.constant dense<0.000000e+00> : vector<2x32xf32>
    %552 = tpu.matmul %550, %6, %cst_563 {dimension_numbers = #tpu.dot_dimension_numbers<[1], [0], [0], [1], [0, 0, 1, 1], [], []>} : vector<2x16xf32>, vector<16x32xf32>, vector<2x32xf32> -> vector<2x32xf32>
    %cst_564 = arith.constant dense<0.000000e+00> : vector<2x32xf32>
    %553 = tpu.matmul %551, %13, %cst_564 {dimension_numbers = #tpu.dot_dimension_numbers<[1], [0], [0], [1], [0, 0, 1, 1], [], []>} : vector<2x16xf32>, vector<16x32xf32>, vector<2x32xf32> -> vector<2x32xf32>
    %554 = arith.addf %552, %553 : vector<2x32xf32>
    %c0_565 = arith.constant 0 : index
    %c0_566 = arith.constant 0 : index
    %c15 = arith.constant 15 : index
    %c0_567 = arith.constant 0 : index
    %555 = vector.load %arg4[%c0_565, %c0_566, %c15, %c0_567] : memref<1x2x32x32xf32, #tpu.memory_space<vmem>>, vector<1x2x1x32xf32>
    %556 = vector.shape_cast %555 : vector<1x2x1x32xf32> to vector<2x32xf32>
    %557 = vector.shape_cast %554 : vector<2x32xf32> to vector<1x2x1x32xf32>
    tpu.vector_store %arg4[%c0_565, %c0_566, %c15, %c0_567], %557 {strides = array<i32>} : memref<1x2x32x32xf32, #tpu.memory_space<vmem>>, vector<1x2x1x32xf32>,
    %cst_568 = arith.constant 0.000000e+00 : f32
    %558 = vector.broadcast %cst_568 : f32 to vector<8x16xf32>
    %c0_569 = arith.constant 0 : index
    %c0_570 = arith.constant 0 : index
    %c8_571 = arith.constant 8 : index
    %c0_572 = arith.constant 0 : index
    %c0_573 = arith.constant 0 : index
    %559 = vector.load %arg2[%c0_569, %c0_570, %c8_571, %c0_572, %c0_573] : memref<1x1x18x4x18xbf16, #tpu.memory_space<vmem>>, vector<1x1x1x4x18xbf16>
    %560 = vector.shape_cast %559 : vector<1x1x1x4x18xbf16> to vector<4x18xbf16>
    %561 = vector.extract_strided_slice %560 {offsets = [0, 0], sizes = [4, 16], strides = [1, 1]} : vector<4x18xbf16> to vector<4x16xbf16>
    %c0_574 = arith.constant 0 : index
    %c0_575 = arith.constant 0 : index
    %c0_576 = arith.constant 0 : index
    %c0_577 = arith.constant 0 : index
    %562 = vector.load %arg3[%c0_574, %c0_575, %c0_576, %c0_577] : memref<3x3x8x4xbf16, #tpu.memory_space<vmem>>, vector<1x1x8x4xbf16>
    %563 = vector.shape_cast %562 : vector<1x1x8x4xbf16> to vector<8x4xbf16>
    %cst_578 = arith.constant dense<0.000000e+00> : vector<8x16xf32>
    %564 = tpu.matmul %563, %561, %cst_578 {dimension_numbers = #tpu.dot_dimension_numbers<[1], [0], [0], [1], [0, 0, 1, 1], [], []>} : vector<8x4xbf16>, vector<4x16xbf16>, vector<8x16xf32> -> vector<8x16xf32>
    %565 = arith.addf %558, %564 : vector<8x16xf32>
    %566 = vector.extract_strided_slice %560 {offsets = [0, 1], sizes = [4, 16], strides = [1, 1]} : vector<4x18xbf16> to vector<4x16xbf16>
    %c0_579 = arith.constant 0 : index
    %c1_580 = arith.constant 1 : index
    %c0_581 = arith.constant 0 : index
    %c0_582 = arith.constant 0 : index
    %567 = vector.load %arg3[%c0_579, %c1_580, %c0_581, %c0_582] : memref<3x3x8x4xbf16, #tpu.memory_space<vmem>>, vector<1x1x8x4xbf16>
    %568 = vector.shape_cast %567 : vector<1x1x8x4xbf16> to vector<8x4xbf16>
    %cst_583 = arith.constant dense<0.000000e+00> : vector<8x16xf32>
    %569 = tpu.matmul %568, %566, %cst_583 {dimension_numbers = #tpu.dot_dimension_numbers<[1], [0], [0], [1], [0, 0, 1, 1], [], []>} : vector<8x4xbf16>, vector<4x16xbf16>, vector<8x16xf32> -> vector<8x16xf32>
    %570 = arith.addf %565, %569 : vector<8x16xf32>
    %571 = vector.extract_strided_slice %560 {offsets = [0, 2], sizes = [4, 16], strides = [1, 1]} : vector<4x18xbf16> to vector<4x16xbf16>
    %c0_584 = arith.constant 0 : index
    %c2_585 = arith.constant 2 : index
    %c0_586 = arith.constant 0 : index
    %c0_587 = arith.constant 0 : index
    %572 = vector.load %arg3[%c0_584, %c2_585, %c0_586, %c0_587] : memref<3x3x8x4xbf16, #tpu.memory_space<vmem>>, vector<1x1x8x4xbf16>
    %573 = vector.shape_cast %572 : vector<1x1x8x4xbf16> to vector<8x4xbf16>
    %cst_588 = arith.constant dense<0.000000e+00> : vector<8x16xf32>
    %574 = tpu.matmul %573, %571, %cst_588 {dimension_numbers = #tpu.dot_dimension_numbers<[1], [0], [0], [1], [0, 0, 1, 1], [], []>} : vector<8x4xbf16>, vector<4x16xbf16>, vector<8x16xf32> -> vector<8x16xf32>
    %575 = arith.addf %570, %574 : vector<8x16xf32>
    %c0_589 = arith.constant 0 : index
    %c0_590 = arith.constant 0 : index
    %c9_591 = arith.constant 9 : index
    %c0_592 = arith.constant 0 : index
    %c0_593 = arith.constant 0 : index
    %576 = vector.load %arg2[%c0_589, %c0_590, %c9_591, %c0_592, %c0_593] : memref<1x1x18x4x18xbf16, #tpu.memory_space<vmem>>, vector<1x1x1x4x18xbf16>
    %577 = vector.shape_cast %576 : vector<1x1x1x4x18xbf16> to vector<4x18xbf16>
    %578 = vector.extract_strided_slice %577 {offsets = [0, 0], sizes = [4, 16], strides = [1, 1]} : vector<4x18xbf16> to vector<4x16xbf16>
    %c1_594 = arith.constant 1 : index
    %c0_595 = arith.constant 0 : index
    %c0_596 = arith.constant 0 : index
    %c0_597 = arith.constant 0 : index
    %579 = vector.load %arg3[%c1_594, %c0_595, %c0_596, %c0_597] : memref<3x3x8x4xbf16, #tpu.memory_space<vmem>>, vector<1x1x8x4xbf16>
    %580 = vector.shape_cast %579 : vector<1x1x8x4xbf16> to vector<8x4xbf16>
    %cst_598 = arith.constant dense<0.000000e+00> : vector<8x16xf32>
    %581 = tpu.matmul %580, %578, %cst_598 {dimension_numbers = #tpu.dot_dimension_numbers<[1], [0], [0], [1], [0, 0, 1, 1], [], []>} : vector<8x4xbf16>, vector<4x16xbf16>, vector<8x16xf32> -> vector<8x16xf32>
    %582 = arith.addf %575, %581 : vector<8x16xf32>
    %583 = vector.extract_strided_slice %577 {offsets = [0, 1], sizes = [4, 16], strides = [1, 1]} : vector<4x18xbf16> to vector<4x16xbf16>
    %c1_599 = arith.constant 1 : index
    %c1_600 = arith.constant 1 : index
    %c0_601 = arith.constant 0 : index
    %c0_602 = arith.constant 0 : index
    %584 = vector.load %arg3[%c1_599, %c1_600, %c0_601, %c0_602] : memref<3x3x8x4xbf16, #tpu.memory_space<vmem>>, vector<1x1x8x4xbf16>
    %585 = vector.shape_cast %584 : vector<1x1x8x4xbf16> to vector<8x4xbf16>
    %cst_603 = arith.constant dense<0.000000e+00> : vector<8x16xf32>
    %586 = tpu.matmul %585, %583, %cst_603 {dimension_numbers = #tpu.dot_dimension_numbers<[1], [0], [0], [1], [0, 0, 1, 1], [], []>} : vector<8x4xbf16>, vector<4x16xbf16>, vector<8x16xf32> -> vector<8x16xf32>
    %587 = arith.addf %582, %586 : vector<8x16xf32>
    %588 = vector.extract_strided_slice %577 {offsets = [0, 2], sizes = [4, 16], strides = [1, 1]} : vector<4x18xbf16> to vector<4x16xbf16>
    %c1_604 = arith.constant 1 : index
    %c2_605 = arith.constant 2 : index
    %c0_606 = arith.constant 0 : index
    %c0_607 = arith.constant 0 : index
    %589 = vector.load %arg3[%c1_604, %c2_605, %c0_606, %c0_607] : memref<3x3x8x4xbf16, #tpu.memory_space<vmem>>, vector<1x1x8x4xbf16>
    %590 = vector.shape_cast %589 : vector<1x1x8x4xbf16> to vector<8x4xbf16>
    %cst_608 = arith.constant dense<0.000000e+00> : vector<8x16xf32>
    %591 = tpu.matmul %590, %588, %cst_608 {dimension_numbers = #tpu.dot_dimension_numbers<[1], [0], [0], [1], [0, 0, 1, 1], [], []>} : vector<8x4xbf16>, vector<4x16xbf16>, vector<8x16xf32> -> vector<8x16xf32>
    %592 = arith.addf %587, %591 : vector<8x16xf32>
    %c0_609 = arith.constant 0 : index
    %c0_610 = arith.constant 0 : index
    %c10_611 = arith.constant 10 : index
    %c0_612 = arith.constant 0 : index
    %c0_613 = arith.constant 0 : index
    %593 = vector.load %arg2[%c0_609, %c0_610, %c10_611, %c0_612, %c0_613] : memref<1x1x18x4x18xbf16, #tpu.memory_space<vmem>>, vector<1x1x1x4x18xbf16>
    %594 = vector.shape_cast %593 : vector<1x1x1x4x18xbf16> to vector<4x18xbf16>
    %595 = vector.extract_strided_slice %594 {offsets = [0, 0], sizes = [4, 16], strides = [1, 1]} : vector<4x18xbf16> to vector<4x16xbf16>
    %c2_614 = arith.constant 2 : index
    %c0_615 = arith.constant 0 : index
    %c0_616 = arith.constant 0 : index
    %c0_617 = arith.constant 0 : index
    %596 = vector.load %arg3[%c2_614, %c0_615, %c0_616, %c0_617] : memref<3x3x8x4xbf16, #tpu.memory_space<vmem>>, vector<1x1x8x4xbf16>
    %597 = vector.shape_cast %596 : vector<1x1x8x4xbf16> to vector<8x4xbf16>
    %cst_618 = arith.constant dense<0.000000e+00> : vector<8x16xf32>
    %598 = tpu.matmul %597, %595, %cst_618 {dimension_numbers = #tpu.dot_dimension_numbers<[1], [0], [0], [1], [0, 0, 1, 1], [], []>} : vector<8x4xbf16>, vector<4x16xbf16>, vector<8x16xf32> -> vector<8x16xf32>
    %599 = arith.addf %592, %598 : vector<8x16xf32>
    %600 = vector.extract_strided_slice %594 {offsets = [0, 1], sizes = [4, 16], strides = [1, 1]} : vector<4x18xbf16> to vector<4x16xbf16>
    %c2_619 = arith.constant 2 : index
    %c1_620 = arith.constant 1 : index
    %c0_621 = arith.constant 0 : index
    %c0_622 = arith.constant 0 : index
    %601 = vector.load %arg3[%c2_619, %c1_620, %c0_621, %c0_622] : memref<3x3x8x4xbf16, #tpu.memory_space<vmem>>, vector<1x1x8x4xbf16>
    %602 = vector.shape_cast %601 : vector<1x1x8x4xbf16> to vector<8x4xbf16>
    %cst_623 = arith.constant dense<0.000000e+00> : vector<8x16xf32>
    %603 = tpu.matmul %602, %600, %cst_623 {dimension_numbers = #tpu.dot_dimension_numbers<[1], [0], [0], [1], [0, 0, 1, 1], [], []>} : vector<8x4xbf16>, vector<4x16xbf16>, vector<8x16xf32> -> vector<8x16xf32>
    %604 = arith.addf %599, %603 : vector<8x16xf32>
    %605 = vector.extract_strided_slice %594 {offsets = [0, 2], sizes = [4, 16], strides = [1, 1]} : vector<4x18xbf16> to vector<4x16xbf16>
    %c2_624 = arith.constant 2 : index
    %c2_625 = arith.constant 2 : index
    %c0_626 = arith.constant 0 : index
    %c0_627 = arith.constant 0 : index
    %606 = vector.load %arg3[%c2_624, %c2_625, %c0_626, %c0_627] : memref<3x3x8x4xbf16, #tpu.memory_space<vmem>>, vector<1x1x8x4xbf16>
    %607 = vector.shape_cast %606 : vector<1x1x8x4xbf16> to vector<8x4xbf16>
    %cst_628 = arith.constant dense<0.000000e+00> : vector<8x16xf32>
    %608 = tpu.matmul %607, %605, %cst_628 {dimension_numbers = #tpu.dot_dimension_numbers<[1], [0], [0], [1], [0, 0, 1, 1], [], []>} : vector<8x4xbf16>, vector<4x16xbf16>, vector<8x16xf32> -> vector<8x16xf32>
    %609 = arith.addf %604, %608 : vector<8x16xf32>
    %610 = vector.extract_strided_slice %609 {offsets = [0, 0], sizes = [2, 16], strides = [1, 1]} : vector<8x16xf32> to vector<2x16xf32>
    %611 = vector.extract_strided_slice %609 {offsets = [2, 0], sizes = [2, 16], strides = [1, 1]} : vector<8x16xf32> to vector<2x16xf32>
    %cst_629 = arith.constant dense<0.000000e+00> : vector<2x32xf32>
    %612 = tpu.matmul %610, %6, %cst_629 {dimension_numbers = #tpu.dot_dimension_numbers<[1], [0], [0], [1], [0, 0, 1, 1], [], []>} : vector<2x16xf32>, vector<16x32xf32>, vector<2x32xf32> -> vector<2x32xf32>
    %cst_630 = arith.constant dense<0.000000e+00> : vector<2x32xf32>
    %613 = tpu.matmul %611, %13, %cst_630 {dimension_numbers = #tpu.dot_dimension_numbers<[1], [0], [0], [1], [0, 0, 1, 1], [], []>} : vector<2x16xf32>, vector<16x32xf32>, vector<2x32xf32> -> vector<2x32xf32>
    %614 = arith.addf %612, %613 : vector<2x32xf32>
    %c0_631 = arith.constant 0 : index
    %c0_632 = arith.constant 0 : index
    %c16 = arith.constant 16 : index
    %c0_633 = arith.constant 0 : index
    %615 = vector.load %arg4[%c0_631, %c0_632, %c16, %c0_633] : memref<1x2x32x32xf32, #tpu.memory_space<vmem>>, vector<1x2x1x32xf32>
    %616 = vector.shape_cast %615 : vector<1x2x1x32xf32> to vector<2x32xf32>
    %617 = vector.shape_cast %614 : vector<2x32xf32> to vector<1x2x1x32xf32>
    tpu.vector_store %arg4[%c0_631, %c0_632, %c16, %c0_633], %617 {strides = array<i32>} : memref<1x2x32x32xf32, #tpu.memory_space<vmem>>, vector<1x2x1x32xf32>,
    %618 = vector.extract_strided_slice %609 {offsets = [4, 0], sizes = [2, 16], strides = [1, 1]} : vector<8x16xf32> to vector<2x16xf32>
    %619 = vector.extract_strided_slice %609 {offsets = [6, 0], sizes = [2, 16], strides = [1, 1]} : vector<8x16xf32> to vector<2x16xf32>
    %cst_634 = arith.constant dense<0.000000e+00> : vector<2x32xf32>
    %620 = tpu.matmul %618, %6, %cst_634 {dimension_numbers = #tpu.dot_dimension_numbers<[1], [0], [0], [1], [0, 0, 1, 1], [], []>} : vector<2x16xf32>, vector<16x32xf32>, vector<2x32xf32> -> vector<2x32xf32>
    %cst_635 = arith.constant dense<0.000000e+00> : vector<2x32xf32>
    %621 = tpu.matmul %619, %13, %cst_635 {dimension_numbers = #tpu.dot_dimension_numbers<[1], [0], [0], [1], [0, 0, 1, 1], [], []>} : vector<2x16xf32>, vector<16x32xf32>, vector<2x32xf32> -> vector<2x32xf32>
    %622 = arith.addf %620, %621 : vector<2x32xf32>
    %c0_636 = arith.constant 0 : index
    %c0_637 = arith.constant 0 : index
    %c17 = arith.constant 17 : index
    %c0_638 = arith.constant 0 : index
    %623 = vector.load %arg4[%c0_636, %c0_637, %c17, %c0_638] : memref<1x2x32x32xf32, #tpu.memory_space<vmem>>, vector<1x2x1x32xf32>
    %624 = vector.shape_cast %623 : vector<1x2x1x32xf32> to vector<2x32xf32>
    %625 = vector.shape_cast %622 : vector<2x32xf32> to vector<1x2x1x32xf32>
    tpu.vector_store %arg4[%c0_636, %c0_637, %c17, %c0_638], %625 {strides = array<i32>} : memref<1x2x32x32xf32, #tpu.memory_space<vmem>>, vector<1x2x1x32xf32>,
    %cst_639 = arith.constant 0.000000e+00 : f32
    %626 = vector.broadcast %cst_639 : f32 to vector<8x16xf32>
    %c0_640 = arith.constant 0 : index
    %c0_641 = arith.constant 0 : index
    %c9_642 = arith.constant 9 : index
    %c0_643 = arith.constant 0 : index
    %c0_644 = arith.constant 0 : index
    %627 = vector.load %arg2[%c0_640, %c0_641, %c9_642, %c0_643, %c0_644] : memref<1x1x18x4x18xbf16, #tpu.memory_space<vmem>>, vector<1x1x1x4x18xbf16>
    %628 = vector.shape_cast %627 : vector<1x1x1x4x18xbf16> to vector<4x18xbf16>
    %629 = vector.extract_strided_slice %628 {offsets = [0, 0], sizes = [4, 16], strides = [1, 1]} : vector<4x18xbf16> to vector<4x16xbf16>
    %c0_645 = arith.constant 0 : index
    %c0_646 = arith.constant 0 : index
    %c0_647 = arith.constant 0 : index
    %c0_648 = arith.constant 0 : index
    %630 = vector.load %arg3[%c0_645, %c0_646, %c0_647, %c0_648] : memref<3x3x8x4xbf16, #tpu.memory_space<vmem>>, vector<1x1x8x4xbf16>
    %631 = vector.shape_cast %630 : vector<1x1x8x4xbf16> to vector<8x4xbf16>
    %cst_649 = arith.constant dense<0.000000e+00> : vector<8x16xf32>
    %632 = tpu.matmul %631, %629, %cst_649 {dimension_numbers = #tpu.dot_dimension_numbers<[1], [0], [0], [1], [0, 0, 1, 1], [], []>} : vector<8x4xbf16>, vector<4x16xbf16>, vector<8x16xf32> -> vector<8x16xf32>
    %633 = arith.addf %626, %632 : vector<8x16xf32>
    %634 = vector.extract_strided_slice %628 {offsets = [0, 1], sizes = [4, 16], strides = [1, 1]} : vector<4x18xbf16> to vector<4x16xbf16>
    %c0_650 = arith.constant 0 : index
    %c1_651 = arith.constant 1 : index
    %c0_652 = arith.constant 0 : index
    %c0_653 = arith.constant 0 : index
    %635 = vector.load %arg3[%c0_650, %c1_651, %c0_652, %c0_653] : memref<3x3x8x4xbf16, #tpu.memory_space<vmem>>, vector<1x1x8x4xbf16>
    %636 = vector.shape_cast %635 : vector<1x1x8x4xbf16> to vector<8x4xbf16>
    %cst_654 = arith.constant dense<0.000000e+00> : vector<8x16xf32>
    %637 = tpu.matmul %636, %634, %cst_654 {dimension_numbers = #tpu.dot_dimension_numbers<[1], [0], [0], [1], [0, 0, 1, 1], [], []>} : vector<8x4xbf16>, vector<4x16xbf16>, vector<8x16xf32> -> vector<8x16xf32>
    %638 = arith.addf %633, %637 : vector<8x16xf32>
    %639 = vector.extract_strided_slice %628 {offsets = [0, 2], sizes = [4, 16], strides = [1, 1]} : vector<4x18xbf16> to vector<4x16xbf16>
    %c0_655 = arith.constant 0 : index
    %c2_656 = arith.constant 2 : index
    %c0_657 = arith.constant 0 : index
    %c0_658 = arith.constant 0 : index
    %640 = vector.load %arg3[%c0_655, %c2_656, %c0_657, %c0_658] : memref<3x3x8x4xbf16, #tpu.memory_space<vmem>>, vector<1x1x8x4xbf16>
    %641 = vector.shape_cast %640 : vector<1x1x8x4xbf16> to vector<8x4xbf16>
    %cst_659 = arith.constant dense<0.000000e+00> : vector<8x16xf32>
    %642 = tpu.matmul %641, %639, %cst_659 {dimension_numbers = #tpu.dot_dimension_numbers<[1], [0], [0], [1], [0, 0, 1, 1], [], []>} : vector<8x4xbf16>, vector<4x16xbf16>, vector<8x16xf32> -> vector<8x16xf32>
    %643 = arith.addf %638, %642 : vector<8x16xf32>
    %c0_660 = arith.constant 0 : index
    %c0_661 = arith.constant 0 : index
    %c10_662 = arith.constant 10 : index
    %c0_663 = arith.constant 0 : index
    %c0_664 = arith.constant 0 : index
    %644 = vector.load %arg2[%c0_660, %c0_661, %c10_662, %c0_663, %c0_664] : memref<1x1x18x4x18xbf16, #tpu.memory_space<vmem>>, vector<1x1x1x4x18xbf16>
    %645 = vector.shape_cast %644 : vector<1x1x1x4x18xbf16> to vector<4x18xbf16>
    %646 = vector.extract_strided_slice %645 {offsets = [0, 0], sizes = [4, 16], strides = [1, 1]} : vector<4x18xbf16> to vector<4x16xbf16>
    %c1_665 = arith.constant 1 : index
    %c0_666 = arith.constant 0 : index
    %c0_667 = arith.constant 0 : index
    %c0_668 = arith.constant 0 : index
    %647 = vector.load %arg3[%c1_665, %c0_666, %c0_667, %c0_668] : memref<3x3x8x4xbf16, #tpu.memory_space<vmem>>, vector<1x1x8x4xbf16>
    %648 = vector.shape_cast %647 : vector<1x1x8x4xbf16> to vector<8x4xbf16>
    %cst_669 = arith.constant dense<0.000000e+00> : vector<8x16xf32>
    %649 = tpu.matmul %648, %646, %cst_669 {dimension_numbers = #tpu.dot_dimension_numbers<[1], [0], [0], [1], [0, 0, 1, 1], [], []>} : vector<8x4xbf16>, vector<4x16xbf16>, vector<8x16xf32> -> vector<8x16xf32>
    %650 = arith.addf %643, %649 : vector<8x16xf32>
    %651 = vector.extract_strided_slice %645 {offsets = [0, 1], sizes = [4, 16], strides = [1, 1]} : vector<4x18xbf16> to vector<4x16xbf16>
    %c1_670 = arith.constant 1 : index
    %c1_671 = arith.constant 1 : index
    %c0_672 = arith.constant 0 : index
    %c0_673 = arith.constant 0 : index
    %652 = vector.load %arg3[%c1_670, %c1_671, %c0_672, %c0_673] : memref<3x3x8x4xbf16, #tpu.memory_space<vmem>>, vector<1x1x8x4xbf16>
    %653 = vector.shape_cast %652 : vector<1x1x8x4xbf16> to vector<8x4xbf16>
    %cst_674 = arith.constant dense<0.000000e+00> : vector<8x16xf32>
    %654 = tpu.matmul %653, %651, %cst_674 {dimension_numbers = #tpu.dot_dimension_numbers<[1], [0], [0], [1], [0, 0, 1, 1], [], []>} : vector<8x4xbf16>, vector<4x16xbf16>, vector<8x16xf32> -> vector<8x16xf32>
    %655 = arith.addf %650, %654 : vector<8x16xf32>
    %656 = vector.extract_strided_slice %645 {offsets = [0, 2], sizes = [4, 16], strides = [1, 1]} : vector<4x18xbf16> to vector<4x16xbf16>
    %c1_675 = arith.constant 1 : index
    %c2_676 = arith.constant 2 : index
    %c0_677 = arith.constant 0 : index
    %c0_678 = arith.constant 0 : index
    %657 = vector.load %arg3[%c1_675, %c2_676, %c0_677, %c0_678] : memref<3x3x8x4xbf16, #tpu.memory_space<vmem>>, vector<1x1x8x4xbf16>
    %658 = vector.shape_cast %657 : vector<1x1x8x4xbf16> to vector<8x4xbf16>
    %cst_679 = arith.constant dense<0.000000e+00> : vector<8x16xf32>
    %659 = tpu.matmul %658, %656, %cst_679 {dimension_numbers = #tpu.dot_dimension_numbers<[1], [0], [0], [1], [0, 0, 1, 1], [], []>} : vector<8x4xbf16>, vector<4x16xbf16>, vector<8x16xf32> -> vector<8x16xf32>
    %660 = arith.addf %655, %659 : vector<8x16xf32>
    %c0_680 = arith.constant 0 : index
    %c0_681 = arith.constant 0 : index
    %c11_682 = arith.constant 11 : index
    %c0_683 = arith.constant 0 : index
    %c0_684 = arith.constant 0 : index
    %661 = vector.load %arg2[%c0_680, %c0_681, %c11_682, %c0_683, %c0_684] : memref<1x1x18x4x18xbf16, #tpu.memory_space<vmem>>, vector<1x1x1x4x18xbf16>
    %662 = vector.shape_cast %661 : vector<1x1x1x4x18xbf16> to vector<4x18xbf16>
    %663 = vector.extract_strided_slice %662 {offsets = [0, 0], sizes = [4, 16], strides = [1, 1]} : vector<4x18xbf16> to vector<4x16xbf16>
    %c2_685 = arith.constant 2 : index
    %c0_686 = arith.constant 0 : index
    %c0_687 = arith.constant 0 : index
    %c0_688 = arith.constant 0 : index
    %664 = vector.load %arg3[%c2_685, %c0_686, %c0_687, %c0_688] : memref<3x3x8x4xbf16, #tpu.memory_space<vmem>>, vector<1x1x8x4xbf16>
    %665 = vector.shape_cast %664 : vector<1x1x8x4xbf16> to vector<8x4xbf16>
    %cst_689 = arith.constant dense<0.000000e+00> : vector<8x16xf32>
    %666 = tpu.matmul %665, %663, %cst_689 {dimension_numbers = #tpu.dot_dimension_numbers<[1], [0], [0], [1], [0, 0, 1, 1], [], []>} : vector<8x4xbf16>, vector<4x16xbf16>, vector<8x16xf32> -> vector<8x16xf32>
    %667 = arith.addf %660, %666 : vector<8x16xf32>
    %668 = vector.extract_strided_slice %662 {offsets = [0, 1], sizes = [4, 16], strides = [1, 1]} : vector<4x18xbf16> to vector<4x16xbf16>
    %c2_690 = arith.constant 2 : index
    %c1_691 = arith.constant 1 : index
    %c0_692 = arith.constant 0 : index
    %c0_693 = arith.constant 0 : index
    %669 = vector.load %arg3[%c2_690, %c1_691, %c0_692, %c0_693] : memref<3x3x8x4xbf16, #tpu.memory_space<vmem>>, vector<1x1x8x4xbf16>
    %670 = vector.shape_cast %669 : vector<1x1x8x4xbf16> to vector<8x4xbf16>
    %cst_694 = arith.constant dense<0.000000e+00> : vector<8x16xf32>
    %671 = tpu.matmul %670, %668, %cst_694 {dimension_numbers = #tpu.dot_dimension_numbers<[1], [0], [0], [1], [0, 0, 1, 1], [], []>} : vector<8x4xbf16>, vector<4x16xbf16>, vector<8x16xf32> -> vector<8x16xf32>
    %672 = arith.addf %667, %671 : vector<8x16xf32>
    %673 = vector.extract_strided_slice %662 {offsets = [0, 2], sizes = [4, 16], strides = [1, 1]} : vector<4x18xbf16> to vector<4x16xbf16>
    %c2_695 = arith.constant 2 : index
    %c2_696 = arith.constant 2 : index
    %c0_697 = arith.constant 0 : index
    %c0_698 = arith.constant 0 : index
    %674 = vector.load %arg3[%c2_695, %c2_696, %c0_697, %c0_698] : memref<3x3x8x4xbf16, #tpu.memory_space<vmem>>, vector<1x1x8x4xbf16>
    %675 = vector.shape_cast %674 : vector<1x1x8x4xbf16> to vector<8x4xbf16>
    %cst_699 = arith.constant dense<0.000000e+00> : vector<8x16xf32>
    %676 = tpu.matmul %675, %673, %cst_699 {dimension_numbers = #tpu.dot_dimension_numbers<[1], [0], [0], [1], [0, 0, 1, 1], [], []>} : vector<8x4xbf16>, vector<4x16xbf16>, vector<8x16xf32> -> vector<8x16xf32>
    %677 = arith.addf %672, %676 : vector<8x16xf32>
    %678 = vector.extract_strided_slice %677 {offsets = [0, 0], sizes = [2, 16], strides = [1, 1]} : vector<8x16xf32> to vector<2x16xf32>
    %679 = vector.extract_strided_slice %677 {offsets = [2, 0], sizes = [2, 16], strides = [1, 1]} : vector<8x16xf32> to vector<2x16xf32>
    %cst_700 = arith.constant dense<0.000000e+00> : vector<2x32xf32>
    %680 = tpu.matmul %678, %6, %cst_700 {dimension_numbers = #tpu.dot_dimension_numbers<[1], [0], [0], [1], [0, 0, 1, 1], [], []>} : vector<2x16xf32>, vector<16x32xf32>, vector<2x32xf32> -> vector<2x32xf32>
    %cst_701 = arith.constant dense<0.000000e+00> : vector<2x32xf32>
    %681 = tpu.matmul %679, %13, %cst_701 {dimension_numbers = #tpu.dot_dimension_numbers<[1], [0], [0], [1], [0, 0, 1, 1], [], []>} : vector<2x16xf32>, vector<16x32xf32>, vector<2x32xf32> -> vector<2x32xf32>
    %682 = arith.addf %680, %681 : vector<2x32xf32>
    %c0_702 = arith.constant 0 : index
    %c0_703 = arith.constant 0 : index
    %c18 = arith.constant 18 : index
    %c0_704 = arith.constant 0 : index
    %683 = vector.load %arg4[%c0_702, %c0_703, %c18, %c0_704] : memref<1x2x32x32xf32, #tpu.memory_space<vmem>>, vector<1x2x1x32xf32>
    %684 = vector.shape_cast %683 : vector<1x2x1x32xf32> to vector<2x32xf32>
    %685 = vector.shape_cast %682 : vector<2x32xf32> to vector<1x2x1x32xf32>
    tpu.vector_store %arg4[%c0_702, %c0_703, %c18, %c0_704], %685 {strides = array<i32>} : memref<1x2x32x32xf32, #tpu.memory_space<vmem>>, vector<1x2x1x32xf32>,
    %686 = vector.extract_strided_slice %677 {offsets = [4, 0], sizes = [2, 16], strides = [1, 1]} : vector<8x16xf32> to vector<2x16xf32>
    %687 = vector.extract_strided_slice %677 {offsets = [6, 0], sizes = [2, 16], strides = [1, 1]} : vector<8x16xf32> to vector<2x16xf32>
    %cst_705 = arith.constant dense<0.000000e+00> : vector<2x32xf32>
    %688 = tpu.matmul %686, %6, %cst_705 {dimension_numbers = #tpu.dot_dimension_numbers<[1], [0], [0], [1], [0, 0, 1, 1], [], []>} : vector<2x16xf32>, vector<16x32xf32>, vector<2x32xf32> -> vector<2x32xf32>
    %cst_706 = arith.constant dense<0.000000e+00> : vector<2x32xf32>
    %689 = tpu.matmul %687, %13, %cst_706 {dimension_numbers = #tpu.dot_dimension_numbers<[1], [0], [0], [1], [0, 0, 1, 1], [], []>} : vector<2x16xf32>, vector<16x32xf32>, vector<2x32xf32> -> vector<2x32xf32>
    %690 = arith.addf %688, %689 : vector<2x32xf32>
    %c0_707 = arith.constant 0 : index
    %c0_708 = arith.constant 0 : index
    %c19 = arith.constant 19 : index
    %c0_709 = arith.constant 0 : index
    %691 = vector.load %arg4[%c0_707, %c0_708, %c19, %c0_709] : memref<1x2x32x32xf32, #tpu.memory_space<vmem>>, vector<1x2x1x32xf32>
    %692 = vector.shape_cast %691 : vector<1x2x1x32xf32> to vector<2x32xf32>
    %693 = vector.shape_cast %690 : vector<2x32xf32> to vector<1x2x1x32xf32>
    tpu.vector_store %arg4[%c0_707, %c0_708, %c19, %c0_709], %693 {strides = array<i32>} : memref<1x2x32x32xf32, #tpu.memory_space<vmem>>, vector<1x2x1x32xf32>,
    %cst_710 = arith.constant 0.000000e+00 : f32
    %694 = vector.broadcast %cst_710 : f32 to vector<8x16xf32>
    %c0_711 = arith.constant 0 : index
    %c0_712 = arith.constant 0 : index
    %c10_713 = arith.constant 10 : index
    %c0_714 = arith.constant 0 : index
    %c0_715 = arith.constant 0 : index
    %695 = vector.load %arg2[%c0_711, %c0_712, %c10_713, %c0_714, %c0_715] : memref<1x1x18x4x18xbf16, #tpu.memory_space<vmem>>, vector<1x1x1x4x18xbf16>
    %696 = vector.shape_cast %695 : vector<1x1x1x4x18xbf16> to vector<4x18xbf16>
    %697 = vector.extract_strided_slice %696 {offsets = [0, 0], sizes = [4, 16], strides = [1, 1]} : vector<4x18xbf16> to vector<4x16xbf16>
    %c0_716 = arith.constant 0 : index
    %c0_717 = arith.constant 0 : index
    %c0_718 = arith.constant 0 : index
    %c0_719 = arith.constant 0 : index
    %698 = vector.load %arg3[%c0_716, %c0_717, %c0_718, %c0_719] : memref<3x3x8x4xbf16, #tpu.memory_space<vmem>>, vector<1x1x8x4xbf16>
    %699 = vector.shape_cast %698 : vector<1x1x8x4xbf16> to vector<8x4xbf16>
    %cst_720 = arith.constant dense<0.000000e+00> : vector<8x16xf32>
    %700 = tpu.matmul %699, %697, %cst_720 {dimension_numbers = #tpu.dot_dimension_numbers<[1], [0], [0], [1], [0, 0, 1, 1], [], []>} : vector<8x4xbf16>, vector<4x16xbf16>, vector<8x16xf32> -> vector<8x16xf32>
    %701 = arith.addf %694, %700 : vector<8x16xf32>
    %702 = vector.extract_strided_slice %696 {offsets = [0, 1], sizes = [4, 16], strides = [1, 1]} : vector<4x18xbf16> to vector<4x16xbf16>
    %c0_721 = arith.constant 0 : index
    %c1_722 = arith.constant 1 : index
    %c0_723 = arith.constant 0 : index
    %c0_724 = arith.constant 0 : index
    %703 = vector.load %arg3[%c0_721, %c1_722, %c0_723, %c0_724] : memref<3x3x8x4xbf16, #tpu.memory_space<vmem>>, vector<1x1x8x4xbf16>
    %704 = vector.shape_cast %703 : vector<1x1x8x4xbf16> to vector<8x4xbf16>
    %cst_725 = arith.constant dense<0.000000e+00> : vector<8x16xf32>
    %705 = tpu.matmul %704, %702, %cst_725 {dimension_numbers = #tpu.dot_dimension_numbers<[1], [0], [0], [1], [0, 0, 1, 1], [], []>} : vector<8x4xbf16>, vector<4x16xbf16>, vector<8x16xf32> -> vector<8x16xf32>
    %706 = arith.addf %701, %705 : vector<8x16xf32>
    %707 = vector.extract_strided_slice %696 {offsets = [0, 2], sizes = [4, 16], strides = [1, 1]} : vector<4x18xbf16> to vector<4x16xbf16>
    %c0_726 = arith.constant 0 : index
    %c2_727 = arith.constant 2 : index
    %c0_728 = arith.constant 0 : index
    %c0_729 = arith.constant 0 : index
    %708 = vector.load %arg3[%c0_726, %c2_727, %c0_728, %c0_729] : memref<3x3x8x4xbf16, #tpu.memory_space<vmem>>, vector<1x1x8x4xbf16>
    %709 = vector.shape_cast %708 : vector<1x1x8x4xbf16> to vector<8x4xbf16>
    %cst_730 = arith.constant dense<0.000000e+00> : vector<8x16xf32>
    %710 = tpu.matmul %709, %707, %cst_730 {dimension_numbers = #tpu.dot_dimension_numbers<[1], [0], [0], [1], [0, 0, 1, 1], [], []>} : vector<8x4xbf16>, vector<4x16xbf16>, vector<8x16xf32> -> vector<8x16xf32>
    %711 = arith.addf %706, %710 : vector<8x16xf32>
    %c0_731 = arith.constant 0 : index
    %c0_732 = arith.constant 0 : index
    %c11_733 = arith.constant 11 : index
    %c0_734 = arith.constant 0 : index
    %c0_735 = arith.constant 0 : index
    %712 = vector.load %arg2[%c0_731, %c0_732, %c11_733, %c0_734, %c0_735] : memref<1x1x18x4x18xbf16, #tpu.memory_space<vmem>>, vector<1x1x1x4x18xbf16>
    %713 = vector.shape_cast %712 : vector<1x1x1x4x18xbf16> to vector<4x18xbf16>
    %714 = vector.extract_strided_slice %713 {offsets = [0, 0], sizes = [4, 16], strides = [1, 1]} : vector<4x18xbf16> to vector<4x16xbf16>
    %c1_736 = arith.constant 1 : index
    %c0_737 = arith.constant 0 : index
    %c0_738 = arith.constant 0 : index
    %c0_739 = arith.constant 0 : index
    %715 = vector.load %arg3[%c1_736, %c0_737, %c0_738, %c0_739] : memref<3x3x8x4xbf16, #tpu.memory_space<vmem>>, vector<1x1x8x4xbf16>
    %716 = vector.shape_cast %715 : vector<1x1x8x4xbf16> to vector<8x4xbf16>
    %cst_740 = arith.constant dense<0.000000e+00> : vector<8x16xf32>
    %717 = tpu.matmul %716, %714, %cst_740 {dimension_numbers = #tpu.dot_dimension_numbers<[1], [0], [0], [1], [0, 0, 1, 1], [], []>} : vector<8x4xbf16>, vector<4x16xbf16>, vector<8x16xf32> -> vector<8x16xf32>
    %718 = arith.addf %711, %717 : vector<8x16xf32>
    %719 = vector.extract_strided_slice %713 {offsets = [0, 1], sizes = [4, 16], strides = [1, 1]} : vector<4x18xbf16> to vector<4x16xbf16>
    %c1_741 = arith.constant 1 : index
    %c1_742 = arith.constant 1 : index
    %c0_743 = arith.constant 0 : index
    %c0_744 = arith.constant 0 : index
    %720 = vector.load %arg3[%c1_741, %c1_742, %c0_743, %c0_744] : memref<3x3x8x4xbf16, #tpu.memory_space<vmem>>, vector<1x1x8x4xbf16>
    %721 = vector.shape_cast %720 : vector<1x1x8x4xbf16> to vector<8x4xbf16>
    %cst_745 = arith.constant dense<0.000000e+00> : vector<8x16xf32>
    %722 = tpu.matmul %721, %719, %cst_745 {dimension_numbers = #tpu.dot_dimension_numbers<[1], [0], [0], [1], [0, 0, 1, 1], [], []>} : vector<8x4xbf16>, vector<4x16xbf16>, vector<8x16xf32> -> vector<8x16xf32>
    %723 = arith.addf %718, %722 : vector<8x16xf32>
    %724 = vector.extract_strided_slice %713 {offsets = [0, 2], sizes = [4, 16], strides = [1, 1]} : vector<4x18xbf16> to vector<4x16xbf16>
    %c1_746 = arith.constant 1 : index
    %c2_747 = arith.constant 2 : index
    %c0_748 = arith.constant 0 : index
    %c0_749 = arith.constant 0 : index
    %725 = vector.load %arg3[%c1_746, %c2_747, %c0_748, %c0_749] : memref<3x3x8x4xbf16, #tpu.memory_space<vmem>>, vector<1x1x8x4xbf16>
    %726 = vector.shape_cast %725 : vector<1x1x8x4xbf16> to vector<8x4xbf16>
    %cst_750 = arith.constant dense<0.000000e+00> : vector<8x16xf32>
    %727 = tpu.matmul %726, %724, %cst_750 {dimension_numbers = #tpu.dot_dimension_numbers<[1], [0], [0], [1], [0, 0, 1, 1], [], []>} : vector<8x4xbf16>, vector<4x16xbf16>, vector<8x16xf32> -> vector<8x16xf32>
    %728 = arith.addf %723, %727 : vector<8x16xf32>
    %c0_751 = arith.constant 0 : index
    %c0_752 = arith.constant 0 : index
    %c12_753 = arith.constant 12 : index
    %c0_754 = arith.constant 0 : index
    %c0_755 = arith.constant 0 : index
    %729 = vector.load %arg2[%c0_751, %c0_752, %c12_753, %c0_754, %c0_755] : memref<1x1x18x4x18xbf16, #tpu.memory_space<vmem>>, vector<1x1x1x4x18xbf16>
    %730 = vector.shape_cast %729 : vector<1x1x1x4x18xbf16> to vector<4x18xbf16>
    %731 = vector.extract_strided_slice %730 {offsets = [0, 0], sizes = [4, 16], strides = [1, 1]} : vector<4x18xbf16> to vector<4x16xbf16>
    %c2_756 = arith.constant 2 : index
    %c0_757 = arith.constant 0 : index
    %c0_758 = arith.constant 0 : index
    %c0_759 = arith.constant 0 : index
    %732 = vector.load %arg3[%c2_756, %c0_757, %c0_758, %c0_759] : memref<3x3x8x4xbf16, #tpu.memory_space<vmem>>, vector<1x1x8x4xbf16>
    %733 = vector.shape_cast %732 : vector<1x1x8x4xbf16> to vector<8x4xbf16>
    %cst_760 = arith.constant dense<0.000000e+00> : vector<8x16xf32>
    %734 = tpu.matmul %733, %731, %cst_760 {dimension_numbers = #tpu.dot_dimension_numbers<[1], [0], [0], [1], [0, 0, 1, 1], [], []>} : vector<8x4xbf16>, vector<4x16xbf16>, vector<8x16xf32> -> vector<8x16xf32>
    %735 = arith.addf %728, %734 : vector<8x16xf32>
    %736 = vector.extract_strided_slice %730 {offsets = [0, 1], sizes = [4, 16], strides = [1, 1]} : vector<4x18xbf16> to vector<4x16xbf16>
    %c2_761 = arith.constant 2 : index
    %c1_762 = arith.constant 1 : index
    %c0_763 = arith.constant 0 : index
    %c0_764 = arith.constant 0 : index
    %737 = vector.load %arg3[%c2_761, %c1_762, %c0_763, %c0_764] : memref<3x3x8x4xbf16, #tpu.memory_space<vmem>>, vector<1x1x8x4xbf16>
    %738 = vector.shape_cast %737 : vector<1x1x8x4xbf16> to vector<8x4xbf16>
    %cst_765 = arith.constant dense<0.000000e+00> : vector<8x16xf32>
    %739 = tpu.matmul %738, %736, %cst_765 {dimension_numbers = #tpu.dot_dimension_numbers<[1], [0], [0], [1], [0, 0, 1, 1], [], []>} : vector<8x4xbf16>, vector<4x16xbf16>, vector<8x16xf32> -> vector<8x16xf32>
    %740 = arith.addf %735, %739 : vector<8x16xf32>
    %741 = vector.extract_strided_slice %730 {offsets = [0, 2], sizes = [4, 16], strides = [1, 1]} : vector<4x18xbf16> to vector<4x16xbf16>
    %c2_766 = arith.constant 2 : index
    %c2_767 = arith.constant 2 : index
    %c0_768 = arith.constant 0 : index
    %c0_769 = arith.constant 0 : index
    %742 = vector.load %arg3[%c2_766, %c2_767, %c0_768, %c0_769] : memref<3x3x8x4xbf16, #tpu.memory_space<vmem>>, vector<1x1x8x4xbf16>
    %743 = vector.shape_cast %742 : vector<1x1x8x4xbf16> to vector<8x4xbf16>
    %cst_770 = arith.constant dense<0.000000e+00> : vector<8x16xf32>
    %744 = tpu.matmul %743, %741, %cst_770 {dimension_numbers = #tpu.dot_dimension_numbers<[1], [0], [0], [1], [0, 0, 1, 1], [], []>} : vector<8x4xbf16>, vector<4x16xbf16>, vector<8x16xf32> -> vector<8x16xf32>
    %745 = arith.addf %740, %744 : vector<8x16xf32>
    %746 = vector.extract_strided_slice %745 {offsets = [0, 0], sizes = [2, 16], strides = [1, 1]} : vector<8x16xf32> to vector<2x16xf32>
    %747 = vector.extract_strided_slice %745 {offsets = [2, 0], sizes = [2, 16], strides = [1, 1]} : vector<8x16xf32> to vector<2x16xf32>
    %cst_771 = arith.constant dense<0.000000e+00> : vector<2x32xf32>
    %748 = tpu.matmul %746, %6, %cst_771 {dimension_numbers = #tpu.dot_dimension_numbers<[1], [0], [0], [1], [0, 0, 1, 1], [], []>} : vector<2x16xf32>, vector<16x32xf32>, vector<2x32xf32> -> vector<2x32xf32>
    %cst_772 = arith.constant dense<0.000000e+00> : vector<2x32xf32>
    %749 = tpu.matmul %747, %13, %cst_772 {dimension_numbers = #tpu.dot_dimension_numbers<[1], [0], [0], [1], [0, 0, 1, 1], [], []>} : vector<2x16xf32>, vector<16x32xf32>, vector<2x32xf32> -> vector<2x32xf32>
    %750 = arith.addf %748, %749 : vector<2x32xf32>
    %c0_773 = arith.constant 0 : index
    %c0_774 = arith.constant 0 : index
    %c20 = arith.constant 20 : index
    %c0_775 = arith.constant 0 : index
    %751 = vector.load %arg4[%c0_773, %c0_774, %c20, %c0_775] : memref<1x2x32x32xf32, #tpu.memory_space<vmem>>, vector<1x2x1x32xf32>
    %752 = vector.shape_cast %751 : vector<1x2x1x32xf32> to vector<2x32xf32>
    %753 = vector.shape_cast %750 : vector<2x32xf32> to vector<1x2x1x32xf32>
    tpu.vector_store %arg4[%c0_773, %c0_774, %c20, %c0_775], %753 {strides = array<i32>} : memref<1x2x32x32xf32, #tpu.memory_space<vmem>>, vector<1x2x1x32xf32>,
    %754 = vector.extract_strided_slice %745 {offsets = [4, 0], sizes = [2, 16], strides = [1, 1]} : vector<8x16xf32> to vector<2x16xf32>
    %755 = vector.extract_strided_slice %745 {offsets = [6, 0], sizes = [2, 16], strides = [1, 1]} : vector<8x16xf32> to vector<2x16xf32>
    %cst_776 = arith.constant dense<0.000000e+00> : vector<2x32xf32>
    %756 = tpu.matmul %754, %6, %cst_776 {dimension_numbers = #tpu.dot_dimension_numbers<[1], [0], [0], [1], [0, 0, 1, 1], [], []>} : vector<2x16xf32>, vector<16x32xf32>, vector<2x32xf32> -> vector<2x32xf32>
    %cst_777 = arith.constant dense<0.000000e+00> : vector<2x32xf32>
    %757 = tpu.matmul %755, %13, %cst_777 {dimension_numbers = #tpu.dot_dimension_numbers<[1], [0], [0], [1], [0, 0, 1, 1], [], []>} : vector<2x16xf32>, vector<16x32xf32>, vector<2x32xf32> -> vector<2x32xf32>
    %758 = arith.addf %756, %757 : vector<2x32xf32>
    %c0_778 = arith.constant 0 : index
    %c0_779 = arith.constant 0 : index
    %c21 = arith.constant 21 : index
    %c0_780 = arith.constant 0 : index
    %759 = vector.load %arg4[%c0_778, %c0_779, %c21, %c0_780] : memref<1x2x32x32xf32, #tpu.memory_space<vmem>>, vector<1x2x1x32xf32>
    %760 = vector.shape_cast %759 : vector<1x2x1x32xf32> to vector<2x32xf32>
    %761 = vector.shape_cast %758 : vector<2x32xf32> to vector<1x2x1x32xf32>
    tpu.vector_store %arg4[%c0_778, %c0_779, %c21, %c0_780], %761 {strides = array<i32>} : memref<1x2x32x32xf32, #tpu.memory_space<vmem>>, vector<1x2x1x32xf32>,
    %cst_781 = arith.constant 0.000000e+00 : f32
    %762 = vector.broadcast %cst_781 : f32 to vector<8x16xf32>
    %c0_782 = arith.constant 0 : index
    %c0_783 = arith.constant 0 : index
    %c11_784 = arith.constant 11 : index
    %c0_785 = arith.constant 0 : index
    %c0_786 = arith.constant 0 : index
    %763 = vector.load %arg2[%c0_782, %c0_783, %c11_784, %c0_785, %c0_786] : memref<1x1x18x4x18xbf16, #tpu.memory_space<vmem>>, vector<1x1x1x4x18xbf16>
    %764 = vector.shape_cast %763 : vector<1x1x1x4x18xbf16> to vector<4x18xbf16>
    %765 = vector.extract_strided_slice %764 {offsets = [0, 0], sizes = [4, 16], strides = [1, 1]} : vector<4x18xbf16> to vector<4x16xbf16>
    %c0_787 = arith.constant 0 : index
    %c0_788 = arith.constant 0 : index
    %c0_789 = arith.constant 0 : index
    %c0_790 = arith.constant 0 : index
    %766 = vector.load %arg3[%c0_787, %c0_788, %c0_789, %c0_790] : memref<3x3x8x4xbf16, #tpu.memory_space<vmem>>, vector<1x1x8x4xbf16>
    %767 = vector.shape_cast %766 : vector<1x1x8x4xbf16> to vector<8x4xbf16>
    %cst_791 = arith.constant dense<0.000000e+00> : vector<8x16xf32>
    %768 = tpu.matmul %767, %765, %cst_791 {dimension_numbers = #tpu.dot_dimension_numbers<[1], [0], [0], [1], [0, 0, 1, 1], [], []>} : vector<8x4xbf16>, vector<4x16xbf16>, vector<8x16xf32> -> vector<8x16xf32>
    %769 = arith.addf %762, %768 : vector<8x16xf32>
    %770 = vector.extract_strided_slice %764 {offsets = [0, 1], sizes = [4, 16], strides = [1, 1]} : vector<4x18xbf16> to vector<4x16xbf16>
    %c0_792 = arith.constant 0 : index
    %c1_793 = arith.constant 1 : index
    %c0_794 = arith.constant 0 : index
    %c0_795 = arith.constant 0 : index
    %771 = vector.load %arg3[%c0_792, %c1_793, %c0_794, %c0_795] : memref<3x3x8x4xbf16, #tpu.memory_space<vmem>>, vector<1x1x8x4xbf16>
    %772 = vector.shape_cast %771 : vector<1x1x8x4xbf16> to vector<8x4xbf16>
    %cst_796 = arith.constant dense<0.000000e+00> : vector<8x16xf32>
    %773 = tpu.matmul %772, %770, %cst_796 {dimension_numbers = #tpu.dot_dimension_numbers<[1], [0], [0], [1], [0, 0, 1, 1], [], []>} : vector<8x4xbf16>, vector<4x16xbf16>, vector<8x16xf32> -> vector<8x16xf32>
    %774 = arith.addf %769, %773 : vector<8x16xf32>
    %775 = vector.extract_strided_slice %764 {offsets = [0, 2], sizes = [4, 16], strides = [1, 1]} : vector<4x18xbf16> to vector<4x16xbf16>
    %c0_797 = arith.constant 0 : index
    %c2_798 = arith.constant 2 : index
    %c0_799 = arith.constant 0 : index
    %c0_800 = arith.constant 0 : index
    %776 = vector.load %arg3[%c0_797, %c2_798, %c0_799, %c0_800] : memref<3x3x8x4xbf16, #tpu.memory_space<vmem>>, vector<1x1x8x4xbf16>
    %777 = vector.shape_cast %776 : vector<1x1x8x4xbf16> to vector<8x4xbf16>
    %cst_801 = arith.constant dense<0.000000e+00> : vector<8x16xf32>
    %778 = tpu.matmul %777, %775, %cst_801 {dimension_numbers = #tpu.dot_dimension_numbers<[1], [0], [0], [1], [0, 0, 1, 1], [], []>} : vector<8x4xbf16>, vector<4x16xbf16>, vector<8x16xf32> -> vector<8x16xf32>
    %779 = arith.addf %774, %778 : vector<8x16xf32>
    %c0_802 = arith.constant 0 : index
    %c0_803 = arith.constant 0 : index
    %c12_804 = arith.constant 12 : index
    %c0_805 = arith.constant 0 : index
    %c0_806 = arith.constant 0 : index
    %780 = vector.load %arg2[%c0_802, %c0_803, %c12_804, %c0_805, %c0_806] : memref<1x1x18x4x18xbf16, #tpu.memory_space<vmem>>, vector<1x1x1x4x18xbf16>
    %781 = vector.shape_cast %780 : vector<1x1x1x4x18xbf16> to vector<4x18xbf16>
    %782 = vector.extract_strided_slice %781 {offsets = [0, 0], sizes = [4, 16], strides = [1, 1]} : vector<4x18xbf16> to vector<4x16xbf16>
    %c1_807 = arith.constant 1 : index
    %c0_808 = arith.constant 0 : index
    %c0_809 = arith.constant 0 : index
    %c0_810 = arith.constant 0 : index
    %783 = vector.load %arg3[%c1_807, %c0_808, %c0_809, %c0_810] : memref<3x3x8x4xbf16, #tpu.memory_space<vmem>>, vector<1x1x8x4xbf16>
    %784 = vector.shape_cast %783 : vector<1x1x8x4xbf16> to vector<8x4xbf16>
    %cst_811 = arith.constant dense<0.000000e+00> : vector<8x16xf32>
    %785 = tpu.matmul %784, %782, %cst_811 {dimension_numbers = #tpu.dot_dimension_numbers<[1], [0], [0], [1], [0, 0, 1, 1], [], []>} : vector<8x4xbf16>, vector<4x16xbf16>, vector<8x16xf32> -> vector<8x16xf32>
    %786 = arith.addf %779, %785 : vector<8x16xf32>
    %787 = vector.extract_strided_slice %781 {offsets = [0, 1], sizes = [4, 16], strides = [1, 1]} : vector<4x18xbf16> to vector<4x16xbf16>
    %c1_812 = arith.constant 1 : index
    %c1_813 = arith.constant 1 : index
    %c0_814 = arith.constant 0 : index
    %c0_815 = arith.constant 0 : index
    %788 = vector.load %arg3[%c1_812, %c1_813, %c0_814, %c0_815] : memref<3x3x8x4xbf16, #tpu.memory_space<vmem>>, vector<1x1x8x4xbf16>
    %789 = vector.shape_cast %788 : vector<1x1x8x4xbf16> to vector<8x4xbf16>
    %cst_816 = arith.constant dense<0.000000e+00> : vector<8x16xf32>
    %790 = tpu.matmul %789, %787, %cst_816 {dimension_numbers = #tpu.dot_dimension_numbers<[1], [0], [0], [1], [0, 0, 1, 1], [], []>} : vector<8x4xbf16>, vector<4x16xbf16>, vector<8x16xf32> -> vector<8x16xf32>
    %791 = arith.addf %786, %790 : vector<8x16xf32>
    %792 = vector.extract_strided_slice %781 {offsets = [0, 2], sizes = [4, 16], strides = [1, 1]} : vector<4x18xbf16> to vector<4x16xbf16>
    %c1_817 = arith.constant 1 : index
    %c2_818 = arith.constant 2 : index
    %c0_819 = arith.constant 0 : index
    %c0_820 = arith.constant 0 : index
    %793 = vector.load %arg3[%c1_817, %c2_818, %c0_819, %c0_820] : memref<3x3x8x4xbf16, #tpu.memory_space<vmem>>, vector<1x1x8x4xbf16>
    %794 = vector.shape_cast %793 : vector<1x1x8x4xbf16> to vector<8x4xbf16>
    %cst_821 = arith.constant dense<0.000000e+00> : vector<8x16xf32>
    %795 = tpu.matmul %794, %792, %cst_821 {dimension_numbers = #tpu.dot_dimension_numbers<[1], [0], [0], [1], [0, 0, 1, 1], [], []>} : vector<8x4xbf16>, vector<4x16xbf16>, vector<8x16xf32> -> vector<8x16xf32>
    %796 = arith.addf %791, %795 : vector<8x16xf32>
    %c0_822 = arith.constant 0 : index
    %c0_823 = arith.constant 0 : index
    %c13_824 = arith.constant 13 : index
    %c0_825 = arith.constant 0 : index
    %c0_826 = arith.constant 0 : index
    %797 = vector.load %arg2[%c0_822, %c0_823, %c13_824, %c0_825, %c0_826] : memref<1x1x18x4x18xbf16, #tpu.memory_space<vmem>>, vector<1x1x1x4x18xbf16>
    %798 = vector.shape_cast %797 : vector<1x1x1x4x18xbf16> to vector<4x18xbf16>
    %799 = vector.extract_strided_slice %798 {offsets = [0, 0], sizes = [4, 16], strides = [1, 1]} : vector<4x18xbf16> to vector<4x16xbf16>
    %c2_827 = arith.constant 2 : index
    %c0_828 = arith.constant 0 : index
    %c0_829 = arith.constant 0 : index
    %c0_830 = arith.constant 0 : index
    %800 = vector.load %arg3[%c2_827, %c0_828, %c0_829, %c0_830] : memref<3x3x8x4xbf16, #tpu.memory_space<vmem>>, vector<1x1x8x4xbf16>
    %801 = vector.shape_cast %800 : vector<1x1x8x4xbf16> to vector<8x4xbf16>
    %cst_831 = arith.constant dense<0.000000e+00> : vector<8x16xf32>
    %802 = tpu.matmul %801, %799, %cst_831 {dimension_numbers = #tpu.dot_dimension_numbers<[1], [0], [0], [1], [0, 0, 1, 1], [], []>} : vector<8x4xbf16>, vector<4x16xbf16>, vector<8x16xf32> -> vector<8x16xf32>
    %803 = arith.addf %796, %802 : vector<8x16xf32>
    %804 = vector.extract_strided_slice %798 {offsets = [0, 1], sizes = [4, 16], strides = [1, 1]} : vector<4x18xbf16> to vector<4x16xbf16>
    %c2_832 = arith.constant 2 : index
    %c1_833 = arith.constant 1 : index
    %c0_834 = arith.constant 0 : index
    %c0_835 = arith.constant 0 : index
    %805 = vector.load %arg3[%c2_832, %c1_833, %c0_834, %c0_835] : memref<3x3x8x4xbf16, #tpu.memory_space<vmem>>, vector<1x1x8x4xbf16>
    %806 = vector.shape_cast %805 : vector<1x1x8x4xbf16> to vector<8x4xbf16>
    %cst_836 = arith.constant dense<0.000000e+00> : vector<8x16xf32>
    %807 = tpu.matmul %806, %804, %cst_836 {dimension_numbers = #tpu.dot_dimension_numbers<[1], [0], [0], [1], [0, 0, 1, 1], [], []>} : vector<8x4xbf16>, vector<4x16xbf16>, vector<8x16xf32> -> vector<8x16xf32>
    %808 = arith.addf %803, %807 : vector<8x16xf32>
    %809 = vector.extract_strided_slice %798 {offsets = [0, 2], sizes = [4, 16], strides = [1, 1]} : vector<4x18xbf16> to vector<4x16xbf16>
    %c2_837 = arith.constant 2 : index
    %c2_838 = arith.constant 2 : index
    %c0_839 = arith.constant 0 : index
    %c0_840 = arith.constant 0 : index
    %810 = vector.load %arg3[%c2_837, %c2_838, %c0_839, %c0_840] : memref<3x3x8x4xbf16, #tpu.memory_space<vmem>>, vector<1x1x8x4xbf16>
    %811 = vector.shape_cast %810 : vector<1x1x8x4xbf16> to vector<8x4xbf16>
    %cst_841 = arith.constant dense<0.000000e+00> : vector<8x16xf32>
    %812 = tpu.matmul %811, %809, %cst_841 {dimension_numbers = #tpu.dot_dimension_numbers<[1], [0], [0], [1], [0, 0, 1, 1], [], []>} : vector<8x4xbf16>, vector<4x16xbf16>, vector<8x16xf32> -> vector<8x16xf32>
    %813 = arith.addf %808, %812 : vector<8x16xf32>
    %814 = vector.extract_strided_slice %813 {offsets = [0, 0], sizes = [2, 16], strides = [1, 1]} : vector<8x16xf32> to vector<2x16xf32>
    %815 = vector.extract_strided_slice %813 {offsets = [2, 0], sizes = [2, 16], strides = [1, 1]} : vector<8x16xf32> to vector<2x16xf32>
    %cst_842 = arith.constant dense<0.000000e+00> : vector<2x32xf32>
    %816 = tpu.matmul %814, %6, %cst_842 {dimension_numbers = #tpu.dot_dimension_numbers<[1], [0], [0], [1], [0, 0, 1, 1], [], []>} : vector<2x16xf32>, vector<16x32xf32>, vector<2x32xf32> -> vector<2x32xf32>
    %cst_843 = arith.constant dense<0.000000e+00> : vector<2x32xf32>
    %817 = tpu.matmul %815, %13, %cst_843 {dimension_numbers = #tpu.dot_dimension_numbers<[1], [0], [0], [1], [0, 0, 1, 1], [], []>} : vector<2x16xf32>, vector<16x32xf32>, vector<2x32xf32> -> vector<2x32xf32>
    %818 = arith.addf %816, %817 : vector<2x32xf32>
    %c0_844 = arith.constant 0 : index
    %c0_845 = arith.constant 0 : index
    %c22 = arith.constant 22 : index
    %c0_846 = arith.constant 0 : index
    %819 = vector.load %arg4[%c0_844, %c0_845, %c22, %c0_846] : memref<1x2x32x32xf32, #tpu.memory_space<vmem>>, vector<1x2x1x32xf32>
    %820 = vector.shape_cast %819 : vector<1x2x1x32xf32> to vector<2x32xf32>
    %821 = vector.shape_cast %818 : vector<2x32xf32> to vector<1x2x1x32xf32>
    tpu.vector_store %arg4[%c0_844, %c0_845, %c22, %c0_846], %821 {strides = array<i32>} : memref<1x2x32x32xf32, #tpu.memory_space<vmem>>, vector<1x2x1x32xf32>,
    %822 = vector.extract_strided_slice %813 {offsets = [4, 0], sizes = [2, 16], strides = [1, 1]} : vector<8x16xf32> to vector<2x16xf32>
    %823 = vector.extract_strided_slice %813 {offsets = [6, 0], sizes = [2, 16], strides = [1, 1]} : vector<8x16xf32> to vector<2x16xf32>
    %cst_847 = arith.constant dense<0.000000e+00> : vector<2x32xf32>
    %824 = tpu.matmul %822, %6, %cst_847 {dimension_numbers = #tpu.dot_dimension_numbers<[1], [0], [0], [1], [0, 0, 1, 1], [], []>} : vector<2x16xf32>, vector<16x32xf32>, vector<2x32xf32> -> vector<2x32xf32>
    %cst_848 = arith.constant dense<0.000000e+00> : vector<2x32xf32>
    %825 = tpu.matmul %823, %13, %cst_848 {dimension_numbers = #tpu.dot_dimension_numbers<[1], [0], [0], [1], [0, 0, 1, 1], [], []>} : vector<2x16xf32>, vector<16x32xf32>, vector<2x32xf32> -> vector<2x32xf32>
    %826 = arith.addf %824, %825 : vector<2x32xf32>
    %c0_849 = arith.constant 0 : index
    %c0_850 = arith.constant 0 : index
    %c23 = arith.constant 23 : index
    %c0_851 = arith.constant 0 : index
    %827 = vector.load %arg4[%c0_849, %c0_850, %c23, %c0_851] : memref<1x2x32x32xf32, #tpu.memory_space<vmem>>, vector<1x2x1x32xf32>
    %828 = vector.shape_cast %827 : vector<1x2x1x32xf32> to vector<2x32xf32>
    %829 = vector.shape_cast %826 : vector<2x32xf32> to vector<1x2x1x32xf32>
    tpu.vector_store %arg4[%c0_849, %c0_850, %c23, %c0_851], %829 {strides = array<i32>} : memref<1x2x32x32xf32, #tpu.memory_space<vmem>>, vector<1x2x1x32xf32>,
    %cst_852 = arith.constant 0.000000e+00 : f32
    %830 = vector.broadcast %cst_852 : f32 to vector<8x16xf32>
    %c0_853 = arith.constant 0 : index
    %c0_854 = arith.constant 0 : index
    %c12_855 = arith.constant 12 : index
    %c0_856 = arith.constant 0 : index
    %c0_857 = arith.constant 0 : index
    %831 = vector.load %arg2[%c0_853, %c0_854, %c12_855, %c0_856, %c0_857] : memref<1x1x18x4x18xbf16, #tpu.memory_space<vmem>>, vector<1x1x1x4x18xbf16>
    %832 = vector.shape_cast %831 : vector<1x1x1x4x18xbf16> to vector<4x18xbf16>
    %833 = vector.extract_strided_slice %832 {offsets = [0, 0], sizes = [4, 16], strides = [1, 1]} : vector<4x18xbf16> to vector<4x16xbf16>
    %c0_858 = arith.constant 0 : index
    %c0_859 = arith.constant 0 : index
    %c0_860 = arith.constant 0 : index
    %c0_861 = arith.constant 0 : index
    %834 = vector.load %arg3[%c0_858, %c0_859, %c0_860, %c0_861] : memref<3x3x8x4xbf16, #tpu.memory_space<vmem>>, vector<1x1x8x4xbf16>
    %835 = vector.shape_cast %834 : vector<1x1x8x4xbf16> to vector<8x4xbf16>
    %cst_862 = arith.constant dense<0.000000e+00> : vector<8x16xf32>
    %836 = tpu.matmul %835, %833, %cst_862 {dimension_numbers = #tpu.dot_dimension_numbers<[1], [0], [0], [1], [0, 0, 1, 1], [], []>} : vector<8x4xbf16>, vector<4x16xbf16>, vector<8x16xf32> -> vector<8x16xf32>
    %837 = arith.addf %830, %836 : vector<8x16xf32>
    %838 = vector.extract_strided_slice %832 {offsets = [0, 1], sizes = [4, 16], strides = [1, 1]} : vector<4x18xbf16> to vector<4x16xbf16>
    %c0_863 = arith.constant 0 : index
    %c1_864 = arith.constant 1 : index
    %c0_865 = arith.constant 0 : index
    %c0_866 = arith.constant 0 : index
    %839 = vector.load %arg3[%c0_863, %c1_864, %c0_865, %c0_866] : memref<3x3x8x4xbf16, #tpu.memory_space<vmem>>, vector<1x1x8x4xbf16>
    %840 = vector.shape_cast %839 : vector<1x1x8x4xbf16> to vector<8x4xbf16>
    %cst_867 = arith.constant dense<0.000000e+00> : vector<8x16xf32>
    %841 = tpu.matmul %840, %838, %cst_867 {dimension_numbers = #tpu.dot_dimension_numbers<[1], [0], [0], [1], [0, 0, 1, 1], [], []>} : vector<8x4xbf16>, vector<4x16xbf16>, vector<8x16xf32> -> vector<8x16xf32>
    %842 = arith.addf %837, %841 : vector<8x16xf32>
    %843 = vector.extract_strided_slice %832 {offsets = [0, 2], sizes = [4, 16], strides = [1, 1]} : vector<4x18xbf16> to vector<4x16xbf16>
    %c0_868 = arith.constant 0 : index
    %c2_869 = arith.constant 2 : index
    %c0_870 = arith.constant 0 : index
    %c0_871 = arith.constant 0 : index
    %844 = vector.load %arg3[%c0_868, %c2_869, %c0_870, %c0_871] : memref<3x3x8x4xbf16, #tpu.memory_space<vmem>>, vector<1x1x8x4xbf16>
    %845 = vector.shape_cast %844 : vector<1x1x8x4xbf16> to vector<8x4xbf16>
    %cst_872 = arith.constant dense<0.000000e+00> : vector<8x16xf32>
    %846 = tpu.matmul %845, %843, %cst_872 {dimension_numbers = #tpu.dot_dimension_numbers<[1], [0], [0], [1], [0, 0, 1, 1], [], []>} : vector<8x4xbf16>, vector<4x16xbf16>, vector<8x16xf32> -> vector<8x16xf32>
    %847 = arith.addf %842, %846 : vector<8x16xf32>
    %c0_873 = arith.constant 0 : index
    %c0_874 = arith.constant 0 : index
    %c13_875 = arith.constant 13 : index
    %c0_876 = arith.constant 0 : index
    %c0_877 = arith.constant 0 : index
    %848 = vector.load %arg2[%c0_873, %c0_874, %c13_875, %c0_876, %c0_877] : memref<1x1x18x4x18xbf16, #tpu.memory_space<vmem>>, vector<1x1x1x4x18xbf16>
    %849 = vector.shape_cast %848 : vector<1x1x1x4x18xbf16> to vector<4x18xbf16>
    %850 = vector.extract_strided_slice %849 {offsets = [0, 0], sizes = [4, 16], strides = [1, 1]} : vector<4x18xbf16> to vector<4x16xbf16>
    %c1_878 = arith.constant 1 : index
    %c0_879 = arith.constant 0 : index
    %c0_880 = arith.constant 0 : index
    %c0_881 = arith.constant 0 : index
    %851 = vector.load %arg3[%c1_878, %c0_879, %c0_880, %c0_881] : memref<3x3x8x4xbf16, #tpu.memory_space<vmem>>, vector<1x1x8x4xbf16>
    %852 = vector.shape_cast %851 : vector<1x1x8x4xbf16> to vector<8x4xbf16>
    %cst_882 = arith.constant dense<0.000000e+00> : vector<8x16xf32>
    %853 = tpu.matmul %852, %850, %cst_882 {dimension_numbers = #tpu.dot_dimension_numbers<[1], [0], [0], [1], [0, 0, 1, 1], [], []>} : vector<8x4xbf16>, vector<4x16xbf16>, vector<8x16xf32> -> vector<8x16xf32>
    %854 = arith.addf %847, %853 : vector<8x16xf32>
    %855 = vector.extract_strided_slice %849 {offsets = [0, 1], sizes = [4, 16], strides = [1, 1]} : vector<4x18xbf16> to vector<4x16xbf16>
    %c1_883 = arith.constant 1 : index
    %c1_884 = arith.constant 1 : index
    %c0_885 = arith.constant 0 : index
    %c0_886 = arith.constant 0 : index
    %856 = vector.load %arg3[%c1_883, %c1_884, %c0_885, %c0_886] : memref<3x3x8x4xbf16, #tpu.memory_space<vmem>>, vector<1x1x8x4xbf16>
    %857 = vector.shape_cast %856 : vector<1x1x8x4xbf16> to vector<8x4xbf16>
    %cst_887 = arith.constant dense<0.000000e+00> : vector<8x16xf32>
    %858 = tpu.matmul %857, %855, %cst_887 {dimension_numbers = #tpu.dot_dimension_numbers<[1], [0], [0], [1], [0, 0, 1, 1], [], []>} : vector<8x4xbf16>, vector<4x16xbf16>, vector<8x16xf32> -> vector<8x16xf32>
    %859 = arith.addf %854, %858 : vector<8x16xf32>
    %860 = vector.extract_strided_slice %849 {offsets = [0, 2], sizes = [4, 16], strides = [1, 1]} : vector<4x18xbf16> to vector<4x16xbf16>
    %c1_888 = arith.constant 1 : index
    %c2_889 = arith.constant 2 : index
    %c0_890 = arith.constant 0 : index
    %c0_891 = arith.constant 0 : index
    %861 = vector.load %arg3[%c1_888, %c2_889, %c0_890, %c0_891] : memref<3x3x8x4xbf16, #tpu.memory_space<vmem>>, vector<1x1x8x4xbf16>
    %862 = vector.shape_cast %861 : vector<1x1x8x4xbf16> to vector<8x4xbf16>
    %cst_892 = arith.constant dense<0.000000e+00> : vector<8x16xf32>
    %863 = tpu.matmul %862, %860, %cst_892 {dimension_numbers = #tpu.dot_dimension_numbers<[1], [0], [0], [1], [0, 0, 1, 1], [], []>} : vector<8x4xbf16>, vector<4x16xbf16>, vector<8x16xf32> -> vector<8x16xf32>
    %864 = arith.addf %859, %863 : vector<8x16xf32>
    %c0_893 = arith.constant 0 : index
    %c0_894 = arith.constant 0 : index
    %c14_895 = arith.constant 14 : index
    %c0_896 = arith.constant 0 : index
    %c0_897 = arith.constant 0 : index
    %865 = vector.load %arg2[%c0_893, %c0_894, %c14_895, %c0_896, %c0_897] : memref<1x1x18x4x18xbf16, #tpu.memory_space<vmem>>, vector<1x1x1x4x18xbf16>
    %866 = vector.shape_cast %865 : vector<1x1x1x4x18xbf16> to vector<4x18xbf16>
    %867 = vector.extract_strided_slice %866 {offsets = [0, 0], sizes = [4, 16], strides = [1, 1]} : vector<4x18xbf16> to vector<4x16xbf16>
    %c2_898 = arith.constant 2 : index
    %c0_899 = arith.constant 0 : index
    %c0_900 = arith.constant 0 : index
    %c0_901 = arith.constant 0 : index
    %868 = vector.load %arg3[%c2_898, %c0_899, %c0_900, %c0_901] : memref<3x3x8x4xbf16, #tpu.memory_space<vmem>>, vector<1x1x8x4xbf16>
    %869 = vector.shape_cast %868 : vector<1x1x8x4xbf16> to vector<8x4xbf16>
    %cst_902 = arith.constant dense<0.000000e+00> : vector<8x16xf32>
    %870 = tpu.matmul %869, %867, %cst_902 {dimension_numbers = #tpu.dot_dimension_numbers<[1], [0], [0], [1], [0, 0, 1, 1], [], []>} : vector<8x4xbf16>, vector<4x16xbf16>, vector<8x16xf32> -> vector<8x16xf32>
    %871 = arith.addf %864, %870 : vector<8x16xf32>
    %872 = vector.extract_strided_slice %866 {offsets = [0, 1], sizes = [4, 16], strides = [1, 1]} : vector<4x18xbf16> to vector<4x16xbf16>
    %c2_903 = arith.constant 2 : index
    %c1_904 = arith.constant 1 : index
    %c0_905 = arith.constant 0 : index
    %c0_906 = arith.constant 0 : index
    %873 = vector.load %arg3[%c2_903, %c1_904, %c0_905, %c0_906] : memref<3x3x8x4xbf16, #tpu.memory_space<vmem>>, vector<1x1x8x4xbf16>
    %874 = vector.shape_cast %873 : vector<1x1x8x4xbf16> to vector<8x4xbf16>
    %cst_907 = arith.constant dense<0.000000e+00> : vector<8x16xf32>
    %875 = tpu.matmul %874, %872, %cst_907 {dimension_numbers = #tpu.dot_dimension_numbers<[1], [0], [0], [1], [0, 0, 1, 1], [], []>} : vector<8x4xbf16>, vector<4x16xbf16>, vector<8x16xf32> -> vector<8x16xf32>
    %876 = arith.addf %871, %875 : vector<8x16xf32>
    %877 = vector.extract_strided_slice %866 {offsets = [0, 2], sizes = [4, 16], strides = [1, 1]} : vector<4x18xbf16> to vector<4x16xbf16>
    %c2_908 = arith.constant 2 : index
    %c2_909 = arith.constant 2 : index
    %c0_910 = arith.constant 0 : index
    %c0_911 = arith.constant 0 : index
    %878 = vector.load %arg3[%c2_908, %c2_909, %c0_910, %c0_911] : memref<3x3x8x4xbf16, #tpu.memory_space<vmem>>, vector<1x1x8x4xbf16>
    %879 = vector.shape_cast %878 : vector<1x1x8x4xbf16> to vector<8x4xbf16>
    %cst_912 = arith.constant dense<0.000000e+00> : vector<8x16xf32>
    %880 = tpu.matmul %879, %877, %cst_912 {dimension_numbers = #tpu.dot_dimension_numbers<[1], [0], [0], [1], [0, 0, 1, 1], [], []>} : vector<8x4xbf16>, vector<4x16xbf16>, vector<8x16xf32> -> vector<8x16xf32>
    %881 = arith.addf %876, %880 : vector<8x16xf32>
    %882 = vector.extract_strided_slice %881 {offsets = [0, 0], sizes = [2, 16], strides = [1, 1]} : vector<8x16xf32> to vector<2x16xf32>
    %883 = vector.extract_strided_slice %881 {offsets = [2, 0], sizes = [2, 16], strides = [1, 1]} : vector<8x16xf32> to vector<2x16xf32>
    %cst_913 = arith.constant dense<0.000000e+00> : vector<2x32xf32>
    %884 = tpu.matmul %882, %6, %cst_913 {dimension_numbers = #tpu.dot_dimension_numbers<[1], [0], [0], [1], [0, 0, 1, 1], [], []>} : vector<2x16xf32>, vector<16x32xf32>, vector<2x32xf32> -> vector<2x32xf32>
    %cst_914 = arith.constant dense<0.000000e+00> : vector<2x32xf32>
    %885 = tpu.matmul %883, %13, %cst_914 {dimension_numbers = #tpu.dot_dimension_numbers<[1], [0], [0], [1], [0, 0, 1, 1], [], []>} : vector<2x16xf32>, vector<16x32xf32>, vector<2x32xf32> -> vector<2x32xf32>
    %886 = arith.addf %884, %885 : vector<2x32xf32>
    %c0_915 = arith.constant 0 : index
    %c0_916 = arith.constant 0 : index
    %c24 = arith.constant 24 : index
    %c0_917 = arith.constant 0 : index
    %887 = vector.load %arg4[%c0_915, %c0_916, %c24, %c0_917] : memref<1x2x32x32xf32, #tpu.memory_space<vmem>>, vector<1x2x1x32xf32>
    %888 = vector.shape_cast %887 : vector<1x2x1x32xf32> to vector<2x32xf32>
    %889 = vector.shape_cast %886 : vector<2x32xf32> to vector<1x2x1x32xf32>
    tpu.vector_store %arg4[%c0_915, %c0_916, %c24, %c0_917], %889 {strides = array<i32>} : memref<1x2x32x32xf32, #tpu.memory_space<vmem>>, vector<1x2x1x32xf32>,
    %890 = vector.extract_strided_slice %881 {offsets = [4, 0], sizes = [2, 16], strides = [1, 1]} : vector<8x16xf32> to vector<2x16xf32>
    %891 = vector.extract_strided_slice %881 {offsets = [6, 0], sizes = [2, 16], strides = [1, 1]} : vector<8x16xf32> to vector<2x16xf32>
    %cst_918 = arith.constant dense<0.000000e+00> : vector<2x32xf32>
    %892 = tpu.matmul %890, %6, %cst_918 {dimension_numbers = #tpu.dot_dimension_numbers<[1], [0], [0], [1], [0, 0, 1, 1], [], []>} : vector<2x16xf32>, vector<16x32xf32>, vector<2x32xf32> -> vector<2x32xf32>
    %cst_919 = arith.constant dense<0.000000e+00> : vector<2x32xf32>
    %893 = tpu.matmul %891, %13, %cst_919 {dimension_numbers = #tpu.dot_dimension_numbers<[1], [0], [0], [1], [0, 0, 1, 1], [], []>} : vector<2x16xf32>, vector<16x32xf32>, vector<2x32xf32> -> vector<2x32xf32>
    %894 = arith.addf %892, %893 : vector<2x32xf32>
    %c0_920 = arith.constant 0 : index
    %c0_921 = arith.constant 0 : index
    %c25 = arith.constant 25 : index
    %c0_922 = arith.constant 0 : index
    %895 = vector.load %arg4[%c0_920, %c0_921, %c25, %c0_922] : memref<1x2x32x32xf32, #tpu.memory_space<vmem>>, vector<1x2x1x32xf32>
    %896 = vector.shape_cast %895 : vector<1x2x1x32xf32> to vector<2x32xf32>
    %897 = vector.shape_cast %894 : vector<2x32xf32> to vector<1x2x1x32xf32>
    tpu.vector_store %arg4[%c0_920, %c0_921, %c25, %c0_922], %897 {strides = array<i32>} : memref<1x2x32x32xf32, #tpu.memory_space<vmem>>, vector<1x2x1x32xf32>,
    %cst_923 = arith.constant 0.000000e+00 : f32
    %898 = vector.broadcast %cst_923 : f32 to vector<8x16xf32>
    %c0_924 = arith.constant 0 : index
    %c0_925 = arith.constant 0 : index
    %c13_926 = arith.constant 13 : index
    %c0_927 = arith.constant 0 : index
    %c0_928 = arith.constant 0 : index
    %899 = vector.load %arg2[%c0_924, %c0_925, %c13_926, %c0_927, %c0_928] : memref<1x1x18x4x18xbf16, #tpu.memory_space<vmem>>, vector<1x1x1x4x18xbf16>
    %900 = vector.shape_cast %899 : vector<1x1x1x4x18xbf16> to vector<4x18xbf16>
    %901 = vector.extract_strided_slice %900 {offsets = [0, 0], sizes = [4, 16], strides = [1, 1]} : vector<4x18xbf16> to vector<4x16xbf16>
    %c0_929 = arith.constant 0 : index
    %c0_930 = arith.constant 0 : index
    %c0_931 = arith.constant 0 : index
    %c0_932 = arith.constant 0 : index
    %902 = vector.load %arg3[%c0_929, %c0_930, %c0_931, %c0_932] : memref<3x3x8x4xbf16, #tpu.memory_space<vmem>>, vector<1x1x8x4xbf16>
    %903 = vector.shape_cast %902 : vector<1x1x8x4xbf16> to vector<8x4xbf16>
    %cst_933 = arith.constant dense<0.000000e+00> : vector<8x16xf32>
    %904 = tpu.matmul %903, %901, %cst_933 {dimension_numbers = #tpu.dot_dimension_numbers<[1], [0], [0], [1], [0, 0, 1, 1], [], []>} : vector<8x4xbf16>, vector<4x16xbf16>, vector<8x16xf32> -> vector<8x16xf32>
    %905 = arith.addf %898, %904 : vector<8x16xf32>
    %906 = vector.extract_strided_slice %900 {offsets = [0, 1], sizes = [4, 16], strides = [1, 1]} : vector<4x18xbf16> to vector<4x16xbf16>
    %c0_934 = arith.constant 0 : index
    %c1_935 = arith.constant 1 : index
    %c0_936 = arith.constant 0 : index
    %c0_937 = arith.constant 0 : index
    %907 = vector.load %arg3[%c0_934, %c1_935, %c0_936, %c0_937] : memref<3x3x8x4xbf16, #tpu.memory_space<vmem>>, vector<1x1x8x4xbf16>
    %908 = vector.shape_cast %907 : vector<1x1x8x4xbf16> to vector<8x4xbf16>
    %cst_938 = arith.constant dense<0.000000e+00> : vector<8x16xf32>
    %909 = tpu.matmul %908, %906, %cst_938 {dimension_numbers = #tpu.dot_dimension_numbers<[1], [0], [0], [1], [0, 0, 1, 1], [], []>} : vector<8x4xbf16>, vector<4x16xbf16>, vector<8x16xf32> -> vector<8x16xf32>
    %910 = arith.addf %905, %909 : vector<8x16xf32>
    %911 = vector.extract_strided_slice %900 {offsets = [0, 2], sizes = [4, 16], strides = [1, 1]} : vector<4x18xbf16> to vector<4x16xbf16>
    %c0_939 = arith.constant 0 : index
    %c2_940 = arith.constant 2 : index
    %c0_941 = arith.constant 0 : index
    %c0_942 = arith.constant 0 : index
    %912 = vector.load %arg3[%c0_939, %c2_940, %c0_941, %c0_942] : memref<3x3x8x4xbf16, #tpu.memory_space<vmem>>, vector<1x1x8x4xbf16>
    %913 = vector.shape_cast %912 : vector<1x1x8x4xbf16> to vector<8x4xbf16>
    %cst_943 = arith.constant dense<0.000000e+00> : vector<8x16xf32>
    %914 = tpu.matmul %913, %911, %cst_943 {dimension_numbers = #tpu.dot_dimension_numbers<[1], [0], [0], [1], [0, 0, 1, 1], [], []>} : vector<8x4xbf16>, vector<4x16xbf16>, vector<8x16xf32> -> vector<8x16xf32>
    %915 = arith.addf %910, %914 : vector<8x16xf32>
    %c0_944 = arith.constant 0 : index
    %c0_945 = arith.constant 0 : index
    %c14_946 = arith.constant 14 : index
    %c0_947 = arith.constant 0 : index
    %c0_948 = arith.constant 0 : index
    %916 = vector.load %arg2[%c0_944, %c0_945, %c14_946, %c0_947, %c0_948] : memref<1x1x18x4x18xbf16, #tpu.memory_space<vmem>>, vector<1x1x1x4x18xbf16>
    %917 = vector.shape_cast %916 : vector<1x1x1x4x18xbf16> to vector<4x18xbf16>
    %918 = vector.extract_strided_slice %917 {offsets = [0, 0], sizes = [4, 16], strides = [1, 1]} : vector<4x18xbf16> to vector<4x16xbf16>
    %c1_949 = arith.constant 1 : index
    %c0_950 = arith.constant 0 : index
    %c0_951 = arith.constant 0 : index
    %c0_952 = arith.constant 0 : index
    %919 = vector.load %arg3[%c1_949, %c0_950, %c0_951, %c0_952] : memref<3x3x8x4xbf16, #tpu.memory_space<vmem>>, vector<1x1x8x4xbf16>
    %920 = vector.shape_cast %919 : vector<1x1x8x4xbf16> to vector<8x4xbf16>
    %cst_953 = arith.constant dense<0.000000e+00> : vector<8x16xf32>
    %921 = tpu.matmul %920, %918, %cst_953 {dimension_numbers = #tpu.dot_dimension_numbers<[1], [0], [0], [1], [0, 0, 1, 1], [], []>} : vector<8x4xbf16>, vector<4x16xbf16>, vector<8x16xf32> -> vector<8x16xf32>
    %922 = arith.addf %915, %921 : vector<8x16xf32>
    %923 = vector.extract_strided_slice %917 {offsets = [0, 1], sizes = [4, 16], strides = [1, 1]} : vector<4x18xbf16> to vector<4x16xbf16>
    %c1_954 = arith.constant 1 : index
    %c1_955 = arith.constant 1 : index
    %c0_956 = arith.constant 0 : index
    %c0_957 = arith.constant 0 : index
    %924 = vector.load %arg3[%c1_954, %c1_955, %c0_956, %c0_957] : memref<3x3x8x4xbf16, #tpu.memory_space<vmem>>, vector<1x1x8x4xbf16>
    %925 = vector.shape_cast %924 : vector<1x1x8x4xbf16> to vector<8x4xbf16>
    %cst_958 = arith.constant dense<0.000000e+00> : vector<8x16xf32>
    %926 = tpu.matmul %925, %923, %cst_958 {dimension_numbers = #tpu.dot_dimension_numbers<[1], [0], [0], [1], [0, 0, 1, 1], [], []>} : vector<8x4xbf16>, vector<4x16xbf16>, vector<8x16xf32> -> vector<8x16xf32>
    %927 = arith.addf %922, %926 : vector<8x16xf32>
    %928 = vector.extract_strided_slice %917 {offsets = [0, 2], sizes = [4, 16], strides = [1, 1]} : vector<4x18xbf16> to vector<4x16xbf16>
    %c1_959 = arith.constant 1 : index
    %c2_960 = arith.constant 2 : index
    %c0_961 = arith.constant 0 : index
    %c0_962 = arith.constant 0 : index
    %929 = vector.load %arg3[%c1_959, %c2_960, %c0_961, %c0_962] : memref<3x3x8x4xbf16, #tpu.memory_space<vmem>>, vector<1x1x8x4xbf16>
    %930 = vector.shape_cast %929 : vector<1x1x8x4xbf16> to vector<8x4xbf16>
    %cst_963 = arith.constant dense<0.000000e+00> : vector<8x16xf32>
    %931 = tpu.matmul %930, %928, %cst_963 {dimension_numbers = #tpu.dot_dimension_numbers<[1], [0], [0], [1], [0, 0, 1, 1], [], []>} : vector<8x4xbf16>, vector<4x16xbf16>, vector<8x16xf32> -> vector<8x16xf32>
    %932 = arith.addf %927, %931 : vector<8x16xf32>
    %c0_964 = arith.constant 0 : index
    %c0_965 = arith.constant 0 : index
    %c15_966 = arith.constant 15 : index
    %c0_967 = arith.constant 0 : index
    %c0_968 = arith.constant 0 : index
    %933 = vector.load %arg2[%c0_964, %c0_965, %c15_966, %c0_967, %c0_968] : memref<1x1x18x4x18xbf16, #tpu.memory_space<vmem>>, vector<1x1x1x4x18xbf16>
    %934 = vector.shape_cast %933 : vector<1x1x1x4x18xbf16> to vector<4x18xbf16>
    %935 = vector.extract_strided_slice %934 {offsets = [0, 0], sizes = [4, 16], strides = [1, 1]} : vector<4x18xbf16> to vector<4x16xbf16>
    %c2_969 = arith.constant 2 : index
    %c0_970 = arith.constant 0 : index
    %c0_971 = arith.constant 0 : index
    %c0_972 = arith.constant 0 : index
    %936 = vector.load %arg3[%c2_969, %c0_970, %c0_971, %c0_972] : memref<3x3x8x4xbf16, #tpu.memory_space<vmem>>, vector<1x1x8x4xbf16>
    %937 = vector.shape_cast %936 : vector<1x1x8x4xbf16> to vector<8x4xbf16>
    %cst_973 = arith.constant dense<0.000000e+00> : vector<8x16xf32>
    %938 = tpu.matmul %937, %935, %cst_973 {dimension_numbers = #tpu.dot_dimension_numbers<[1], [0], [0], [1], [0, 0, 1, 1], [], []>} : vector<8x4xbf16>, vector<4x16xbf16>, vector<8x16xf32> -> vector<8x16xf32>
    %939 = arith.addf %932, %938 : vector<8x16xf32>
    %940 = vector.extract_strided_slice %934 {offsets = [0, 1], sizes = [4, 16], strides = [1, 1]} : vector<4x18xbf16> to vector<4x16xbf16>
    %c2_974 = arith.constant 2 : index
    %c1_975 = arith.constant 1 : index
    %c0_976 = arith.constant 0 : index
    %c0_977 = arith.constant 0 : index
    %941 = vector.load %arg3[%c2_974, %c1_975, %c0_976, %c0_977] : memref<3x3x8x4xbf16, #tpu.memory_space<vmem>>, vector<1x1x8x4xbf16>
    %942 = vector.shape_cast %941 : vector<1x1x8x4xbf16> to vector<8x4xbf16>
    %cst_978 = arith.constant dense<0.000000e+00> : vector<8x16xf32>
    %943 = tpu.matmul %942, %940, %cst_978 {dimension_numbers = #tpu.dot_dimension_numbers<[1], [0], [0], [1], [0, 0, 1, 1], [], []>} : vector<8x4xbf16>, vector<4x16xbf16>, vector<8x16xf32> -> vector<8x16xf32>
    %944 = arith.addf %939, %943 : vector<8x16xf32>
    %945 = vector.extract_strided_slice %934 {offsets = [0, 2], sizes = [4, 16], strides = [1, 1]} : vector<4x18xbf16> to vector<4x16xbf16>
    %c2_979 = arith.constant 2 : index
    %c2_980 = arith.constant 2 : index
    %c0_981 = arith.constant 0 : index
    %c0_982 = arith.constant 0 : index
    %946 = vector.load %arg3[%c2_979, %c2_980, %c0_981, %c0_982] : memref<3x3x8x4xbf16, #tpu.memory_space<vmem>>, vector<1x1x8x4xbf16>
    %947 = vector.shape_cast %946 : vector<1x1x8x4xbf16> to vector<8x4xbf16>
    %cst_983 = arith.constant dense<0.000000e+00> : vector<8x16xf32>
    %948 = tpu.matmul %947, %945, %cst_983 {dimension_numbers = #tpu.dot_dimension_numbers<[1], [0], [0], [1], [0, 0, 1, 1], [], []>} : vector<8x4xbf16>, vector<4x16xbf16>, vector<8x16xf32> -> vector<8x16xf32>
    %949 = arith.addf %944, %948 : vector<8x16xf32>
    %950 = vector.extract_strided_slice %949 {offsets = [0, 0], sizes = [2, 16], strides = [1, 1]} : vector<8x16xf32> to vector<2x16xf32>
    %951 = vector.extract_strided_slice %949 {offsets = [2, 0], sizes = [2, 16], strides = [1, 1]} : vector<8x16xf32> to vector<2x16xf32>
    %cst_984 = arith.constant dense<0.000000e+00> : vector<2x32xf32>
    %952 = tpu.matmul %950, %6, %cst_984 {dimension_numbers = #tpu.dot_dimension_numbers<[1], [0], [0], [1], [0, 0, 1, 1], [], []>} : vector<2x16xf32>, vector<16x32xf32>, vector<2x32xf32> -> vector<2x32xf32>
    %cst_985 = arith.constant dense<0.000000e+00> : vector<2x32xf32>
    %953 = tpu.matmul %951, %13, %cst_985 {dimension_numbers = #tpu.dot_dimension_numbers<[1], [0], [0], [1], [0, 0, 1, 1], [], []>} : vector<2x16xf32>, vector<16x32xf32>, vector<2x32xf32> -> vector<2x32xf32>
    %954 = arith.addf %952, %953 : vector<2x32xf32>
    %c0_986 = arith.constant 0 : index
    %c0_987 = arith.constant 0 : index
    %c26 = arith.constant 26 : index
    %c0_988 = arith.constant 0 : index
    %955 = vector.load %arg4[%c0_986, %c0_987, %c26, %c0_988] : memref<1x2x32x32xf32, #tpu.memory_space<vmem>>, vector<1x2x1x32xf32>
    %956 = vector.shape_cast %955 : vector<1x2x1x32xf32> to vector<2x32xf32>
    %957 = vector.shape_cast %954 : vector<2x32xf32> to vector<1x2x1x32xf32>
    tpu.vector_store %arg4[%c0_986, %c0_987, %c26, %c0_988], %957 {strides = array<i32>} : memref<1x2x32x32xf32, #tpu.memory_space<vmem>>, vector<1x2x1x32xf32>,
    %958 = vector.extract_strided_slice %949 {offsets = [4, 0], sizes = [2, 16], strides = [1, 1]} : vector<8x16xf32> to vector<2x16xf32>
    %959 = vector.extract_strided_slice %949 {offsets = [6, 0], sizes = [2, 16], strides = [1, 1]} : vector<8x16xf32> to vector<2x16xf32>
    %cst_989 = arith.constant dense<0.000000e+00> : vector<2x32xf32>
    %960 = tpu.matmul %958, %6, %cst_989 {dimension_numbers = #tpu.dot_dimension_numbers<[1], [0], [0], [1], [0, 0, 1, 1], [], []>} : vector<2x16xf32>, vector<16x32xf32>, vector<2x32xf32> -> vector<2x32xf32>
    %cst_990 = arith.constant dense<0.000000e+00> : vector<2x32xf32>
    %961 = tpu.matmul %959, %13, %cst_990 {dimension_numbers = #tpu.dot_dimension_numbers<[1], [0], [0], [1], [0, 0, 1, 1], [], []>} : vector<2x16xf32>, vector<16x32xf32>, vector<2x32xf32> -> vector<2x32xf32>
    %962 = arith.addf %960, %961 : vector<2x32xf32>
    %c0_991 = arith.constant 0 : index
    %c0_992 = arith.constant 0 : index
    %c27 = arith.constant 27 : index
    %c0_993 = arith.constant 0 : index
    %963 = vector.load %arg4[%c0_991, %c0_992, %c27, %c0_993] : memref<1x2x32x32xf32, #tpu.memory_space<vmem>>, vector<1x2x1x32xf32>
    %964 = vector.shape_cast %963 : vector<1x2x1x32xf32> to vector<2x32xf32>
    %965 = vector.shape_cast %962 : vector<2x32xf32> to vector<1x2x1x32xf32>
    tpu.vector_store %arg4[%c0_991, %c0_992, %c27, %c0_993], %965 {strides = array<i32>} : memref<1x2x32x32xf32, #tpu.memory_space<vmem>>, vector<1x2x1x32xf32>,
    %cst_994 = arith.constant 0.000000e+00 : f32
    %966 = vector.broadcast %cst_994 : f32 to vector<8x16xf32>
    %c0_995 = arith.constant 0 : index
    %c0_996 = arith.constant 0 : index
    %c14_997 = arith.constant 14 : index
    %c0_998 = arith.constant 0 : index
    %c0_999 = arith.constant 0 : index
    %967 = vector.load %arg2[%c0_995, %c0_996, %c14_997, %c0_998, %c0_999] : memref<1x1x18x4x18xbf16, #tpu.memory_space<vmem>>, vector<1x1x1x4x18xbf16>
    %968 = vector.shape_cast %967 : vector<1x1x1x4x18xbf16> to vector<4x18xbf16>
    %969 = vector.extract_strided_slice %968 {offsets = [0, 0], sizes = [4, 16], strides = [1, 1]} : vector<4x18xbf16> to vector<4x16xbf16>
    %c0_1000 = arith.constant 0 : index
    %c0_1001 = arith.constant 0 : index
    %c0_1002 = arith.constant 0 : index
    %c0_1003 = arith.constant 0 : index
    %970 = vector.load %arg3[%c0_1000, %c0_1001, %c0_1002, %c0_1003] : memref<3x3x8x4xbf16, #tpu.memory_space<vmem>>, vector<1x1x8x4xbf16>
    %971 = vector.shape_cast %970 : vector<1x1x8x4xbf16> to vector<8x4xbf16>
    %cst_1004 = arith.constant dense<0.000000e+00> : vector<8x16xf32>
    %972 = tpu.matmul %971, %969, %cst_1004 {dimension_numbers = #tpu.dot_dimension_numbers<[1], [0], [0], [1], [0, 0, 1, 1], [], []>} : vector<8x4xbf16>, vector<4x16xbf16>, vector<8x16xf32> -> vector<8x16xf32>
    %973 = arith.addf %966, %972 : vector<8x16xf32>
    %974 = vector.extract_strided_slice %968 {offsets = [0, 1], sizes = [4, 16], strides = [1, 1]} : vector<4x18xbf16> to vector<4x16xbf16>
    %c0_1005 = arith.constant 0 : index
    %c1_1006 = arith.constant 1 : index
    %c0_1007 = arith.constant 0 : index
    %c0_1008 = arith.constant 0 : index
    %975 = vector.load %arg3[%c0_1005, %c1_1006, %c0_1007, %c0_1008] : memref<3x3x8x4xbf16, #tpu.memory_space<vmem>>, vector<1x1x8x4xbf16>
    %976 = vector.shape_cast %975 : vector<1x1x8x4xbf16> to vector<8x4xbf16>
    %cst_1009 = arith.constant dense<0.000000e+00> : vector<8x16xf32>
    %977 = tpu.matmul %976, %974, %cst_1009 {dimension_numbers = #tpu.dot_dimension_numbers<[1], [0], [0], [1], [0, 0, 1, 1], [], []>} : vector<8x4xbf16>, vector<4x16xbf16>, vector<8x16xf32> -> vector<8x16xf32>
    %978 = arith.addf %973, %977 : vector<8x16xf32>
    %979 = vector.extract_strided_slice %968 {offsets = [0, 2], sizes = [4, 16], strides = [1, 1]} : vector<4x18xbf16> to vector<4x16xbf16>
    %c0_1010 = arith.constant 0 : index
    %c2_1011 = arith.constant 2 : index
    %c0_1012 = arith.constant 0 : index
    %c0_1013 = arith.constant 0 : index
    %980 = vector.load %arg3[%c0_1010, %c2_1011, %c0_1012, %c0_1013] : memref<3x3x8x4xbf16, #tpu.memory_space<vmem>>, vector<1x1x8x4xbf16>
    %981 = vector.shape_cast %980 : vector<1x1x8x4xbf16> to vector<8x4xbf16>
    %cst_1014 = arith.constant dense<0.000000e+00> : vector<8x16xf32>
    %982 = tpu.matmul %981, %979, %cst_1014 {dimension_numbers = #tpu.dot_dimension_numbers<[1], [0], [0], [1], [0, 0, 1, 1], [], []>} : vector<8x4xbf16>, vector<4x16xbf16>, vector<8x16xf32> -> vector<8x16xf32>
    %983 = arith.addf %978, %982 : vector<8x16xf32>
    %c0_1015 = arith.constant 0 : index
    %c0_1016 = arith.constant 0 : index
    %c15_1017 = arith.constant 15 : index
    %c0_1018 = arith.constant 0 : index
    %c0_1019 = arith.constant 0 : index
    %984 = vector.load %arg2[%c0_1015, %c0_1016, %c15_1017, %c0_1018, %c0_1019] : memref<1x1x18x4x18xbf16, #tpu.memory_space<vmem>>, vector<1x1x1x4x18xbf16>
    %985 = vector.shape_cast %984 : vector<1x1x1x4x18xbf16> to vector<4x18xbf16>
    %986 = vector.extract_strided_slice %985 {offsets = [0, 0], sizes = [4, 16], strides = [1, 1]} : vector<4x18xbf16> to vector<4x16xbf16>
    %c1_1020 = arith.constant 1 : index
    %c0_1021 = arith.constant 0 : index
    %c0_1022 = arith.constant 0 : index
    %c0_1023 = arith.constant 0 : index
    %987 = vector.load %arg3[%c1_1020, %c0_1021, %c0_1022, %c0_1023] : memref<3x3x8x4xbf16, #tpu.memory_space<vmem>>, vector<1x1x8x4xbf16>
    %988 = vector.shape_cast %987 : vector<1x1x8x4xbf16> to vector<8x4xbf16>
    %cst_1024 = arith.constant dense<0.000000e+00> : vector<8x16xf32>
    %989 = tpu.matmul %988, %986, %cst_1024 {dimension_numbers = #tpu.dot_dimension_numbers<[1], [0], [0], [1], [0, 0, 1, 1], [], []>} : vector<8x4xbf16>, vector<4x16xbf16>, vector<8x16xf32> -> vector<8x16xf32>
    %990 = arith.addf %983, %989 : vector<8x16xf32>
    %991 = vector.extract_strided_slice %985 {offsets = [0, 1], sizes = [4, 16], strides = [1, 1]} : vector<4x18xbf16> to vector<4x16xbf16>
    %c1_1025 = arith.constant 1 : index
    %c1_1026 = arith.constant 1 : index
    %c0_1027 = arith.constant 0 : index
    %c0_1028 = arith.constant 0 : index
    %992 = vector.load %arg3[%c1_1025, %c1_1026, %c0_1027, %c0_1028] : memref<3x3x8x4xbf16, #tpu.memory_space<vmem>>, vector<1x1x8x4xbf16>
    %993 = vector.shape_cast %992 : vector<1x1x8x4xbf16> to vector<8x4xbf16>
    %cst_1029 = arith.constant dense<0.000000e+00> : vector<8x16xf32>
    %994 = tpu.matmul %993, %991, %cst_1029 {dimension_numbers = #tpu.dot_dimension_numbers<[1], [0], [0], [1], [0, 0, 1, 1], [], []>} : vector<8x4xbf16>, vector<4x16xbf16>, vector<8x16xf32> -> vector<8x16xf32>
    %995 = arith.addf %990, %994 : vector<8x16xf32>
    %996 = vector.extract_strided_slice %985 {offsets = [0, 2], sizes = [4, 16], strides = [1, 1]} : vector<4x18xbf16> to vector<4x16xbf16>
    %c1_1030 = arith.constant 1 : index
    %c2_1031 = arith.constant 2 : index
    %c0_1032 = arith.constant 0 : index
    %c0_1033 = arith.constant 0 : index
    %997 = vector.load %arg3[%c1_1030, %c2_1031, %c0_1032, %c0_1033] : memref<3x3x8x4xbf16, #tpu.memory_space<vmem>>, vector<1x1x8x4xbf16>
    %998 = vector.shape_cast %997 : vector<1x1x8x4xbf16> to vector<8x4xbf16>
    %cst_1034 = arith.constant dense<0.000000e+00> : vector<8x16xf32>
    %999 = tpu.matmul %998, %996, %cst_1034 {dimension_numbers = #tpu.dot_dimension_numbers<[1], [0], [0], [1], [0, 0, 1, 1], [], []>} : vector<8x4xbf16>, vector<4x16xbf16>, vector<8x16xf32> -> vector<8x16xf32>
    %1000 = arith.addf %995, %999 : vector<8x16xf32>
    %c0_1035 = arith.constant 0 : index
    %c0_1036 = arith.constant 0 : index
    %c16_1037 = arith.constant 16 : index
    %c0_1038 = arith.constant 0 : index
    %c0_1039 = arith.constant 0 : index
    %1001 = vector.load %arg2[%c0_1035, %c0_1036, %c16_1037, %c0_1038, %c0_1039] : memref<1x1x18x4x18xbf16, #tpu.memory_space<vmem>>, vector<1x1x1x4x18xbf16>
    %1002 = vector.shape_cast %1001 : vector<1x1x1x4x18xbf16> to vector<4x18xbf16>
    %1003 = vector.extract_strided_slice %1002 {offsets = [0, 0], sizes = [4, 16], strides = [1, 1]} : vector<4x18xbf16> to vector<4x16xbf16>
    %c2_1040 = arith.constant 2 : index
    %c0_1041 = arith.constant 0 : index
    %c0_1042 = arith.constant 0 : index
    %c0_1043 = arith.constant 0 : index
    %1004 = vector.load %arg3[%c2_1040, %c0_1041, %c0_1042, %c0_1043] : memref<3x3x8x4xbf16, #tpu.memory_space<vmem>>, vector<1x1x8x4xbf16>
    %1005 = vector.shape_cast %1004 : vector<1x1x8x4xbf16> to vector<8x4xbf16>
    %cst_1044 = arith.constant dense<0.000000e+00> : vector<8x16xf32>
    %1006 = tpu.matmul %1005, %1003, %cst_1044 {dimension_numbers = #tpu.dot_dimension_numbers<[1], [0], [0], [1], [0, 0, 1, 1], [], []>} : vector<8x4xbf16>, vector<4x16xbf16>, vector<8x16xf32> -> vector<8x16xf32>
    %1007 = arith.addf %1000, %1006 : vector<8x16xf32>
    %1008 = vector.extract_strided_slice %1002 {offsets = [0, 1], sizes = [4, 16], strides = [1, 1]} : vector<4x18xbf16> to vector<4x16xbf16>
    %c2_1045 = arith.constant 2 : index
    %c1_1046 = arith.constant 1 : index
    %c0_1047 = arith.constant 0 : index
    %c0_1048 = arith.constant 0 : index
    %1009 = vector.load %arg3[%c2_1045, %c1_1046, %c0_1047, %c0_1048] : memref<3x3x8x4xbf16, #tpu.memory_space<vmem>>, vector<1x1x8x4xbf16>
    %1010 = vector.shape_cast %1009 : vector<1x1x8x4xbf16> to vector<8x4xbf16>
    %cst_1049 = arith.constant dense<0.000000e+00> : vector<8x16xf32>
    %1011 = tpu.matmul %1010, %1008, %cst_1049 {dimension_numbers = #tpu.dot_dimension_numbers<[1], [0], [0], [1], [0, 0, 1, 1], [], []>} : vector<8x4xbf16>, vector<4x16xbf16>, vector<8x16xf32> -> vector<8x16xf32>
    %1012 = arith.addf %1007, %1011 : vector<8x16xf32>
    %1013 = vector.extract_strided_slice %1002 {offsets = [0, 2], sizes = [4, 16], strides = [1, 1]} : vector<4x18xbf16> to vector<4x16xbf16>
    %c2_1050 = arith.constant 2 : index
    %c2_1051 = arith.constant 2 : index
    %c0_1052 = arith.constant 0 : index
    %c0_1053 = arith.constant 0 : index
    %1014 = vector.load %arg3[%c2_1050, %c2_1051, %c0_1052, %c0_1053] : memref<3x3x8x4xbf16, #tpu.memory_space<vmem>>, vector<1x1x8x4xbf16>
    %1015 = vector.shape_cast %1014 : vector<1x1x8x4xbf16> to vector<8x4xbf16>
    %cst_1054 = arith.constant dense<0.000000e+00> : vector<8x16xf32>
    %1016 = tpu.matmul %1015, %1013, %cst_1054 {dimension_numbers = #tpu.dot_dimension_numbers<[1], [0], [0], [1], [0, 0, 1, 1], [], []>} : vector<8x4xbf16>, vector<4x16xbf16>, vector<8x16xf32> -> vector<8x16xf32>
    %1017 = arith.addf %1012, %1016 : vector<8x16xf32>
    %1018 = vector.extract_strided_slice %1017 {offsets = [0, 0], sizes = [2, 16], strides = [1, 1]} : vector<8x16xf32> to vector<2x16xf32>
    %1019 = vector.extract_strided_slice %1017 {offsets = [2, 0], sizes = [2, 16], strides = [1, 1]} : vector<8x16xf32> to vector<2x16xf32>
    %cst_1055 = arith.constant dense<0.000000e+00> : vector<2x32xf32>
    %1020 = tpu.matmul %1018, %6, %cst_1055 {dimension_numbers = #tpu.dot_dimension_numbers<[1], [0], [0], [1], [0, 0, 1, 1], [], []>} : vector<2x16xf32>, vector<16x32xf32>, vector<2x32xf32> -> vector<2x32xf32>
    %cst_1056 = arith.constant dense<0.000000e+00> : vector<2x32xf32>
    %1021 = tpu.matmul %1019, %13, %cst_1056 {dimension_numbers = #tpu.dot_dimension_numbers<[1], [0], [0], [1], [0, 0, 1, 1], [], []>} : vector<2x16xf32>, vector<16x32xf32>, vector<2x32xf32> -> vector<2x32xf32>
    %1022 = arith.addf %1020, %1021 : vector<2x32xf32>
    %c0_1057 = arith.constant 0 : index
    %c0_1058 = arith.constant 0 : index
    %c28 = arith.constant 28 : index
    %c0_1059 = arith.constant 0 : index
    %1023 = vector.load %arg4[%c0_1057, %c0_1058, %c28, %c0_1059] : memref<1x2x32x32xf32, #tpu.memory_space<vmem>>, vector<1x2x1x32xf32>
    %1024 = vector.shape_cast %1023 : vector<1x2x1x32xf32> to vector<2x32xf32>
    %1025 = vector.shape_cast %1022 : vector<2x32xf32> to vector<1x2x1x32xf32>
    tpu.vector_store %arg4[%c0_1057, %c0_1058, %c28, %c0_1059], %1025 {strides = array<i32>} : memref<1x2x32x32xf32, #tpu.memory_space<vmem>>, vector<1x2x1x32xf32>,
    %1026 = vector.extract_strided_slice %1017 {offsets = [4, 0], sizes = [2, 16], strides = [1, 1]} : vector<8x16xf32> to vector<2x16xf32>
    %1027 = vector.extract_strided_slice %1017 {offsets = [6, 0], sizes = [2, 16], strides = [1, 1]} : vector<8x16xf32> to vector<2x16xf32>
    %cst_1060 = arith.constant dense<0.000000e+00> : vector<2x32xf32>
    %1028 = tpu.matmul %1026, %6, %cst_1060 {dimension_numbers = #tpu.dot_dimension_numbers<[1], [0], [0], [1], [0, 0, 1, 1], [], []>} : vector<2x16xf32>, vector<16x32xf32>, vector<2x32xf32> -> vector<2x32xf32>
    %cst_1061 = arith.constant dense<0.000000e+00> : vector<2x32xf32>
    %1029 = tpu.matmul %1027, %13, %cst_1061 {dimension_numbers = #tpu.dot_dimension_numbers<[1], [0], [0], [1], [0, 0, 1, 1], [], []>} : vector<2x16xf32>, vector<16x32xf32>, vector<2x32xf32> -> vector<2x32xf32>
    %1030 = arith.addf %1028, %1029 : vector<2x32xf32>
    %c0_1062 = arith.constant 0 : index
    %c0_1063 = arith.constant 0 : index
    %c29 = arith.constant 29 : index
    %c0_1064 = arith.constant 0 : index
    %1031 = vector.load %arg4[%c0_1062, %c0_1063, %c29, %c0_1064] : memref<1x2x32x32xf32, #tpu.memory_space<vmem>>, vector<1x2x1x32xf32>
    %1032 = vector.shape_cast %1031 : vector<1x2x1x32xf32> to vector<2x32xf32>
    %1033 = vector.shape_cast %1030 : vector<2x32xf32> to vector<1x2x1x32xf32>
    tpu.vector_store %arg4[%c0_1062, %c0_1063, %c29, %c0_1064], %1033 {strides = array<i32>} : memref<1x2x32x32xf32, #tpu.memory_space<vmem>>, vector<1x2x1x32xf32>,
    %cst_1065 = arith.constant 0.000000e+00 : f32
    %1034 = vector.broadcast %cst_1065 : f32 to vector<8x16xf32>
    %c0_1066 = arith.constant 0 : index
    %c0_1067 = arith.constant 0 : index
    %c15_1068 = arith.constant 15 : index
    %c0_1069 = arith.constant 0 : index
    %c0_1070 = arith.constant 0 : index
    %1035 = vector.load %arg2[%c0_1066, %c0_1067, %c15_1068, %c0_1069, %c0_1070] : memref<1x1x18x4x18xbf16, #tpu.memory_space<vmem>>, vector<1x1x1x4x18xbf16>
    %1036 = vector.shape_cast %1035 : vector<1x1x1x4x18xbf16> to vector<4x18xbf16>
    %1037 = vector.extract_strided_slice %1036 {offsets = [0, 0], sizes = [4, 16], strides = [1, 1]} : vector<4x18xbf16> to vector<4x16xbf16>
    %c0_1071 = arith.constant 0 : index
    %c0_1072 = arith.constant 0 : index
    %c0_1073 = arith.constant 0 : index
    %c0_1074 = arith.constant 0 : index
    %1038 = vector.load %arg3[%c0_1071, %c0_1072, %c0_1073, %c0_1074] : memref<3x3x8x4xbf16, #tpu.memory_space<vmem>>, vector<1x1x8x4xbf16>
    %1039 = vector.shape_cast %1038 : vector<1x1x8x4xbf16> to vector<8x4xbf16>
    %cst_1075 = arith.constant dense<0.000000e+00> : vector<8x16xf32>
    %1040 = tpu.matmul %1039, %1037, %cst_1075 {dimension_numbers = #tpu.dot_dimension_numbers<[1], [0], [0], [1], [0, 0, 1, 1], [], []>} : vector<8x4xbf16>, vector<4x16xbf16>, vector<8x16xf32> -> vector<8x16xf32>
    %1041 = arith.addf %1034, %1040 : vector<8x16xf32>
    %1042 = vector.extract_strided_slice %1036 {offsets = [0, 1], sizes = [4, 16], strides = [1, 1]} : vector<4x18xbf16> to vector<4x16xbf16>
    %c0_1076 = arith.constant 0 : index
    %c1_1077 = arith.constant 1 : index
    %c0_1078 = arith.constant 0 : index
    %c0_1079 = arith.constant 0 : index
    %1043 = vector.load %arg3[%c0_1076, %c1_1077, %c0_1078, %c0_1079] : memref<3x3x8x4xbf16, #tpu.memory_space<vmem>>, vector<1x1x8x4xbf16>
    %1044 = vector.shape_cast %1043 : vector<1x1x8x4xbf16> to vector<8x4xbf16>
    %cst_1080 = arith.constant dense<0.000000e+00> : vector<8x16xf32>
    %1045 = tpu.matmul %1044, %1042, %cst_1080 {dimension_numbers = #tpu.dot_dimension_numbers<[1], [0], [0], [1], [0, 0, 1, 1], [], []>} : vector<8x4xbf16>, vector<4x16xbf16>, vector<8x16xf32> -> vector<8x16xf32>
    %1046 = arith.addf %1041, %1045 : vector<8x16xf32>
    %1047 = vector.extract_strided_slice %1036 {offsets = [0, 2], sizes = [4, 16], strides = [1, 1]} : vector<4x18xbf16> to vector<4x16xbf16>
    %c0_1081 = arith.constant 0 : index
    %c2_1082 = arith.constant 2 : index
    %c0_1083 = arith.constant 0 : index
    %c0_1084 = arith.constant 0 : index
    %1048 = vector.load %arg3[%c0_1081, %c2_1082, %c0_1083, %c0_1084] : memref<3x3x8x4xbf16, #tpu.memory_space<vmem>>, vector<1x1x8x4xbf16>
    %1049 = vector.shape_cast %1048 : vector<1x1x8x4xbf16> to vector<8x4xbf16>
    %cst_1085 = arith.constant dense<0.000000e+00> : vector<8x16xf32>
    %1050 = tpu.matmul %1049, %1047, %cst_1085 {dimension_numbers = #tpu.dot_dimension_numbers<[1], [0], [0], [1], [0, 0, 1, 1], [], []>} : vector<8x4xbf16>, vector<4x16xbf16>, vector<8x16xf32> -> vector<8x16xf32>
    %1051 = arith.addf %1046, %1050 : vector<8x16xf32>
    %c0_1086 = arith.constant 0 : index
    %c0_1087 = arith.constant 0 : index
    %c16_1088 = arith.constant 16 : index
    %c0_1089 = arith.constant 0 : index
    %c0_1090 = arith.constant 0 : index
    %1052 = vector.load %arg2[%c0_1086, %c0_1087, %c16_1088, %c0_1089, %c0_1090] : memref<1x1x18x4x18xbf16, #tpu.memory_space<vmem>>, vector<1x1x1x4x18xbf16>
    %1053 = vector.shape_cast %1052 : vector<1x1x1x4x18xbf16> to vector<4x18xbf16>
    %1054 = vector.extract_strided_slice %1053 {offsets = [0, 0], sizes = [4, 16], strides = [1, 1]} : vector<4x18xbf16> to vector<4x16xbf16>
    %c1_1091 = arith.constant 1 : index
    %c0_1092 = arith.constant 0 : index
    %c0_1093 = arith.constant 0 : index
    %c0_1094 = arith.constant 0 : index
    %1055 = vector.load %arg3[%c1_1091, %c0_1092, %c0_1093, %c0_1094] : memref<3x3x8x4xbf16, #tpu.memory_space<vmem>>, vector<1x1x8x4xbf16>
    %1056 = vector.shape_cast %1055 : vector<1x1x8x4xbf16> to vector<8x4xbf16>
    %cst_1095 = arith.constant dense<0.000000e+00> : vector<8x16xf32>
    %1057 = tpu.matmul %1056, %1054, %cst_1095 {dimension_numbers = #tpu.dot_dimension_numbers<[1], [0], [0], [1], [0, 0, 1, 1], [], []>} : vector<8x4xbf16>, vector<4x16xbf16>, vector<8x16xf32> -> vector<8x16xf32>
    %1058 = arith.addf %1051, %1057 : vector<8x16xf32>
    %1059 = vector.extract_strided_slice %1053 {offsets = [0, 1], sizes = [4, 16], strides = [1, 1]} : vector<4x18xbf16> to vector<4x16xbf16>
    %c1_1096 = arith.constant 1 : index
    %c1_1097 = arith.constant 1 : index
    %c0_1098 = arith.constant 0 : index
    %c0_1099 = arith.constant 0 : index
    %1060 = vector.load %arg3[%c1_1096, %c1_1097, %c0_1098, %c0_1099] : memref<3x3x8x4xbf16, #tpu.memory_space<vmem>>, vector<1x1x8x4xbf16>
    %1061 = vector.shape_cast %1060 : vector<1x1x8x4xbf16> to vector<8x4xbf16>
    %cst_1100 = arith.constant dense<0.000000e+00> : vector<8x16xf32>
    %1062 = tpu.matmul %1061, %1059, %cst_1100 {dimension_numbers = #tpu.dot_dimension_numbers<[1], [0], [0], [1], [0, 0, 1, 1], [], []>} : vector<8x4xbf16>, vector<4x16xbf16>, vector<8x16xf32> -> vector<8x16xf32>
    %1063 = arith.addf %1058, %1062 : vector<8x16xf32>
    %1064 = vector.extract_strided_slice %1053 {offsets = [0, 2], sizes = [4, 16], strides = [1, 1]} : vector<4x18xbf16> to vector<4x16xbf16>
    %c1_1101 = arith.constant 1 : index
    %c2_1102 = arith.constant 2 : index
    %c0_1103 = arith.constant 0 : index
    %c0_1104 = arith.constant 0 : index
    %1065 = vector.load %arg3[%c1_1101, %c2_1102, %c0_1103, %c0_1104] : memref<3x3x8x4xbf16, #tpu.memory_space<vmem>>, vector<1x1x8x4xbf16>
    %1066 = vector.shape_cast %1065 : vector<1x1x8x4xbf16> to vector<8x4xbf16>
    %cst_1105 = arith.constant dense<0.000000e+00> : vector<8x16xf32>
    %1067 = tpu.matmul %1066, %1064, %cst_1105 {dimension_numbers = #tpu.dot_dimension_numbers<[1], [0], [0], [1], [0, 0, 1, 1], [], []>} : vector<8x4xbf16>, vector<4x16xbf16>, vector<8x16xf32> -> vector<8x16xf32>
    %1068 = arith.addf %1063, %1067 : vector<8x16xf32>
    %c0_1106 = arith.constant 0 : index
    %c0_1107 = arith.constant 0 : index
    %c17_1108 = arith.constant 17 : index
    %c0_1109 = arith.constant 0 : index
    %c0_1110 = arith.constant 0 : index
    %1069 = vector.load %arg2[%c0_1106, %c0_1107, %c17_1108, %c0_1109, %c0_1110] : memref<1x1x18x4x18xbf16, #tpu.memory_space<vmem>>, vector<1x1x1x4x18xbf16>
    %1070 = vector.shape_cast %1069 : vector<1x1x1x4x18xbf16> to vector<4x18xbf16>
    %1071 = vector.extract_strided_slice %1070 {offsets = [0, 0], sizes = [4, 16], strides = [1, 1]} : vector<4x18xbf16> to vector<4x16xbf16>
    %c2_1111 = arith.constant 2 : index
    %c0_1112 = arith.constant 0 : index
    %c0_1113 = arith.constant 0 : index
    %c0_1114 = arith.constant 0 : index
    %1072 = vector.load %arg3[%c2_1111, %c0_1112, %c0_1113, %c0_1114] : memref<3x3x8x4xbf16, #tpu.memory_space<vmem>>, vector<1x1x8x4xbf16>
    %1073 = vector.shape_cast %1072 : vector<1x1x8x4xbf16> to vector<8x4xbf16>
    %cst_1115 = arith.constant dense<0.000000e+00> : vector<8x16xf32>
    %1074 = tpu.matmul %1073, %1071, %cst_1115 {dimension_numbers = #tpu.dot_dimension_numbers<[1], [0], [0], [1], [0, 0, 1, 1], [], []>} : vector<8x4xbf16>, vector<4x16xbf16>, vector<8x16xf32> -> vector<8x16xf32>
    %1075 = arith.addf %1068, %1074 : vector<8x16xf32>
    %1076 = vector.extract_strided_slice %1070 {offsets = [0, 1], sizes = [4, 16], strides = [1, 1]} : vector<4x18xbf16> to vector<4x16xbf16>
    %c2_1116 = arith.constant 2 : index
    %c1_1117 = arith.constant 1 : index
    %c0_1118 = arith.constant 0 : index
    %c0_1119 = arith.constant 0 : index
    %1077 = vector.load %arg3[%c2_1116, %c1_1117, %c0_1118, %c0_1119] : memref<3x3x8x4xbf16, #tpu.memory_space<vmem>>, vector<1x1x8x4xbf16>
    %1078 = vector.shape_cast %1077 : vector<1x1x8x4xbf16> to vector<8x4xbf16>
    %cst_1120 = arith.constant dense<0.000000e+00> : vector<8x16xf32>
    %1079 = tpu.matmul %1078, %1076, %cst_1120 {dimension_numbers = #tpu.dot_dimension_numbers<[1], [0], [0], [1], [0, 0, 1, 1], [], []>} : vector<8x4xbf16>, vector<4x16xbf16>, vector<8x16xf32> -> vector<8x16xf32>
    %1080 = arith.addf %1075, %1079 : vector<8x16xf32>
    %1081 = vector.extract_strided_slice %1070 {offsets = [0, 2], sizes = [4, 16], strides = [1, 1]} : vector<4x18xbf16> to vector<4x16xbf16>
    %c2_1121 = arith.constant 2 : index
    %c2_1122 = arith.constant 2 : index
    %c0_1123 = arith.constant 0 : index
    %c0_1124 = arith.constant 0 : index
    %1082 = vector.load %arg3[%c2_1121, %c2_1122, %c0_1123, %c0_1124] : memref<3x3x8x4xbf16, #tpu.memory_space<vmem>>, vector<1x1x8x4xbf16>
    %1083 = vector.shape_cast %1082 : vector<1x1x8x4xbf16> to vector<8x4xbf16>
    %cst_1125 = arith.constant dense<0.000000e+00> : vector<8x16xf32>
    %1084 = tpu.matmul %1083, %1081, %cst_1125 {dimension_numbers = #tpu.dot_dimension_numbers<[1], [0], [0], [1], [0, 0, 1, 1], [], []>} : vector<8x4xbf16>, vector<4x16xbf16>, vector<8x16xf32> -> vector<8x16xf32>
    %1085 = arith.addf %1080, %1084 : vector<8x16xf32>
    %1086 = vector.extract_strided_slice %1085 {offsets = [0, 0], sizes = [2, 16], strides = [1, 1]} : vector<8x16xf32> to vector<2x16xf32>
    %1087 = vector.extract_strided_slice %1085 {offsets = [2, 0], sizes = [2, 16], strides = [1, 1]} : vector<8x16xf32> to vector<2x16xf32>
    %cst_1126 = arith.constant dense<0.000000e+00> : vector<2x32xf32>
    %1088 = tpu.matmul %1086, %6, %cst_1126 {dimension_numbers = #tpu.dot_dimension_numbers<[1], [0], [0], [1], [0, 0, 1, 1], [], []>} : vector<2x16xf32>, vector<16x32xf32>, vector<2x32xf32> -> vector<2x32xf32>
    %cst_1127 = arith.constant dense<0.000000e+00> : vector<2x32xf32>
    %1089 = tpu.matmul %1087, %13, %cst_1127 {dimension_numbers = #tpu.dot_dimension_numbers<[1], [0], [0], [1], [0, 0, 1, 1], [], []>} : vector<2x16xf32>, vector<16x32xf32>, vector<2x32xf32> -> vector<2x32xf32>
    %1090 = arith.addf %1088, %1089 : vector<2x32xf32>
    %c0_1128 = arith.constant 0 : index
    %c0_1129 = arith.constant 0 : index
    %c30 = arith.constant 30 : index
    %c0_1130 = arith.constant 0 : index
    %1091 = vector.load %arg4[%c0_1128, %c0_1129, %c30, %c0_1130] : memref<1x2x32x32xf32, #tpu.memory_space<vmem>>, vector<1x2x1x32xf32>
    %1092 = vector.shape_cast %1091 : vector<1x2x1x32xf32> to vector<2x32xf32>
    %1093 = vector.shape_cast %1090 : vector<2x32xf32> to vector<1x2x1x32xf32>
    tpu.vector_store %arg4[%c0_1128, %c0_1129, %c30, %c0_1130], %1093 {strides = array<i32>} : memref<1x2x32x32xf32, #tpu.memory_space<vmem>>, vector<1x2x1x32xf32>,
    %1094 = vector.extract_strided_slice %1085 {offsets = [4, 0], sizes = [2, 16], strides = [1, 1]} : vector<8x16xf32> to vector<2x16xf32>
    %1095 = vector.extract_strided_slice %1085 {offsets = [6, 0], sizes = [2, 16], strides = [1, 1]} : vector<8x16xf32> to vector<2x16xf32>
    %cst_1131 = arith.constant dense<0.000000e+00> : vector<2x32xf32>
    %1096 = tpu.matmul %1094, %6, %cst_1131 {dimension_numbers = #tpu.dot_dimension_numbers<[1], [0], [0], [1], [0, 0, 1, 1], [], []>} : vector<2x16xf32>, vector<16x32xf32>, vector<2x32xf32> -> vector<2x32xf32>
    %cst_1132 = arith.constant dense<0.000000e+00> : vector<2x32xf32>
    %1097 = tpu.matmul %1095, %13, %cst_1132 {dimension_numbers = #tpu.dot_dimension_numbers<[1], [0], [0], [1], [0, 0, 1, 1], [], []>} : vector<2x16xf32>, vector<16x32xf32>, vector<2x32xf32> -> vector<2x32xf32>
    %1098 = arith.addf %1096, %1097 : vector<2x32xf32>
    %c0_1133 = arith.constant 0 : index
    %c0_1134 = arith.constant 0 : index
    %c31 = arith.constant 31 : index
    %c0_1135 = arith.constant 0 : index
    %1099 = vector.load %arg4[%c0_1133, %c0_1134, %c31, %c0_1135] : memref<1x2x32x32xf32, #tpu.memory_space<vmem>>, vector<1x2x1x32xf32>
    %1100 = vector.shape_cast %1099 : vector<1x2x1x32xf32> to vector<2x32xf32>
    %1101 = vector.shape_cast %1098 : vector<2x32xf32> to vector<1x2x1x32xf32>
    tpu.vector_store %arg4[%c0_1133, %c0_1134, %c31, %c0_1135], %1101 {strides = array<i32>} : memref<1x2x32x32xf32, #tpu.memory_space<vmem>>, vector<1x2x1x32xf32>,
    return
  }
  func.func @transform_0(%arg0: i32, %arg1: i32) -> (i32, i32, i32, i32, i32) {
    %c0_i32 = arith.constant 0 : i32
    %c0_i32_0 = arith.constant 0 : i32
    %c0_i32_1 = arith.constant 0 : i32
    %c0_i32_2 = arith.constant 0 : i32
    return %arg0, %arg1, %c0_i32, %c0_i32_0, %c0_i32_1 : i32, i32, i32, i32, i32
  }
  func.func @transform_1(%arg0: i32, %arg1: i32) -> (i32, i32, i32, i32) {
    %c0_i32 = arith.constant 0 : i32
    %c0_i32_0 = arith.constant 0 : i32
    %c0_i32_1 = arith.constant 0 : i32
    %c0_i32_2 = arith.constant 0 : i32
    %c0_i32_3 = arith.constant 0 : i32
    return %c0_i32, %c0_i32_0, %c0_i32_1, %c0_i32_2 : i32, i32, i32, i32
  }
  func.func @transform_2(%arg0: i32, %arg1: i32) -> (i32, i32, i32, i32) {
    %c0_i32 = arith.constant 0 : i32
    %c0_i32_0 = arith.constant 0 : i32
    %c0_i32_1 = arith.constant 0 : i32
    return %arg0, %c0_i32, %arg1, %c0_i32_0 : i32, i32, i32, i32
  }
}

</mosaic_0001>

<bundles_post_ra>
// kernel: tpu_custom_call.1
= control target key start
LH: loop header
LB: loop body
LE: loop exit
PB: predicated region body
PF: predicated region fallthrough
CT: control target
= control target key end

     0   :  { %7 = vsyncpa [#allocation3], 0  ;;  %s18541_s0 = inlined_call_operand.hbm [shape: bf16[2,1,18,4,18], index: 0, kind: input, shape index: {}]   ;;  %s18542_s1 = inlined_call_operand.vmem [shape: bf16[3,3,8,4], index: 1, kind: input, shape index: {}]   ;;  %s18543_s2 = inlined_call_operand.hbm [shape: f32[2,2,32,32], index: 2, kind: output, shape index: {}]  }
   0x1   :  { %9 = vsyncpa [#allocation3 + $0x1], 0 }
   0x2   :  { %10 = vsyncpa [#allocation4], 0 }
   0x3   :  { %12 = vsyncpa [#allocation4 + $0x1], 0  ;;  %s15909_s9 = smov 0   ;;  %s15911_s10 = smov 0  }
   0x4   :  { %s15913_s11 = smov 0   ;;  %s15915_s12 = smov 0  }
   0x5   :  { %s15917_s13 = smov 0   ;;  %s15919_s14 = smov 0  }
   0x6 LB: > { %s13375_s15 = sadd.s32 4294967295, %s15879_s14   ;;  %s13376_s16 = sadd.s32 4294967294, %s15879_s14   ;;  %s15879_s14 = sphi %s15919_s14, %s18_s14   ;;  %s15875_s13 = sphi %s15917_s13, %s18562_s13   ;;  %s15871_s12 = sphi %s15915_s12, %s18561_s12   ;;  %s15867_s11 = sphi %s15913_s11, %s18560_s11   ;;  %s15863_s10 = sphi %s15911_s10, %s18559_s10   ;;  %s15859_s9 = sphi %s15909_s9, %s18558_s9  }
   0x7   : > { %s30_s17 = sadd.s32 1, %s15875_s13  ;;  %s39_s18 = sadd.s32 1, %s15867_s11 }
   0x8   : > { %p32_p0 = scmp.ge.s32.totalorder %s30_s17, 2  ;;  %p46_p1 = scmp.ne.s32.totalorder %s15867_s11, %s15863_s10 }
   0x9   : > { %p47_p2 = scmp.eq.s32.totalorder %s15879_s14, 0  ;;  %p52_p3 = scmp.ne.s32.totalorder %s15863_s10, %s15859_s9 }
   0xa   : > { %s18564_s17 = smov (%p32_p0, %s30_s17), 0  ;;  %p53_p5 = scmp.eq.s32.totalorder %s13375_s15, 0 }
   0xb   : > { %p15950_p4 = por %p47_p2, %p46_p1  ;;  %s34_s20 = ssub.s32 %s15875_s13, %s18564_s17 }
   0xc   : > { %p99_p6 = scmp.eq.s32.totalorder %s13375_s15, 1  ;;  %p37_p7 = scmp.eq.s32.totalorder %s34_s20, 0 }
   0xd   : > { %p15956_p8 = por %p53_p5, %p52_p3  ;;  %p105_p10 = scmp.eq.s32.totalorder %s13376_s16, 1 }
   0xe   : > { %p15960_p9 = por %p99_p6, %p46_p1  ;;  %p15710_p13 = scmp.lt.s32.totalorder %s15879_s14, 2 }
   0xf   : > { %s15965_s23 = scalar_select %p37_p7, %s15867_s11, %s39_s18  }
  0x10   : > { %p15967_p11 = por %p105_p10, %p52_p3  ;;  %s128_s25 = sand.u32 1, %s15867_s11  }
  0x11   : > { %s15695_s26 = smul.u32 36, %s128_s25  ;;  %p15977_p0 = pnand %p15710_p13, %p15950_p4 }
  0x12   : > { %s15696_s27 = smul.u32 576, %s15875_s13  ;;  %p13380_p1 = scmp.ge.s32.totalorder %s15879_s14, 1 }
  0x13   : > { %s132_s4 = scalar_lea.vmem [#allocation2], %s15695_s26  ;;  %s129_s6 = scalar_lea.sflag [#allocation3], %s128_s25 }
  0x14   : > { %s140_s3 = scalar_lea.hbm %s18541_s0, %s15696_s27  ;;  %s141_s5 = sshll.u32 %s132_s4, 4  ;;  %s142_s5 = int_to_ptr.vmem [resolvable:$true] %s141_s5 }
  0x15   : > { %p15773_p2 = pneg %p15977_p0  ;;  %s15784_s7 = scalar_lea.vmem %s142_s5, 576 }
  0x16   : > { %p15785_p3 = scmp.ne.s32.totalorder %s142_s5, %s15784_s7  ;;  %s15881_s8 = smov [#allocation2]  }
  0x17   : > { %s15789_s15 = sshll.u32 %s15881_s8, 4  ;;  %s15790_s15 = int_to_ptr.vmem [resolvable:$false] %s15789_s15 }
  0x18   : > { %p15787_p5 = pnand %p15785_p3, %p15773_p2  ;;  %s15791_s16 = scalar_lea.vmem %s15790_s15, 1152 }
  0x19   : > { %p15792_p4 = scmp.lt.s32.totalorder %s142_s5, %s15790_s15  ;;  %p15793_p7 = scmp.lt.s32.totalorder %s15791_s16, %s15784_s7 }
  0x1a   : > { %p15788_p6 = pneg %p15787_p5 }
  0x1b   : > { %p15794_p10 = por %p15793_p7, %p15792_p4 }
  0x1d   : > { %p15795_p13 = pnand %p15794_p10, %p15788_p6 }
  0x1f   : > { %15798 = shalt.err (!%p15795_p13)
}
  0x20   : > { %s15882_s18 = smov 32   ;;  %s15883_s19 = smov 2  }
  0x21   : > { %15705 = dma.hbm_to_vmem [thread:$0]  (!%p15977_p0), %s140_s3, 576, %s142_s5, %s129_s6, %s15882_s18, %s15882_s18, %s15883_s19  }
  0x22   : > { %p149_p12 = scmp.lt.s32.totalorder %s15879_s14, 3 }
  0x24   : > { %p150_p2 = pnand %p13380_p1, %p149_p12 }
  0x25   : > { %s15993_s20 = sand.u32 (!%p150_p2), 1, %s15863_s10  }
  0x26   : > { %153 = sbr.rel (%p150_p2) target bundleno = 4164 (0x1044), region = 28  ;;  %s156_s26 = scalar_lea.sflag (!%p150_p2), [#allocation3], %s15993_s20 }
  0x27   : > { %s15697_s25 = smul.u32 (!%p150_p2), 36, %s15993_s20 }
  0x29   : > { %s15997_s27 = scalar_lea.vmem (!%p150_p2), [#allocation2], %s15697_s25 }
  0x2b   : > { %15850 = dma.done.wait (%p15956_p8), %s156_s26, 576  }
  0x2c   : > { %15852 = vsyncadd (%p15956_p8), %s156_s26, 4294966720  ;;  %v182_v0 = vlaneseq  ;;  %v15884_v1 = vmov 1983009808   ;;  %v15885_v4 = vmov 0.0   ;;  %vm15886_vm0 = vmmov 0   ;;  %s15887_s29 = smov 127  }
  0x2d   : > { %v209_v2 = vunpack.c.l.s4 %v15884_v1  ;;  %14383 = vmatprep.subr.bf16.mxu0 %v15885_v4  ;;  %14389 = vmatprep.subr.bf16.mxu1 %v15885_v4  ;;  %vm221_vm1 = vcmask 1041408   ;;  %v203_v7 = vld [vmem:[%s15997_s27] sm:$0x3]  ;;  %v13391_v8 = vld [vmem:[%s15997_s27 + $0x2] sm:$0x3]  ;;  %vm217_vm2 = vcmask 31744  }
  0x2e   : > { %v16004_v3 = vshrl.u32 %v182_v0, 7  ;;  %14385 = vmatprep.mubr.msk.bf16.mxu0 %vm15886_vm0, %v15885_v4  ;;  %14391 = vmatprep.mubr.msk.bf16.mxu1 %vm15886_vm0, %v15885_v4  ;;  %v269_v11 = vsel %vm221_vm1, %v203_v7, 0  ;;  %v204_v12 = vld [vmem:[%s18542_s1] sm:$0xf]  ;;  %v370_v13 = vsel %vm221_vm1, %v13391_v8, 0  ;;  %s15888_s30 = smov 126  }
  0x2f   : > { %v210_v5 = vunpack.c.0.s8 %v209_v2  ;;  %14390 = vmatpush3.bf16.msra.mxu1 %v269_v11  ;;  %v13398_v14 = vld [vmem:[%s15997_s27 + $0x4] sm:$0x3]  ;;  %v13392_v16 = vld [vmem:[%s18542_s1 + $0xc] sm:$0xf]  ;;  %v16044_v17 = vld [vmem:[%s15997_s27 + $0x2] sm:$0x3] }
  0x30   : > { %14401 = vmatprep.subr.bf16.mxu1 %v15885_v4  ;;  %v16047_v18 = vld [vmem:[%s15997_s27 + $0x4] sm:$0x3]  ;;  %v16056_v21 = vld [vmem:[%s15997_s27 + $0x6] sm:$0x3]  ;;  %v13396_v31 = vld [vmem:[%s18542_s1 + $0x14] sm:$0xf] }
  0x31   : > { %v16013_v6 = vsub.s32 %v210_v5, %v16004_v3  ;;  %v13386_v26 = vld [vmem:[%s18542_s1 + $0x4] sm:$0xf]  ;;  %v13389_v34 = vld [vmem:[%s18542_s1 + $0x8] sm:$0xf]  ;;  %v13401_v36 = vld [vmem:[%s18542_s1 + $0x1c] sm:$0xf] }
  0x32   : > { %14392 = vmatmul.mubr.msk.bf16.vlgmr.msra.gmra.mxu1 %vm217_vm2, %v204_v12  ;;  %v13394_v37 = vld [vmem:[%s18542_s1 + $0x10] sm:$0xf]  ;;  %v531_v38 = vsel %vm221_vm1, %v13398_v14, 0  ;;  %v13399_v40 = vld [vmem:[%s18542_s1 + $0x18] sm:$0xf]  ;;  %v186_v51 = vadd.s32 8, %v16004_v3 }
  0x33   : > { %v214_v9 = vrot.slane %v203_v7, %v16013_v6  ;;  %v422_v10 = vrot.slane %v13391_v8, %v16013_v6  ;;  %14402 = vmatpush3.bf16.msra.mxu1 %v370_v13  ;;  %14403 = vmatprep.mubr.msk.bf16.mxu1 %vm15886_vm0, %v15885_v4  ;;  %v583_v15 = vrot.slane %v13398_v14, %v16013_v6  ;;  %v13403_v42 = vld [vmem:[%s18542_s1 + $0x20] sm:$0xf]  ;;  %v183_v53 = vand.u32 127, %v182_v0  ;;  %v16156_v62 = vld [vmem:[%s15997_s27 + $0x4] sm:$0x3]  ;;  %s13381_s15 = sshll.u32 %s15993_s20, 6 }
  0x34   : > { %14413 = vmatprep.subr.bf16.mxu1 %v15885_v4  ;;  %v1042_v19 = vrot.slane %v16044_v17, %v16013_v6  ;;  %v1244_v20 = vrot.slane %v16047_v18, %v16013_v6  ;;  %v1402_v22 = vrot.slane %v16056_v21, %v16013_v6  ;;  %v188_v52 = vmul.u32 2, %v186_v51  ;;  %v16159_v63 = vld [vmem:[%s15997_s27 + $0x6] sm:$0x3]  ;;  %v16168_v2 = vld [vmem:[%s15997_s27 + $0x8] sm:$0x3]  ;;  %s16323_s16 = scalar_lea.vmem [#allocation5], %s13381_s15 }
  0x35   : > { %215 = vrot.lane.b32.xlu0 %v214_v9, %s15887_s29  ;;  %423 = vrot.lane.b32.xlu1 %v422_v10, %s15887_s29  ;;  %v187_v55 = vmul.u32 2, %v16004_v3  ;;  %v15889_v58 = vmov 1.0   ;;  %v1858_v0 = vrot.slane %v16156_v62, %v16013_v6  ;;  %v2060_v1 = vrot.slane %v16159_v63, %v16013_v6  ;;  %s13902_s6 = sshll.u32 %s15871_s12, 10  ;;  %s13288_s7 = sshll.u32 %s16323_s16, 4  ;;  %s18488_s7 = int_to_ptr.vmem [resolvable:$true] %s13288_s7 }
  0x36   : > { %v196_v54 = vadd.s32 1, %v188_v52  ;;  %vm16147_vm5 = vcmp.eq.s32.totalorder %v183_v53, %v188_v52  ;;  %v2218_v5 = vrot.slane %v16168_v2, %v16013_v6  ;;  %vm686_vm7 = vcmask 130048   ;;  %s18486_s18 = scalar_lea.hbm %s18543_s2, %s13902_s6  ;;  %s13273_s12 = scalar_lea.sflag [#allocation4], %s15993_s20 }
  0x37   : > { %v195_v57 = vadd.s32 1, %v187_v55  ;;  %vm16151_vm6 = vcmp.eq.s32.totalorder %v183_v53, %v187_v55  ;;  %vm856_vm8 = vcmask 253952   ;;  %s15799_s19 = scalar_lea.vmem %s18488_s7, 1024  ;;  %s15891_s25 = smov [#allocation5]  }
  0x38   : > { %vm16123_vm3 = vcmp.eq.s32.totalorder %v183_v53, %v196_v54  ;;  %v1095_v54 = vsel %vm221_vm1, %v16044_v17, 0  ;;  %v13421_v17 = vld [vmem:[%s18542_s1 + $0x8] sm:$0xf]  ;;  %p15800_p8 = scmp.ne.s32.totalorder %s18488_s7, %s15799_s19  ;;  %s15803_s26 = sshll.u32 %s15891_s25, 4  ;;  %s15804_s26 = int_to_ptr.vmem [resolvable:$false] %s15803_s26 }
  0x39   : > { %313 = vrot.lane.b32.xlu0 %v214_v9, %s15888_s30  ;;  %474 = vrot.lane.b32.xlu1 %v422_v10, %s15888_s30  ;;  %vm16134_vm4 = vcmp.eq.s32.totalorder %v183_v53, %v195_v57  ;;  %v1033_v57 = vld [vmem:[%s18542_s1] sm:$0xf]  ;;  %s15805_s21 = scalar_lea.vmem %s15804_s26, 2048  ;;  %p15806_p1 = scmp.lt.s32.totalorder %s18488_s7, %s15804_s26 }
  0x3a   : > { %14404 = vmatmul.mubr.msk.bf16.vlgmr.msra.gmra.mxu1 %vm217_vm2, %v13392_v16  ;;  %p15801_p12 = pnand %p15800_p8, %p15960_p9  ;;  %p15807_p3 = scmp.lt.s32.totalorder %s15805_s21, %s15799_s19 }
  0x3b   : > { %14415 = vmatprep.mubr.msk.bf16.mxu1 %vm15886_vm0, %v15885_v4 }
  0x3c   : > { %p15802_p0 = pneg %p15801_p12  ;;  %p15808_p5 = por %p15807_p3, %p15806_p1 }
  0x3d   : > { %584 = vrot.lane.b32.xlu0 %v583_v15, %s15887_s29  ;;  %635 = vrot.lane.b32.xlu1 %v583_v15, %s15888_s30 }
  0x3e   : > { %p15809_p6 = pnand %p15808_p5, %p15802_p0 }
  0x41   : > { %1043 = vrot.lane.b32.xlu0 %v1042_v19, %s15887_s29  ;;  %1138 = vrot.lane.b32.xlu1 %v1042_v19, %s15888_s30 }
  0x45   : > { %1245 = vrot.lane.b32.xlu0 %v1244_v20, %s15887_s29  ;;  %1295 = vrot.lane.b32.xlu1 %v1244_v20, %s15888_s30 }
  0x49   : > { %1403 = vrot.lane.b32.xlu0 %v1402_v22, %s15887_s29  ;;  %1453 = vrot.lane.b32.xlu1 %v1402_v22, %s15888_s30 }
  0x4d   : > { %1859 = vrot.lane.b32.xlu0 %v1858_v0, %s15887_s29  ;;  %1954 = vrot.lane.b32.xlu1 %v1858_v0, %s15888_s30  ;;  %v1193_v0 = vsel %vm221_vm1, %v16047_v18, 0  ;;  %v13424_v18 = vld [vmem:[%s18542_s1 + $0xc] sm:$0xf] }
  0x51   : > { %2061 = vrot.lane.b32.xlu0 %v2060_v1, %s15887_s29  ;;  %2111 = vrot.lane.b32.xlu1 %v2060_v1, %s15888_s30 }
  0x55   : > { %2219 = vrot.lane.b32.xlu0 %v2218_v5, %s15887_s29  ;;  %2269 = vrot.lane.b32.xlu1 %v2218_v5, %s15888_s30 }
  0xa7   : > { %v216_v23 = vpop.permute.xlu0 %215  ;;  %v424_v24 = vpop.permute.xlu1 %423 }
  0xa8   : > { %v223_v25 = vsel %vm221_vm1, %v216_v23, 0  ;;  %v429_v35 = vsel %vm221_vm1, %v424_v24, 0 }
  0xa9   : > { %14384 = vmatpush3.bf16.msra.mxu0 %v223_v25 }
  0xaa   : > { %14395 = vmatprep.subr.bf16.mxu0 %v15885_v4 }
  0xab   : > { %v314_v27 = vpop.permute.xlu0 %313  ;;  %v475_v28 = vpop.permute.xlu1 %474 }
  0xac   : > { %v319_v29 = vsel %vm221_vm1, %v314_v27, 0  ;;  %14386 = vmatmul.mubr.msk.bf16.vlgmr.msra.gmra.mxu0 %vm217_vm2, %v13386_v26  ;;  %v480_v30 = vsel %vm221_vm1, %v475_v28, 0 }
  0xad   : > { %14396 = vmatpush3.bf16.msra.mxu0 %v319_v29  ;;  %14397 = vmatprep.mubr.msk.bf16.mxu0 %vm15886_vm0, %v15885_v4 }
  0xae   : > { %14407 = vmatprep.subr.bf16.mxu0 %v15885_v4  ;;  %14414 = vmatpush3.bf16.msra.mxu1 %v480_v30 }
  0xaf   : > { %v585_v32 = vpop.permute.xlu0 %584  ;;  %14425 = vmatprep.subr.bf16.mxu1 %v15885_v4  ;;  %v636_v39 = vpop.permute.xlu1 %635 }
  0xb0   : > { %v590_v33 = vsel %vm221_vm1, %v585_v32, 0  ;;  %v641_v41 = vsel %vm221_vm1, %v636_v39, 0 }
  0xb1   : > { %14416 = vmatmul.mubr.msk.bf16.vlgmr.msra.gmra.mxu1 %vm217_vm2, %v13396_v31 }
  0xb2   : > { %14426 = vmatpush3.bf16.msra.mxu1 %v590_v33  ;;  %14427 = vmatprep.mubr.msk.bf16.mxu1 %vm15886_vm0, %v15885_v4 }
  0xb3   : > { %14437 = vmatprep.subr.mxu1 %v15885_v4  ;;  %v1139_v51 = vpop.permute.xlu1 %1138 }
  0xb4   : > { %14398 = vmatmul.mubr.msk.bf16.vlgmr.msra.gmra.mxu0 %vm217_vm2, %v13389_v34  ;;  %v1144_v52 = vsel %vm221_vm1, %v1139_v51, 0 }
  0xb5   : > { %14408 = vmatpush3.bf16.msra.mxu0 %v429_v35  ;;  %14409 = vmatprep.mubr.msk.bf16.mxu0 %vm15886_vm0, %v15885_v4 }
  0xb6   : > { %14419 = vmatprep.subr.bf16.mxu0 %v15885_v4 }
  0xb7   : > { %v1296_v5 = vpop.permute.xlu1 %1295 }
  0xb9   : > { %14428 = vmatmul.mubr.msk.bf16.vlgmr.msra.gmra.mxu1 %vm217_vm2, %v13401_v36 }
  0xba   : > { %14441 = vmatprep.mubr.msk.f32.mxu1 %vm15886_vm0, %v15885_v4  ;;  %14438 = vmatpush3.msk.msra.mxu1 %vm16123_vm3, %v15889_v58 }
  0xbb   : > { %14439 = vmatprep.subr.mxu1 %v15885_v4 }
  0xbc   : > { %14410 = vmatmul.mubr.msk.bf16.vlgmr.msra.gmra.mxu0 %vm217_vm2, %v13394_v37  ;;  %14440 = vmatpush3.msk.msra.mxu1 %vm16134_vm4, %v15889_v58 }
  0xbd   : > { %14420 = vmatpush3.bf16.msra.mxu0 %v531_v38  ;;  %14421 = vmatprep.mubr.msk.bf16.mxu0 %vm15886_vm0, %v15885_v4 }
  0xbe   : > { %14431 = vmatprep.subr.bf16.mxu0 %v15885_v4  ;;  %14444 = vmatprep.subr.mxu1 %v15885_v4 }
  0xc4   : > { %14422 = vmatmul.mubr.msk.bf16.vlgmr.msra.gmra.mxu0 %vm217_vm2, %v13399_v40 }
  0xc5   : > { %14432 = vmatpush3.bf16.msra.mxu0 %v641_v41  ;;  %14433 = vmatprep.mubr.msk.bf16.mxu0 %vm15886_vm0, %v15885_v4 }
  0xc6   : > { %14451 = vmatprep.subr.mxu0 %v15885_v4 }
  0xcc   : > { %14434 = vmatmul.mubr.msk.bf16.vlgmr.msra.gmra.mxu0 %vm217_vm2, %v13403_v42  ;;  %v1044_v42 = vpop.permute.xlu0 %1043 }
  0xcd   : > { %14455 = vmatprep.mubr.msk.f32.mxu0 %vm15886_vm0, %v15885_v4  ;;  %14452 = vmatpush3.msk.msra.mxu0 %vm16123_vm3, %v15889_v58 }
  0xce   : > { %14453 = vmatprep.subr.mxu0 %v15885_v4 }
  0xcf   : > { %14454 = vmatpush3.msk.msra.mxu0 %vm16134_vm4, %v15889_v58 }
  0xd0   : > { %14465 = vmatprep.subr.bf16.mxu0 %v15885_v4  ;;  %v1246_v55 = vpop.permute.xlu0 %1245 }
  0xd1   : > { %v1251_v1 = vsel %vm221_vm1, %v1246_v55, 0 }
  0xf2   : > { %v305_v43 = vpop.f32.mrf.mxu1 }
  0xf4   : > { %v14393_v44 = vpop.f32.mrf.mxu1 }
  0xf6   : > { %v308_v45 = vpop.f32.mrf.mxu1 }
  0xf8   : > { %v14394_v46 = vpop.f32.mrf.mxu1 }
  0xfa   : > { %v406_v47 = vpop.f32.mrf.mxu1 }
  0xfc   : > { %v14405_v48 = vpop.f32.mrf.mxu1 }
  0xfe   : > { %v409_v49 = vpop.f32.mrf.mxu1 }
 0x100   : > { %v14406_v50 = vpop.f32.mrf.mxu1 }
 0x101   : > { %v13418_v50 = vld [vmem:[%s18542_s1 + $0x4] sm:$0xf] }
 0x16c   : > { %v259_v7 = vpop.f32.mrf.mxu0 }
 0x16d   : > { %v306_v20 = vadd.f32 %v305_v43, %v259_v7  ;;  %v13426_v7 = vld [vmem:[%s18542_s1 + $0x10] sm:$0xf] }
 0x16e   : > { %v14387_v8 = vpop.f32.mrf.mxu0 }
 0x16f   : > { %v1301_v8 = vsel %vm221_vm1, %v1296_v5, 0 }
 0x170   : > { %v262_v9 = vpop.f32.mrf.mxu0 }
 0x171   : > { %v516_v10 = vpop.f32.mrf.mxu1  ;;  %v1351_v9 = vsel %vm221_vm1, %v16056_v21, 0  ;;  %v13428_v21 = vld [vmem:[%s18542_s1 + $0x14] sm:$0xf] }
 0x172   : > { %v14388_v11 = vpop.f32.mrf.mxu0 }
 0x173   : > { %v14417_v12 = vpop.f32.mrf.mxu1  ;;  %v1454_v11 = vpop.permute.xlu1 %1453 }
 0x174   : > { %v355_v13 = vpop.f32.mrf.mxu0  ;;  %v13431_v12 = vld [vmem:[%s18542_s1 + $0x18] sm:$0xf] }
 0x175   : > { %v519_v14 = vpop.f32.mrf.mxu1  ;;  %v361_v24 = vadd.f32 %v355_v13, %v306_v20  ;;  %v16299_v20 = vld [vmem:[%s15997_s27 + $0x8] sm:$0x3] }
 0x176   : > { %v14399_v15 = vpop.f32.mrf.mxu0  ;;  %v1459_v14 = vsel %vm221_vm1, %v1454_v11, 0 }
 0x177   : > { %v14418_v16 = vpop.f32.mrf.mxu1  ;;  %v412_v29 = vadd.f32 %v406_v47, %v361_v24  ;;  %v1049_v47 = vsel %vm221_vm1, %v1044_v42, 0  ;;  %v13433_v15 = vld [vmem:[%s18542_s1 + $0x1c] sm:$0xf]  ;;  %v16308_v24 = vld [vmem:[%s15997_s27 + $0xa] sm:$0x3] }
 0x178   : > { %v358_v19 = vpop.f32.mrf.mxu0  ;;  %v13435_v16 = vld [vmem:[%s18542_s1 + $0x20] sm:$0xf] }
 0x179   : > { %v626_v22 = vpop.f32.mrf.mxu1  ;;  %v16296_v19 = vld [vmem:[%s15997_s27 + $0x6] sm:$0x3] }
 0x17a   : > { %v14400_v23 = vpop.f32.mrf.mxu0 }
 0x17b   : > { %v14429_v25 = vpop.f32.mrf.mxu1  ;;  %v2876_v23 = vrot.slane %v16299_v20, %v16013_v6 }
 0x17c   : > { %v465_v26 = vpop.f32.mrf.mxu0  ;;  %v3034_v25 = vrot.slane %v16308_v24, %v16013_v6 }
 0x17d   : > { %v629_v27 = vpop.f32.mrf.mxu1  ;;  %v471_v32 = vadd.f32 %v465_v26, %v412_v29  ;;  %v15890_v26 = vmov 1966171168  }
 0x17e   : > { %v14411_v28 = vpop.f32.mrf.mxu0  ;;  %v833_v27 = vunpack.c.l.s4 %v15890_v26 }
 0x17f   : > { %v14430_v30 = vpop.f32.mrf.mxu1  ;;  %v522_v35 = vadd.f32 %v516_v10, %v471_v32  ;;  %v1404_v10 = vpop.permute.xlu0 %1403 }
 0x180   : > { %v468_v31 = vpop.f32.mrf.mxu0  ;;  %v1409_v13 = vsel %vm221_vm1, %v1404_v10, 0  ;;  %v834_v28 = vunpack.c.0.s8 %v833_v27 }
 0x182   : > { %v14412_v33 = vpop.f32.mrf.mxu0 }
 0x183   : > { %v16317_v33 = vsub.s32 %v834_v28, %v16004_v3 }
 0x184   : > { %v567_v34 = vpop.f32.mrf.mxu0 }
 0x185   : > { %v573_v37 = vadd.f32 %v567_v34, %v522_v35 }
 0x186   : > { %v14423_v36 = vpop.f32.mrf.mxu0 }
 0x187   : > { %v632_v40 = vadd.f32 %v626_v22, %v573_v37  ;;  %v2674_v22 = vrot.slane %v16296_v19, %v16013_v6 }
 0x188   : > { %v570_v38 = vpop.f32.mrf.mxu0 }
 0x189   : > { %2675 = vrot.lane.b32.xlu0 %v2674_v22, %s15887_s29  ;;  %2770 = vrot.lane.b32.xlu1 %v2674_v22, %s15888_s30 }
 0x18a   : > { %v14424_v39 = vpop.f32.mrf.mxu0 }
 0x18c   : > { %v677_v41 = vpop.f32.mrf.mxu0 }
 0x18d   : > { %v683_v43 = vadd.f32 %v677_v41, %v632_v40  ;;  %2877 = vrot.lane.b32.xlu0 %v2876_v23, %s15887_s29  ;;  %2927 = vrot.lane.b32.xlu1 %v2876_v23, %s15888_s30 }
 0x18e   : > { %v14435_v44 = vpop.f32.mrf.mxu0 }
 0x18f   : > { %v685_v45 = vrot.slane %v683_v43, 2  ;;  %v859_v46 = vrot.slane %v683_v43, 6  ;;  %v932_v53 = vrot.slane %v683_v43, 4 }
 0x190   : > { %v680_v48 = vpop.f32.mrf.mxu0 }
 0x191   : > { %14442 = vmatmul.mubr.msk.f32.vlgmr.msra.gmra.mxu1 %vm686_vm7, %v685_v45  ;;  %14456 = vmatmul.mubr.msk.f32.vlgmr.msra.gmra.mxu0 %vm686_vm7, %v859_v46 }
 0x192   : > { %v14436_v49 = vpop.f32.mrf.mxu0  ;;  %14445 = vmatpush3.msk.msra.mxu1 %vm16147_vm5, %v15889_v58  ;;  %14466 = vmatpush3.bf16.msra.mxu0 %v1049_v47 }
 0x193   : > { %14446 = vmatprep.subr.mxu1 %v15885_v4  ;;  %14448 = vmatprep.mubr.msk.f32.mxu1 %vm15886_vm0, %v15885_v4 }
 0x194   : > { %14447 = vmatpush3.msk.msra.mxu1 %vm16151_vm6, %v15889_v58  ;;  %14467 = vmatprep.mubr.msk.bf16.mxu0 %vm15886_vm0, %v15885_v4 }
 0x195   : > { %14449 = vmatmul.mubr.msk.f32.vlgmr.msra.gmra.mxu1 %vm686_vm7, %v683_v43  ;;  %14458 = vmatprep.subr.mxu1 %v15885_v4 }
 0x196   : > { %14468 = vmatmul.mubr.msk.bf16.vlgmr.msra.gmra.mxu0 %vm217_vm2, %v13418_v50  ;;  %14459 = vmatpush3.msk.msra.mxu1 %vm16147_vm5, %v15889_v58 }
 0x197   : > { %14460 = vmatprep.subr.mxu1 %v15885_v4  ;;  %14477 = vmatprep.subr.bf16.mxu0 %v15885_v4 }
 0x198   : > { %14461 = vmatpush3.msk.msra.mxu1 %vm16151_vm6, %v15889_v58  ;;  %14462 = vmatprep.mubr.msk.f32.mxu1 %vm15886_vm0, %v15885_v4 }
 0x199   : > { %14478 = vmatpush3.bf16.msra.mxu0 %v1144_v52  ;;  %14463 = vmatmul.mubr.msk.f32.vlgmr.msra.gmra.mxu1 %vm686_vm7, %v932_v53 }
 0x19a   : > { %14471 = vmatprep.subr.bf16.mxu1 %v15885_v4  ;;  %14473 = vmatprep.mubr.msk.bf16.mxu1 %vm15886_vm0, %v15885_v4 }
 0x19b   : > { %14472 = vmatpush3.bf16.msra.mxu1 %v1095_v54  ;;  %14479 = vmatprep.mubr.msk.bf16.mxu0 %vm15886_vm0, %v15885_v4 }
 0x19c   : > { %14483 = vmatprep.subr.bf16.mxu1 %v15885_v4  ;;  %14489 = vmatprep.subr.bf16.mxu0 %v15885_v4 }
 0x19d   : > { %3035 = vrot.lane.b32.xlu0 %v3034_v25, %s15887_s29  ;;  %3085 = vrot.lane.b32.xlu1 %v3034_v25, %s15888_s30 }
 0x19e   : > { %14474 = vmatmul.mubr.msk.bf16.vlgmr.msra.gmra.mxu1 %vm217_vm2, %v1033_v57  ;;  %14480 = vmatmul.mubr.msk.bf16.vlgmr.msra.gmra.mxu0 %vm217_vm2, %v13421_v17 }
 0x19f   : > { %14484 = vmatpush3.bf16.msra.mxu1 %v1193_v0  ;;  %14490 = vmatpush3.bf16.msra.mxu0 %v1251_v1 }
 0x1a0   : > { %14485 = vmatprep.mubr.msk.bf16.mxu1 %vm15886_vm0, %v15885_v4  ;;  %14491 = vmatprep.mubr.msk.bf16.mxu0 %vm15886_vm0, %v15885_v4 }
 0x1a1   : > { %14495 = vmatprep.subr.bf16.mxu1 %v15885_v4  ;;  %14501 = vmatprep.subr.bf16.mxu0 %v15885_v4 }
 0x1a6   : > { %14486 = vmatmul.mubr.msk.bf16.vlgmr.msra.gmra.mxu1 %vm217_vm2, %v13424_v18  ;;  %14492 = vmatmul.mubr.msk.bf16.vlgmr.msra.gmra.mxu0 %vm217_vm2, %v13426_v7 }
 0x1a7   : > { %14496 = vmatpush3.bf16.msra.mxu1 %v1301_v8  ;;  %14502 = vmatpush3.bf16.msra.mxu0 %v1351_v9 }
 0x1a8   : > { %14497 = vmatprep.mubr.msk.bf16.mxu1 %vm15886_vm0, %v15885_v4  ;;  %14503 = vmatprep.mubr.msk.bf16.mxu0 %vm15886_vm0, %v15885_v4 }
 0x1a9   : > { %14507 = vmatprep.subr.bf16.mxu1 %v15885_v4  ;;  %14513 = vmatprep.subr.bf16.mxu0 %v15885_v4 }
 0x1ae   : > { %14498 = vmatmul.mubr.msk.bf16.vlgmr.msra.gmra.mxu1 %vm217_vm2, %v13428_v21  ;;  %14504 = vmatmul.mubr.msk.bf16.vlgmr.msra.gmra.mxu0 %vm217_vm2, %v13431_v12 }
 0x1af   : > { %14508 = vmatpush3.bf16.msra.mxu1 %v1409_v13  ;;  %14514 = vmatpush3.bf16.msra.mxu0 %v1459_v14 }
 0x1b0   : > { %14509 = vmatprep.mubr.msk.bf16.mxu1 %vm15886_vm0, %v15885_v4  ;;  %14515 = vmatprep.mubr.msk.bf16.mxu0 %vm15886_vm0, %v15885_v4 }
 0x1b1   : > { %14519 = vmatprep.subr.mxu1 %v15885_v4  ;;  %14533 = vmatprep.subr.mxu0 %v15885_v4 }
 0x1b6   : > { %14510 = vmatmul.mubr.msk.bf16.vlgmr.msra.gmra.mxu1 %vm217_vm2, %v13433_v15  ;;  %14516 = vmatmul.mubr.msk.bf16.vlgmr.msra.gmra.mxu0 %vm217_vm2, %v13435_v16 }
 0x1b7   : > { %14520 = vmatpush3.msk.msra.mxu1 %vm16123_vm3, %v15889_v58  ;;  %14534 = vmatpush3.msk.msra.mxu0 %vm16123_vm3, %v15889_v58 }
 0x1b8   : > { %14521 = vmatprep.subr.mxu1 %v15885_v4  ;;  %14535 = vmatprep.subr.mxu0 %v15885_v4 }
 0x1b9   : > { %14522 = vmatpush3.msk.msra.mxu1 %vm16134_vm4, %v15889_v58  ;;  %14523 = vmatprep.mubr.msk.f32.mxu1 %vm15886_vm0, %v15885_v4 }
 0x1ba   : > { %14536 = vmatpush3.msk.msra.mxu0 %vm16134_vm4, %v15889_v58  ;;  %14537 = vmatprep.mubr.msk.f32.mxu0 %vm15886_vm0, %v15885_v4 }
 0x1bb   : > { %14526 = vmatprep.subr.mxu1 %v15885_v4  ;;  %14547 = vmatprep.subr.bf16.mxu0 %v15885_v4 }
 0x251   : > { %v755_v29 = vpop.f32.mrf.mxu1  ;;  %v928_v30 = vpop.f32.mrf.mxu0 }
 0x253   : > { %v14443_v31 = vpop.f32.mrf.mxu1  ;;  %v14457_v32 = vpop.f32.mrf.mxu0 }
 0x255   : > { %v827_v34 = vpop.f32.mrf.mxu1 }
 0x256   : > { %v828_v35 = vadd.f32 %v827_v34, %v755_v29  ;;  %v1085_v36 = vpop.f32.mrf.mxu0 }
 0x257   : > { %v14450_v37 = vpop.f32.mrf.mxu1 }
 0x258   : > { %v838_v38 = vrot.slane %v828_v35, %v16317_v33  ;;  %v14469_v39 = vpop.f32.mrf.mxu0  ;;  %v1860_v35 = vpop.permute.xlu0 %1859 }
 0x259   : > { %v1001_v40 = vpop.f32.mrf.mxu1 }
 0x25a   : > { %v839_v41 = vcombine.high %v838_v38, %v838_v38  ;;  %v846_v42 = vrot.slane %v838_v38, %v16317_v33  ;;  %v1002_v43 = vadd.f32 %v1001_v40, %v928_v30  ;;  %v1088_v44 = vpop.f32.mrf.mxu0 }
 0x25b   : > { %v14464_v45 = vpop.f32.mrf.mxu1 }
 0x25c   : > { %v853_v46 = vrot.slane %v839_v41, %v16317_v33  ;;  %857 = vst.msk [vmem:[%s16323_s16] sm:$0x1] %vm856_vm8, %v846_v42  ;;  %v1012_v3 = vrot.slane %v1002_v43, %v16317_v33  ;;  %v14470_v47 = vpop.f32.mrf.mxu0  ;;  %v1865_v43 = vsel %vm221_vm1, %v1860_v35, 0 }
 0x25e   : > { %858 = vst.msk [vmem:[%s16323_s16 + $0x20] sm:$0x1] %vm856_vm8, %v853_v46  ;;  %v1013_v48 = vcombine.high %v1012_v3, %v1012_v3  ;;  %v1020_v49 = vrot.slane %v1012_v3, %v16317_v33  ;;  %v1131_v50 = vpop.f32.mrf.mxu1  ;;  %v1180_v51 = vpop.f32.mrf.mxu0  ;;  %v13450_v46 = vld [vmem:[%s18542_s1 + $0x4] sm:$0xf] }
 0x25f   : > { %v1132_v1 = vadd.f32 %v1131_v50, %v1085_v36  ;;  %v1955_v3 = vpop.permute.xlu1 %1954  ;;  %v2062_v50 = vpop.permute.xlu0 %2061 }
 0x260   : > { %v1027_v52 = vrot.slane %v1013_v48, %v16317_v33  ;;  %1030 = vst.msk [vmem:[%s16323_s16 + $0x1] sm:$0x1] %vm856_vm8, %v1020_v49  ;;  %v14475_v53 = vpop.f32.mrf.mxu1  ;;  %v14481_v54 = vpop.f32.mrf.mxu0  ;;  %v1960_v47 = vsel %vm221_vm1, %v1955_v3, 0  ;;  %v1911_v49 = vsel %vm221_vm1, %v16156_v62, 0  ;;  %v13453_v62 = vld [vmem:[%s18542_s1 + $0x8] sm:$0xf] }
 0x261   : > { %v1186_v9 = vadd.f32 %v1180_v51, %v1132_v1  ;;  %v1849_v51 = vld [vmem:[%s18542_s1] sm:$0xf]  ;;  %v2067_v53 = vsel %vm221_vm1, %v2062_v50, 0 }
 0x262   : > { %1031 = vst.msk [vmem:[%s16323_s16 + $0x21] sm:$0x1] %vm856_vm8, %v1027_v52  ;;  %v1134_v55 = vpop.f32.mrf.mxu1  ;;  %v1183_v57 = vpop.f32.mrf.mxu0  ;;  %v2009_v52 = vsel %vm221_vm1, %v16159_v63, 0  ;;  %v13456_v63 = vld [vmem:[%s18542_s1 + $0xc] sm:$0xf] }
 0x263   : > { %v2112_v54 = vpop.permute.xlu1 %2111  ;;  %v13458_v55 = vld [vmem:[%s18542_s1 + $0x10] sm:$0xf] }
 0x264   : > { %v14476_v17 = vpop.f32.mrf.mxu1  ;;  %v14482_v0 = vpop.f32.mrf.mxu0  ;;  %v2117_v57 = vsel %vm221_vm1, %v2112_v54, 0 }
 0x265   : > { %v2167_v17 = vsel %vm221_vm1, %v16168_v2, 0  ;;  %v2220_v0 = vpop.permute.xlu0 %2219  ;;  %v13460_v2 = vld [vmem:[%s18542_s1 + $0x14] sm:$0xf] }
 0x266   : > { %v1229_v5 = vpop.f32.mrf.mxu1  ;;  %v1287_v18 = vpop.f32.mrf.mxu0 }
 0x267   : > { %v1235_v21 = vadd.f32 %v1229_v5, %v1186_v9  ;;  %v2270_v1 = vpop.permute.xlu1 %2269  ;;  %v13463_v5 = vld [vmem:[%s18542_s1 + $0x18] sm:$0xf]  ;;  %v13467_v9 = vld [vmem:[%s18542_s1 + $0x20] sm:$0xf] }
 0x268   : > { %v14487_v7 = vpop.f32.mrf.mxu1  ;;  %v14493_v8 = vpop.f32.mrf.mxu0 }
 0x269   : > { %v1293_v16 = vadd.f32 %v1287_v18, %v1235_v21  ;;  %v2225_v18 = vsel %vm221_vm1, %v2220_v0, 0  ;;  %v2275_v7 = vsel %vm221_vm1, %v2270_v1, 0  ;;  %v13465_v8 = vld [vmem:[%s18542_s1 + $0x1c] sm:$0xf] }
 0x26a   : > { %v1232_v10 = vpop.f32.mrf.mxu1  ;;  %v1290_v11 = vpop.f32.mrf.mxu0 }
 0x26b   : > { %v16456_v10 = vld [vmem:[%s15997_s27 + $0x8] sm:$0x3]  ;;  %v16459_v11 = vld [vmem:[%s15997_s27 + $0xa] sm:$0x3] }
 0x26c   : > { %v14488_v12 = vpop.f32.mrf.mxu1  ;;  %v14494_v13 = vpop.f32.mrf.mxu0  ;;  %v3490_v21 = vrot.slane %v16456_v10, %v16013_v6 }
 0x26d   : > { %v3692_v12 = vrot.slane %v16459_v11, %v16013_v6  ;;  %v16468_v13 = vld [vmem:[%s15997_s27 + $0xc] sm:$0x3] }
 0x26e   : > { %v1337_v14 = vpop.f32.mrf.mxu1  ;;  %v1387_v15 = vpop.f32.mrf.mxu0  ;;  %3491 = vrot.lane.b32.xlu0 %v3490_v21, %s15887_s29  ;;  %3586 = vrot.lane.b32.xlu1 %v3490_v21, %s15888_s30 }
 0x26f   : > { %v1343_v25 = vadd.f32 %v1337_v14, %v1293_v16  ;;  %v3850_v14 = vrot.slane %v16468_v13, %v16013_v6 }
 0x270   : > { %v14499_v22 = vpop.f32.mrf.mxu1  ;;  %v14505_v23 = vpop.f32.mrf.mxu0 }
 0x271   : > { %v1393_v30 = vadd.f32 %v1387_v15, %v1343_v25 }
 0x272   : > { %v1340_v26 = vpop.f32.mrf.mxu1  ;;  %v1390_v27 = vpop.f32.mrf.mxu0  ;;  %3693 = vrot.lane.b32.xlu0 %v3692_v12, %s15887_s29  ;;  %3743 = vrot.lane.b32.xlu1 %v3692_v12, %s15888_s30 }
 0x274   : > { %v14500_v28 = vpop.f32.mrf.mxu1  ;;  %v14506_v29 = vpop.f32.mrf.mxu0 }
 0x276   : > { %v1445_v31 = vpop.f32.mrf.mxu1  ;;  %v1495_v32 = vpop.f32.mrf.mxu0  ;;  %3851 = vrot.lane.b32.xlu0 %v3850_v14, %s15887_s29  ;;  %3901 = vrot.lane.b32.xlu1 %v3850_v14, %s15888_s30 }
 0x277   : > { %v1451_v34 = vadd.f32 %v1445_v31, %v1393_v30 }
 0x278   : > { %v14511_v36 = vpop.f32.mrf.mxu1  ;;  %v14517_v37 = vpop.f32.mrf.mxu0 }
 0x279   : > { %v1501_v38 = vadd.f32 %v1495_v32, %v1451_v34 }
 0x27a   : > { %v1448_v39 = vpop.f32.mrf.mxu1  ;;  %v1498_v40 = vpop.f32.mrf.mxu0 }
 0x27b   : > { %v1503_v41 = vrot.slane %v1501_v38, 2  ;;  %v1675_v42 = vrot.slane %v1501_v38, 6  ;;  %v1748_v48 = vrot.slane %v1501_v38, 4 }
 0x27c   : > { %v14512_v44 = vpop.f32.mrf.mxu1  ;;  %v14518_v45 = vpop.f32.mrf.mxu0 }
 0x27d   : > { %14524 = vmatmul.mubr.msk.f32.vlgmr.msra.gmra.mxu1 %vm686_vm7, %v1503_v41  ;;  %14538 = vmatmul.mubr.msk.f32.vlgmr.msra.gmra.mxu0 %vm686_vm7, %v1675_v42 }
 0x27e   : > { %14527 = vmatpush3.msk.msra.mxu1 %vm16147_vm5, %v15889_v58  ;;  %14548 = vmatpush3.bf16.msra.mxu0 %v1865_v43 }
 0x27f   : > { %14528 = vmatprep.subr.mxu1 %v15885_v4  ;;  %14530 = vmatprep.mubr.msk.f32.mxu1 %vm15886_vm0, %v15885_v4 }
 0x280   : > { %14529 = vmatpush3.msk.msra.mxu1 %vm16151_vm6, %v15889_v58  ;;  %14549 = vmatprep.mubr.msk.bf16.mxu0 %vm15886_vm0, %v15885_v4 }
 0x281   : > { %14531 = vmatmul.mubr.msk.f32.vlgmr.msra.gmra.mxu1 %vm686_vm7, %v1501_v38  ;;  %14540 = vmatprep.subr.mxu1 %v15885_v4 }
 0x282   : > { %14550 = vmatmul.mubr.msk.bf16.vlgmr.msra.gmra.mxu0 %vm217_vm2, %v13450_v46  ;;  %14541 = vmatpush3.msk.msra.mxu1 %vm16147_vm5, %v15889_v58 }
 0x283   : > { %14542 = vmatprep.subr.mxu1 %v15885_v4  ;;  %14559 = vmatprep.subr.bf16.mxu0 %v15885_v4 }
 0x284   : > { %14543 = vmatpush3.msk.msra.mxu1 %vm16151_vm6, %v15889_v58  ;;  %14544 = vmatprep.mubr.msk.f32.mxu1 %vm15886_vm0, %v15885_v4 }
 0x285   : > { %14560 = vmatpush3.bf16.msra.mxu0 %v1960_v47  ;;  %14545 = vmatmul.mubr.msk.f32.vlgmr.msra.gmra.mxu1 %vm686_vm7, %v1748_v48 }
 0x286   : > { %14553 = vmatprep.subr.bf16.mxu1 %v15885_v4  ;;  %14555 = vmatprep.mubr.msk.bf16.mxu1 %vm15886_vm0, %v15885_v4 }
 0x287   : > { %14554 = vmatpush3.bf16.msra.mxu1 %v1911_v49  ;;  %14561 = vmatprep.mubr.msk.bf16.mxu0 %vm15886_vm0, %v15885_v4 }
 0x288   : > { %14565 = vmatprep.subr.bf16.mxu1 %v15885_v4  ;;  %14571 = vmatprep.subr.bf16.mxu0 %v15885_v4 }
 0x28a   : > { %14556 = vmatmul.mubr.msk.bf16.vlgmr.msra.gmra.mxu1 %vm217_vm2, %v1849_v51  ;;  %14562 = vmatmul.mubr.msk.bf16.vlgmr.msra.gmra.mxu0 %vm217_vm2, %v13453_v62 }
 0x28b   : > { %14566 = vmatpush3.bf16.msra.mxu1 %v2009_v52  ;;  %14572 = vmatpush3.bf16.msra.mxu0 %v2067_v53 }
 0x28c   : > { %14567 = vmatprep.mubr.msk.bf16.mxu1 %vm15886_vm0, %v15885_v4  ;;  %14573 = vmatprep.mubr.msk.bf16.mxu0 %vm15886_vm0, %v15885_v4 }
 0x28d   : > { %14577 = vmatprep.subr.bf16.mxu1 %v15885_v4  ;;  %14583 = vmatprep.subr.bf16.mxu0 %v15885_v4 }
 0x292   : > { %14568 = vmatmul.mubr.msk.bf16.vlgmr.msra.gmra.mxu1 %vm217_vm2, %v13456_v63  ;;  %14574 = vmatmul.mubr.msk.bf16.vlgmr.msra.gmra.mxu0 %vm217_vm2, %v13458_v55 }
 0x293   : > { %14578 = vmatpush3.bf16.msra.mxu1 %v2117_v57  ;;  %14584 = vmatpush3.bf16.msra.mxu0 %v2167_v17 }
 0x294   : > { %14579 = vmatprep.mubr.msk.bf16.mxu1 %vm15886_vm0, %v15885_v4  ;;  %14585 = vmatprep.mubr.msk.bf16.mxu0 %vm15886_vm0, %v15885_v4 }
 0x295   : > { %14589 = vmatprep.subr.bf16.mxu1 %v15885_v4  ;;  %14595 = vmatprep.subr.bf16.mxu0 %v15885_v4 }
 0x29a   : > { %14580 = vmatmul.mubr.msk.bf16.vlgmr.msra.gmra.mxu1 %vm217_vm2, %v13460_v2  ;;  %14586 = vmatmul.mubr.msk.bf16.vlgmr.msra.gmra.mxu0 %vm217_vm2, %v13463_v5 }
 0x29b   : > { %14590 = vmatpush3.bf16.msra.mxu1 %v2225_v18  ;;  %14596 = vmatpush3.bf16.msra.mxu0 %v2275_v7 }
 0x29c   : > { %14591 = vmatprep.mubr.msk.bf16.mxu1 %vm15886_vm0, %v15885_v4  ;;  %14597 = vmatprep.mubr.msk.bf16.mxu0 %vm15886_vm0, %v15885_v4 }
 0x29d   : > { %14601 = vmatprep.subr.mxu1 %v15885_v4  ;;  %14615 = vmatprep.subr.mxu0 %v15885_v4 }
 0x2a2   : > { %14592 = vmatmul.mubr.msk.bf16.vlgmr.msra.gmra.mxu1 %vm217_vm2, %v13465_v8  ;;  %14598 = vmatmul.mubr.msk.bf16.vlgmr.msra.gmra.mxu0 %vm217_vm2, %v13467_v9 }
 0x2a3   : > { %14602 = vmatpush3.msk.msra.mxu1 %vm16123_vm3, %v15889_v58  ;;  %14616 = vmatpush3.msk.msra.mxu0 %vm16123_vm3, %v15889_v58 }
 0x2a4   : > { %14603 = vmatprep.subr.mxu1 %v15885_v4  ;;  %14617 = vmatprep.subr.mxu0 %v15885_v4 }
 0x2a5   : > { %14604 = vmatpush3.msk.msra.mxu1 %vm16134_vm4, %v15889_v58  ;;  %14605 = vmatprep.mubr.msk.f32.mxu1 %vm15886_vm0, %v15885_v4 }
 0x2a6   : > { %14618 = vmatpush3.msk.msra.mxu0 %vm16134_vm4, %v15889_v58  ;;  %14619 = vmatprep.mubr.msk.f32.mxu0 %vm15886_vm0, %v15885_v4 }
 0x2a7   : > { %14608 = vmatprep.subr.mxu1 %v15885_v4  ;;  %14629 = vmatprep.subr.bf16.mxu0 %v15885_v4 }
 0x33d   : > { %v1572_v15 = vpop.f32.mrf.mxu1  ;;  %v1744_v16 = vpop.f32.mrf.mxu0 }
 0x33f   : > { %v14525_v22 = vpop.f32.mrf.mxu1  ;;  %v14539_v23 = vpop.f32.mrf.mxu0 }
 0x341   : > { %v1644_v25 = vpop.f32.mrf.mxu1 }
 0x342   : > { %v1645_v26 = vadd.f32 %v1644_v25, %v1572_v15  ;;  %v1901_v27 = vpop.f32.mrf.mxu0 }
 0x343   : > { %v14532_v28 = vpop.f32.mrf.mxu1 }
 0x344   : > { %v1655_v29 = vrot.slane %v1645_v26, %v16317_v33  ;;  %v14551_v30 = vpop.f32.mrf.mxu0  ;;  %v2676_v26 = vpop.permute.xlu0 %2675 }
 0x345   : > { %v1817_v31 = vpop.f32.mrf.mxu1 }
 0x346   : > { %v1656_v32 = vcombine.high %v1655_v29, %v1655_v29  ;;  %v1663_v34 = vrot.slane %v1655_v29, %v16317_v33  ;;  %v1818_v35 = vadd.f32 %v1817_v31, %v1744_v16  ;;  %v1904_v36 = vpop.f32.mrf.mxu0 }
 0x347   : > { %v14546_v37 = vpop.f32.mrf.mxu1 }
 0x348   : > { %v1670_v38 = vrot.slane %v1656_v32, %v16317_v33  ;;  %1673 = vst.msk [vmem:[%s16323_s16 + $0x2] sm:$0x1] %vm856_vm8, %v1663_v34  ;;  %v1828_v39 = vrot.slane %v1818_v35, %v16317_v33  ;;  %v14552_v40 = vpop.f32.mrf.mxu0  ;;  %v2681_v35 = vsel %vm221_vm1, %v2676_v26, 0 }
 0x34a   : > { %1674 = vst.msk [vmem:[%s16323_s16 + $0x22] sm:$0x1] %vm856_vm8, %v1670_v38  ;;  %v1829_v41 = vcombine.high %v1828_v39, %v1828_v39  ;;  %v1836_v42 = vrot.slane %v1828_v39, %v16317_v33  ;;  %v1947_v43 = vpop.f32.mrf.mxu1  ;;  %v1996_v44 = vpop.f32.mrf.mxu0  ;;  %v13482_v38 = vld [vmem:[%s18542_s1 + $0x4] sm:$0xf] }
 0x34b   : > { %v1948_v51 = vadd.f32 %v1947_v43, %v1901_v27  ;;  %v2771_v39 = vpop.permute.xlu1 %2770  ;;  %v2878_v43 = vpop.permute.xlu0 %2877 }
 0x34c   : > { %v1843_v45 = vrot.slane %v1829_v41, %v16317_v33  ;;  %1846 = vst.msk [vmem:[%s16323_s16 + $0x3] sm:$0x1] %vm856_vm8, %v1836_v42  ;;  %v14557_v46 = vpop.f32.mrf.mxu1  ;;  %v14563_v3 = vpop.f32.mrf.mxu0  ;;  %v2776_v40 = vsel %vm221_vm1, %v2771_v39, 0  ;;  %v2727_v42 = vsel %vm221_vm1, %v16296_v19, 0  ;;  %v13485_v19 = vld [vmem:[%s18542_s1 + $0x8] sm:$0xf] }
 0x34d   : > { %v2002_v63 = vadd.f32 %v1996_v44, %v1948_v51  ;;  %v2665_v44 = vld [vmem:[%s18542_s1] sm:$0xf]  ;;  %v2883_v46 = vsel %vm221_vm1, %v2878_v43, 0 }
 0x34e   : > { %1847 = vst.msk [vmem:[%s16323_s16 + $0x23] sm:$0x1] %vm856_vm8, %v1843_v45  ;;  %v1950_v47 = vpop.f32.mrf.mxu1  ;;  %v1999_v48 = vpop.f32.mrf.mxu0  ;;  %v2825_v45 = vsel %vm221_vm1, %v16299_v20, 0  ;;  %v13488_v20 = vld [vmem:[%s18542_s1 + $0xc] sm:$0xf] }
 0x34f   : > { %v2928_v3 = vpop.permute.xlu1 %2927  ;;  %v13490_v47 = vld [vmem:[%s18542_s1 + $0x10] sm:$0xf] }
 0x350   : > { %v14558_v49 = vpop.f32.mrf.mxu1  ;;  %v14564_v50 = vpop.f32.mrf.mxu0  ;;  %v2933_v48 = vsel %vm221_vm1, %v2928_v3, 0 }
 0x351   : > { %v2983_v49 = vsel %vm221_vm1, %v16308_v24, 0  ;;  %v3036_v50 = vpop.permute.xlu0 %3035  ;;  %v13492_v24 = vld [vmem:[%s18542_s1 + $0x14] sm:$0xf] }
 0x352   : > { %v2045_v62 = vpop.f32.mrf.mxu1  ;;  %v2103_v52 = vpop.f32.mrf.mxu0 }
 0x353   : > { %v2051_v17 = vadd.f32 %v2045_v62, %v2002_v63  ;;  %v3086_v51 = vpop.permute.xlu1 %3085  ;;  %v13495_v62 = vld [vmem:[%s18542_s1 + $0x18] sm:$0xf]  ;;  %v13499_v63 = vld [vmem:[%s18542_s1 + $0x20] sm:$0xf] }
 0x354   : > { %v14569_v53 = vpop.f32.mrf.mxu1  ;;  %v14575_v54 = vpop.f32.mrf.mxu0 }
 0x355   : > { %v2109_v18 = vadd.f32 %v2103_v52, %v2051_v17  ;;  %v3041_v52 = vsel %vm221_vm1, %v3036_v50, 0  ;;  %v3091_v53 = vsel %vm221_vm1, %v3086_v51, 0  ;;  %v13497_v54 = vld [vmem:[%s18542_s1 + $0x1c] sm:$0xf] }
 0x356   : > { %v2048_v55 = vpop.f32.mrf.mxu1  ;;  %v2106_v57 = vpop.f32.mrf.mxu0 }
 0x357   : > { %v16610_v55 = vld [vmem:[%s15997_s27 + $0xa] sm:$0x3]  ;;  %v16613_v57 = vld [vmem:[%s15997_s27 + $0xc] sm:$0x3] }
 0x358   : > { %v14570_v0 = vpop.f32.mrf.mxu1  ;;  %v14576_v1 = vpop.f32.mrf.mxu0  ;;  %v4306_v17 = vrot.slane %v16610_v55, %v16013_v6 }
 0x359   : > { %v4508_v0 = vrot.slane %v16613_v57, %v16013_v6  ;;  %v16622_v1 = vld [vmem:[%s15997_s27 + $0xe] sm:$0x3] }
 0x35a   : > { %v2153_v2 = vpop.f32.mrf.mxu1  ;;  %v2203_v5 = vpop.f32.mrf.mxu0  ;;  %4307 = vrot.lane.b32.xlu0 %v4306_v17, %s15887_s29  ;;  %4402 = vrot.lane.b32.xlu1 %v4306_v17, %s15888_s30 }
 0x35b   : > { %v2159_v9 = vadd.f32 %v2153_v2, %v2109_v18  ;;  %v4666_v2 = vrot.slane %v16622_v1, %v16013_v6 }
 0x35c   : > { %v14581_v7 = vpop.f32.mrf.mxu1  ;;  %v14587_v8 = vpop.f32.mrf.mxu0 }
 0x35d   : > { %v2209_v16 = vadd.f32 %v2203_v5, %v2159_v9 }
 0x35e   : > { %v2156_v21 = vpop.f32.mrf.mxu1  ;;  %v2206_v12 = vpop.f32.mrf.mxu0  ;;  %4509 = vrot.lane.b32.xlu0 %v4508_v0, %s15887_s29  ;;  %4559 = vrot.lane.b32.xlu1 %v4508_v0, %s15888_s30 }
 0x360   : > { %v14582_v14 = vpop.f32.mrf.mxu1  ;;  %v14588_v15 = vpop.f32.mrf.mxu0 }
 0x362   : > { %v2261_v22 = vpop.f32.mrf.mxu1  ;;  %v2311_v23 = vpop.f32.mrf.mxu0  ;;  %4667 = vrot.lane.b32.xlu0 %v4666_v2, %s15887_s29  ;;  %4717 = vrot.lane.b32.xlu1 %v4666_v2, %s15888_s30 }
 0x363   : > { %v2267_v25 = vadd.f32 %v2261_v22, %v2209_v16 }
 0x364   : > { %v14593_v27 = vpop.f32.mrf.mxu1  ;;  %v14599_v28 = vpop.f32.mrf.mxu0 }
 0x365   : > { %v2317_v29 = vadd.f32 %v2311_v23, %v2267_v25 }
 0x366   : > { %v2264_v30 = vpop.f32.mrf.mxu1  ;;  %v2314_v31 = vpop.f32.mrf.mxu0 }
 0x367   : > { %v2319_v32 = vrot.slane %v2317_v29, 2  ;;  %v2491_v34 = vrot.slane %v2317_v29, 6  ;;  %v2564_v41 = vrot.slane %v2317_v29, 4 }
 0x368   : > { %v14594_v36 = vpop.f32.mrf.mxu1  ;;  %v14600_v37 = vpop.f32.mrf.mxu0 }
 0x369   : > { %14606 = vmatmul.mubr.msk.f32.vlgmr.msra.gmra.mxu1 %vm686_vm7, %v2319_v32  ;;  %14620 = vmatmul.mubr.msk.f32.vlgmr.msra.gmra.mxu0 %vm686_vm7, %v2491_v34 }
 0x36a   : > { %14609 = vmatpush3.msk.msra.mxu1 %vm16147_vm5, %v15889_v58  ;;  %14630 = vmatpush3.bf16.msra.mxu0 %v2681_v35 }
 0x36b   : > { %14610 = vmatprep.subr.mxu1 %v15885_v4  ;;  %14612 = vmatprep.mubr.msk.f32.mxu1 %vm15886_vm0, %v15885_v4 }
 0x36c   : > { %14611 = vmatpush3.msk.msra.mxu1 %vm16151_vm6, %v15889_v58  ;;  %14631 = vmatprep.mubr.msk.bf16.mxu0 %vm15886_vm0, %v15885_v4 }
 0x36d   : > { %14613 = vmatmul.mubr.msk.f32.vlgmr.msra.gmra.mxu1 %vm686_vm7, %v2317_v29  ;;  %14622 = vmatprep.subr.mxu1 %v15885_v4 }
 0x36e   : > { %14632 = vmatmul.mubr.msk.bf16.vlgmr.msra.gmra.mxu0 %vm217_vm2, %v13482_v38  ;;  %14623 = vmatpush3.msk.msra.mxu1 %vm16147_vm5, %v15889_v58 }
 0x36f   : > { %14624 = vmatprep.subr.mxu1 %v15885_v4  ;;  %14641 = vmatprep.subr.bf16.mxu0 %v15885_v4 }
 0x370   : > { %14625 = vmatpush3.msk.msra.mxu1 %vm16151_vm6, %v15889_v58  ;;  %14626 = vmatprep.mubr.msk.f32.mxu1 %vm15886_vm0, %v15885_v4 }
 0x371   : > { %14642 = vmatpush3.bf16.msra.mxu0 %v2776_v40  ;;  %14627 = vmatmul.mubr.msk.f32.vlgmr.msra.gmra.mxu1 %vm686_vm7, %v2564_v41 }
 0x372   : > { %14635 = vmatprep.subr.bf16.mxu1 %v15885_v4  ;;  %14637 = vmatprep.mubr.msk.bf16.mxu1 %vm15886_vm0, %v15885_v4 }
 0x373   : > { %14636 = vmatpush3.bf16.msra.mxu1 %v2727_v42  ;;  %14643 = vmatprep.mubr.msk.bf16.mxu0 %vm15886_vm0, %v15885_v4 }
 0x374   : > { %14647 = vmatprep.subr.bf16.mxu1 %v15885_v4  ;;  %14653 = vmatprep.subr.bf16.mxu0 %v15885_v4 }
 0x376   : > { %14638 = vmatmul.mubr.msk.bf16.vlgmr.msra.gmra.mxu1 %vm217_vm2, %v2665_v44  ;;  %14644 = vmatmul.mubr.msk.bf16.vlgmr.msra.gmra.mxu0 %vm217_vm2, %v13485_v19 }
 0x377   : > { %14648 = vmatpush3.bf16.msra.mxu1 %v2825_v45  ;;  %14654 = vmatpush3.bf16.msra.mxu0 %v2883_v46 }
 0x378   : > { %14649 = vmatprep.mubr.msk.bf16.mxu1 %vm15886_vm0, %v15885_v4  ;;  %14655 = vmatprep.mubr.msk.bf16.mxu0 %vm15886_vm0, %v15885_v4 }
 0x379   : > { %14659 = vmatprep.subr.bf16.mxu1 %v15885_v4  ;;  %14665 = vmatprep.subr.bf16.mxu0 %v15885_v4 }
 0x37e   : > { %14650 = vmatmul.mubr.msk.bf16.vlgmr.msra.gmra.mxu1 %vm217_vm2, %v13488_v20  ;;  %14656 = vmatmul.mubr.msk.bf16.vlgmr.msra.gmra.mxu0 %vm217_vm2, %v13490_v47 }
 0x37f   : > { %14660 = vmatpush3.bf16.msra.mxu1 %v2933_v48  ;;  %14666 = vmatpush3.bf16.msra.mxu0 %v2983_v49 }
 0x380   : > { %14661 = vmatprep.mubr.msk.bf16.mxu1 %vm15886_vm0, %v15885_v4  ;;  %14667 = vmatprep.mubr.msk.bf16.mxu0 %vm15886_vm0, %v15885_v4 }
 0x381   : > { %14671 = vmatprep.subr.bf16.mxu1 %v15885_v4  ;;  %14677 = vmatprep.subr.bf16.mxu0 %v15885_v4 }
 0x386   : > { %14662 = vmatmul.mubr.msk.bf16.vlgmr.msra.gmra.mxu1 %vm217_vm2, %v13492_v24  ;;  %14668 = vmatmul.mubr.msk.bf16.vlgmr.msra.gmra.mxu0 %vm217_vm2, %v13495_v62 }
 0x387   : > { %14672 = vmatpush3.bf16.msra.mxu1 %v3041_v52  ;;  %14678 = vmatpush3.bf16.msra.mxu0 %v3091_v53 }
 0x388   : > { %14673 = vmatprep.mubr.msk.bf16.mxu1 %vm15886_vm0, %v15885_v4  ;;  %14679 = vmatprep.mubr.msk.bf16.mxu0 %vm15886_vm0, %v15885_v4 }
 0x389   : > { %14683 = vmatprep.subr.mxu1 %v15885_v4  ;;  %14697 = vmatprep.subr.mxu0 %v15885_v4 }
 0x38e   : > { %14674 = vmatmul.mubr.msk.bf16.vlgmr.msra.gmra.mxu1 %vm217_vm2, %v13497_v54  ;;  %14680 = vmatmul.mubr.msk.bf16.vlgmr.msra.gmra.mxu0 %vm217_vm2, %v13499_v63 }
 0x38f   : > { %14684 = vmatpush3.msk.msra.mxu1 %vm16123_vm3, %v15889_v58  ;;  %14698 = vmatpush3.msk.msra.mxu0 %vm16123_vm3, %v15889_v58 }
 0x390   : > { %14685 = vmatprep.subr.mxu1 %v15885_v4  ;;  %14699 = vmatprep.subr.mxu0 %v15885_v4 }
 0x391   : > { %14686 = vmatpush3.msk.msra.mxu1 %vm16134_vm4, %v15889_v58  ;;  %14687 = vmatprep.mubr.msk.f32.mxu1 %vm15886_vm0, %v15885_v4 }
 0x392   : > { %14700 = vmatpush3.msk.msra.mxu0 %vm16134_vm4, %v15889_v58  ;;  %14701 = vmatprep.mubr.msk.f32.mxu0 %vm15886_vm0, %v15885_v4 }
 0x393   : > { %14690 = vmatprep.subr.mxu1 %v15885_v4  ;;  %14711 = vmatprep.subr.bf16.mxu0 %v15885_v4 }
 0x429   : > { %v2388_v5 = vpop.f32.mrf.mxu1  ;;  %v2560_v18 = vpop.f32.mrf.mxu0 }
 0x42b   : > { %v14607_v7 = vpop.f32.mrf.mxu1  ;;  %v14621_v8 = vpop.f32.mrf.mxu0 }
 0x42d   : > { %v2460_v9 = vpop.f32.mrf.mxu1 }
 0x42e   : > { %v2461_v21 = vadd.f32 %v2460_v9, %v2388_v5  ;;  %v2717_v12 = vpop.f32.mrf.mxu0 }
 0x42f   : > { %v14614_v14 = vpop.f32.mrf.mxu1 }
 0x430   : > { %v2471_v15 = vrot.slane %v2461_v21, %v16317_v33  ;;  %v14633_v16 = vpop.f32.mrf.mxu0  ;;  %v3492_v21 = vpop.permute.xlu0 %3491 }
 0x431   : > { %v2633_v22 = vpop.f32.mrf.mxu1 }
 0x432   : > { %v2472_v23 = vcombine.high %v2471_v15, %v2471_v15  ;;  %v2479_v25 = vrot.slane %v2471_v15, %v16317_v33  ;;  %v2634_v26 = vadd.f32 %v2633_v22, %v2560_v18  ;;  %v2720_v27 = vpop.f32.mrf.mxu0 }
 0x433   : > { %v14628_v28 = vpop.f32.mrf.mxu1 }
 0x434   : > { %v2486_v29 = vrot.slane %v2472_v23, %v16317_v33  ;;  %2489 = vst.msk [vmem:[%s16323_s16 + $0x4] sm:$0x1] %vm856_vm8, %v2479_v25  ;;  %v2644_v30 = vrot.slane %v2634_v26, %v16317_v33  ;;  %v14634_v31 = vpop.f32.mrf.mxu0  ;;  %v3497_v26 = vsel %vm221_vm1, %v3492_v21, 0 }
 0x436   : > { %2490 = vst.msk [vmem:[%s16323_s16 + $0x24] sm:$0x1] %vm856_vm8, %v2486_v29  ;;  %v2645_v32 = vcombine.high %v2644_v30, %v2644_v30  ;;  %v2652_v34 = vrot.slane %v2644_v30, %v16317_v33  ;;  %v2763_v35 = vpop.f32.mrf.mxu1  ;;  %v2812_v36 = vpop.f32.mrf.mxu0  ;;  %v13514_v29 = vld [vmem:[%s18542_s1 + $0x4] sm:$0xf] }
 0x437   : > { %v2764_v44 = vadd.f32 %v2763_v35, %v2717_v12  ;;  %v3587_v30 = vpop.permute.xlu1 %3586  ;;  %v3694_v35 = vpop.permute.xlu0 %3693 }
 0x438   : > { %v2659_v37 = vrot.slane %v2645_v32, %v16317_v33  ;;  %2662 = vst.msk [vmem:[%s16323_s16 + $0x5] sm:$0x1] %vm856_vm8, %v2652_v34  ;;  %v14639_v38 = vpop.f32.mrf.mxu1  ;;  %v14645_v39 = vpop.f32.mrf.mxu0  ;;  %v3592_v31 = vsel %vm221_vm1, %v3587_v30, 0  ;;  %v3543_v34 = vsel %vm221_vm1, %v16456_v10, 0  ;;  %v13517_v10 = vld [vmem:[%s18542_s1 + $0x8] sm:$0xf] }
 0x439   : > { %v2818_v20 = vadd.f32 %v2812_v36, %v2764_v44  ;;  %v3481_v36 = vld [vmem:[%s18542_s1] sm:$0xf]  ;;  %v3699_v38 = vsel %vm221_vm1, %v3694_v35, 0 }
 0x43a   : > { %2663 = vst.msk [vmem:[%s16323_s16 + $0x25] sm:$0x1] %vm856_vm8, %v2659_v37  ;;  %v2766_v40 = vpop.f32.mrf.mxu1  ;;  %v2815_v41 = vpop.f32.mrf.mxu0  ;;  %v3641_v37 = vsel %vm221_vm1, %v16459_v11, 0  ;;  %v13520_v11 = vld [vmem:[%s18542_s1 + $0xc] sm:$0xf] }
 0x43b   : > { %v3744_v39 = vpop.permute.xlu1 %3743  ;;  %v13522_v40 = vld [vmem:[%s18542_s1 + $0x10] sm:$0xf] }
 0x43c   : > { %v14640_v42 = vpop.f32.mrf.mxu1  ;;  %v14646_v43 = vpop.f32.mrf.mxu0  ;;  %v3749_v41 = vsel %vm221_vm1, %v3744_v39, 0 }
 0x43d   : > { %v3799_v42 = vsel %vm221_vm1, %v16468_v13, 0  ;;  %v3852_v43 = vpop.permute.xlu0 %3851  ;;  %v13524_v13 = vld [vmem:[%s18542_s1 + $0x14] sm:$0xf] }
 0x43e   : > { %v2861_v19 = vpop.f32.mrf.mxu1  ;;  %v2919_v45 = vpop.f32.mrf.mxu0 }
 0x43f   : > { %v2867_v49 = vadd.f32 %v2861_v19, %v2818_v20  ;;  %v3902_v44 = vpop.permute.xlu1 %3901  ;;  %v13527_v19 = vld [vmem:[%s18542_s1 + $0x18] sm:$0xf]  ;;  %v13531_v20 = vld [vmem:[%s18542_s1 + $0x20] sm:$0xf] }
 0x440   : > { %v14651_v46 = vpop.f32.mrf.mxu1  ;;  %v14657_v3 = vpop.f32.mrf.mxu0 }
 0x441   : > { %v2925_v52 = vadd.f32 %v2919_v45, %v2867_v49  ;;  %v3857_v45 = vsel %vm221_vm1, %v3852_v43, 0  ;;  %v3907_v46 = vsel %vm221_vm1, %v3902_v44, 0  ;;  %v13529_v3 = vld [vmem:[%s18542_s1 + $0x1c] sm:$0xf] }
 0x442   : > { %v2864_v47 = vpop.f32.mrf.mxu1  ;;  %v2922_v48 = vpop.f32.mrf.mxu0 }
 0x443   : > { %v16764_v47 = vld [vmem:[%s15997_s27 + $0xc] sm:$0x3]  ;;  %v16767_v48 = vld [vmem:[%s15997_s27 + $0xe] sm:$0x3] }
 0x444   : > { %v14652_v50 = vpop.f32.mrf.mxu1  ;;  %v14658_v51 = vpop.f32.mrf.mxu0  ;;  %v5122_v49 = vrot.slane %v16764_v47, %v16013_v6 }
 0x445   : > { %v5324_v50 = vrot.slane %v16767_v48, %v16013_v6  ;;  %v16776_v51 = vld [vmem:[%s15997_s27 + $0x10] sm:$0x3] }
 0x446   : > { %v2969_v24 = vpop.f32.mrf.mxu1  ;;  %v3019_v62 = vpop.f32.mrf.mxu0  ;;  %5123 = vrot.lane.b32.xlu0 %v5122_v49, %s15887_s29  ;;  %5218 = vrot.lane.b32.xlu1 %v5122_v49, %s15888_s30 }
 0x447   : > { %v2975_v63 = vadd.f32 %v2969_v24, %v2925_v52  ;;  %v5482_v24 = vrot.slane %v16776_v51, %v16013_v6 }
 0x448   : > { %v14663_v53 = vpop.f32.mrf.mxu1  ;;  %v14669_v54 = vpop.f32.mrf.mxu0 }
 0x449   : > { %v3025_v18 = vadd.f32 %v3019_v62, %v2975_v63 }
 0x44a   : > { %v2972_v17 = vpop.f32.mrf.mxu1  ;;  %v3022_v0 = vpop.f32.mrf.mxu0  ;;  %5325 = vrot.lane.b32.xlu0 %v5324_v50, %s15887_s29  ;;  %5375 = vrot.lane.b32.xlu1 %v5324_v50, %s15888_s30 }
 0x44c   : > { %v14664_v2 = vpop.f32.mrf.mxu1  ;;  %v14670_v5 = vpop.f32.mrf.mxu0 }
 0x44e   : > { %v3077_v7 = vpop.f32.mrf.mxu1  ;;  %v3127_v8 = vpop.f32.mrf.mxu0  ;;  %5483 = vrot.lane.b32.xlu0 %v5482_v24, %s15887_s29  ;;  %5533 = vrot.lane.b32.xlu1 %v5482_v24, %s15888_s30 }
 0x44f   : > { %v3083_v9 = vadd.f32 %v3077_v7, %v3025_v18 }
 0x450   : > { %v14675_v12 = vpop.f32.mrf.mxu1  ;;  %v14681_v14 = vpop.f32.mrf.mxu0 }
 0x451   : > { %v3133_v15 = vadd.f32 %v3127_v8, %v3083_v9 }
 0x452   : > { %v3080_v16 = vpop.f32.mrf.mxu1  ;;  %v3130_v22 = vpop.f32.mrf.mxu0 }
 0x453   : > { %v3135_v23 = vrot.slane %v3133_v15, 2  ;;  %v3307_v25 = vrot.slane %v3133_v15, 6  ;;  %v3380_v32 = vrot.slane %v3133_v15, 4 }
 0x454   : > { %v14676_v27 = vpop.f32.mrf.mxu1  ;;  %v14682_v28 = vpop.f32.mrf.mxu0 }
 0x455   : > { %14688 = vmatmul.mubr.msk.f32.vlgmr.msra.gmra.mxu1 %vm686_vm7, %v3135_v23  ;;  %14702 = vmatmul.mubr.msk.f32.vlgmr.msra.gmra.mxu0 %vm686_vm7, %v3307_v25 }
 0x456   : > { %14691 = vmatpush3.msk.msra.mxu1 %vm16147_vm5, %v15889_v58  ;;  %14712 = vmatpush3.bf16.msra.mxu0 %v3497_v26 }
 0x457   : > { %14692 = vmatprep.subr.mxu1 %v15885_v4  ;;  %14694 = vmatprep.mubr.msk.f32.mxu1 %vm15886_vm0, %v15885_v4 }
 0x458   : > { %14693 = vmatpush3.msk.msra.mxu1 %vm16151_vm6, %v15889_v58  ;;  %14713 = vmatprep.mubr.msk.bf16.mxu0 %vm15886_vm0, %v15885_v4 }
 0x459   : > { %14695 = vmatmul.mubr.msk.f32.vlgmr.msra.gmra.mxu1 %vm686_vm7, %v3133_v15  ;;  %14704 = vmatprep.subr.mxu1 %v15885_v4 }
 0x45a   : > { %14714 = vmatmul.mubr.msk.bf16.vlgmr.msra.gmra.mxu0 %vm217_vm2, %v13514_v29  ;;  %14705 = vmatpush3.msk.msra.mxu1 %vm16147_vm5, %v15889_v58 }
 0x45b   : > { %14706 = vmatprep.subr.mxu1 %v15885_v4  ;;  %14723 = vmatprep.subr.bf16.mxu0 %v15885_v4 }
 0x45c   : > { %14707 = vmatpush3.msk.msra.mxu1 %vm16151_vm6, %v15889_v58  ;;  %14708 = vmatprep.mubr.msk.f32.mxu1 %vm15886_vm0, %v15885_v4 }
 0x45d   : > { %14724 = vmatpush3.bf16.msra.mxu0 %v3592_v31  ;;  %14709 = vmatmul.mubr.msk.f32.vlgmr.msra.gmra.mxu1 %vm686_vm7, %v3380_v32 }
 0x45e   : > { %14717 = vmatprep.subr.bf16.mxu1 %v15885_v4  ;;  %14719 = vmatprep.mubr.msk.bf16.mxu1 %vm15886_vm0, %v15885_v4 }
 0x45f   : > { %14718 = vmatpush3.bf16.msra.mxu1 %v3543_v34  ;;  %14725 = vmatprep.mubr.msk.bf16.mxu0 %vm15886_vm0, %v15885_v4 }
 0x460   : > { %14729 = vmatprep.subr.bf16.mxu1 %v15885_v4  ;;  %14735 = vmatprep.subr.bf16.mxu0 %v15885_v4 }
 0x462   : > { %14720 = vmatmul.mubr.msk.bf16.vlgmr.msra.gmra.mxu1 %vm217_vm2, %v3481_v36  ;;  %14726 = vmatmul.mubr.msk.bf16.vlgmr.msra.gmra.mxu0 %vm217_vm2, %v13517_v10 }
 0x463   : > { %14730 = vmatpush3.bf16.msra.mxu1 %v3641_v37  ;;  %14736 = vmatpush3.bf16.msra.mxu0 %v3699_v38 }
 0x464   : > { %14731 = vmatprep.mubr.msk.bf16.mxu1 %vm15886_vm0, %v15885_v4  ;;  %14737 = vmatprep.mubr.msk.bf16.mxu0 %vm15886_vm0, %v15885_v4 }
 0x465   : > { %14741 = vmatprep.subr.bf16.mxu1 %v15885_v4  ;;  %14747 = vmatprep.subr.bf16.mxu0 %v15885_v4 }
 0x46a   : > { %14732 = vmatmul.mubr.msk.bf16.vlgmr.msra.gmra.mxu1 %vm217_vm2, %v13520_v11  ;;  %14738 = vmatmul.mubr.msk.bf16.vlgmr.msra.gmra.mxu0 %vm217_vm2, %v13522_v40 }
 0x46b   : > { %14742 = vmatpush3.bf16.msra.mxu1 %v3749_v41  ;;  %14748 = vmatpush3.bf16.msra.mxu0 %v3799_v42 }
 0x46c   : > { %14743 = vmatprep.mubr.msk.bf16.mxu1 %vm15886_vm0, %v15885_v4  ;;  %14749 = vmatprep.mubr.msk.bf16.mxu0 %vm15886_vm0, %v15885_v4 }
 0x46d   : > { %14753 = vmatprep.subr.bf16.mxu1 %v15885_v4  ;;  %14759 = vmatprep.subr.bf16.mxu0 %v15885_v4 }
 0x472   : > { %14744 = vmatmul.mubr.msk.bf16.vlgmr.msra.gmra.mxu1 %vm217_vm2, %v13524_v13  ;;  %14750 = vmatmul.mubr.msk.bf16.vlgmr.msra.gmra.mxu0 %vm217_vm2, %v13527_v19 }
 0x473   : > { %14754 = vmatpush3.bf16.msra.mxu1 %v3857_v45  ;;  %14760 = vmatpush3.bf16.msra.mxu0 %v3907_v46 }
 0x474   : > { %14755 = vmatprep.mubr.msk.bf16.mxu1 %vm15886_vm0, %v15885_v4  ;;  %14761 = vmatprep.mubr.msk.bf16.mxu0 %vm15886_vm0, %v15885_v4 }
 0x475   : > { %14765 = vmatprep.subr.mxu1 %v15885_v4  ;;  %14779 = vmatprep.subr.mxu0 %v15885_v4 }
 0x47a   : > { %14756 = vmatmul.mubr.msk.bf16.vlgmr.msra.gmra.mxu1 %vm217_vm2, %v13529_v3  ;;  %14762 = vmatmul.mubr.msk.bf16.vlgmr.msra.gmra.mxu0 %vm217_vm2, %v13531_v20 }
 0x47b   : > { %14766 = vmatpush3.msk.msra.mxu1 %vm16123_vm3, %v15889_v58  ;;  %14780 = vmatpush3.msk.msra.mxu0 %vm16123_vm3, %v15889_v58 }
 0x47c   : > { %14767 = vmatprep.subr.mxu1 %v15885_v4  ;;  %14781 = vmatprep.subr.mxu0 %v15885_v4 }
 0x47d   : > { %14768 = vmatpush3.msk.msra.mxu1 %vm16134_vm4, %v15889_v58  ;;  %14769 = vmatprep.mubr.msk.f32.mxu1 %vm15886_vm0, %v15885_v4 }
 0x47e   : > { %14782 = vmatpush3.msk.msra.mxu0 %vm16134_vm4, %v15889_v58  ;;  %14783 = vmatprep.mubr.msk.f32.mxu0 %vm15886_vm0, %v15885_v4 }
 0x47f   : > { %14772 = vmatprep.subr.mxu1 %v15885_v4  ;;  %14793 = vmatprep.subr.bf16.mxu0 %v15885_v4 }
 0x515   : > { %v3204_v62 = vpop.f32.mrf.mxu1  ;;  %v3376_v52 = vpop.f32.mrf.mxu0 }
 0x517   : > { %v14689_v53 = vpop.f32.mrf.mxu1  ;;  %v14703_v54 = vpop.f32.mrf.mxu0 }
 0x519   : > { %v3276_v63 = vpop.f32.mrf.mxu1 }
 0x51a   : > { %v3277_v17 = vadd.f32 %v3276_v63, %v3204_v62  ;;  %v3533_v0 = vpop.f32.mrf.mxu0 }
 0x51b   : > { %v14696_v2 = vpop.f32.mrf.mxu1 }
 0x51c   : > { %v3287_v5 = vrot.slane %v3277_v17, %v16317_v33  ;;  %v14715_v18 = vpop.f32.mrf.mxu0  ;;  %v4308_v17 = vpop.permute.xlu0 %4307 }
 0x51d   : > { %v3449_v7 = vpop.f32.mrf.mxu1 }
 0x51e   : > { %v3288_v8 = vcombine.high %v3287_v5, %v3287_v5  ;;  %v3295_v9 = vrot.slane %v3287_v5, %v16317_v33  ;;  %v3450_v21 = vadd.f32 %v3449_v7, %v3376_v52  ;;  %v3536_v12 = vpop.f32.mrf.mxu0 }
 0x51f   : > { %v14710_v14 = vpop.f32.mrf.mxu1 }
 0x520   : > { %v3302_v15 = vrot.slane %v3288_v8, %v16317_v33  ;;  %3305 = vst.msk [vmem:[%s16323_s16 + $0x6] sm:$0x1] %vm856_vm8, %v3295_v9  ;;  %v3460_v16 = vrot.slane %v3450_v21, %v16317_v33  ;;  %v14716_v22 = vpop.f32.mrf.mxu0  ;;  %v4313_v21 = vsel %vm221_vm1, %v4308_v17, 0 }
 0x522   : > { %3306 = vst.msk [vmem:[%s16323_s16 + $0x26] sm:$0x1] %vm856_vm8, %v3302_v15  ;;  %v3461_v23 = vcombine.high %v3460_v16, %v3460_v16  ;;  %v3468_v25 = vrot.slane %v3460_v16, %v16317_v33  ;;  %v3579_v26 = vpop.f32.mrf.mxu1  ;;  %v3628_v27 = vpop.f32.mrf.mxu0  ;;  %v13546_v15 = vld [vmem:[%s18542_s1 + $0x4] sm:$0xf] }
 0x523   : > { %v3580_v36 = vadd.f32 %v3579_v26, %v3533_v0  ;;  %v4403_v16 = vpop.permute.xlu1 %4402  ;;  %v4510_v26 = vpop.permute.xlu0 %4509 }
 0x524   : > { %v3475_v28 = vrot.slane %v3461_v23, %v16317_v33  ;;  %3478 = vst.msk [vmem:[%s16323_s16 + $0x7] sm:$0x1] %vm856_vm8, %v3468_v25  ;;  %v14721_v29 = vpop.f32.mrf.mxu1  ;;  %v14727_v30 = vpop.f32.mrf.mxu0  ;;  %v4408_v22 = vsel %vm221_vm1, %v4403_v16, 0  ;;  %v4359_v25 = vsel %vm221_vm1, %v16610_v55, 0  ;;  %v13549_v55 = vld [vmem:[%s18542_s1 + $0x8] sm:$0xf] }
 0x525   : > { %v3634_v11 = vadd.f32 %v3628_v27, %v3580_v36  ;;  %v4297_v27 = vld [vmem:[%s18542_s1] sm:$0xf]  ;;  %v4515_v29 = vsel %vm221_vm1, %v4510_v26, 0 }
 0x526   : > { %3479 = vst.msk [vmem:[%s16323_s16 + $0x27] sm:$0x1] %vm856_vm8, %v3475_v28  ;;  %v3582_v31 = vpop.f32.mrf.mxu1  ;;  %v3631_v32 = vpop.f32.mrf.mxu0  ;;  %v4457_v28 = vsel %vm221_vm1, %v16613_v57, 0  ;;  %v13552_v57 = vld [vmem:[%s18542_s1 + $0xc] sm:$0xf] }
 0x527   : > { %v4560_v30 = vpop.permute.xlu1 %4559  ;;  %v13554_v31 = vld [vmem:[%s18542_s1 + $0x10] sm:$0xf] }
 0x528   : > { %v14722_v34 = vpop.f32.mrf.mxu1  ;;  %v14728_v35 = vpop.f32.mrf.mxu0  ;;  %v4565_v32 = vsel %vm221_vm1, %v4560_v30, 0 }
 0x529   : > { %v4615_v34 = vsel %vm221_vm1, %v16622_v1, 0  ;;  %v4668_v35 = vpop.permute.xlu0 %4667  ;;  %v13556_v1 = vld [vmem:[%s18542_s1 + $0x14] sm:$0xf] }
 0x52a   : > { %v3677_v10 = vpop.f32.mrf.mxu1  ;;  %v3735_v37 = vpop.f32.mrf.mxu0 }
 0x52b   : > { %v3683_v42 = vadd.f32 %v3677_v10, %v3634_v11  ;;  %v4718_v36 = vpop.permute.xlu1 %4717  ;;  %v13559_v10 = vld [vmem:[%s18542_s1 + $0x18] sm:$0xf]  ;;  %v13563_v11 = vld [vmem:[%s18542_s1 + $0x20] sm:$0xf] }
 0x52c   : > { %v14733_v38 = vpop.f32.mrf.mxu1  ;;  %v14739_v39 = vpop.f32.mrf.mxu0 }
 0x52d   : > { %v3741_v45 = vadd.f32 %v3735_v37, %v3683_v42  ;;  %v4673_v37 = vsel %vm221_vm1, %v4668_v35, 0  ;;  %v4723_v38 = vsel %vm221_vm1, %v4718_v36, 0  ;;  %v13561_v39 = vld [vmem:[%s18542_s1 + $0x1c] sm:$0xf] }
 0x52e   : > { %v3680_v40 = vpop.f32.mrf.mxu1  ;;  %v3738_v41 = vpop.f32.mrf.mxu0 }
 0x52f   : > { %v16918_v40 = vld [vmem:[%s15997_s27 + $0xe] sm:$0x3]  ;;  %v16921_v41 = vld [vmem:[%s15997_s27 + $0x10] sm:$0x3] }
 0x530   : > { %v14734_v43 = vpop.f32.mrf.mxu1  ;;  %v14740_v44 = vpop.f32.mrf.mxu0  ;;  %v5938_v42 = vrot.slane %v16918_v40, %v16013_v6 }
 0x531   : > { %v6140_v43 = vrot.slane %v16921_v41, %v16013_v6  ;;  %v16930_v44 = vld [vmem:[%s15997_s27 + $0x12] sm:$0x3] }
 0x532   : > { %v3785_v13 = vpop.f32.mrf.mxu1  ;;  %v3835_v19 = vpop.f32.mrf.mxu0  ;;  %5939 = vrot.lane.b32.xlu0 %v5938_v42, %s15887_s29  ;;  %6034 = vrot.lane.b32.xlu1 %v5938_v42, %s15888_s30 }
 0x533   : > { %v3791_v20 = vadd.f32 %v3785_v13, %v3741_v45  ;;  %v6298_v13 = vrot.slane %v16930_v44, %v16013_v6 }
 0x534   : > { %v14745_v46 = vpop.f32.mrf.mxu1  ;;  %v14751_v3 = vpop.f32.mrf.mxu0 }
 0x535   : > { %v3841_v52 = vadd.f32 %v3835_v19, %v3791_v20 }
 0x536   : > { %v3788_v49 = vpop.f32.mrf.mxu1  ;;  %v3838_v50 = vpop.f32.mrf.mxu0  ;;  %6141 = vrot.lane.b32.xlu0 %v6140_v43, %s15887_s29  ;;  %6191 = vrot.lane.b32.xlu1 %v6140_v43, %s15888_s30 }
 0x538   : > { %v14746_v24 = vpop.f32.mrf.mxu1  ;;  %v14752_v62 = vpop.f32.mrf.mxu0 }
 0x53a   : > { %v3893_v53 = vpop.f32.mrf.mxu1  ;;  %v3943_v54 = vpop.f32.mrf.mxu0  ;;  %6299 = vrot.lane.b32.xlu0 %v6298_v13, %s15887_s29  ;;  %6349 = vrot.lane.b32.xlu1 %v6298_v13, %s15888_s30 }
 0x53b   : > { %v3899_v63 = vadd.f32 %v3893_v53, %v3841_v52 }
 0x53c   : > { %v14757_v0 = vpop.f32.mrf.mxu1  ;;  %v14763_v2 = vpop.f32.mrf.mxu0 }
 0x53d   : > { %v3949_v5 = vadd.f32 %v3943_v54, %v3899_v63 }
 0x53e   : > { %v3896_v18 = vpop.f32.mrf.mxu1  ;;  %v3946_v7 = vpop.f32.mrf.mxu0 }
 0x53f   : > { %v3951_v8 = vrot.slane %v3949_v5, 2  ;;  %v4123_v9 = vrot.slane %v3949_v5, 6  ;;  %v4196_v23 = vrot.slane %v3949_v5, 4 }
 0x540   : > { %v14758_v12 = vpop.f32.mrf.mxu1  ;;  %v14764_v14 = vpop.f32.mrf.mxu0 }
 0x541   : > { %14770 = vmatmul.mubr.msk.f32.vlgmr.msra.gmra.mxu1 %vm686_vm7, %v3951_v8  ;;  %14784 = vmatmul.mubr.msk.f32.vlgmr.msra.gmra.mxu0 %vm686_vm7, %v4123_v9 }
 0x542   : > { %14773 = vmatpush3.msk.msra.mxu1 %vm16147_vm5, %v15889_v58  ;;  %14794 = vmatpush3.bf16.msra.mxu0 %v4313_v21 }
 0x543   : > { %14774 = vmatprep.subr.mxu1 %v15885_v4  ;;  %14776 = vmatprep.mubr.msk.f32.mxu1 %vm15886_vm0, %v15885_v4 }
 0x544   : > { %14775 = vmatpush3.msk.msra.mxu1 %vm16151_vm6, %v15889_v58  ;;  %14795 = vmatprep.mubr.msk.bf16.mxu0 %vm15886_vm0, %v15885_v4 }
 0x545   : > { %14777 = vmatmul.mubr.msk.f32.vlgmr.msra.gmra.mxu1 %vm686_vm7, %v3949_v5  ;;  %14786 = vmatprep.subr.mxu1 %v15885_v4 }
 0x546   : > { %14796 = vmatmul.mubr.msk.bf16.vlgmr.msra.gmra.mxu0 %vm217_vm2, %v13546_v15  ;;  %14787 = vmatpush3.msk.msra.mxu1 %vm16147_vm5, %v15889_v58 }
 0x547   : > { %14788 = vmatprep.subr.mxu1 %v15885_v4  ;;  %14805 = vmatprep.subr.bf16.mxu0 %v15885_v4 }
 0x548   : > { %14789 = vmatpush3.msk.msra.mxu1 %vm16151_vm6, %v15889_v58  ;;  %14790 = vmatprep.mubr.msk.f32.mxu1 %vm15886_vm0, %v15885_v4 }
 0x549   : > { %14806 = vmatpush3.bf16.msra.mxu0 %v4408_v22  ;;  %14791 = vmatmul.mubr.msk.f32.vlgmr.msra.gmra.mxu1 %vm686_vm7, %v4196_v23 }
 0x54a   : > { %14799 = vmatprep.subr.bf16.mxu1 %v15885_v4  ;;  %14801 = vmatprep.mubr.msk.bf16.mxu1 %vm15886_vm0, %v15885_v4 }
 0x54b   : > { %14800 = vmatpush3.bf16.msra.mxu1 %v4359_v25  ;;  %14807 = vmatprep.mubr.msk.bf16.mxu0 %vm15886_vm0, %v15885_v4 }
 0x54c   : > { %14811 = vmatprep.subr.bf16.mxu1 %v15885_v4  ;;  %14817 = vmatprep.subr.bf16.mxu0 %v15885_v4 }
 0x54e   : > { %14802 = vmatmul.mubr.msk.bf16.vlgmr.msra.gmra.mxu1 %vm217_vm2, %v4297_v27  ;;  %14808 = vmatmul.mubr.msk.bf16.vlgmr.msra.gmra.mxu0 %vm217_vm2, %v13549_v55 }
 0x54f   : > { %14812 = vmatpush3.bf16.msra.mxu1 %v4457_v28  ;;  %14818 = vmatpush3.bf16.msra.mxu0 %v4515_v29 }
 0x550   : > { %14813 = vmatprep.mubr.msk.bf16.mxu1 %vm15886_vm0, %v15885_v4  ;;  %14819 = vmatprep.mubr.msk.bf16.mxu0 %vm15886_vm0, %v15885_v4 }
 0x551   : > { %14823 = vmatprep.subr.bf16.mxu1 %v15885_v4  ;;  %14829 = vmatprep.subr.bf16.mxu0 %v15885_v4 }
 0x556   : > { %14814 = vmatmul.mubr.msk.bf16.vlgmr.msra.gmra.mxu1 %vm217_vm2, %v13552_v57  ;;  %14820 = vmatmul.mubr.msk.bf16.vlgmr.msra.gmra.mxu0 %vm217_vm2, %v13554_v31 }
 0x557   : > { %14824 = vmatpush3.bf16.msra.mxu1 %v4565_v32  ;;  %14830 = vmatpush3.bf16.msra.mxu0 %v4615_v34 }
 0x558   : > { %14825 = vmatprep.mubr.msk.bf16.mxu1 %vm15886_vm0, %v15885_v4  ;;  %14831 = vmatprep.mubr.msk.bf16.mxu0 %vm15886_vm0, %v15885_v4 }
 0x559   : > { %14835 = vmatprep.subr.bf16.mxu1 %v15885_v4  ;;  %14841 = vmatprep.subr.bf16.mxu0 %v15885_v4 }
 0x55e   : > { %14826 = vmatmul.mubr.msk.bf16.vlgmr.msra.gmra.mxu1 %vm217_vm2, %v13556_v1  ;;  %14832 = vmatmul.mubr.msk.bf16.vlgmr.msra.gmra.mxu0 %vm217_vm2, %v13559_v10 }
 0x55f   : > { %14836 = vmatpush3.bf16.msra.mxu1 %v4673_v37  ;;  %14842 = vmatpush3.bf16.msra.mxu0 %v4723_v38 }
 0x560   : > { %14837 = vmatprep.mubr.msk.bf16.mxu1 %vm15886_vm0, %v15885_v4  ;;  %14843 = vmatprep.mubr.msk.bf16.mxu0 %vm15886_vm0, %v15885_v4 }
 0x561   : > { %14847 = vmatprep.subr.mxu1 %v15885_v4  ;;  %14861 = vmatprep.subr.mxu0 %v15885_v4 }
 0x566   : > { %14838 = vmatmul.mubr.msk.bf16.vlgmr.msra.gmra.mxu1 %vm217_vm2, %v13561_v39  ;;  %14844 = vmatmul.mubr.msk.bf16.vlgmr.msra.gmra.mxu0 %vm217_vm2, %v13563_v11 }
 0x567   : > { %14848 = vmatpush3.msk.msra.mxu1 %vm16123_vm3, %v15889_v58  ;;  %14862 = vmatpush3.msk.msra.mxu0 %vm16123_vm3, %v15889_v58 }
 0x568   : > { %14849 = vmatprep.subr.mxu1 %v15885_v4  ;;  %14863 = vmatprep.subr.mxu0 %v15885_v4 }
 0x569   : > { %14850 = vmatpush3.msk.msra.mxu1 %vm16134_vm4, %v15889_v58  ;;  %14851 = vmatprep.mubr.msk.f32.mxu1 %vm15886_vm0, %v15885_v4 }
 0x56a   : > { %14864 = vmatpush3.msk.msra.mxu0 %vm16134_vm4, %v15889_v58  ;;  %14865 = vmatprep.mubr.msk.f32.mxu0 %vm15886_vm0, %v15885_v4 }
 0x56b   : > { %14854 = vmatprep.subr.mxu1 %v15885_v4  ;;  %14875 = vmatprep.subr.bf16.mxu0 %v15885_v4 }
 0x601   : > { %v4020_v19 = vpop.f32.mrf.mxu1  ;;  %v4192_v45 = vpop.f32.mrf.mxu0 }
 0x603   : > { %v14771_v46 = vpop.f32.mrf.mxu1  ;;  %v14785_v3 = vpop.f32.mrf.mxu0 }
 0x605   : > { %v4092_v20 = vpop.f32.mrf.mxu1 }
 0x606   : > { %v4093_v49 = vadd.f32 %v4092_v20, %v4020_v19  ;;  %v4349_v50 = vpop.f32.mrf.mxu0 }
 0x607   : > { %v14778_v24 = vpop.f32.mrf.mxu1 }
 0x608   : > { %v4103_v62 = vrot.slane %v4093_v49, %v16317_v33  ;;  %v14797_v52 = vpop.f32.mrf.mxu0  ;;  %v5124_v49 = vpop.permute.xlu0 %5123 }
 0x609   : > { %v4265_v53 = vpop.f32.mrf.mxu1 }
 0x60a   : > { %v4104_v54 = vcombine.high %v4103_v62, %v4103_v62  ;;  %v4111_v63 = vrot.slane %v4103_v62, %v16317_v33  ;;  %v4266_v17 = vadd.f32 %v4265_v53, %v4192_v45  ;;  %v4352_v0 = vpop.f32.mrf.mxu0 }
 0x60b   : > { %v14792_v2 = vpop.f32.mrf.mxu1 }
 0x60c   : > { %v4118_v5 = vrot.slane %v4104_v54, %v16317_v33  ;;  %4121 = vst.msk [vmem:[%s16323_s16 + $0x8] sm:$0x1] %vm856_vm8, %v4111_v63  ;;  %v4276_v18 = vrot.slane %v4266_v17, %v16317_v33  ;;  %v14798_v7 = vpop.f32.mrf.mxu0  ;;  %v5129_v17 = vsel %vm221_vm1, %v5124_v49, 0 }
 0x60e   : > { %4122 = vst.msk [vmem:[%s16323_s16 + $0x28] sm:$0x1] %vm856_vm8, %v4118_v5  ;;  %v4277_v8 = vcombine.high %v4276_v18, %v4276_v18  ;;  %v4284_v9 = vrot.slane %v4276_v18, %v16317_v33  ;;  %v4395_v21 = vpop.f32.mrf.mxu1  ;;  %v4444_v12 = vpop.f32.mrf.mxu0  ;;  %v13578_v5 = vld [vmem:[%s18542_s1 + $0x4] sm:$0xf] }
 0x60f   : > { %v4396_v27 = vadd.f32 %v4395_v21, %v4349_v50  ;;  %v5219_v18 = vpop.permute.xlu1 %5218  ;;  %v5326_v21 = vpop.permute.xlu0 %5325 }
 0x610   : > { %v4291_v14 = vrot.slane %v4277_v8, %v16317_v33  ;;  %4294 = vst.msk [vmem:[%s16323_s16 + $0x9] sm:$0x1] %vm856_vm8, %v4284_v9  ;;  %v14803_v15 = vpop.f32.mrf.mxu1  ;;  %v14809_v16 = vpop.f32.mrf.mxu0  ;;  %v5224_v7 = vsel %vm221_vm1, %v5219_v18, 0  ;;  %v5175_v9 = vsel %vm221_vm1, %v16764_v47, 0  ;;  %v13581_v47 = vld [vmem:[%s18542_s1 + $0x8] sm:$0xf] }
 0x611   : > { %v4450_v57 = vadd.f32 %v4444_v12, %v4396_v27  ;;  %v5113_v12 = vld [vmem:[%s18542_s1] sm:$0xf]  ;;  %v5331_v15 = vsel %vm221_vm1, %v5326_v21, 0 }
 0x612   : > { %4295 = vst.msk [vmem:[%s16323_s16 + $0x29] sm:$0x1] %vm856_vm8, %v4291_v14  ;;  %v4398_v22 = vpop.f32.mrf.mxu1  ;;  %v4447_v23 = vpop.f32.mrf.mxu0  ;;  %v5273_v14 = vsel %vm221_vm1, %v16767_v48, 0  ;;  %v13584_v48 = vld [vmem:[%s18542_s1 + $0xc] sm:$0xf] }
 0x613   : > { %v5376_v16 = vpop.permute.xlu1 %5375  ;;  %v13586_v22 = vld [vmem:[%s18542_s1 + $0x10] sm:$0xf] }
 0x614   : > { %v14804_v25 = vpop.f32.mrf.mxu1  ;;  %v14810_v26 = vpop.f32.mrf.mxu0  ;;  %v5381_v23 = vsel %vm221_vm1, %v5376_v16, 0 }
 0x615   : > { %v5431_v25 = vsel %vm221_vm1, %v16776_v51, 0  ;;  %v5484_v26 = vpop.permute.xlu0 %5483  ;;  %v13588_v51 = vld [vmem:[%s18542_s1 + $0x14] sm:$0xf] }
 0x616   : > { %v4493_v55 = vpop.f32.mrf.mxu1  ;;  %v4551_v28 = vpop.f32.mrf.mxu0 }
 0x617   : > { %v4499_v34 = vadd.f32 %v4493_v55, %v4450_v57  ;;  %v5534_v27 = vpop.permute.xlu1 %5533  ;;  %v13591_v55 = vld [vmem:[%s18542_s1 + $0x18] sm:$0xf]  ;;  %v13595_v57 = vld [vmem:[%s18542_s1 + $0x20] sm:$0xf] }
 0x618   : > { %v14815_v29 = vpop.f32.mrf.mxu1  ;;  %v14821_v30 = vpop.f32.mrf.mxu0 }
 0x619   : > { %v4557_v37 = vadd.f32 %v4551_v28, %v4499_v34  ;;  %v5489_v28 = vsel %vm221_vm1, %v5484_v26, 0  ;;  %v5539_v29 = vsel %vm221_vm1, %v5534_v27, 0  ;;  %v13593_v30 = vld [vmem:[%s18542_s1 + $0x1c] sm:$0xf] }
 0x61a   : > { %v4496_v31 = vpop.f32.mrf.mxu1  ;;  %v4554_v32 = vpop.f32.mrf.mxu0 }
 0x61b   : > { %v17072_v31 = vld [vmem:[%s15997_s27 + $0x10] sm:$0x3]  ;;  %v17075_v32 = vld [vmem:[%s15997_s27 + $0x12] sm:$0x3] }
 0x61c   : > { %v14816_v35 = vpop.f32.mrf.mxu1  ;;  %v14822_v36 = vpop.f32.mrf.mxu0  ;;  %v6754_v34 = vrot.slane %v17072_v31, %v16013_v6 }
 0x61d   : > { %v6956_v35 = vrot.slane %v17075_v32, %v16013_v6  ;;  %v17084_v36 = vld [vmem:[%s15997_s27 + $0x14] sm:$0x3] }
 0x61e   : > { %v4601_v1 = vpop.f32.mrf.mxu1  ;;  %v4651_v10 = vpop.f32.mrf.mxu0  ;;  %6755 = vrot.lane.b32.xlu0 %v6754_v34, %s15887_s29  ;;  %6850 = vrot.lane.b32.xlu1 %v6754_v34, %s15888_s30 }
 0x61f   : > { %v4607_v11 = vadd.f32 %v4601_v1, %v4557_v37  ;;  %v7114_v1 = vrot.slane %v17084_v36, %v16013_v6 }
 0x620   : > { %v14827_v38 = vpop.f32.mrf.mxu1  ;;  %v14833_v39 = vpop.f32.mrf.mxu0 }
 0x621   : > { %v4657_v45 = vadd.f32 %v4651_v10, %v4607_v11 }
 0x622   : > { %v4604_v42 = vpop.f32.mrf.mxu1  ;;  %v4654_v43 = vpop.f32.mrf.mxu0  ;;  %6957 = vrot.lane.b32.xlu0 %v6956_v35, %s15887_s29  ;;  %7007 = vrot.lane.b32.xlu1 %v6956_v35, %s15888_s30 }
 0x624   : > { %v14828_v13 = vpop.f32.mrf.mxu1  ;;  %v14834_v19 = vpop.f32.mrf.mxu0 }
 0x626   : > { %v4709_v46 = vpop.f32.mrf.mxu1  ;;  %v4759_v3 = vpop.f32.mrf.mxu0  ;;  %7115 = vrot.lane.b32.xlu0 %v7114_v1, %s15887_s29  ;;  %7165 = vrot.lane.b32.xlu1 %v7114_v1, %s15888_s30 }
 0x627   : > { %v4715_v20 = vadd.f32 %v4709_v46, %v4657_v45 }
 0x628   : > { %v14839_v50 = vpop.f32.mrf.mxu1  ;;  %v14845_v24 = vpop.f32.mrf.mxu0 }
 0x629   : > { %v4765_v62 = vadd.f32 %v4759_v3, %v4715_v20 }
 0x62a   : > { %v4712_v52 = vpop.f32.mrf.mxu1  ;;  %v4762_v53 = vpop.f32.mrf.mxu0 }
 0x62b   : > { %v4767_v54 = vrot.slane %v4765_v62, 2  ;;  %v4939_v63 = vrot.slane %v4765_v62, 6  ;;  %v5012_v8 = vrot.slane %v4765_v62, 4 }
 0x62c   : > { %v14840_v0 = vpop.f32.mrf.mxu1  ;;  %v14846_v2 = vpop.f32.mrf.mxu0 }
 0x62d   : > { %14852 = vmatmul.mubr.msk.f32.vlgmr.msra.gmra.mxu1 %vm686_vm7, %v4767_v54  ;;  %14866 = vmatmul.mubr.msk.f32.vlgmr.msra.gmra.mxu0 %vm686_vm7, %v4939_v63 }
 0x62e   : > { %14855 = vmatpush3.msk.msra.mxu1 %vm16147_vm5, %v15889_v58  ;;  %14876 = vmatpush3.bf16.msra.mxu0 %v5129_v17 }
 0x62f   : > { %14856 = vmatprep.subr.mxu1 %v15885_v4  ;;  %14858 = vmatprep.mubr.msk.f32.mxu1 %vm15886_vm0, %v15885_v4 }
 0x630   : > { %14857 = vmatpush3.msk.msra.mxu1 %vm16151_vm6, %v15889_v58  ;;  %14877 = vmatprep.mubr.msk.bf16.mxu0 %vm15886_vm0, %v15885_v4 }
 0x631   : > { %14859 = vmatmul.mubr.msk.f32.vlgmr.msra.gmra.mxu1 %vm686_vm7, %v4765_v62  ;;  %14868 = vmatprep.subr.mxu1 %v15885_v4 }
 0x632   : > { %14878 = vmatmul.mubr.msk.bf16.vlgmr.msra.gmra.mxu0 %vm217_vm2, %v13578_v5  ;;  %14869 = vmatpush3.msk.msra.mxu1 %vm16147_vm5, %v15889_v58 }
 0x633   : > { %14870 = vmatprep.subr.mxu1 %v15885_v4  ;;  %14887 = vmatprep.subr.bf16.mxu0 %v15885_v4 }
 0x634   : > { %14871 = vmatpush3.msk.msra.mxu1 %vm16151_vm6, %v15889_v58  ;;  %14872 = vmatprep.mubr.msk.f32.mxu1 %vm15886_vm0, %v15885_v4 }
 0x635   : > { %14888 = vmatpush3.bf16.msra.mxu0 %v5224_v7  ;;  %14873 = vmatmul.mubr.msk.f32.vlgmr.msra.gmra.mxu1 %vm686_vm7, %v5012_v8 }
 0x636   : > { %14881 = vmatprep.subr.bf16.mxu1 %v15885_v4  ;;  %14883 = vmatprep.mubr.msk.bf16.mxu1 %vm15886_vm0, %v15885_v4 }
 0x637   : > { %14882 = vmatpush3.bf16.msra.mxu1 %v5175_v9  ;;  %14889 = vmatprep.mubr.msk.bf16.mxu0 %vm15886_vm0, %v15885_v4 }
 0x638   : > { %14893 = vmatprep.subr.bf16.mxu1 %v15885_v4  ;;  %14899 = vmatprep.subr.bf16.mxu0 %v15885_v4 }
 0x63a   : > { %14884 = vmatmul.mubr.msk.bf16.vlgmr.msra.gmra.mxu1 %vm217_vm2, %v5113_v12  ;;  %14890 = vmatmul.mubr.msk.bf16.vlgmr.msra.gmra.mxu0 %vm217_vm2, %v13581_v47 }
 0x63b   : > { %14894 = vmatpush3.bf16.msra.mxu1 %v5273_v14  ;;  %14900 = vmatpush3.bf16.msra.mxu0 %v5331_v15 }
 0x63c   : > { %14895 = vmatprep.mubr.msk.bf16.mxu1 %vm15886_vm0, %v15885_v4  ;;  %14901 = vmatprep.mubr.msk.bf16.mxu0 %vm15886_vm0, %v15885_v4 }
 0x63d   : > { %14905 = vmatprep.subr.bf16.mxu1 %v15885_v4  ;;  %14911 = vmatprep.subr.bf16.mxu0 %v15885_v4 }
 0x642   : > { %14896 = vmatmul.mubr.msk.bf16.vlgmr.msra.gmra.mxu1 %vm217_vm2, %v13584_v48  ;;  %14902 = vmatmul.mubr.msk.bf16.vlgmr.msra.gmra.mxu0 %vm217_vm2, %v13586_v22 }
 0x643   : > { %14906 = vmatpush3.bf16.msra.mxu1 %v5381_v23  ;;  %14912 = vmatpush3.bf16.msra.mxu0 %v5431_v25 }
 0x644   : > { %14907 = vmatprep.mubr.msk.bf16.mxu1 %vm15886_vm0, %v15885_v4  ;;  %14913 = vmatprep.mubr.msk.bf16.mxu0 %vm15886_vm0, %v15885_v4 }
 0x645   : > { %14917 = vmatprep.subr.bf16.mxu1 %v15885_v4  ;;  %14923 = vmatprep.subr.bf16.mxu0 %v15885_v4 }
 0x64a   : > { %14908 = vmatmul.mubr.msk.bf16.vlgmr.msra.gmra.mxu1 %vm217_vm2, %v13588_v51  ;;  %14914 = vmatmul.mubr.msk.bf16.vlgmr.msra.gmra.mxu0 %vm217_vm2, %v13591_v55 }
 0x64b   : > { %14918 = vmatpush3.bf16.msra.mxu1 %v5489_v28  ;;  %14924 = vmatpush3.bf16.msra.mxu0 %v5539_v29 }
 0x64c   : > { %14919 = vmatprep.mubr.msk.bf16.mxu1 %vm15886_vm0, %v15885_v4  ;;  %14925 = vmatprep.mubr.msk.bf16.mxu0 %vm15886_vm0, %v15885_v4 }
 0x64d   : > { %14929 = vmatprep.subr.mxu1 %v15885_v4  ;;  %14943 = vmatprep.subr.mxu0 %v15885_v4 }
 0x652   : > { %14920 = vmatmul.mubr.msk.bf16.vlgmr.msra.gmra.mxu1 %vm217_vm2, %v13593_v30  ;;  %14926 = vmatmul.mubr.msk.bf16.vlgmr.msra.gmra.mxu0 %vm217_vm2, %v13595_v57 }
 0x653   : > { %14930 = vmatpush3.msk.msra.mxu1 %vm16123_vm3, %v15889_v58  ;;  %14944 = vmatpush3.msk.msra.mxu0 %vm16123_vm3, %v15889_v58 }
 0x654   : > { %14931 = vmatprep.subr.mxu1 %v15885_v4  ;;  %14945 = vmatprep.subr.mxu0 %v15885_v4 }
 0x655   : > { %14932 = vmatpush3.msk.msra.mxu1 %vm16134_vm4, %v15889_v58  ;;  %14933 = vmatprep.mubr.msk.f32.mxu1 %vm15886_vm0, %v15885_v4 }
 0x656   : > { %14946 = vmatpush3.msk.msra.mxu0 %vm16134_vm4, %v15889_v58  ;;  %14947 = vmatprep.mubr.msk.f32.mxu0 %vm15886_vm0, %v15885_v4 }
 0x657   : > { %14936 = vmatprep.subr.mxu1 %v15885_v4  ;;  %14957 = vmatprep.subr.bf16.mxu0 %v15885_v4 }
 0x6ed   : > { %v4836_v10 = vpop.f32.mrf.mxu1  ;;  %v5008_v37 = vpop.f32.mrf.mxu0 }
 0x6ef   : > { %v14853_v38 = vpop.f32.mrf.mxu1  ;;  %v14867_v39 = vpop.f32.mrf.mxu0 }
 0x6f1   : > { %v4908_v11 = vpop.f32.mrf.mxu1 }
 0x6f2   : > { %v4909_v42 = vadd.f32 %v4908_v11, %v4836_v10  ;;  %v5165_v43 = vpop.f32.mrf.mxu0 }
 0x6f3   : > { %v14860_v13 = vpop.f32.mrf.mxu1 }
 0x6f4   : > { %v4919_v19 = vrot.slane %v4909_v42, %v16317_v33  ;;  %v14879_v45 = vpop.f32.mrf.mxu0  ;;  %v5940_v42 = vpop.permute.xlu0 %5939 }
 0x6f5   : > { %v5081_v46 = vpop.f32.mrf.mxu1 }
 0x6f6   : > { %v4920_v3 = vcombine.high %v4919_v19, %v4919_v19  ;;  %v4927_v20 = vrot.slane %v4919_v19, %v16317_v33  ;;  %v5082_v49 = vadd.f32 %v5081_v46, %v5008_v37  ;;  %v5168_v50 = vpop.f32.mrf.mxu0 }
 0x6f7   : > { %v14874_v24 = vpop.f32.mrf.mxu1 }
 0x6f8   : > { %v4934_v62 = vrot.slane %v4920_v3, %v16317_v33  ;;  %4937 = vst.msk [vmem:[%s16323_s16 + $0xa] sm:$0x1] %vm856_vm8, %v4927_v20  ;;  %v5092_v52 = vrot.slane %v5082_v49, %v16317_v33  ;;  %v14880_v53 = vpop.f32.mrf.mxu0  ;;  %v5945_v49 = vsel %vm221_vm1, %v5940_v42, 0 }
 0x6fa   : > { %4938 = vst.msk [vmem:[%s16323_s16 + $0x2a] sm:$0x1] %vm856_vm8, %v4934_v62  ;;  %v5093_v54 = vcombine.high %v5092_v52, %v5092_v52  ;;  %v5100_v63 = vrot.slane %v5092_v52, %v16317_v33  ;;  %v5211_v17 = vpop.f32.mrf.mxu1  ;;  %v5260_v0 = vpop.f32.mrf.mxu0  ;;  %v13610_v62 = vld [vmem:[%s18542_s1 + $0x4] sm:$0xf] }
 0x6fb   : > { %v5212_v12 = vadd.f32 %v5211_v17, %v5165_v43  ;;  %v6035_v52 = vpop.permute.xlu1 %6034  ;;  %v6142_v17 = vpop.permute.xlu0 %6141 }
 0x6fc   : > { %v5107_v2 = vrot.slane %v5093_v54, %v16317_v33  ;;  %5110 = vst.msk [vmem:[%s16323_s16 + $0xb] sm:$0x1] %vm856_vm8, %v5100_v63  ;;  %v14885_v5 = vpop.f32.mrf.mxu1  ;;  %v14891_v18 = vpop.f32.mrf.mxu0  ;;  %v6040_v53 = vsel %vm221_vm1, %v6035_v52, 0  ;;  %v5991_v63 = vsel %vm221_vm1, %v16918_v40, 0  ;;  %v13613_v40 = vld [vmem:[%s18542_s1 + $0x8] sm:$0xf] }
 0x6fd   : > { %v5266_v48 = vadd.f32 %v5260_v0, %v5212_v12  ;;  %v5929_v0 = vld [vmem:[%s18542_s1] sm:$0xf]  ;;  %v6147_v5 = vsel %vm221_vm1, %v6142_v17, 0 }
 0x6fe   : > { %5111 = vst.msk [vmem:[%s16323_s16 + $0x2b] sm:$0x1] %vm856_vm8, %v5107_v2  ;;  %v5214_v7 = vpop.f32.mrf.mxu1  ;;  %v5263_v8 = vpop.f32.mrf.mxu0  ;;  %v6089_v2 = vsel %vm221_vm1, %v16921_v41, 0  ;;  %v13616_v41 = vld [vmem:[%s18542_s1 + $0xc] sm:$0xf] }
 0x6ff   : > { %v6192_v18 = vpop.permute.xlu1 %6191  ;;  %v13618_v7 = vld [vmem:[%s18542_s1 + $0x10] sm:$0xf] }
 0x700   : > { %v14886_v9 = vpop.f32.mrf.mxu1  ;;  %v14892_v21 = vpop.f32.mrf.mxu0  ;;  %v6197_v8 = vsel %vm221_vm1, %v6192_v18, 0 }
 0x701   : > { %v6247_v9 = vsel %vm221_vm1, %v16930_v44, 0  ;;  %v6300_v21 = vpop.permute.xlu0 %6299  ;;  %v13620_v44 = vld [vmem:[%s18542_s1 + $0x14] sm:$0xf] }
 0x702   : > { %v5309_v47 = vpop.f32.mrf.mxu1  ;;  %v5367_v14 = vpop.f32.mrf.mxu0 }
 0x703   : > { %v5315_v25 = vadd.f32 %v5309_v47, %v5266_v48  ;;  %v6350_v12 = vpop.permute.xlu1 %6349  ;;  %v13623_v47 = vld [vmem:[%s18542_s1 + $0x18] sm:$0xf]  ;;  %v13627_v48 = vld [vmem:[%s18542_s1 + $0x20] sm:$0xf] }
 0x704   : > { %v14897_v15 = vpop.f32.mrf.mxu1  ;;  %v14903_v16 = vpop.f32.mrf.mxu0 }
 0x705   : > { %v5373_v28 = vadd.f32 %v5367_v14, %v5315_v25  ;;  %v6305_v14 = vsel %vm221_vm1, %v6300_v21, 0  ;;  %v6355_v15 = vsel %vm221_vm1, %v6350_v12, 0  ;;  %v13625_v16 = vld [vmem:[%s18542_s1 + $0x1c] sm:$0xf] }
 0x706   : > { %v5312_v22 = vpop.f32.mrf.mxu1  ;;  %v5370_v23 = vpop.f32.mrf.mxu0 }
 0x707   : > { %v17226_v22 = vld [vmem:[%s15997_s27 + $0x12] sm:$0x3]  ;;  %v17229_v23 = vld [vmem:[%s15997_s27 + $0x14] sm:$0x3] }
 0x708   : > { %v14898_v26 = vpop.f32.mrf.mxu1  ;;  %v14904_v27 = vpop.f32.mrf.mxu0  ;;  %v7570_v25 = vrot.slane %v17226_v22, %v16013_v6 }
 0x709   : > { %v7772_v26 = vrot.slane %v17229_v23, %v16013_v6  ;;  %v17238_v27 = vld [vmem:[%s15997_s27 + $0x16] sm:$0x3] }
 0x70a   : > { %v5417_v51 = vpop.f32.mrf.mxu1  ;;  %v5467_v55 = vpop.f32.mrf.mxu0  ;;  %7571 = vrot.lane.b32.xlu0 %v7570_v25, %s15887_s29  ;;  %7666 = vrot.lane.b32.xlu1 %v7570_v25, %s15888_s30 }
 0x70b   : > { %v5423_v57 = vadd.f32 %v5417_v51, %v5373_v28  ;;  %v7930_v51 = vrot.slane %v17238_v27, %v16013_v6 }
 0x70c   : > { %v14909_v29 = vpop.f32.mrf.mxu1  ;;  %v14915_v30 = vpop.f32.mrf.mxu0 }
 0x70d   : > { %v5473_v37 = vadd.f32 %v5467_v55, %v5423_v57 }
 0x70e   : > { %v5420_v34 = vpop.f32.mrf.mxu1  ;;  %v5470_v35 = vpop.f32.mrf.mxu0  ;;  %7773 = vrot.lane.b32.xlu0 %v7772_v26, %s15887_s29  ;;  %7823 = vrot.lane.b32.xlu1 %v7772_v26, %s15888_s30 }
 0x710   : > { %v14910_v1 = vpop.f32.mrf.mxu1  ;;  %v14916_v10 = vpop.f32.mrf.mxu0 }
 0x712   : > { %v5525_v38 = vpop.f32.mrf.mxu1  ;;  %v5575_v39 = vpop.f32.mrf.mxu0  ;;  %7931 = vrot.lane.b32.xlu0 %v7930_v51, %s15887_s29  ;;  %7981 = vrot.lane.b32.xlu1 %v7930_v51, %s15888_s30 }
 0x713   : > { %v5531_v11 = vadd.f32 %v5525_v38, %v5473_v37 }
 0x714   : > { %v14921_v43 = vpop.f32.mrf.mxu1  ;;  %v14927_v13 = vpop.f32.mrf.mxu0 }
 0x715   : > { %v5581_v19 = vadd.f32 %v5575_v39, %v5531_v11 }
 0x716   : > { %v5528_v45 = vpop.f32.mrf.mxu1  ;;  %v5578_v46 = vpop.f32.mrf.mxu0 }
 0x717   : > { %v5583_v3 = vrot.slane %v5581_v19, 2  ;;  %v5755_v20 = vrot.slane %v5581_v19, 6  ;;  %v5828_v54 = vrot.slane %v5581_v19, 4 }
 0x718   : > { %v14922_v50 = vpop.f32.mrf.mxu1  ;;  %v14928_v24 = vpop.f32.mrf.mxu0 }
 0x719   : > { %14934 = vmatmul.mubr.msk.f32.vlgmr.msra.gmra.mxu1 %vm686_vm7, %v5583_v3  ;;  %14948 = vmatmul.mubr.msk.f32.vlgmr.msra.gmra.mxu0 %vm686_vm7, %v5755_v20 }
 0x71a   : > { %14937 = vmatpush3.msk.msra.mxu1 %vm16147_vm5, %v15889_v58  ;;  %14958 = vmatpush3.bf16.msra.mxu0 %v5945_v49 }
 0x71b   : > { %14938 = vmatprep.subr.mxu1 %v15885_v4  ;;  %14940 = vmatprep.mubr.msk.f32.mxu1 %vm15886_vm0, %v15885_v4 }
 0x71c   : > { %14939 = vmatpush3.msk.msra.mxu1 %vm16151_vm6, %v15889_v58  ;;  %14959 = vmatprep.mubr.msk.bf16.mxu0 %vm15886_vm0, %v15885_v4 }
 0x71d   : > { %14941 = vmatmul.mubr.msk.f32.vlgmr.msra.gmra.mxu1 %vm686_vm7, %v5581_v19  ;;  %14950 = vmatprep.subr.mxu1 %v15885_v4 }
 0x71e   : > { %14960 = vmatmul.mubr.msk.bf16.vlgmr.msra.gmra.mxu0 %vm217_vm2, %v13610_v62  ;;  %14951 = vmatpush3.msk.msra.mxu1 %vm16147_vm5, %v15889_v58 }
 0x71f   : > { %14952 = vmatprep.subr.mxu1 %v15885_v4  ;;  %14969 = vmatprep.subr.bf16.mxu0 %v15885_v4 }
 0x720   : > { %14953 = vmatpush3.msk.msra.mxu1 %vm16151_vm6, %v15889_v58  ;;  %14954 = vmatprep.mubr.msk.f32.mxu1 %vm15886_vm0, %v15885_v4 }
 0x721   : > { %14970 = vmatpush3.bf16.msra.mxu0 %v6040_v53  ;;  %14955 = vmatmul.mubr.msk.f32.vlgmr.msra.gmra.mxu1 %vm686_vm7, %v5828_v54 }
 0x722   : > { %14963 = vmatprep.subr.bf16.mxu1 %v15885_v4  ;;  %14965 = vmatprep.mubr.msk.bf16.mxu1 %vm15886_vm0, %v15885_v4 }
 0x723   : > { %14964 = vmatpush3.bf16.msra.mxu1 %v5991_v63  ;;  %14971 = vmatprep.mubr.msk.bf16.mxu0 %vm15886_vm0, %v15885_v4 }
 0x724   : > { %14975 = vmatprep.subr.bf16.mxu1 %v15885_v4  ;;  %14981 = vmatprep.subr.bf16.mxu0 %v15885_v4 }
 0x726   : > { %14966 = vmatmul.mubr.msk.bf16.vlgmr.msra.gmra.mxu1 %vm217_vm2, %v5929_v0  ;;  %14972 = vmatmul.mubr.msk.bf16.vlgmr.msra.gmra.mxu0 %vm217_vm2, %v13613_v40 }
 0x727   : > { %14976 = vmatpush3.bf16.msra.mxu1 %v6089_v2  ;;  %14982 = vmatpush3.bf16.msra.mxu0 %v6147_v5 }
 0x728   : > { %14977 = vmatprep.mubr.msk.bf16.mxu1 %vm15886_vm0, %v15885_v4  ;;  %14983 = vmatprep.mubr.msk.bf16.mxu0 %vm15886_vm0, %v15885_v4 }
 0x729   : > { %14987 = vmatprep.subr.bf16.mxu1 %v15885_v4  ;;  %14993 = vmatprep.subr.bf16.mxu0 %v15885_v4 }
 0x72e   : > { %14978 = vmatmul.mubr.msk.bf16.vlgmr.msra.gmra.mxu1 %vm217_vm2, %v13616_v41  ;;  %14984 = vmatmul.mubr.msk.bf16.vlgmr.msra.gmra.mxu0 %vm217_vm2, %v13618_v7 }
 0x72f   : > { %14988 = vmatpush3.bf16.msra.mxu1 %v6197_v8  ;;  %14994 = vmatpush3.bf16.msra.mxu0 %v6247_v9 }
 0x730   : > { %14989 = vmatprep.mubr.msk.bf16.mxu1 %vm15886_vm0, %v15885_v4  ;;  %14995 = vmatprep.mubr.msk.bf16.mxu0 %vm15886_vm0, %v15885_v4 }
 0x731   : > { %14999 = vmatprep.subr.bf16.mxu1 %v15885_v4  ;;  %15005 = vmatprep.subr.bf16.mxu0 %v15885_v4 }
 0x736   : > { %14990 = vmatmul.mubr.msk.bf16.vlgmr.msra.gmra.mxu1 %vm217_vm2, %v13620_v44  ;;  %14996 = vmatmul.mubr.msk.bf16.vlgmr.msra.gmra.mxu0 %vm217_vm2, %v13623_v47 }
 0x737   : > { %15000 = vmatpush3.bf16.msra.mxu1 %v6305_v14  ;;  %15006 = vmatpush3.bf16.msra.mxu0 %v6355_v15 }
 0x738   : > { %15001 = vmatprep.mubr.msk.bf16.mxu1 %vm15886_vm0, %v15885_v4  ;;  %15007 = vmatprep.mubr.msk.bf16.mxu0 %vm15886_vm0, %v15885_v4 }
 0x739   : > { %15011 = vmatprep.subr.mxu1 %v15885_v4  ;;  %15025 = vmatprep.subr.mxu0 %v15885_v4 }
 0x73e   : > { %15002 = vmatmul.mubr.msk.bf16.vlgmr.msra.gmra.mxu1 %vm217_vm2, %v13625_v16  ;;  %15008 = vmatmul.mubr.msk.bf16.vlgmr.msra.gmra.mxu0 %vm217_vm2, %v13627_v48 }
 0x73f   : > { %15012 = vmatpush3.msk.msra.mxu1 %vm16123_vm3, %v15889_v58  ;;  %15026 = vmatpush3.msk.msra.mxu0 %vm16123_vm3, %v15889_v58 }
 0x740   : > { %15013 = vmatprep.subr.mxu1 %v15885_v4  ;;  %15027 = vmatprep.subr.mxu0 %v15885_v4 }
 0x741   : > { %15014 = vmatpush3.msk.msra.mxu1 %vm16134_vm4, %v15889_v58  ;;  %15015 = vmatprep.mubr.msk.f32.mxu1 %vm15886_vm0, %v15885_v4 }
 0x742   : > { %15028 = vmatpush3.msk.msra.mxu0 %vm16134_vm4, %v15889_v58  ;;  %15029 = vmatprep.mubr.msk.f32.mxu0 %vm15886_vm0, %v15885_v4 }
 0x743   : > { %15018 = vmatprep.subr.mxu1 %v15885_v4  ;;  %15039 = vmatprep.subr.bf16.mxu0 %v15885_v4 }
 0x7d9   : > { %v5652_v55 = vpop.f32.mrf.mxu1  ;;  %v5824_v28 = vpop.f32.mrf.mxu0 }
 0x7db   : > { %v14935_v29 = vpop.f32.mrf.mxu1  ;;  %v14949_v30 = vpop.f32.mrf.mxu0 }
 0x7dd   : > { %v5724_v57 = vpop.f32.mrf.mxu1 }
 0x7de   : > { %v5725_v34 = vadd.f32 %v5724_v57, %v5652_v55  ;;  %v5981_v35 = vpop.f32.mrf.mxu0 }
 0x7df   : > { %v14942_v1 = vpop.f32.mrf.mxu1 }
 0x7e0   : > { %v5735_v10 = vrot.slane %v5725_v34, %v16317_v33  ;;  %v14961_v37 = vpop.f32.mrf.mxu0  ;;  %v6756_v34 = vpop.permute.xlu0 %6755 }
 0x7e1   : > { %v5897_v38 = vpop.f32.mrf.mxu1 }
 0x7e2   : > { %v5736_v39 = vcombine.high %v5735_v10, %v5735_v10  ;;  %v5743_v11 = vrot.slane %v5735_v10, %v16317_v33  ;;  %v5898_v42 = vadd.f32 %v5897_v38, %v5824_v28  ;;  %v5984_v43 = vpop.f32.mrf.mxu0 }
 0x7e3   : > { %v14956_v13 = vpop.f32.mrf.mxu1 }
 0x7e4   : > { %v5750_v19 = vrot.slane %v5736_v39, %v16317_v33  ;;  %5753 = vst.msk [vmem:[%s16323_s16 + $0xc] sm:$0x1] %vm856_vm8, %v5743_v11  ;;  %v5908_v45 = vrot.slane %v5898_v42, %v16317_v33  ;;  %v14962_v46 = vpop.f32.mrf.mxu0  ;;  %v6761_v42 = vsel %vm221_vm1, %v6756_v34, 0 }
 0x7e6   : > { %5754 = vst.msk [vmem:[%s16323_s16 + $0x2c] sm:$0x1] %vm856_vm8, %v5750_v19  ;;  %v5909_v3 = vcombine.high %v5908_v45, %v5908_v45  ;;  %v5916_v20 = vrot.slane %v5908_v45, %v16317_v33  ;;  %v6027_v49 = vpop.f32.mrf.mxu1  ;;  %v6076_v50 = vpop.f32.mrf.mxu0  ;;  %v13642_v19 = vld [vmem:[%s18542_s1 + $0x4] sm:$0xf] }
 0x7e7   : > { %v6028_v0 = vadd.f32 %v6027_v49, %v5981_v35  ;;  %v6851_v45 = vpop.permute.xlu1 %6850  ;;  %v6958_v49 = vpop.permute.xlu0 %6957 }
 0x7e8   : > { %v5923_v24 = vrot.slane %v5909_v3, %v16317_v33  ;;  %5926 = vst.msk [vmem:[%s16323_s16 + $0xd] sm:$0x1] %vm856_vm8, %v5916_v20  ;;  %v14967_v62 = vpop.f32.mrf.mxu1  ;;  %v14973_v52 = vpop.f32.mrf.mxu0  ;;  %v6856_v46 = vsel %vm221_vm1, %v6851_v45, 0  ;;  %v6807_v20 = vsel %vm221_vm1, %v17072_v31, 0  ;;  %v13645_v31 = vld [vmem:[%s18542_s1 + $0x8] sm:$0xf] }
 0x7e9   : > { %v6082_v41 = vadd.f32 %v6076_v50, %v6028_v0  ;;  %v6745_v50 = vld [vmem:[%s18542_s1] sm:$0xf]  ;;  %v6963_v62 = vsel %vm221_vm1, %v6958_v49, 0 }
 0x7ea   : > { %5927 = vst.msk [vmem:[%s16323_s16 + $0x2d] sm:$0x1] %vm856_vm8, %v5923_v24  ;;  %v6030_v53 = vpop.f32.mrf.mxu1  ;;  %v6079_v54 = vpop.f32.mrf.mxu0  ;;  %v6905_v24 = vsel %vm221_vm1, %v17075_v32, 0  ;;  %v13648_v32 = vld [vmem:[%s18542_s1 + $0xc] sm:$0xf] }
 0x7eb   : > { %v7008_v52 = vpop.permute.xlu1 %7007  ;;  %v13650_v53 = vld [vmem:[%s18542_s1 + $0x10] sm:$0xf] }
 0x7ec   : > { %v14968_v63 = vpop.f32.mrf.mxu1  ;;  %v14974_v17 = vpop.f32.mrf.mxu0  ;;  %v7013_v54 = vsel %vm221_vm1, %v7008_v52, 0 }
 0x7ed   : > { %v7063_v63 = vsel %vm221_vm1, %v17084_v36, 0  ;;  %v7116_v17 = vpop.permute.xlu0 %7115  ;;  %v13652_v36 = vld [vmem:[%s18542_s1 + $0x14] sm:$0xf] }
 0x7ee   : > { %v6125_v40 = vpop.f32.mrf.mxu1  ;;  %v6183_v2 = vpop.f32.mrf.mxu0 }
 0x7ef   : > { %v6131_v9 = vadd.f32 %v6125_v40, %v6082_v41  ;;  %v7166_v0 = vpop.permute.xlu1 %7165  ;;  %v13655_v40 = vld [vmem:[%s18542_s1 + $0x18] sm:$0xf]  ;;  %v13659_v41 = vld [vmem:[%s18542_s1 + $0x20] sm:$0xf] }
 0x7f0   : > { %v14979_v5 = vpop.f32.mrf.mxu1  ;;  %v14985_v18 = vpop.f32.mrf.mxu0 }
 0x7f1   : > { %v6189_v14 = vadd.f32 %v6183_v2, %v6131_v9  ;;  %v7121_v2 = vsel %vm221_vm1, %v7116_v17, 0  ;;  %v7171_v5 = vsel %vm221_vm1, %v7166_v0, 0  ;;  %v13657_v18 = vld [vmem:[%s18542_s1 + $0x1c] sm:$0xf] }
 0x7f2   : > { %v6128_v7 = vpop.f32.mrf.mxu1  ;;  %v6186_v8 = vpop.f32.mrf.mxu0 }
 0x7f3   : > { %v17380_v7 = vld [vmem:[%s15997_s27 + $0x14] sm:$0x3]  ;;  %v17383_v8 = vld [vmem:[%s15997_s27 + $0x16] sm:$0x3] }
 0x7f4   : > { %v14980_v21 = vpop.f32.mrf.mxu1  ;;  %v14986_v12 = vpop.f32.mrf.mxu0  ;;  %v8386_v9 = vrot.slane %v17380_v7, %v16013_v6 }
 0x7f5   : > { %v8588_v21 = vrot.slane %v17383_v8, %v16013_v6  ;;  %v17392_v12 = vld [vmem:[%s15997_s27 + $0x18] sm:$0x3] }
 0x7f6   : > { %v6233_v44 = vpop.f32.mrf.mxu1  ;;  %v6283_v47 = vpop.f32.mrf.mxu0  ;;  %8387 = vrot.lane.b32.xlu0 %v8386_v9, %s15887_s29  ;;  %8482 = vrot.lane.b32.xlu1 %v8386_v9, %s15888_s30 }
 0x7f7   : > { %v6239_v48 = vadd.f32 %v6233_v44, %v6189_v14  ;;  %v8746_v44 = vrot.slane %v17392_v12, %v16013_v6 }
 0x7f8   : > { %v14991_v15 = vpop.f32.mrf.mxu1  ;;  %v14997_v16 = vpop.f32.mrf.mxu0 }
 0x7f9   : > { %v6289_v28 = vadd.f32 %v6283_v47, %v6239_v48 }
 0x7fa   : > { %v6236_v25 = vpop.f32.mrf.mxu1  ;;  %v6286_v26 = vpop.f32.mrf.mxu0  ;;  %8589 = vrot.lane.b32.xlu0 %v8588_v21, %s15887_s29  ;;  %8639 = vrot.lane.b32.xlu1 %v8588_v21, %s15888_s30 }
 0x7fc   : > { %v14992_v51 = vpop.f32.mrf.mxu1  ;;  %v14998_v55 = vpop.f32.mrf.mxu0 }
 0x7fe   : > { %v6341_v29 = vpop.f32.mrf.mxu1  ;;  %v6391_v30 = vpop.f32.mrf.mxu0  ;;  %8747 = vrot.lane.b32.xlu0 %v8746_v44, %s15887_s29  ;;  %8797 = vrot.lane.b32.xlu1 %v8746_v44, %s15888_s30 }
 0x7ff   : > { %v6347_v57 = vadd.f32 %v6341_v29, %v6289_v28 }
 0x800   : > { %v15003_v35 = vpop.f32.mrf.mxu1  ;;  %v15009_v1 = vpop.f32.mrf.mxu0 }
 0x801   : > { %v6397_v10 = vadd.f32 %v6391_v30, %v6347_v57 }
 0x802   : > { %v6344_v37 = vpop.f32.mrf.mxu1  ;;  %v6394_v38 = vpop.f32.mrf.mxu0 }
 0x803   : > { %v6399_v39 = vrot.slane %v6397_v10, 2  ;;  %v6571_v11 = vrot.slane %v6397_v10, 6  ;;  %v6644_v3 = vrot.slane %v6397_v10, 4 }
 0x804   : > { %v15004_v43 = vpop.f32.mrf.mxu1  ;;  %v15010_v13 = vpop.f32.mrf.mxu0 }
 0x805   : > { %15016 = vmatmul.mubr.msk.f32.vlgmr.msra.gmra.mxu1 %vm686_vm7, %v6399_v39  ;;  %15030 = vmatmul.mubr.msk.f32.vlgmr.msra.gmra.mxu0 %vm686_vm7, %v6571_v11 }
 0x806   : > { %15019 = vmatpush3.msk.msra.mxu1 %vm16147_vm5, %v15889_v58  ;;  %15040 = vmatpush3.bf16.msra.mxu0 %v6761_v42 }
 0x807   : > { %15020 = vmatprep.subr.mxu1 %v15885_v4  ;;  %15022 = vmatprep.mubr.msk.f32.mxu1 %vm15886_vm0, %v15885_v4 }
 0x808   : > { %15021 = vmatpush3.msk.msra.mxu1 %vm16151_vm6, %v15889_v58  ;;  %15041 = vmatprep.mubr.msk.bf16.mxu0 %vm15886_vm0, %v15885_v4 }
 0x809   : > { %15023 = vmatmul.mubr.msk.f32.vlgmr.msra.gmra.mxu1 %vm686_vm7, %v6397_v10  ;;  %15032 = vmatprep.subr.mxu1 %v15885_v4 }
 0x80a   : > { %15042 = vmatmul.mubr.msk.bf16.vlgmr.msra.gmra.mxu0 %vm217_vm2, %v13642_v19  ;;  %15033 = vmatpush3.msk.msra.mxu1 %vm16147_vm5, %v15889_v58 }
 0x80b   : > { %15034 = vmatprep.subr.mxu1 %v15885_v4  ;;  %15051 = vmatprep.subr.bf16.mxu0 %v15885_v4 }
 0x80c   : > { %15035 = vmatpush3.msk.msra.mxu1 %vm16151_vm6, %v15889_v58  ;;  %15036 = vmatprep.mubr.msk.f32.mxu1 %vm15886_vm0, %v15885_v4 }
 0x80d   : > { %15052 = vmatpush3.bf16.msra.mxu0 %v6856_v46  ;;  %15037 = vmatmul.mubr.msk.f32.vlgmr.msra.gmra.mxu1 %vm686_vm7, %v6644_v3 }
 0x80e   : > { %15045 = vmatprep.subr.bf16.mxu1 %v15885_v4  ;;  %15047 = vmatprep.mubr.msk.bf16.mxu1 %vm15886_vm0, %v15885_v4 }
 0x80f   : > { %15046 = vmatpush3.bf16.msra.mxu1 %v6807_v20  ;;  %15053 = vmatprep.mubr.msk.bf16.mxu0 %vm15886_vm0, %v15885_v4 }
 0x810   : > { %15057 = vmatprep.subr.bf16.mxu1 %v15885_v4  ;;  %15063 = vmatprep.subr.bf16.mxu0 %v15885_v4 }
 0x812   : > { %15048 = vmatmul.mubr.msk.bf16.vlgmr.msra.gmra.mxu1 %vm217_vm2, %v6745_v50  ;;  %15054 = vmatmul.mubr.msk.bf16.vlgmr.msra.gmra.mxu0 %vm217_vm2, %v13645_v31 }
 0x813   : > { %15058 = vmatpush3.bf16.msra.mxu1 %v6905_v24  ;;  %15064 = vmatpush3.bf16.msra.mxu0 %v6963_v62 }
 0x814   : > { %15059 = vmatprep.mubr.msk.bf16.mxu1 %vm15886_vm0, %v15885_v4  ;;  %15065 = vmatprep.mubr.msk.bf16.mxu0 %vm15886_vm0, %v15885_v4 }
 0x815   : > { %15069 = vmatprep.subr.bf16.mxu1 %v15885_v4  ;;  %15075 = vmatprep.subr.bf16.mxu0 %v15885_v4 }
 0x81a   : > { %15060 = vmatmul.mubr.msk.bf16.vlgmr.msra.gmra.mxu1 %vm217_vm2, %v13648_v32  ;;  %15066 = vmatmul.mubr.msk.bf16.vlgmr.msra.gmra.mxu0 %vm217_vm2, %v13650_v53 }
 0x81b   : > { %15070 = vmatpush3.bf16.msra.mxu1 %v7013_v54  ;;  %15076 = vmatpush3.bf16.msra.mxu0 %v7063_v63 }
 0x81c   : > { %15071 = vmatprep.mubr.msk.bf16.mxu1 %vm15886_vm0, %v15885_v4  ;;  %15077 = vmatprep.mubr.msk.bf16.mxu0 %vm15886_vm0, %v15885_v4 }
 0x81d   : > { %15081 = vmatprep.subr.bf16.mxu1 %v15885_v4  ;;  %15087 = vmatprep.subr.bf16.mxu0 %v15885_v4 }
 0x822   : > { %15072 = vmatmul.mubr.msk.bf16.vlgmr.msra.gmra.mxu1 %vm217_vm2, %v13652_v36  ;;  %15078 = vmatmul.mubr.msk.bf16.vlgmr.msra.gmra.mxu0 %vm217_vm2, %v13655_v40 }
 0x823   : > { %15082 = vmatpush3.bf16.msra.mxu1 %v7121_v2  ;;  %15088 = vmatpush3.bf16.msra.mxu0 %v7171_v5 }
 0x824   : > { %15083 = vmatprep.mubr.msk.bf16.mxu1 %vm15886_vm0, %v15885_v4  ;;  %15089 = vmatprep.mubr.msk.bf16.mxu0 %vm15886_vm0, %v15885_v4 }
 0x825   : > { %15093 = vmatprep.subr.mxu1 %v15885_v4  ;;  %15107 = vmatprep.subr.mxu0 %v15885_v4 }
 0x82a   : > { %15084 = vmatmul.mubr.msk.bf16.vlgmr.msra.gmra.mxu1 %vm217_vm2, %v13657_v18  ;;  %15090 = vmatmul.mubr.msk.bf16.vlgmr.msra.gmra.mxu0 %vm217_vm2, %v13659_v41 }
 0x82b   : > { %15094 = vmatpush3.msk.msra.mxu1 %vm16123_vm3, %v15889_v58  ;;  %15108 = vmatpush3.msk.msra.mxu0 %vm16123_vm3, %v15889_v58 }
 0x82c   : > { %15095 = vmatprep.subr.mxu1 %v15885_v4  ;;  %15109 = vmatprep.subr.mxu0 %v15885_v4 }
 0x82d   : > { %15096 = vmatpush3.msk.msra.mxu1 %vm16134_vm4, %v15889_v58  ;;  %15097 = vmatprep.mubr.msk.f32.mxu1 %vm15886_vm0, %v15885_v4 }
 0x82e   : > { %15110 = vmatpush3.msk.msra.mxu0 %vm16134_vm4, %v15889_v58  ;;  %15111 = vmatprep.mubr.msk.f32.mxu0 %vm15886_vm0, %v15885_v4 }
 0x82f   : > { %15100 = vmatprep.subr.mxu1 %v15885_v4  ;;  %15121 = vmatprep.subr.bf16.mxu0 %v15885_v4 }
 0x8c5   : > { %v6468_v47 = vpop.f32.mrf.mxu1  ;;  %v6640_v14 = vpop.f32.mrf.mxu0 }
 0x8c7   : > { %v15017_v15 = vpop.f32.mrf.mxu1  ;;  %v15031_v16 = vpop.f32.mrf.mxu0 }
 0x8c9   : > { %v6540_v48 = vpop.f32.mrf.mxu1 }
 0x8ca   : > { %v6541_v25 = vadd.f32 %v6540_v48, %v6468_v47  ;;  %v6797_v26 = vpop.f32.mrf.mxu0 }
 0x8cb   : > { %v15024_v51 = vpop.f32.mrf.mxu1 }
 0x8cc   : > { %v6551_v55 = vrot.slane %v6541_v25, %v16317_v33  ;;  %v15043_v28 = vpop.f32.mrf.mxu0  ;;  %v7572_v25 = vpop.permute.xlu0 %7571 }
 0x8cd   : > { %v6713_v29 = vpop.f32.mrf.mxu1 }
 0x8ce   : > { %v6552_v30 = vcombine.high %v6551_v55, %v6551_v55  ;;  %v6559_v57 = vrot.slane %v6551_v55, %v16317_v33  ;;  %v6714_v34 = vadd.f32 %v6713_v29, %v6640_v14  ;;  %v6800_v35 = vpop.f32.mrf.mxu0 }
 0x8cf   : > { %v15038_v1 = vpop.f32.mrf.mxu1 }
 0x8d0   : > { %v6566_v10 = vrot.slane %v6552_v30, %v16317_v33  ;;  %6569 = vst.msk [vmem:[%s16323_s16 + $0xe] sm:$0x1] %vm856_vm8, %v6559_v57  ;;  %v6724_v37 = vrot.slane %v6714_v34, %v16317_v33  ;;  %v15044_v38 = vpop.f32.mrf.mxu0  ;;  %v7577_v34 = vsel %vm221_vm1, %v7572_v25, 0 }
 0x8d2   : > { %6570 = vst.msk [vmem:[%s16323_s16 + $0x2e] sm:$0x1] %vm856_vm8, %v6566_v10  ;;  %v6725_v39 = vcombine.high %v6724_v37, %v6724_v37  ;;  %v6732_v11 = vrot.slane %v6724_v37, %v16317_v33  ;;  %v6843_v42 = vpop.f32.mrf.mxu1  ;;  %v6892_v43 = vpop.f32.mrf.mxu0  ;;  %v13674_v10 = vld [vmem:[%s18542_s1 + $0x4] sm:$0xf] }
 0x8d3   : > { %v6844_v50 = vadd.f32 %v6843_v42, %v6797_v26  ;;  %v7667_v37 = vpop.permute.xlu1 %7666  ;;  %v7774_v42 = vpop.permute.xlu0 %7773 }
 0x8d4   : > { %v6739_v13 = vrot.slane %v6725_v39, %v16317_v33  ;;  %6742 = vst.msk [vmem:[%s16323_s16 + $0xf] sm:$0x1] %vm856_vm8, %v6732_v11  ;;  %v15049_v19 = vpop.f32.mrf.mxu1  ;;  %v15055_v45 = vpop.f32.mrf.mxu0  ;;  %v7672_v38 = vsel %vm221_vm1, %v7667_v37, 0  ;;  %v7623_v11 = vsel %vm221_vm1, %v17226_v22, 0  ;;  %v13677_v22 = vld [vmem:[%s18542_s1 + $0x8] sm:$0xf] }
 0x8d5   : > { %v6898_v32 = vadd.f32 %v6892_v43, %v6844_v50  ;;  %v7561_v43 = vld [vmem:[%s18542_s1] sm:$0xf]  ;;  %v7779_v19 = vsel %vm221_vm1, %v7774_v42, 0 }
 0x8d6   : > { %6743 = vst.msk [vmem:[%s16323_s16 + $0x2f] sm:$0x1] %vm856_vm8, %v6739_v13  ;;  %v6846_v46 = vpop.f32.mrf.mxu1  ;;  %v6895_v3 = vpop.f32.mrf.mxu0  ;;  %v7721_v13 = vsel %vm221_vm1, %v17229_v23, 0  ;;  %v13680_v23 = vld [vmem:[%s18542_s1 + $0xc] sm:$0xf] }
 0x8d7   : > { %v7824_v45 = vpop.permute.xlu1 %7823  ;;  %v13682_v46 = vld [vmem:[%s18542_s1 + $0x10] sm:$0xf] }
 0x8d8   : > { %v15050_v20 = vpop.f32.mrf.mxu1  ;;  %v15056_v49 = vpop.f32.mrf.mxu0  ;;  %v7829_v3 = vsel %vm221_vm1, %v7824_v45, 0 }
 0x8d9   : > { %v7879_v20 = vsel %vm221_vm1, %v17238_v27, 0  ;;  %v7932_v49 = vpop.permute.xlu0 %7931  ;;  %v13684_v27 = vld [vmem:[%s18542_s1 + $0x14] sm:$0xf] }
 0x8da   : > { %v6941_v31 = vpop.f32.mrf.mxu1  ;;  %v6999_v24 = vpop.f32.mrf.mxu0 }
 0x8db   : > { %v6947_v63 = vadd.f32 %v6941_v31, %v6898_v32  ;;  %v7982_v50 = vpop.permute.xlu1 %7981  ;;  %v13687_v31 = vld [vmem:[%s18542_s1 + $0x18] sm:$0xf]  ;;  %v13691_v32 = vld [vmem:[%s18542_s1 + $0x20] sm:$0xf] }
 0x8dc   : > { %v15061_v62 = vpop.f32.mrf.mxu1  ;;  %v15067_v52 = vpop.f32.mrf.mxu0 }
 0x8dd   : > { %v7005_v2 = vadd.f32 %v6999_v24, %v6947_v63  ;;  %v7937_v24 = vsel %vm221_vm1, %v7932_v49, 0  ;;  %v7987_v62 = vsel %vm221_vm1, %v7982_v50, 0  ;;  %v13689_v52 = vld [vmem:[%s18542_s1 + $0x1c] sm:$0xf] }
 0x8de   : > { %v6944_v53 = vpop.f32.mrf.mxu1  ;;  %v7002_v54 = vpop.f32.mrf.mxu0 }
 0x8df   : > { %v17534_v53 = vld [vmem:[%s15997_s27 + $0x16] sm:$0x3]  ;;  %v17537_v54 = vld [vmem:[%s15997_s27 + $0x18] sm:$0x3] }
 0x8e0   : > { %v15062_v17 = vpop.f32.mrf.mxu1  ;;  %v15068_v0 = vpop.f32.mrf.mxu0  ;;  %v9202_v63 = vrot.slane %v17534_v53, %v16013_v6 }
 0x8e1   : > { %v9404_v17 = vrot.slane %v17537_v54, %v16013_v6  ;;  %v17546_v0 = vld [vmem:[%s15997_s27 + $0x1a] sm:$0x3] }
 0x8e2   : > { %v7049_v36 = vpop.f32.mrf.mxu1  ;;  %v7099_v40 = vpop.f32.mrf.mxu0  ;;  %9203 = vrot.lane.b32.xlu0 %v9202_v63, %s15887_s29  ;;  %9298 = vrot.lane.b32.xlu1 %v9202_v63, %s15888_s30 }
 0x8e3   : > { %v7055_v41 = vadd.f32 %v7049_v36, %v7005_v2  ;;  %v9562_v36 = vrot.slane %v17546_v0, %v16013_v6 }
 0x8e4   : > { %v15073_v5 = vpop.f32.mrf.mxu1  ;;  %v15079_v18 = vpop.f32.mrf.mxu0 }
 0x8e5   : > { %v7105_v14 = vadd.f32 %v7099_v40, %v7055_v41 }
 0x8e6   : > { %v7052_v9 = vpop.f32.mrf.mxu1  ;;  %v7102_v21 = vpop.f32.mrf.mxu0  ;;  %9405 = vrot.lane.b32.xlu0 %v9404_v17, %s15887_s29  ;;  %9455 = vrot.lane.b32.xlu1 %v9404_v17, %s15888_s30 }
 0x8e8   : > { %v15074_v44 = vpop.f32.mrf.mxu1  ;;  %v15080_v47 = vpop.f32.mrf.mxu0 }
 0x8ea   : > { %v7157_v15 = vpop.f32.mrf.mxu1  ;;  %v7207_v16 = vpop.f32.mrf.mxu0  ;;  %9563 = vrot.lane.b32.xlu0 %v9562_v36, %s15887_s29  ;;  %9613 = vrot.lane.b32.xlu1 %v9562_v36, %s15888_s30 }
 0x8eb   : > { %v7163_v48 = vadd.f32 %v7157_v15, %v7105_v14 }
 0x8ec   : > { %v15085_v26 = vpop.f32.mrf.mxu1  ;;  %v15091_v51 = vpop.f32.mrf.mxu0 }
 0x8ed   : > { %v7213_v55 = vadd.f32 %v7207_v16, %v7163_v48 }
 0x8ee   : > { %v7160_v28 = vpop.f32.mrf.mxu1  ;;  %v7210_v29 = vpop.f32.mrf.mxu0 }
 0x8ef   : > { %v7215_v30 = vrot.slane %v7213_v55, 2  ;;  %v7387_v57 = vrot.slane %v7213_v55, 6  ;;  %v7460_v39 = vrot.slane %v7213_v55, 4 }
 0x8f0   : > { %v15086_v35 = vpop.f32.mrf.mxu1  ;;  %v15092_v1 = vpop.f32.mrf.mxu0 }
 0x8f1   : > { %15098 = vmatmul.mubr.msk.f32.vlgmr.msra.gmra.mxu1 %vm686_vm7, %v7215_v30  ;;  %15112 = vmatmul.mubr.msk.f32.vlgmr.msra.gmra.mxu0 %vm686_vm7, %v7387_v57 }
 0x8f2   : > { %15101 = vmatpush3.msk.msra.mxu1 %vm16147_vm5, %v15889_v58  ;;  %15122 = vmatpush3.bf16.msra.mxu0 %v7577_v34 }
 0x8f3   : > { %15102 = vmatprep.subr.mxu1 %v15885_v4  ;;  %15104 = vmatprep.mubr.msk.f32.mxu1 %vm15886_vm0, %v15885_v4 }
 0x8f4   : > { %15103 = vmatpush3.msk.msra.mxu1 %vm16151_vm6, %v15889_v58  ;;  %15123 = vmatprep.mubr.msk.bf16.mxu0 %vm15886_vm0, %v15885_v4 }
 0x8f5   : > { %15105 = vmatmul.mubr.msk.f32.vlgmr.msra.gmra.mxu1 %vm686_vm7, %v7213_v55  ;;  %15114 = vmatprep.subr.mxu1 %v15885_v4 }
 0x8f6   : > { %15124 = vmatmul.mubr.msk.bf16.vlgmr.msra.gmra.mxu0 %vm217_vm2, %v13674_v10  ;;  %15115 = vmatpush3.msk.msra.mxu1 %vm16147_vm5, %v15889_v58 }
 0x8f7   : > { %15116 = vmatprep.subr.mxu1 %v15885_v4  ;;  %15133 = vmatprep.subr.bf16.mxu0 %v15885_v4 }
 0x8f8   : > { %15117 = vmatpush3.msk.msra.mxu1 %vm16151_vm6, %v15889_v58  ;;  %15118 = vmatprep.mubr.msk.f32.mxu1 %vm15886_vm0, %v15885_v4 }
 0x8f9   : > { %15134 = vmatpush3.bf16.msra.mxu0 %v7672_v38  ;;  %15119 = vmatmul.mubr.msk.f32.vlgmr.msra.gmra.mxu1 %vm686_vm7, %v7460_v39 }
 0x8fa   : > { %15127 = vmatprep.subr.bf16.mxu1 %v15885_v4  ;;  %15129 = vmatprep.mubr.msk.bf16.mxu1 %vm15886_vm0, %v15885_v4 }
 0x8fb   : > { %15128 = vmatpush3.bf16.msra.mxu1 %v7623_v11  ;;  %15135 = vmatprep.mubr.msk.bf16.mxu0 %vm15886_vm0, %v15885_v4 }
 0x8fc   : > { %15139 = vmatprep.subr.bf16.mxu1 %v15885_v4  ;;  %15145 = vmatprep.subr.bf16.mxu0 %v15885_v4 }
 0x8fe   : > { %15130 = vmatmul.mubr.msk.bf16.vlgmr.msra.gmra.mxu1 %vm217_vm2, %v7561_v43  ;;  %15136 = vmatmul.mubr.msk.bf16.vlgmr.msra.gmra.mxu0 %vm217_vm2, %v13677_v22 }
 0x8ff   : > { %15140 = vmatpush3.bf16.msra.mxu1 %v7721_v13  ;;  %15146 = vmatpush3.bf16.msra.mxu0 %v7779_v19 }
 0x900   : > { %15141 = vmatprep.mubr.msk.bf16.mxu1 %vm15886_vm0, %v15885_v4  ;;  %15147 = vmatprep.mubr.msk.bf16.mxu0 %vm15886_vm0, %v15885_v4 }
 0x901   : > { %15151 = vmatprep.subr.bf16.mxu1 %v15885_v4  ;;  %15157 = vmatprep.subr.bf16.mxu0 %v15885_v4 }
 0x906   : > { %15142 = vmatmul.mubr.msk.bf16.vlgmr.msra.gmra.mxu1 %vm217_vm2, %v13680_v23  ;;  %15148 = vmatmul.mubr.msk.bf16.vlgmr.msra.gmra.mxu0 %vm217_vm2, %v13682_v46 }
 0x907   : > { %15152 = vmatpush3.bf16.msra.mxu1 %v7829_v3  ;;  %15158 = vmatpush3.bf16.msra.mxu0 %v7879_v20 }
 0x908   : > { %15153 = vmatprep.mubr.msk.bf16.mxu1 %vm15886_vm0, %v15885_v4  ;;  %15159 = vmatprep.mubr.msk.bf16.mxu0 %vm15886_vm0, %v15885_v4 }
 0x909   : > { %15163 = vmatprep.subr.bf16.mxu1 %v15885_v4  ;;  %15169 = vmatprep.subr.bf16.mxu0 %v15885_v4 }
 0x90e   : > { %15154 = vmatmul.mubr.msk.bf16.vlgmr.msra.gmra.mxu1 %vm217_vm2, %v13684_v27  ;;  %15160 = vmatmul.mubr.msk.bf16.vlgmr.msra.gmra.mxu0 %vm217_vm2, %v13687_v31 }
 0x90f   : > { %15164 = vmatpush3.bf16.msra.mxu1 %v7937_v24  ;;  %15170 = vmatpush3.bf16.msra.mxu0 %v7987_v62 }
 0x910   : > { %15165 = vmatprep.mubr.msk.bf16.mxu1 %vm15886_vm0, %v15885_v4  ;;  %15171 = vmatprep.mubr.msk.bf16.mxu0 %vm15886_vm0, %v15885_v4 }
 0x911   : > { %15175 = vmatprep.subr.mxu1 %v15885_v4  ;;  %15189 = vmatprep.subr.mxu0 %v15885_v4 }
 0x916   : > { %15166 = vmatmul.mubr.msk.bf16.vlgmr.msra.gmra.mxu1 %vm217_vm2, %v13689_v52  ;;  %15172 = vmatmul.mubr.msk.bf16.vlgmr.msra.gmra.mxu0 %vm217_vm2, %v13691_v32 }
 0x917   : > { %15176 = vmatpush3.msk.msra.mxu1 %vm16123_vm3, %v15889_v58  ;;  %15190 = vmatpush3.msk.msra.mxu0 %vm16123_vm3, %v15889_v58 }
 0x918   : > { %15177 = vmatprep.subr.mxu1 %v15885_v4  ;;  %15191 = vmatprep.subr.mxu0 %v15885_v4 }
 0x919   : > { %15178 = vmatpush3.msk.msra.mxu1 %vm16134_vm4, %v15889_v58  ;;  %15179 = vmatprep.mubr.msk.f32.mxu1 %vm15886_vm0, %v15885_v4 }
 0x91a   : > { %15192 = vmatpush3.msk.msra.mxu0 %vm16134_vm4, %v15889_v58  ;;  %15193 = vmatprep.mubr.msk.f32.mxu0 %vm15886_vm0, %v15885_v4 }
 0x91b   : > { %15182 = vmatprep.subr.mxu1 %v15885_v4  ;;  %15203 = vmatprep.subr.bf16.mxu0 %v15885_v4 }
 0x9b1   : > { %v7284_v40 = vpop.f32.mrf.mxu1  ;;  %v7456_v2 = vpop.f32.mrf.mxu0 }
 0x9b3   : > { %v15099_v5 = vpop.f32.mrf.mxu1  ;;  %v15113_v18 = vpop.f32.mrf.mxu0 }
 0x9b5   : > { %v7356_v41 = vpop.f32.mrf.mxu1 }
 0x9b6   : > { %v7357_v9 = vadd.f32 %v7356_v41, %v7284_v40  ;;  %v7613_v21 = vpop.f32.mrf.mxu0 }
 0x9b7   : > { %v15106_v44 = vpop.f32.mrf.mxu1 }
 0x9b8   : > { %v7367_v47 = vrot.slane %v7357_v9, %v16317_v33  ;;  %v15125_v14 = vpop.f32.mrf.mxu0  ;;  %v8388_v9 = vpop.permute.xlu0 %8387 }
 0x9b9   : > { %v7529_v15 = vpop.f32.mrf.mxu1 }
 0x9ba   : > { %v7368_v16 = vcombine.high %v7367_v47, %v7367_v47  ;;  %v7375_v48 = vrot.slane %v7367_v47, %v16317_v33  ;;  %v7530_v25 = vadd.f32 %v7529_v15, %v7456_v2  ;;  %v7616_v26 = vpop.f32.mrf.mxu0 }
 0x9bb   : > { %v15120_v51 = vpop.f32.mrf.mxu1 }
 0x9bc   : > { %v7382_v55 = vrot.slane %v7368_v16, %v16317_v33  ;;  %7385 = vst.msk [vmem:[%s16323_s16 + $0x10] sm:$0x1] %vm856_vm8, %v7375_v48  ;;  %v7540_v28 = vrot.slane %v7530_v25, %v16317_v33  ;;  %v15126_v29 = vpop.f32.mrf.mxu0  ;;  %v8393_v25 = vsel %vm221_vm1, %v8388_v9, 0 }
 0x9be   : > { %7386 = vst.msk [vmem:[%s16323_s16 + $0x30] sm:$0x1] %vm856_vm8, %v7382_v55  ;;  %v7541_v30 = vcombine.high %v7540_v28, %v7540_v28  ;;  %v7548_v57 = vrot.slane %v7540_v28, %v16317_v33  ;;  %v7659_v34 = vpop.f32.mrf.mxu1  ;;  %v7708_v35 = vpop.f32.mrf.mxu0  ;;  %v13706_v55 = vld [vmem:[%s18542_s1 + $0x4] sm:$0xf] }
 0x9bf   : > { %v7660_v43 = vadd.f32 %v7659_v34, %v7613_v21  ;;  %v8483_v28 = vpop.permute.xlu1 %8482  ;;  %v8590_v34 = vpop.permute.xlu0 %8589 }
 0x9c0   : > { %v7555_v1 = vrot.slane %v7541_v30, %v16317_v33  ;;  %7558 = vst.msk [vmem:[%s16323_s16 + $0x11] sm:$0x1] %vm856_vm8, %v7548_v57  ;;  %v15131_v10 = vpop.f32.mrf.mxu1  ;;  %v15137_v37 = vpop.f32.mrf.mxu0  ;;  %v8488_v29 = vsel %vm221_vm1, %v8483_v28, 0  ;;  %v8439_v57 = vsel %vm221_vm1, %v17380_v7, 0  ;;  %v13709_v7 = vld [vmem:[%s18542_s1 + $0x8] sm:$0xf] }
 0x9c1   : > { %v7714_v23 = vadd.f32 %v7708_v35, %v7660_v43  ;;  %v8377_v35 = vld [vmem:[%s18542_s1] sm:$0xf]  ;;  %v8595_v10 = vsel %vm221_vm1, %v8590_v34, 0 }
 0x9c2   : > { %7559 = vst.msk [vmem:[%s16323_s16 + $0x31] sm:$0x1] %vm856_vm8, %v7555_v1  ;;  %v7662_v38 = vpop.f32.mrf.mxu1  ;;  %v7711_v39 = vpop.f32.mrf.mxu0  ;;  %v8537_v1 = vsel %vm221_vm1, %v17383_v8, 0  ;;  %v13712_v8 = vld [vmem:[%s18542_s1 + $0xc] sm:$0xf] }
 0x9c3   : > { %v8640_v37 = vpop.permute.xlu1 %8639  ;;  %v13714_v38 = vld [vmem:[%s18542_s1 + $0x10] sm:$0xf] }
 0x9c4   : > { %v15132_v11 = vpop.f32.mrf.mxu1  ;;  %v15138_v42 = vpop.f32.mrf.mxu0  ;;  %v8645_v39 = vsel %vm221_vm1, %v8640_v37, 0 }
 0x9c5   : > { %v8695_v11 = vsel %vm221_vm1, %v17392_v12, 0  ;;  %v8748_v42 = vpop.permute.xlu0 %8747  ;;  %v13716_v12 = vld [vmem:[%s18542_s1 + $0x14] sm:$0xf] }
 0x9c6   : > { %v7757_v22 = vpop.f32.mrf.mxu1  ;;  %v7815_v13 = vpop.f32.mrf.mxu0 }
 0x9c7   : > { %v7763_v20 = vadd.f32 %v7757_v22, %v7714_v23  ;;  %v8798_v43 = vpop.permute.xlu1 %8797  ;;  %v13719_v22 = vld [vmem:[%s18542_s1 + $0x18] sm:$0xf]  ;;  %v13723_v23 = vld [vmem:[%s18542_s1 + $0x20] sm:$0xf] }
 0x9c8   : > { %v15143_v19 = vpop.f32.mrf.mxu1  ;;  %v15149_v45 = vpop.f32.mrf.mxu0 }
 0x9c9   : > { %v7821_v24 = vadd.f32 %v7815_v13, %v7763_v20  ;;  %v8753_v13 = vsel %vm221_vm1, %v8748_v42, 0  ;;  %v8803_v19 = vsel %vm221_vm1, %v8798_v43, 0  ;;  %v13721_v45 = vld [vmem:[%s18542_s1 + $0x1c] sm:$0xf] }
 0x9ca   : > { %v7760_v46 = vpop.f32.mrf.mxu1  ;;  %v7818_v3 = vpop.f32.mrf.mxu0 }
 0x9cb   : > { %v17688_v46 = vld [vmem:[%s15997_s27 + $0x18] sm:$0x3]  ;;  %v17691_v3 = vld [vmem:[%s15997_s27 + $0x1a] sm:$0x3] }
 0x9cc   : > { %v15144_v49 = vpop.f32.mrf.mxu1  ;;  %v15150_v50 = vpop.f32.mrf.mxu0  ;;  %v10018_v20 = vrot.slane %v17688_v46, %v16013_v6 }
 0x9cd   : > { %v10220_v49 = vrot.slane %v17691_v3, %v16013_v6  ;;  %v17700_v50 = vld [vmem:[%s15997_s27 + $0x1c] sm:$0x3] }
 0x9ce   : > { %v7865_v27 = vpop.f32.mrf.mxu1  ;;  %v7915_v31 = vpop.f32.mrf.mxu0  ;;  %10019 = vrot.lane.b32.xlu0 %v10018_v20, %s15887_s29  ;;  %10114 = vrot.lane.b32.xlu1 %v10018_v20, %s15888_s30 }
 0x9cf   : > { %v7871_v32 = vadd.f32 %v7865_v27, %v7821_v24  ;;  %v10378_v27 = vrot.slane %v17700_v50, %v16013_v6 }
 0x9d0   : > { %v15155_v62 = vpop.f32.mrf.mxu1  ;;  %v15161_v52 = vpop.f32.mrf.mxu0 }
 0x9d1   : > { %v7921_v2 = vadd.f32 %v7915_v31, %v7871_v32 }
 0x9d2   : > { %v7868_v63 = vpop.f32.mrf.mxu1  ;;  %v7918_v17 = vpop.f32.mrf.mxu0  ;;  %10221 = vrot.lane.b32.xlu0 %v10220_v49, %s15887_s29  ;;  %10271 = vrot.lane.b32.xlu1 %v10220_v49, %s15888_s30 }
 0x9d4   : > { %v15156_v36 = vpop.f32.mrf.mxu1  ;;  %v15162_v40 = vpop.f32.mrf.mxu0 }
 0x9d6   : > { %v7973_v5 = vpop.f32.mrf.mxu1  ;;  %v8023_v18 = vpop.f32.mrf.mxu0  ;;  %10379 = vrot.lane.b32.xlu0 %v10378_v27, %s15887_s29  ;;  %10429 = vrot.lane.b32.xlu1 %v10378_v27, %s15888_s30 }
 0x9d7   : > { %v7979_v41 = vadd.f32 %v7973_v5, %v7921_v2 }
 0x9d8   : > { %v15167_v21 = vpop.f32.mrf.mxu1  ;;  %v15173_v44 = vpop.f32.mrf.mxu0 }
 0x9d9   : > { %v8029_v47 = vadd.f32 %v8023_v18, %v7979_v41 }
 0x9da   : > { %v7976_v14 = vpop.f32.mrf.mxu1  ;;  %v8026_v15 = vpop.f32.mrf.mxu0 }
 0x9db   : > { %v8031_v16 = vrot.slane %v8029_v47, 2  ;;  %v8203_v48 = vrot.slane %v8029_v47, 6  ;;  %v8276_v30 = vrot.slane %v8029_v47, 4 }
 0x9dc   : > { %v15168_v26 = vpop.f32.mrf.mxu1  ;;  %v15174_v51 = vpop.f32.mrf.mxu0 }
 0x9dd   : > { %15180 = vmatmul.mubr.msk.f32.vlgmr.msra.gmra.mxu1 %vm686_vm7, %v8031_v16  ;;  %15194 = vmatmul.mubr.msk.f32.vlgmr.msra.gmra.mxu0 %vm686_vm7, %v8203_v48 }
 0x9de   : > { %15183 = vmatpush3.msk.msra.mxu1 %vm16147_vm5, %v15889_v58  ;;  %15204 = vmatpush3.bf16.msra.mxu0 %v8393_v25 }
 0x9df   : > { %15184 = vmatprep.subr.mxu1 %v15885_v4  ;;  %15186 = vmatprep.mubr.msk.f32.mxu1 %vm15886_vm0, %v15885_v4 }
 0x9e0   : > { %15185 = vmatpush3.msk.msra.mxu1 %vm16151_vm6, %v15889_v58  ;;  %15205 = vmatprep.mubr.msk.bf16.mxu0 %vm15886_vm0, %v15885_v4 }
 0x9e1   : > { %15187 = vmatmul.mubr.msk.f32.vlgmr.msra.gmra.mxu1 %vm686_vm7, %v8029_v47  ;;  %15196 = vmatprep.subr.mxu1 %v15885_v4 }
 0x9e2   : > { %15206 = vmatmul.mubr.msk.bf16.vlgmr.msra.gmra.mxu0 %vm217_vm2, %v13706_v55  ;;  %15197 = vmatpush3.msk.msra.mxu1 %vm16147_vm5, %v15889_v58 }
 0x9e3   : > { %15198 = vmatprep.subr.mxu1 %v15885_v4  ;;  %15215 = vmatprep.subr.bf16.mxu0 %v15885_v4 }
 0x9e4   : > { %15199 = vmatpush3.msk.msra.mxu1 %vm16151_vm6, %v15889_v58  ;;  %15200 = vmatprep.mubr.msk.f32.mxu1 %vm15886_vm0, %v15885_v4 }
 0x9e5   : > { %15216 = vmatpush3.bf16.msra.mxu0 %v8488_v29  ;;  %15201 = vmatmul.mubr.msk.f32.vlgmr.msra.gmra.mxu1 %vm686_vm7, %v8276_v30 }
 0x9e6   : > { %15209 = vmatprep.subr.bf16.mxu1 %v15885_v4  ;;  %15211 = vmatprep.mubr.msk.bf16.mxu1 %vm15886_vm0, %v15885_v4 }
 0x9e7   : > { %15210 = vmatpush3.bf16.msra.mxu1 %v8439_v57  ;;  %15217 = vmatprep.mubr.msk.bf16.mxu0 %vm15886_vm0, %v15885_v4 }
 0x9e8   : > { %15221 = vmatprep.subr.bf16.mxu1 %v15885_v4  ;;  %15227 = vmatprep.subr.bf16.mxu0 %v15885_v4 }
 0x9ea   : > { %15212 = vmatmul.mubr.msk.bf16.vlgmr.msra.gmra.mxu1 %vm217_vm2, %v8377_v35  ;;  %15218 = vmatmul.mubr.msk.bf16.vlgmr.msra.gmra.mxu0 %vm217_vm2, %v13709_v7 }
 0x9eb   : > { %15222 = vmatpush3.bf16.msra.mxu1 %v8537_v1  ;;  %15228 = vmatpush3.bf16.msra.mxu0 %v8595_v10 }
 0x9ec   : > { %15223 = vmatprep.mubr.msk.bf16.mxu1 %vm15886_vm0, %v15885_v4  ;;  %15229 = vmatprep.mubr.msk.bf16.mxu0 %vm15886_vm0, %v15885_v4 }
 0x9ed   : > { %15233 = vmatprep.subr.bf16.mxu1 %v15885_v4  ;;  %15239 = vmatprep.subr.bf16.mxu0 %v15885_v4 }
 0x9f2   : > { %15224 = vmatmul.mubr.msk.bf16.vlgmr.msra.gmra.mxu1 %vm217_vm2, %v13712_v8  ;;  %15230 = vmatmul.mubr.msk.bf16.vlgmr.msra.gmra.mxu0 %vm217_vm2, %v13714_v38 }
 0x9f3   : > { %15234 = vmatpush3.bf16.msra.mxu1 %v8645_v39  ;;  %15240 = vmatpush3.bf16.msra.mxu0 %v8695_v11 }
 0x9f4   : > { %15235 = vmatprep.mubr.msk.bf16.mxu1 %vm15886_vm0, %v15885_v4  ;;  %15241 = vmatprep.mubr.msk.bf16.mxu0 %vm15886_vm0, %v15885_v4 }
 0x9f5   : > { %15245 = vmatprep.subr.bf16.mxu1 %v15885_v4  ;;  %15251 = vmatprep.subr.bf16.mxu0 %v15885_v4 }
 0x9fa   : > { %15236 = vmatmul.mubr.msk.bf16.vlgmr.msra.gmra.mxu1 %vm217_vm2, %v13716_v12  ;;  %15242 = vmatmul.mubr.msk.bf16.vlgmr.msra.gmra.mxu0 %vm217_vm2, %v13719_v22 }
 0x9fb   : > { %15246 = vmatpush3.bf16.msra.mxu1 %v8753_v13  ;;  %15252 = vmatpush3.bf16.msra.mxu0 %v8803_v19 }
 0x9fc   : > { %15247 = vmatprep.mubr.msk.bf16.mxu1 %vm15886_vm0, %v15885_v4  ;;  %15253 = vmatprep.mubr.msk.bf16.mxu0 %vm15886_vm0, %v15885_v4 }
 0x9fd   : > { %15257 = vmatprep.subr.mxu1 %v15885_v4  ;;  %15271 = vmatprep.subr.mxu0 %v15885_v4 }
 0xa02   : > { %15248 = vmatmul.mubr.msk.bf16.vlgmr.msra.gmra.mxu1 %vm217_vm2, %v13721_v45  ;;  %15254 = vmatmul.mubr.msk.bf16.vlgmr.msra.gmra.mxu0 %vm217_vm2, %v13723_v23 }
 0xa03   : > { %15258 = vmatpush3.msk.msra.mxu1 %vm16123_vm3, %v15889_v58  ;;  %15272 = vmatpush3.msk.msra.mxu0 %vm16123_vm3, %v15889_v58 }
 0xa04   : > { %15259 = vmatprep.subr.mxu1 %v15885_v4  ;;  %15273 = vmatprep.subr.mxu0 %v15885_v4 }
 0xa05   : > { %15260 = vmatpush3.msk.msra.mxu1 %vm16134_vm4, %v15889_v58  ;;  %15261 = vmatprep.mubr.msk.f32.mxu1 %vm15886_vm0, %v15885_v4 }
 0xa06   : > { %15274 = vmatpush3.msk.msra.mxu0 %vm16134_vm4, %v15889_v58  ;;  %15275 = vmatprep.mubr.msk.f32.mxu0 %vm15886_vm0, %v15885_v4 }
 0xa07   : > { %15264 = vmatprep.subr.mxu1 %v15885_v4  ;;  %15285 = vmatprep.subr.bf16.mxu0 %v15885_v4 }
 0xa9d   : > { %v8100_v31 = vpop.f32.mrf.mxu1  ;;  %v8272_v24 = vpop.f32.mrf.mxu0 }
 0xa9f   : > { %v15181_v62 = vpop.f32.mrf.mxu1  ;;  %v15195_v52 = vpop.f32.mrf.mxu0 }
 0xaa1   : > { %v8172_v32 = vpop.f32.mrf.mxu1 }
 0xaa2   : > { %v8173_v63 = vadd.f32 %v8172_v32, %v8100_v31  ;;  %v8429_v17 = vpop.f32.mrf.mxu0 }
 0xaa3   : > { %v15188_v36 = vpop.f32.mrf.mxu1 }
 0xaa4   : > { %v8183_v40 = vrot.slane %v8173_v63, %v16317_v33  ;;  %v15207_v2 = vpop.f32.mrf.mxu0  ;;  %v9204_v63 = vpop.permute.xlu0 %9203 }
 0xaa5   : > { %v8345_v5 = vpop.f32.mrf.mxu1 }
 0xaa6   : > { %v8184_v18 = vcombine.high %v8183_v40, %v8183_v40  ;;  %v8191_v41 = vrot.slane %v8183_v40, %v16317_v33  ;;  %v8346_v9 = vadd.f32 %v8345_v5, %v8272_v24  ;;  %v8432_v21 = vpop.f32.mrf.mxu0 }
 0xaa7   : > { %v15202_v44 = vpop.f32.mrf.mxu1 }
 0xaa8   : > { %v8198_v47 = vrot.slane %v8184_v18, %v16317_v33  ;;  %8201 = vst.msk [vmem:[%s16323_s16 + $0x12] sm:$0x1] %vm856_vm8, %v8191_v41  ;;  %v8356_v14 = vrot.slane %v8346_v9, %v16317_v33  ;;  %v15208_v15 = vpop.f32.mrf.mxu0  ;;  %v9209_v9 = vsel %vm221_vm1, %v9204_v63, 0 }
 0xaaa   : > { %8202 = vst.msk [vmem:[%s16323_s16 + $0x32] sm:$0x1] %vm856_vm8, %v8198_v47  ;;  %v8357_v16 = vcombine.high %v8356_v14, %v8356_v14  ;;  %v8364_v48 = vrot.slane %v8356_v14, %v16317_v33  ;;  %v8475_v25 = vpop.f32.mrf.mxu1  ;;  %v8524_v26 = vpop.f32.mrf.mxu0  ;;  %v13738_v47 = vld [vmem:[%s18542_s1 + $0x4] sm:$0xf] }
 0xaab   : > { %v8476_v35 = vadd.f32 %v8475_v25, %v8429_v17  ;;  %v9299_v14 = vpop.permute.xlu1 %9298  ;;  %v9406_v25 = vpop.permute.xlu0 %9405 }
 0xaac   : > { %v8371_v51 = vrot.slane %v8357_v16, %v16317_v33  ;;  %8374 = vst.msk [vmem:[%s16323_s16 + $0x13] sm:$0x1] %vm856_vm8, %v8364_v48  ;;  %v15213_v55 = vpop.f32.mrf.mxu1  ;;  %v15219_v28 = vpop.f32.mrf.mxu0  ;;  %v9304_v15 = vsel %vm221_vm1, %v9299_v14, 0  ;;  %v9255_v48 = vsel %vm221_vm1, %v17534_v53, 0  ;;  %v13741_v53 = vld [vmem:[%s18542_s1 + $0x8] sm:$0xf] }
 0xaad   : > { %v8530_v8 = vadd.f32 %v8524_v26, %v8476_v35  ;;  %v9193_v26 = vld [vmem:[%s18542_s1] sm:$0xf]  ;;  %v9411_v55 = vsel %vm221_vm1, %v9406_v25, 0 }
 0xaae   : > { %8375 = vst.msk [vmem:[%s16323_s16 + $0x33] sm:$0x1] %vm856_vm8, %v8371_v51  ;;  %v8478_v29 = vpop.f32.mrf.mxu1  ;;  %v8527_v30 = vpop.f32.mrf.mxu0  ;;  %v9353_v51 = vsel %vm221_vm1, %v17537_v54, 0  ;;  %v13744_v54 = vld [vmem:[%s18542_s1 + $0xc] sm:$0xf] }
 0xaaf   : > { %v9456_v28 = vpop.permute.xlu1 %9455  ;;  %v13746_v29 = vld [vmem:[%s18542_s1 + $0x10] sm:$0xf] }
 0xab0   : > { %v15214_v57 = vpop.f32.mrf.mxu1  ;;  %v15220_v34 = vpop.f32.mrf.mxu0  ;;  %v9461_v30 = vsel %vm221_vm1, %v9456_v28, 0 }
 0xab1   : > { %v9511_v57 = vsel %vm221_vm1, %v17546_v0, 0  ;;  %v9564_v34 = vpop.permute.xlu0 %9563  ;;  %v13748_v0 = vld [vmem:[%s18542_s1 + $0x14] sm:$0xf] }
 0xab2   : > { %v8573_v7 = vpop.f32.mrf.mxu1  ;;  %v8631_v1 = vpop.f32.mrf.mxu0 }
 0xab3   : > { %v8579_v11 = vadd.f32 %v8573_v7, %v8530_v8  ;;  %v9614_v35 = vpop.permute.xlu1 %9613  ;;  %v13751_v7 = vld [vmem:[%s18542_s1 + $0x18] sm:$0xf]  ;;  %v13755_v8 = vld [vmem:[%s18542_s1 + $0x20] sm:$0xf] }
 0xab4   : > { %v15225_v10 = vpop.f32.mrf.mxu1  ;;  %v15231_v37 = vpop.f32.mrf.mxu0 }
 0xab5   : > { %v8637_v13 = vadd.f32 %v8631_v1, %v8579_v11  ;;  %v9569_v1 = vsel %vm221_vm1, %v9564_v34, 0  ;;  %v9619_v10 = vsel %vm221_vm1, %v9614_v35, 0  ;;  %v13753_v37 = vld [vmem:[%s18542_s1 + $0x1c] sm:$0xf] }
 0xab6   : > { %v8576_v38 = vpop.f32.mrf.mxu1  ;;  %v8634_v39 = vpop.f32.mrf.mxu0 }
 0xab7   : > { %v17842_v38 = vld [vmem:[%s15997_s27 + $0x1a] sm:$0x3]  ;;  %v17845_v39 = vld [vmem:[%s15997_s27 + $0x1c] sm:$0x3] }
 0xab8   : > { %v15226_v42 = vpop.f32.mrf.mxu1  ;;  %v15232_v43 = vpop.f32.mrf.mxu0  ;;  %v10834_v11 = vrot.slane %v17842_v38, %v16013_v6 }
 0xab9   : > { %v11036_v42 = vrot.slane %v17845_v39, %v16013_v6  ;;  %v17854_v43 = vld [vmem:[%s15997_s27 + $0x1e] sm:$0x3] }
 0xaba   : > { %v8681_v12 = vpop.f32.mrf.mxu1  ;;  %v8731_v22 = vpop.f32.mrf.mxu0  ;;  %10835 = vrot.lane.b32.xlu0 %v10834_v11, %s15887_s29  ;;  %10930 = vrot.lane.b32.xlu1 %v10834_v11, %s15888_s30 }
 0xabb   : > { %v8687_v23 = vadd.f32 %v8681_v12, %v8637_v13  ;;  %v11194_v12 = vrot.slane %v17854_v43, %v16013_v6 }
 0xabc   : > { %v15237_v19 = vpop.f32.mrf.mxu1  ;;  %v15243_v45 = vpop.f32.mrf.mxu0 }
 0xabd   : > { %v8737_v24 = vadd.f32 %v8731_v22, %v8687_v23 }
 0xabe   : > { %v8684_v20 = vpop.f32.mrf.mxu1  ;;  %v8734_v49 = vpop.f32.mrf.mxu0  ;;  %11037 = vrot.lane.b32.xlu0 %v11036_v42, %s15887_s29  ;;  %11087 = vrot.lane.b32.xlu1 %v11036_v42, %s15888_s30 }
 0xac0   : > { %v15238_v27 = vpop.f32.mrf.mxu1  ;;  %v15244_v31 = vpop.f32.mrf.mxu0 }
 0xac2   : > { %v8789_v62 = vpop.f32.mrf.mxu1  ;;  %v8839_v52 = vpop.f32.mrf.mxu0  ;;  %11195 = vrot.lane.b32.xlu0 %v11194_v12, %s15887_s29  ;;  %11245 = vrot.lane.b32.xlu1 %v11194_v12, %s15888_s30 }
 0xac3   : > { %v8795_v32 = vadd.f32 %v8789_v62, %v8737_v24 }
 0xac4   : > { %v15249_v17 = vpop.f32.mrf.mxu1  ;;  %v15255_v36 = vpop.f32.mrf.mxu0 }
 0xac5   : > { %v8845_v40 = vadd.f32 %v8839_v52, %v8795_v32 }
 0xac6   : > { %v8792_v2 = vpop.f32.mrf.mxu1  ;;  %v8842_v5 = vpop.f32.mrf.mxu0 }
 0xac7   : > { %v8847_v18 = vrot.slane %v8845_v40, 2  ;;  %v9019_v41 = vrot.slane %v8845_v40, 6  ;;  %v9092_v16 = vrot.slane %v8845_v40, 4 }
 0xac8   : > { %v15250_v21 = vpop.f32.mrf.mxu1  ;;  %v15256_v44 = vpop.f32.mrf.mxu0 }
 0xac9   : > { %15262 = vmatmul.mubr.msk.f32.vlgmr.msra.gmra.mxu1 %vm686_vm7, %v8847_v18  ;;  %15276 = vmatmul.mubr.msk.f32.vlgmr.msra.gmra.mxu0 %vm686_vm7, %v9019_v41 }
 0xaca   : > { %15265 = vmatpush3.msk.msra.mxu1 %vm16147_vm5, %v15889_v58  ;;  %15286 = vmatpush3.bf16.msra.mxu0 %v9209_v9 }
 0xacb   : > { %15266 = vmatprep.subr.mxu1 %v15885_v4  ;;  %15268 = vmatprep.mubr.msk.f32.mxu1 %vm15886_vm0, %v15885_v4 }
 0xacc   : > { %15267 = vmatpush3.msk.msra.mxu1 %vm16151_vm6, %v15889_v58  ;;  %15287 = vmatprep.mubr.msk.bf16.mxu0 %vm15886_vm0, %v15885_v4 }
 0xacd   : > { %15269 = vmatmul.mubr.msk.f32.vlgmr.msra.gmra.mxu1 %vm686_vm7, %v8845_v40  ;;  %15278 = vmatprep.subr.mxu1 %v15885_v4 }
 0xace   : > { %15288 = vmatmul.mubr.msk.bf16.vlgmr.msra.gmra.mxu0 %vm217_vm2, %v13738_v47  ;;  %15279 = vmatpush3.msk.msra.mxu1 %vm16147_vm5, %v15889_v58 }
 0xacf   : > { %15280 = vmatprep.subr.mxu1 %v15885_v4  ;;  %15297 = vmatprep.subr.bf16.mxu0 %v15885_v4 }
 0xad0   : > { %15281 = vmatpush3.msk.msra.mxu1 %vm16151_vm6, %v15889_v58  ;;  %15282 = vmatprep.mubr.msk.f32.mxu1 %vm15886_vm0, %v15885_v4 }
 0xad1   : > { %15298 = vmatpush3.bf16.msra.mxu0 %v9304_v15  ;;  %15283 = vmatmul.mubr.msk.f32.vlgmr.msra.gmra.mxu1 %vm686_vm7, %v9092_v16 }
 0xad2   : > { %15291 = vmatprep.subr.bf16.mxu1 %v15885_v4  ;;  %15293 = vmatprep.mubr.msk.bf16.mxu1 %vm15886_vm0, %v15885_v4 }
 0xad3   : > { %15292 = vmatpush3.bf16.msra.mxu1 %v9255_v48  ;;  %15299 = vmatprep.mubr.msk.bf16.mxu0 %vm15886_vm0, %v15885_v4 }
 0xad4   : > { %15303 = vmatprep.subr.bf16.mxu1 %v15885_v4  ;;  %15309 = vmatprep.subr.bf16.mxu0 %v15885_v4 }
 0xad6   : > { %15294 = vmatmul.mubr.msk.bf16.vlgmr.msra.gmra.mxu1 %vm217_vm2, %v9193_v26  ;;  %15300 = vmatmul.mubr.msk.bf16.vlgmr.msra.gmra.mxu0 %vm217_vm2, %v13741_v53 }
 0xad7   : > { %15304 = vmatpush3.bf16.msra.mxu1 %v9353_v51  ;;  %15310 = vmatpush3.bf16.msra.mxu0 %v9411_v55 }
 0xad8   : > { %15305 = vmatprep.mubr.msk.bf16.mxu1 %vm15886_vm0, %v15885_v4  ;;  %15311 = vmatprep.mubr.msk.bf16.mxu0 %vm15886_vm0, %v15885_v4 }
 0xad9   : > { %15315 = vmatprep.subr.bf16.mxu1 %v15885_v4  ;;  %15321 = vmatprep.subr.bf16.mxu0 %v15885_v4 }
 0xade   : > { %15306 = vmatmul.mubr.msk.bf16.vlgmr.msra.gmra.mxu1 %vm217_vm2, %v13744_v54  ;;  %15312 = vmatmul.mubr.msk.bf16.vlgmr.msra.gmra.mxu0 %vm217_vm2, %v13746_v29 }
 0xadf   : > { %15316 = vmatpush3.bf16.msra.mxu1 %v9461_v30  ;;  %15322 = vmatpush3.bf16.msra.mxu0 %v9511_v57 }
 0xae0   : > { %15317 = vmatprep.mubr.msk.bf16.mxu1 %vm15886_vm0, %v15885_v4  ;;  %15323 = vmatprep.mubr.msk.bf16.mxu0 %vm15886_vm0, %v15885_v4 }
 0xae1   : > { %15327 = vmatprep.subr.bf16.mxu1 %v15885_v4  ;;  %15333 = vmatprep.subr.bf16.mxu0 %v15885_v4 }
 0xae6   : > { %15318 = vmatmul.mubr.msk.bf16.vlgmr.msra.gmra.mxu1 %vm217_vm2, %v13748_v0  ;;  %15324 = vmatmul.mubr.msk.bf16.vlgmr.msra.gmra.mxu0 %vm217_vm2, %v13751_v7 }
 0xae7   : > { %15328 = vmatpush3.bf16.msra.mxu1 %v9569_v1  ;;  %15334 = vmatpush3.bf16.msra.mxu0 %v9619_v10 }
 0xae8   : > { %15329 = vmatprep.mubr.msk.bf16.mxu1 %vm15886_vm0, %v15885_v4  ;;  %15335 = vmatprep.mubr.msk.bf16.mxu0 %vm15886_vm0, %v15885_v4 }
 0xae9   : > { %15339 = vmatprep.subr.mxu1 %v15885_v4  ;;  %15353 = vmatprep.subr.mxu0 %v15885_v4 }
 0xaee   : > { %15330 = vmatmul.mubr.msk.bf16.vlgmr.msra.gmra.mxu1 %vm217_vm2, %v13753_v37  ;;  %15336 = vmatmul.mubr.msk.bf16.vlgmr.msra.gmra.mxu0 %vm217_vm2, %v13755_v8 }
 0xaef   : > { %15340 = vmatpush3.msk.msra.mxu1 %vm16123_vm3, %v15889_v58  ;;  %15354 = vmatpush3.msk.msra.mxu0 %vm16123_vm3, %v15889_v58 }
 0xaf0   : > { %15341 = vmatprep.subr.mxu1 %v15885_v4  ;;  %15355 = vmatprep.subr.mxu0 %v15885_v4 }
 0xaf1   : > { %15342 = vmatpush3.msk.msra.mxu1 %vm16134_vm4, %v15889_v58  ;;  %15343 = vmatprep.mubr.msk.f32.mxu1 %vm15886_vm0, %v15885_v4 }
 0xaf2   : > { %15356 = vmatpush3.msk.msra.mxu0 %vm16134_vm4, %v15889_v58  ;;  %15357 = vmatprep.mubr.msk.f32.mxu0 %vm15886_vm0, %v15885_v4 }
 0xaf3   : > { %15346 = vmatprep.subr.mxu1 %v15885_v4  ;;  %15367 = vmatprep.subr.bf16.mxu0 %v15885_v4 }
 0xb89   : > { %v8916_v22 = vpop.f32.mrf.mxu1  ;;  %v9088_v13 = vpop.f32.mrf.mxu0 }
 0xb8b   : > { %v15263_v19 = vpop.f32.mrf.mxu1  ;;  %v15277_v45 = vpop.f32.mrf.mxu0 }
 0xb8d   : > { %v8988_v23 = vpop.f32.mrf.mxu1 }
 0xb8e   : > { %v8989_v20 = vadd.f32 %v8988_v23, %v8916_v22  ;;  %v9245_v49 = vpop.f32.mrf.mxu0 }
 0xb8f   : > { %v15270_v27 = vpop.f32.mrf.mxu1 }
 0xb90   : > { %v8999_v31 = vrot.slane %v8989_v20, %v16317_v33  ;;  %v15289_v24 = vpop.f32.mrf.mxu0  ;;  %v10020_v20 = vpop.permute.xlu0 %10019 }
 0xb91   : > { %v9161_v62 = vpop.f32.mrf.mxu1 }
 0xb92   : > { %v9000_v52 = vcombine.high %v8999_v31, %v8999_v31  ;;  %v9007_v32 = vrot.slane %v8999_v31, %v16317_v33  ;;  %v9162_v63 = vadd.f32 %v9161_v62, %v9088_v13  ;;  %v9248_v17 = vpop.f32.mrf.mxu0 }
 0xb93   : > { %v15284_v36 = vpop.f32.mrf.mxu1 }
 0xb94   : > { %v9014_v40 = vrot.slane %v9000_v52, %v16317_v33  ;;  %9017 = vst.msk [vmem:[%s16323_s16 + $0x14] sm:$0x1] %vm856_vm8, %v9007_v32  ;;  %v9172_v2 = vrot.slane %v9162_v63, %v16317_v33  ;;  %v15290_v5 = vpop.f32.mrf.mxu0  ;;  %v10025_v63 = vsel %vm221_vm1, %v10020_v20, 0 }
 0xb96   : > { %9018 = vst.msk [vmem:[%s16323_s16 + $0x34] sm:$0x1] %vm856_vm8, %v9014_v40  ;;  %v9173_v18 = vcombine.high %v9172_v2, %v9172_v2  ;;  %v9180_v41 = vrot.slane %v9172_v2, %v16317_v33  ;;  %v9291_v9 = vpop.f32.mrf.mxu1  ;;  %v9340_v21 = vpop.f32.mrf.mxu0  ;;  %v13770_v40 = vld [vmem:[%s18542_s1 + $0x4] sm:$0xf] }
 0xb97   : > { %v9292_v26 = vadd.f32 %v9291_v9, %v9245_v49  ;;  %v10115_v2 = vpop.permute.xlu1 %10114  ;;  %v10222_v9 = vpop.permute.xlu0 %10221 }
 0xb98   : > { %v9187_v44 = vrot.slane %v9173_v18, %v16317_v33  ;;  %9190 = vst.msk [vmem:[%s16323_s16 + $0x15] sm:$0x1] %vm856_vm8, %v9180_v41  ;;  %v15295_v47 = vpop.f32.mrf.mxu1  ;;  %v15301_v14 = vpop.f32.mrf.mxu0  ;;  %v10120_v5 = vsel %vm221_vm1, %v10115_v2, 0  ;;  %v10071_v41 = vsel %vm221_vm1, %v17688_v46, 0  ;;  %v13773_v46 = vld [vmem:[%s18542_s1 + $0x8] sm:$0xf] }
 0xb99   : > { %v9346_v54 = vadd.f32 %v9340_v21, %v9292_v26  ;;  %v10009_v21 = vld [vmem:[%s18542_s1] sm:$0xf]  ;;  %v10227_v47 = vsel %vm221_vm1, %v10222_v9, 0 }
 0xb9a   : > { %9191 = vst.msk [vmem:[%s16323_s16 + $0x35] sm:$0x1] %vm856_vm8, %v9187_v44  ;;  %v9294_v15 = vpop.f32.mrf.mxu1  ;;  %v9343_v16 = vpop.f32.mrf.mxu0  ;;  %v10169_v44 = vsel %vm221_vm1, %v17691_v3, 0  ;;  %v13776_v3 = vld [vmem:[%s18542_s1 + $0xc] sm:$0xf] }
 0xb9b   : > { %v10272_v14 = vpop.permute.xlu1 %10271  ;;  %v13778_v15 = vld [vmem:[%s18542_s1 + $0x10] sm:$0xf] }
 0xb9c   : > { %v15296_v48 = vpop.f32.mrf.mxu1  ;;  %v15302_v25 = vpop.f32.mrf.mxu0  ;;  %v10277_v16 = vsel %vm221_vm1, %v10272_v14, 0 }
 0xb9d   : > { %v10327_v48 = vsel %vm221_vm1, %v17700_v50, 0  ;;  %v10380_v25 = vpop.permute.xlu0 %10379  ;;  %v13780_v50 = vld [vmem:[%s18542_s1 + $0x14] sm:$0xf] }
 0xb9e   : > { %v9389_v53 = vpop.f32.mrf.mxu1  ;;  %v9447_v51 = vpop.f32.mrf.mxu0 }
 0xb9f   : > { %v9395_v57 = vadd.f32 %v9389_v53, %v9346_v54  ;;  %v10430_v26 = vpop.permute.xlu1 %10429  ;;  %v13783_v53 = vld [vmem:[%s18542_s1 + $0x18] sm:$0xf]  ;;  %v13787_v54 = vld [vmem:[%s18542_s1 + $0x20] sm:$0xf] }
 0xba0   : > { %v15307_v55 = vpop.f32.mrf.mxu1  ;;  %v15313_v28 = vpop.f32.mrf.mxu0 }
 0xba1   : > { %v9453_v1 = vadd.f32 %v9447_v51, %v9395_v57  ;;  %v10385_v51 = vsel %vm221_vm1, %v10380_v25, 0  ;;  %v10435_v55 = vsel %vm221_vm1, %v10430_v26, 0  ;;  %v13785_v28 = vld [vmem:[%s18542_s1 + $0x1c] sm:$0xf] }
 0xba2   : > { %v9392_v29 = vpop.f32.mrf.mxu1  ;;  %v9450_v30 = vpop.f32.mrf.mxu0 }
 0xba3   : > { %v17996_v29 = vld [vmem:[%s15997_s27 + $0x1c] sm:$0x3]  ;;  %v17999_v30 = vld [vmem:[%s15997_s27 + $0x1e] sm:$0x3] }
 0xba4   : > { %v15308_v34 = vpop.f32.mrf.mxu1  ;;  %v15314_v35 = vpop.f32.mrf.mxu0  ;;  %v11650_v57 = vrot.slane %v17996_v29, %v16013_v6 }
 0xba5   : > { %v11852_v34 = vrot.slane %v17999_v30, %v16013_v6  ;;  %v18008_v35 = vld [vmem:[%s15997_s27 + $0x20] sm:$0x3] }
 0xba6   : > { %v9497_v0 = vpop.f32.mrf.mxu1  ;;  %v9547_v7 = vpop.f32.mrf.mxu0  ;;  %11651 = vrot.lane.b32.xlu0 %v11650_v57, %s15887_s29  ;;  %11746 = vrot.lane.b32.xlu1 %v11650_v57, %s15888_s30 }
 0xba7   : > { %v9503_v8 = vadd.f32 %v9497_v0, %v9453_v1  ;;  %v12010_v0 = vrot.slane %v18008_v35, %v16013_v6 }
 0xba8   : > { %v15319_v10 = vpop.f32.mrf.mxu1  ;;  %v15325_v37 = vpop.f32.mrf.mxu0 }
 0xba9   : > { %v9553_v13 = vadd.f32 %v9547_v7, %v9503_v8 }
 0xbaa   : > { %v9500_v11 = vpop.f32.mrf.mxu1  ;;  %v9550_v42 = vpop.f32.mrf.mxu0  ;;  %11853 = vrot.lane.b32.xlu0 %v11852_v34, %s15887_s29  ;;  %11903 = vrot.lane.b32.xlu1 %v11852_v34, %s15888_s30 }
 0xbac   : > { %v15320_v12 = vpop.f32.mrf.mxu1  ;;  %v15326_v22 = vpop.f32.mrf.mxu0 }
 0xbae   : > { %v9605_v19 = vpop.f32.mrf.mxu1  ;;  %v9655_v45 = vpop.f32.mrf.mxu0  ;;  %12011 = vrot.lane.b32.xlu0 %v12010_v0, %s15887_s29  ;;  %12061 = vrot.lane.b32.xlu1 %v12010_v0, %s15888_s30 }
 0xbaf   : > { %v9611_v23 = vadd.f32 %v9605_v19, %v9553_v13 }
 0xbb0   : > { %v15331_v49 = vpop.f32.mrf.mxu1  ;;  %v15337_v27 = vpop.f32.mrf.mxu0 }
 0xbb1   : > { %v9661_v31 = vadd.f32 %v9655_v45, %v9611_v23 }
 0xbb2   : > { %v9608_v24 = vpop.f32.mrf.mxu1  ;;  %v9658_v62 = vpop.f32.mrf.mxu0 }
 0xbb3   : > { %v9663_v52 = vrot.slane %v9661_v31, 2  ;;  %v9835_v32 = vrot.slane %v9661_v31, 6  ;;  %v9908_v18 = vrot.slane %v9661_v31, 4 }
 0xbb4   : > { %v15332_v17 = vpop.f32.mrf.mxu1  ;;  %v15338_v36 = vpop.f32.mrf.mxu0 }
 0xbb5   : > { %15344 = vmatmul.mubr.msk.f32.vlgmr.msra.gmra.mxu1 %vm686_vm7, %v9663_v52  ;;  %15358 = vmatmul.mubr.msk.f32.vlgmr.msra.gmra.mxu0 %vm686_vm7, %v9835_v32 }
 0xbb6   : > { %15347 = vmatpush3.msk.msra.mxu1 %vm16147_vm5, %v15889_v58  ;;  %15368 = vmatpush3.bf16.msra.mxu0 %v10025_v63 }
 0xbb7   : > { %15348 = vmatprep.subr.mxu1 %v15885_v4  ;;  %15350 = vmatprep.mubr.msk.f32.mxu1 %vm15886_vm0, %v15885_v4 }
 0xbb8   : > { %15349 = vmatpush3.msk.msra.mxu1 %vm16151_vm6, %v15889_v58  ;;  %15369 = vmatprep.mubr.msk.bf16.mxu0 %vm15886_vm0, %v15885_v4 }
 0xbb9   : > { %15351 = vmatmul.mubr.msk.f32.vlgmr.msra.gmra.mxu1 %vm686_vm7, %v9661_v31  ;;  %15360 = vmatprep.subr.mxu1 %v15885_v4 }
 0xbba   : > { %15370 = vmatmul.mubr.msk.bf16.vlgmr.msra.gmra.mxu0 %vm217_vm2, %v13770_v40  ;;  %15361 = vmatpush3.msk.msra.mxu1 %vm16147_vm5, %v15889_v58 }
 0xbbb   : > { %15362 = vmatprep.subr.mxu1 %v15885_v4  ;;  %15379 = vmatprep.subr.bf16.mxu0 %v15885_v4 }
 0xbbc   : > { %15363 = vmatpush3.msk.msra.mxu1 %vm16151_vm6, %v15889_v58  ;;  %15364 = vmatprep.mubr.msk.f32.mxu1 %vm15886_vm0, %v15885_v4 }
 0xbbd   : > { %15380 = vmatpush3.bf16.msra.mxu0 %v10120_v5  ;;  %15365 = vmatmul.mubr.msk.f32.vlgmr.msra.gmra.mxu1 %vm686_vm7, %v9908_v18 }
 0xbbe   : > { %15373 = vmatprep.subr.bf16.mxu1 %v15885_v4  ;;  %15375 = vmatprep.mubr.msk.bf16.mxu1 %vm15886_vm0, %v15885_v4 }
 0xbbf   : > { %15374 = vmatpush3.bf16.msra.mxu1 %v10071_v41  ;;  %15381 = vmatprep.mubr.msk.bf16.mxu0 %vm15886_vm0, %v15885_v4 }
 0xbc0   : > { %15385 = vmatprep.subr.bf16.mxu1 %v15885_v4  ;;  %15391 = vmatprep.subr.bf16.mxu0 %v15885_v4 }
 0xbc2   : > { %15376 = vmatmul.mubr.msk.bf16.vlgmr.msra.gmra.mxu1 %vm217_vm2, %v10009_v21  ;;  %15382 = vmatmul.mubr.msk.bf16.vlgmr.msra.gmra.mxu0 %vm217_vm2, %v13773_v46 }
 0xbc3   : > { %15386 = vmatpush3.bf16.msra.mxu1 %v10169_v44  ;;  %15392 = vmatpush3.bf16.msra.mxu0 %v10227_v47 }
 0xbc4   : > { %15387 = vmatprep.mubr.msk.bf16.mxu1 %vm15886_vm0, %v15885_v4  ;;  %15393 = vmatprep.mubr.msk.bf16.mxu0 %vm15886_vm0, %v15885_v4 }
 0xbc5   : > { %15397 = vmatprep.subr.bf16.mxu1 %v15885_v4  ;;  %15403 = vmatprep.subr.bf16.mxu0 %v15885_v4 }
 0xbca   : > { %15388 = vmatmul.mubr.msk.bf16.vlgmr.msra.gmra.mxu1 %vm217_vm2, %v13776_v3  ;;  %15394 = vmatmul.mubr.msk.bf16.vlgmr.msra.gmra.mxu0 %vm217_vm2, %v13778_v15 }
 0xbcb   : > { %15398 = vmatpush3.bf16.msra.mxu1 %v10277_v16  ;;  %15404 = vmatpush3.bf16.msra.mxu0 %v10327_v48 }
 0xbcc   : > { %15399 = vmatprep.mubr.msk.bf16.mxu1 %vm15886_vm0, %v15885_v4  ;;  %15405 = vmatprep.mubr.msk.bf16.mxu0 %vm15886_vm0, %v15885_v4 }
 0xbcd   : > { %15409 = vmatprep.subr.bf16.mxu1 %v15885_v4  ;;  %15415 = vmatprep.subr.bf16.mxu0 %v15885_v4 }
 0xbd2   : > { %15400 = vmatmul.mubr.msk.bf16.vlgmr.msra.gmra.mxu1 %vm217_vm2, %v13780_v50  ;;  %15406 = vmatmul.mubr.msk.bf16.vlgmr.msra.gmra.mxu0 %vm217_vm2, %v13783_v53 }
 0xbd3   : > { %15410 = vmatpush3.bf16.msra.mxu1 %v10385_v51  ;;  %15416 = vmatpush3.bf16.msra.mxu0 %v10435_v55 }
 0xbd4   : > { %15411 = vmatprep.mubr.msk.bf16.mxu1 %vm15886_vm0, %v15885_v4  ;;  %15417 = vmatprep.mubr.msk.bf16.mxu0 %vm15886_vm0, %v15885_v4 }
 0xbd5   : > { %15421 = vmatprep.subr.mxu1 %v15885_v4  ;;  %15435 = vmatprep.subr.mxu0 %v15885_v4 }
 0xbda   : > { %15412 = vmatmul.mubr.msk.bf16.vlgmr.msra.gmra.mxu1 %vm217_vm2, %v13785_v28  ;;  %15418 = vmatmul.mubr.msk.bf16.vlgmr.msra.gmra.mxu0 %vm217_vm2, %v13787_v54 }
 0xbdb   : > { %15422 = vmatpush3.msk.msra.mxu1 %vm16123_vm3, %v15889_v58  ;;  %15436 = vmatpush3.msk.msra.mxu0 %vm16123_vm3, %v15889_v58 }
 0xbdc   : > { %15423 = vmatprep.subr.mxu1 %v15885_v4  ;;  %15437 = vmatprep.subr.mxu0 %v15885_v4 }
 0xbdd   : > { %15424 = vmatpush3.msk.msra.mxu1 %vm16134_vm4, %v15889_v58  ;;  %15425 = vmatprep.mubr.msk.f32.mxu1 %vm15886_vm0, %v15885_v4 }
 0xbde   : > { %15438 = vmatpush3.msk.msra.mxu0 %vm16134_vm4, %v15889_v58  ;;  %15439 = vmatprep.mubr.msk.f32.mxu0 %vm15886_vm0, %v15885_v4 }
 0xbdf   : > { %15428 = vmatprep.subr.mxu1 %v15885_v4  ;;  %15449 = vmatprep.subr.bf16.mxu0 %v15885_v4 }
 0xc75   : > { %v9732_v7 = vpop.f32.mrf.mxu1  ;;  %v9904_v1 = vpop.f32.mrf.mxu0 }
 0xc77   : > { %v15345_v10 = vpop.f32.mrf.mxu1  ;;  %v15359_v37 = vpop.f32.mrf.mxu0 }
 0xc79   : > { %v9804_v8 = vpop.f32.mrf.mxu1 }
 0xc7a   : > { %v9805_v11 = vadd.f32 %v9804_v8, %v9732_v7  ;;  %v10061_v42 = vpop.f32.mrf.mxu0 }
 0xc7b   : > { %v15352_v12 = vpop.f32.mrf.mxu1 }
 0xc7c   : > { %v9815_v22 = vrot.slane %v9805_v11, %v16317_v33  ;;  %v15371_v13 = vpop.f32.mrf.mxu0  ;;  %v10836_v11 = vpop.permute.xlu0 %10835 }
 0xc7d   : > { %v9977_v19 = vpop.f32.mrf.mxu1 }
 0xc7e   : > { %v9816_v45 = vcombine.high %v9815_v22, %v9815_v22  ;;  %v9823_v23 = vrot.slane %v9815_v22, %v16317_v33  ;;  %v9978_v20 = vadd.f32 %v9977_v19, %v9904_v1  ;;  %v10064_v49 = vpop.f32.mrf.mxu0 }
 0xc7f   : > { %v15366_v27 = vpop.f32.mrf.mxu1 }
 0xc80   : > { %v9830_v31 = vrot.slane %v9816_v45, %v16317_v33  ;;  %9833 = vst.msk [vmem:[%s16323_s16 + $0x16] sm:$0x1] %vm856_vm8, %v9823_v23  ;;  %v9988_v24 = vrot.slane %v9978_v20, %v16317_v33  ;;  %v15372_v62 = vpop.f32.mrf.mxu0  ;;  %v10841_v20 = vsel %vm221_vm1, %v10836_v11, 0 }
 0xc82   : > { %9834 = vst.msk [vmem:[%s16323_s16 + $0x36] sm:$0x1] %vm856_vm8, %v9830_v31  ;;  %v9989_v52 = vcombine.high %v9988_v24, %v9988_v24  ;;  %v9996_v32 = vrot.slane %v9988_v24, %v16317_v33  ;;  %v10107_v63 = vpop.f32.mrf.mxu1  ;;  %v10156_v17 = vpop.f32.mrf.mxu0  ;;  %v13802_v31 = vld [vmem:[%s18542_s1 + $0x4] sm:$0xf] }
 0xc83   : > { %v10108_v21 = vadd.f32 %v10107_v63, %v10061_v42  ;;  %v10931_v24 = vpop.permute.xlu1 %10930  ;;  %v11038_v63 = vpop.permute.xlu0 %11037 }
 0xc84   : > { %v10003_v36 = vrot.slane %v9989_v52, %v16317_v33  ;;  %10006 = vst.msk [vmem:[%s16323_s16 + $0x17] sm:$0x1] %vm856_vm8, %v9996_v32  ;;  %v15377_v40 = vpop.f32.mrf.mxu1  ;;  %v15383_v2 = vpop.f32.mrf.mxu0  ;;  %v10936_v62 = vsel %vm221_vm1, %v10931_v24, 0  ;;  %v10887_v32 = vsel %vm221_vm1, %v17842_v38, 0  ;;  %v13805_v38 = vld [vmem:[%s18542_s1 + $0x8] sm:$0xf] }
 0xc85   : > { %v10162_v3 = vadd.f32 %v10156_v17, %v10108_v21  ;;  %v10825_v17 = vld [vmem:[%s18542_s1] sm:$0xf]  ;;  %v11043_v40 = vsel %vm221_vm1, %v11038_v63, 0 }
 0xc86   : > { %10007 = vst.msk [vmem:[%s16323_s16 + $0x37] sm:$0x1] %vm856_vm8, %v10003_v36  ;;  %v10110_v5 = vpop.f32.mrf.mxu1  ;;  %v10159_v18 = vpop.f32.mrf.mxu0  ;;  %v10985_v36 = vsel %vm221_vm1, %v17845_v39, 0  ;;  %v13808_v39 = vld [vmem:[%s18542_s1 + $0xc] sm:$0xf] }
 0xc87   : > { %v11088_v2 = vpop.permute.xlu1 %11087  ;;  %v13810_v5 = vld [vmem:[%s18542_s1 + $0x10] sm:$0xf] }
 0xc88   : > { %v15378_v41 = vpop.f32.mrf.mxu1  ;;  %v15384_v9 = vpop.f32.mrf.mxu0  ;;  %v11093_v18 = vsel %vm221_vm1, %v11088_v2, 0 }
 0xc89   : > { %v11143_v41 = vsel %vm221_vm1, %v17854_v43, 0  ;;  %v11196_v9 = vpop.permute.xlu0 %11195  ;;  %v13812_v43 = vld [vmem:[%s18542_s1 + $0x14] sm:$0xf] }
 0xc8a   : > { %v10205_v46 = vpop.f32.mrf.mxu1  ;;  %v10263_v44 = vpop.f32.mrf.mxu0 }
 0xc8b   : > { %v10211_v48 = vadd.f32 %v10205_v46, %v10162_v3  ;;  %v11246_v21 = vpop.permute.xlu1 %11245  ;;  %v13815_v46 = vld [vmem:[%s18542_s1 + $0x18] sm:$0xf]  ;;  %v13819_v3 = vld [vmem:[%s18542_s1 + $0x20] sm:$0xf] }
 0xc8c   : > { %v15389_v47 = vpop.f32.mrf.mxu1  ;;  %v15395_v14 = vpop.f32.mrf.mxu0 }
 0xc8d   : > { %v10269_v51 = vadd.f32 %v10263_v44, %v10211_v48  ;;  %v11201_v44 = vsel %vm221_vm1, %v11196_v9, 0  ;;  %v11251_v47 = vsel %vm221_vm1, %v11246_v21, 0  ;;  %v13817_v14 = vld [vmem:[%s18542_s1 + $0x1c] sm:$0xf] }
 0xc8e   : > { %v10208_v15 = vpop.f32.mrf.mxu1  ;;  %v10266_v16 = vpop.f32.mrf.mxu0 }
 0xc8f   : > { %v18150_v15 = vld [vmem:[%s15997_s27 + $0x1e] sm:$0x3]  ;;  %v18153_v16 = vld [vmem:[%s15997_s27 + $0x20] sm:$0x3] }
 0xc90   : > { %v15390_v25 = vpop.f32.mrf.mxu1  ;;  %v15396_v26 = vpop.f32.mrf.mxu0  ;;  %v12466_v48 = vrot.slane %v18150_v15, %v16013_v6 }
 0xc91   : > { %v12668_v25 = vrot.slane %v18153_v16, %v16013_v6  ;;  %v18162_v26 = vld [vmem:[%s15997_s27 + $0x22] sm:$0x3] }
 0xc92   : > { %v10313_v50 = vpop.f32.mrf.mxu1  ;;  %v10363_v53 = vpop.f32.mrf.mxu0  ;;  %12467 = vrot.lane.b32.xlu0 %v12466_v48, %s15887_s29  ;;  %12562 = vrot.lane.b32.xlu1 %v12466_v48, %s15888_s30 }
 0xc93   : > { %v10319_v54 = vadd.f32 %v10313_v50, %v10269_v51  ;;  %v12826_v50 = vrot.slane %v18162_v26, %v16013_v6 }
 0xc94   : > { %v15401_v55 = vpop.f32.mrf.mxu1  ;;  %v15407_v28 = vpop.f32.mrf.mxu0 }
 0xc95   : > { %v10369_v1 = vadd.f32 %v10363_v53, %v10319_v54 }
 0xc96   : > { %v10316_v57 = vpop.f32.mrf.mxu1  ;;  %v10366_v34 = vpop.f32.mrf.mxu0  ;;  %12669 = vrot.lane.b32.xlu0 %v12668_v25, %s15887_s29  ;;  %12719 = vrot.lane.b32.xlu1 %v12668_v25, %s15888_s30 }
 0xc98   : > { %v15402_v0 = vpop.f32.mrf.mxu1  ;;  %v15408_v7 = vpop.f32.mrf.mxu0 }
 0xc9a   : > { %v10421_v10 = vpop.f32.mrf.mxu1  ;;  %v10471_v37 = vpop.f32.mrf.mxu0  ;;  %12827 = vrot.lane.b32.xlu0 %v12826_v50, %s15887_s29  ;;  %12877 = vrot.lane.b32.xlu1 %v12826_v50, %s15888_s30 }
 0xc9b   : > { %v10427_v8 = vadd.f32 %v10421_v10, %v10369_v1 }
 0xc9c   : > { %v15413_v42 = vpop.f32.mrf.mxu1  ;;  %v15419_v12 = vpop.f32.mrf.mxu0 }
 0xc9d   : > { %v10477_v22 = vadd.f32 %v10471_v37, %v10427_v8 }
 0xc9e   : > { %v10424_v13 = vpop.f32.mrf.mxu1  ;;  %v10474_v19 = vpop.f32.mrf.mxu0 }
 0xc9f   : > { %v10479_v45 = vrot.slane %v10477_v22, 2  ;;  %v10651_v23 = vrot.slane %v10477_v22, 6  ;;  %v10724_v52 = vrot.slane %v10477_v22, 4 }
 0xca0   : > { %v15414_v49 = vpop.f32.mrf.mxu1  ;;  %v15420_v27 = vpop.f32.mrf.mxu0 }
 0xca1   : > { %15426 = vmatmul.mubr.msk.f32.vlgmr.msra.gmra.mxu1 %vm686_vm7, %v10479_v45  ;;  %15440 = vmatmul.mubr.msk.f32.vlgmr.msra.gmra.mxu0 %vm686_vm7, %v10651_v23 }
 0xca2   : > { %15429 = vmatpush3.msk.msra.mxu1 %vm16147_vm5, %v15889_v58  ;;  %15450 = vmatpush3.bf16.msra.mxu0 %v10841_v20 }
 0xca3   : > { %15430 = vmatprep.subr.mxu1 %v15885_v4  ;;  %15432 = vmatprep.mubr.msk.f32.mxu1 %vm15886_vm0, %v15885_v4 }
 0xca4   : > { %15431 = vmatpush3.msk.msra.mxu1 %vm16151_vm6, %v15889_v58  ;;  %15451 = vmatprep.mubr.msk.bf16.mxu0 %vm15886_vm0, %v15885_v4 }
 0xca5   : > { %15433 = vmatmul.mubr.msk.f32.vlgmr.msra.gmra.mxu1 %vm686_vm7, %v10477_v22  ;;  %15442 = vmatprep.subr.mxu1 %v15885_v4 }
 0xca6   : > { %15452 = vmatmul.mubr.msk.bf16.vlgmr.msra.gmra.mxu0 %vm217_vm2, %v13802_v31  ;;  %15443 = vmatpush3.msk.msra.mxu1 %vm16147_vm5, %v15889_v58 }
 0xca7   : > { %15444 = vmatprep.subr.mxu1 %v15885_v4  ;;  %15461 = vmatprep.subr.bf16.mxu0 %v15885_v4 }
 0xca8   : > { %15445 = vmatpush3.msk.msra.mxu1 %vm16151_vm6, %v15889_v58  ;;  %15446 = vmatprep.mubr.msk.f32.mxu1 %vm15886_vm0, %v15885_v4 }
 0xca9   : > { %15462 = vmatpush3.bf16.msra.mxu0 %v10936_v62  ;;  %15447 = vmatmul.mubr.msk.f32.vlgmr.msra.gmra.mxu1 %vm686_vm7, %v10724_v52 }
 0xcaa   : > { %15455 = vmatprep.subr.bf16.mxu1 %v15885_v4  ;;  %15457 = vmatprep.mubr.msk.bf16.mxu1 %vm15886_vm0, %v15885_v4 }
 0xcab   : > { %15456 = vmatpush3.bf16.msra.mxu1 %v10887_v32  ;;  %15463 = vmatprep.mubr.msk.bf16.mxu0 %vm15886_vm0, %v15885_v4 }
 0xcac   : > { %15467 = vmatprep.subr.bf16.mxu1 %v15885_v4  ;;  %15473 = vmatprep.subr.bf16.mxu0 %v15885_v4 }
 0xcae   : > { %15458 = vmatmul.mubr.msk.bf16.vlgmr.msra.gmra.mxu1 %vm217_vm2, %v10825_v17  ;;  %15464 = vmatmul.mubr.msk.bf16.vlgmr.msra.gmra.mxu0 %vm217_vm2, %v13805_v38 }
 0xcaf   : > { %15468 = vmatpush3.bf16.msra.mxu1 %v10985_v36  ;;  %15474 = vmatpush3.bf16.msra.mxu0 %v11043_v40 }
 0xcb0   : > { %15469 = vmatprep.mubr.msk.bf16.mxu1 %vm15886_vm0, %v15885_v4  ;;  %15475 = vmatprep.mubr.msk.bf16.mxu0 %vm15886_vm0, %v15885_v4 }
 0xcb1   : > { %15479 = vmatprep.subr.bf16.mxu1 %v15885_v4  ;;  %15485 = vmatprep.subr.bf16.mxu0 %v15885_v4 }
 0xcb6   : > { %15470 = vmatmul.mubr.msk.bf16.vlgmr.msra.gmra.mxu1 %vm217_vm2, %v13808_v39  ;;  %15476 = vmatmul.mubr.msk.bf16.vlgmr.msra.gmra.mxu0 %vm217_vm2, %v13810_v5 }
 0xcb7   : > { %15480 = vmatpush3.bf16.msra.mxu1 %v11093_v18  ;;  %15486 = vmatpush3.bf16.msra.mxu0 %v11143_v41 }
 0xcb8   : > { %15481 = vmatprep.mubr.msk.bf16.mxu1 %vm15886_vm0, %v15885_v4  ;;  %15487 = vmatprep.mubr.msk.bf16.mxu0 %vm15886_vm0, %v15885_v4 }
 0xcb9   : > { %15491 = vmatprep.subr.bf16.mxu1 %v15885_v4  ;;  %15497 = vmatprep.subr.bf16.mxu0 %v15885_v4 }
 0xcbe   : > { %15482 = vmatmul.mubr.msk.bf16.vlgmr.msra.gmra.mxu1 %vm217_vm2, %v13812_v43  ;;  %15488 = vmatmul.mubr.msk.bf16.vlgmr.msra.gmra.mxu0 %vm217_vm2, %v13815_v46 }
 0xcbf   : > { %15492 = vmatpush3.bf16.msra.mxu1 %v11201_v44  ;;  %15498 = vmatpush3.bf16.msra.mxu0 %v11251_v47 }
 0xcc0   : > { %15493 = vmatprep.mubr.msk.bf16.mxu1 %vm15886_vm0, %v15885_v4  ;;  %15499 = vmatprep.mubr.msk.bf16.mxu0 %vm15886_vm0, %v15885_v4 }
 0xcc1   : > { %15503 = vmatprep.subr.mxu1 %v15885_v4  ;;  %15517 = vmatprep.subr.mxu0 %v15885_v4 }
 0xcc6   : > { %15494 = vmatmul.mubr.msk.bf16.vlgmr.msra.gmra.mxu1 %vm217_vm2, %v13817_v14  ;;  %15500 = vmatmul.mubr.msk.bf16.vlgmr.msra.gmra.mxu0 %vm217_vm2, %v13819_v3 }
 0xcc7   : > { %15504 = vmatpush3.msk.msra.mxu1 %vm16123_vm3, %v15889_v58  ;;  %15518 = vmatpush3.msk.msra.mxu0 %vm16123_vm3, %v15889_v58 }
 0xcc8   : > { %15505 = vmatprep.subr.mxu1 %v15885_v4  ;;  %15519 = vmatprep.subr.mxu0 %v15885_v4 }
 0xcc9   : > { %15506 = vmatpush3.msk.msra.mxu1 %vm16134_vm4, %v15889_v58  ;;  %15507 = vmatprep.mubr.msk.f32.mxu1 %vm15886_vm0, %v15885_v4 }
 0xcca   : > { %15520 = vmatpush3.msk.msra.mxu0 %vm16134_vm4, %v15889_v58  ;;  %15521 = vmatprep.mubr.msk.f32.mxu0 %vm15886_vm0, %v15885_v4 }
 0xccb   : > { %15510 = vmatprep.subr.mxu1 %v15885_v4  ;;  %15531 = vmatprep.subr.bf16.mxu0 %v15885_v4 }
 0xd61   : > { %v10548_v53 = vpop.f32.mrf.mxu1  ;;  %v10720_v51 = vpop.f32.mrf.mxu0 }
 0xd63   : > { %v15427_v55 = vpop.f32.mrf.mxu1  ;;  %v15441_v28 = vpop.f32.mrf.mxu0 }
 0xd65   : > { %v10620_v54 = vpop.f32.mrf.mxu1 }
 0xd66   : > { %v10621_v57 = vadd.f32 %v10620_v54, %v10548_v53  ;;  %v10877_v34 = vpop.f32.mrf.mxu0  ;;  %v11652_v54 = vpop.permute.xlu0 %11651 }
 0xd67   : > { %v15434_v0 = vpop.f32.mrf.mxu1 }
 0xd68   : > { %v10631_v7 = vrot.slane %v10621_v57, %v16317_v33  ;;  %v15453_v1 = vpop.f32.mrf.mxu0 }
 0xd69   : > { %v10793_v10 = vpop.f32.mrf.mxu1 }
 0xd6a   : > { %v10632_v6 = vcombine.high %v10631_v7, %v10631_v7  ;;  %v10639_v37 = vrot.slane %v10631_v7, %v16317_v33  ;;  %v10794_v8 = vadd.f32 %v10793_v10, %v10720_v51  ;;  %v10880_v11 = vpop.f32.mrf.mxu0 }
 0xd6b   : > { %v15448_v42 = vpop.f32.mrf.mxu1 }
 0xd6c   : > { %v10646_v12 = vrot.slane %v10632_v6, %v16317_v33  ;;  %10649 = vst.msk [vmem:[%s16323_s16 + $0x18] sm:$0x1] %vm856_vm8, %v10639_v37  ;;  %v10804_v22 = vrot.slane %v10794_v8, %v16317_v33  ;;  %v15454_v13 = vpop.f32.mrf.mxu0  ;;  %v11657_v37 = vsel %vm221_vm1, %v11652_v54, 0  ;;  %v13834_v42 = vld [vmem:[%s18542_s1 + $0x4] sm:$0xf] }
 0xd6e   : > { %10650 = vst.msk [vmem:[%s16323_s16 + $0x38] sm:$0x1] %vm856_vm8, %v10646_v12  ;;  %v10805_v19 = vcombine.high %v10804_v22, %v10804_v22  ;;  %v10812_v45 = vrot.slane %v10804_v22, %v16317_v33  ;;  %v10923_v23 = vpop.f32.mrf.mxu1  ;;  %v10972_v20 = vpop.f32.mrf.mxu0 }
 0xd6f   : > { %v10924_v63 = vadd.f32 %v10923_v23, %v10877_v34  ;;  %v11747_v12 = vpop.permute.xlu1 %11746  ;;  %v11641_v23 = vld [vmem:[%s18542_s1] sm:$0xf] }
 0xd70   : > { %v10819_v49 = vrot.slane %v10805_v19, %v16317_v33  ;;  %10822 = vst.msk [vmem:[%s16323_s16 + $0x19] sm:$0x1] %vm856_vm8, %v10812_v45  ;;  %v15459_v27 = vpop.f32.mrf.mxu1  ;;  %v15465_v31 = vpop.f32.mrf.mxu0  ;;  %v11752_v22 = vsel %vm221_vm1, %v11747_v12, 0  ;;  %v11703_v19 = vsel %vm221_vm1, %v17996_v29, 0  ;;  %v13837_v29 = vld [vmem:[%s18542_s1 + $0x8] sm:$0xf] }
 0xd71   : > { %v10978_v2 = vadd.f32 %v10972_v20, %v10924_v63  ;;  %v11854_v45 = vpop.permute.xlu0 %11853  ;;  %v11801_v20 = vsel %vm221_vm1, %v17999_v30, 0  ;;  %v13840_v30 = vld [vmem:[%s18542_s1 + $0xc] sm:$0xf]  ;;  %v13842_v31 = vld [vmem:[%s18542_s1 + $0x10] sm:$0xf] }
 0xd72   : > { %10823 = vst.msk [vmem:[%s16323_s16 + $0x39] sm:$0x1] %vm856_vm8, %v10819_v49  ;;  %v10926_v24 = vpop.f32.mrf.mxu1  ;;  %v10975_v62 = vpop.f32.mrf.mxu0  ;;  %v11859_v49 = vsel %vm221_vm1, %v11854_v45, 0  ;;  %v13847_v63 = vld [vmem:[%s18542_s1 + $0x18] sm:$0xf] }
 0xd73   : > { %v11904_v27 = vpop.permute.xlu1 %11903  ;;  %v11959_v62 = vsel %vm221_vm1, %v18008_v35, 0  ;;  %v13844_v35 = vld [vmem:[%s18542_s1 + $0x14] sm:$0xf] }
 0xd74   : > { %v15460_v52 = vpop.f32.mrf.mxu1  ;;  %v15466_v32 = vpop.f32.mrf.mxu0  ;;  %v11909_v24 = vsel %vm221_vm1, %v11904_v27, 0 }
 0xd75   : > { %v12012_v52 = vpop.permute.xlu0 %12011 }
 0xd76   : > { %v11021_v17 = vpop.f32.mrf.mxu1  ;;  %v11079_v38 = vpop.f32.mrf.mxu0 }
 0xd77   : > { %v11027_v18 = vadd.f32 %v11021_v17, %v10978_v2  ;;  %v12062_v32 = vpop.permute.xlu1 %12061  ;;  %v12017_v17 = vsel %vm221_vm1, %v12012_v52, 0 }
 0xd78   : > { %v15471_v36 = vpop.f32.mrf.mxu1  ;;  %v15477_v40 = vpop.f32.mrf.mxu0 }
 0xd79   : > { %v11085_v46 = vadd.f32 %v11079_v38, %v11027_v18  ;;  %v12067_v38 = vsel %vm221_vm1, %v12062_v32, 0  ;;  %v13849_v36 = vld [vmem:[%s18542_s1 + $0x1c] sm:$0xf]  ;;  %v13851_v40 = vld [vmem:[%s18542_s1 + $0x20] sm:$0xf] }
 0xd7a   : > { %v11024_v39 = vpop.f32.mrf.mxu1  ;;  %v11082_v5 = vpop.f32.mrf.mxu0 }
 0xd7c   : > { %v15472_v41 = vpop.f32.mrf.mxu1  ;;  %v15478_v9 = vpop.f32.mrf.mxu0 }
 0xd7e   : > { %v11129_v21 = vpop.f32.mrf.mxu1  ;;  %v11179_v43 = vpop.f32.mrf.mxu0 }
 0xd7f   : > { %v11135_v14 = vadd.f32 %v11129_v21, %v11085_v46 }
 0xd80   : > { %v15483_v44 = vpop.f32.mrf.mxu1  ;;  %v15489_v47 = vpop.f32.mrf.mxu0 }
 0xd81   : > { %v11185_v53 = vadd.f32 %v11179_v43, %v11135_v14 }
 0xd82   : > { %v11132_v3 = vpop.f32.mrf.mxu1  ;;  %v11182_v48 = vpop.f32.mrf.mxu0 }
 0xd84   : > { %v15484_v25 = vpop.f32.mrf.mxu1  ;;  %v15490_v50 = vpop.f32.mrf.mxu0 }
 0xd86   : > { %v11237_v51 = vpop.f32.mrf.mxu1  ;;  %v11287_v55 = vpop.f32.mrf.mxu0 }
 0xd87   : > { %v11243_v28 = vadd.f32 %v11237_v51, %v11185_v53 }
 0xd88   : > { %v15495_v57 = vpop.f32.mrf.mxu1  ;;  %v15501_v34 = vpop.f32.mrf.mxu0 }
 0xd89   : > { %v11293_v0 = vadd.f32 %v11287_v55, %v11243_v28 }
 0xd8a   : > { %v11240_v7 = vpop.f32.mrf.mxu1  ;;  %v11290_v1 = vpop.f32.mrf.mxu0 }
 0xd8b   : > { %v11295_v10 = vrot.slane %v11293_v0, 2  ;;  %v11467_v6 = vrot.slane %v11293_v0, 6  ;;  %v11540_v13 = vrot.slane %v11293_v0, 4 }
 0xd8c   : > { %v15496_v8 = vpop.f32.mrf.mxu1  ;;  %v15502_v11 = vpop.f32.mrf.mxu0 }
 0xd8d   : > { %15508 = vmatmul.mubr.msk.f32.vlgmr.msra.gmra.mxu1 %vm686_vm7, %v11295_v10  ;;  %15522 = vmatmul.mubr.msk.f32.vlgmr.msra.gmra.mxu0 %vm686_vm7, %v11467_v6 }
 0xd8e   : > { %15511 = vmatpush3.msk.msra.mxu1 %vm16147_vm5, %v15889_v58  ;;  %15532 = vmatpush3.bf16.msra.mxu0 %v11657_v37 }
 0xd8f   : > { %15512 = vmatprep.subr.mxu1 %v15885_v4  ;;  %15514 = vmatprep.mubr.msk.f32.mxu1 %vm15886_vm0, %v15885_v4 }
 0xd90   : > { %15513 = vmatpush3.msk.msra.mxu1 %vm16151_vm6, %v15889_v58  ;;  %15533 = vmatprep.mubr.msk.bf16.mxu0 %vm15886_vm0, %v15885_v4 }
 0xd91   : > { %15515 = vmatmul.mubr.msk.f32.vlgmr.msra.gmra.mxu1 %vm686_vm7, %v11293_v0  ;;  %15524 = vmatprep.subr.mxu1 %v15885_v4 }
 0xd92   : > { %15534 = vmatmul.mubr.msk.bf16.vlgmr.msra.gmra.mxu0 %vm217_vm2, %v13834_v42  ;;  %15525 = vmatpush3.msk.msra.mxu1 %vm16147_vm5, %v15889_v58 }
 0xd93   : > { %15526 = vmatprep.subr.mxu1 %v15885_v4  ;;  %15543 = vmatprep.subr.bf16.mxu0 %v15885_v4 }
 0xd94   : > { %15527 = vmatpush3.msk.msra.mxu1 %vm16151_vm6, %v15889_v58  ;;  %15528 = vmatprep.mubr.msk.f32.mxu1 %vm15886_vm0, %v15885_v4 }
 0xd95   : > { %15544 = vmatpush3.bf16.msra.mxu0 %v11752_v22  ;;  %15529 = vmatmul.mubr.msk.f32.vlgmr.msra.gmra.mxu1 %vm686_vm7, %v11540_v13 }
 0xd96   : > { %15537 = vmatprep.subr.bf16.mxu1 %v15885_v4  ;;  %15539 = vmatprep.mubr.msk.bf16.mxu1 %vm15886_vm0, %v15885_v4 }
 0xd97   : > { %15538 = vmatpush3.bf16.msra.mxu1 %v11703_v19  ;;  %15545 = vmatprep.mubr.msk.bf16.mxu0 %vm15886_vm0, %v15885_v4 }
 0xd98   : > { %15549 = vmatprep.subr.bf16.mxu1 %v15885_v4  ;;  %15555 = vmatprep.subr.bf16.mxu0 %v15885_v4 }
 0xd9a   : > { %15540 = vmatmul.mubr.msk.bf16.vlgmr.msra.gmra.mxu1 %vm217_vm2, %v11641_v23  ;;  %15546 = vmatmul.mubr.msk.bf16.vlgmr.msra.gmra.mxu0 %vm217_vm2, %v13837_v29 }
 0xd9b   : > { %15550 = vmatpush3.bf16.msra.mxu1 %v11801_v20  ;;  %15556 = vmatpush3.bf16.msra.mxu0 %v11859_v49 }
 0xd9c   : > { %15551 = vmatprep.mubr.msk.bf16.mxu1 %vm15886_vm0, %v15885_v4  ;;  %15557 = vmatprep.mubr.msk.bf16.mxu0 %vm15886_vm0, %v15885_v4 }
 0xd9d   : > { %15561 = vmatprep.subr.bf16.mxu1 %v15885_v4  ;;  %15567 = vmatprep.subr.bf16.mxu0 %v15885_v4 }
 0xda2   : > { %15552 = vmatmul.mubr.msk.bf16.vlgmr.msra.gmra.mxu1 %vm217_vm2, %v13840_v30  ;;  %15558 = vmatmul.mubr.msk.bf16.vlgmr.msra.gmra.mxu0 %vm217_vm2, %v13842_v31 }
 0xda3   : > { %15562 = vmatpush3.bf16.msra.mxu1 %v11909_v24  ;;  %15568 = vmatpush3.bf16.msra.mxu0 %v11959_v62 }
 0xda4   : > { %15563 = vmatprep.mubr.msk.bf16.mxu1 %vm15886_vm0, %v15885_v4  ;;  %15569 = vmatprep.mubr.msk.bf16.mxu0 %vm15886_vm0, %v15885_v4 }
 0xda5   : > { %15573 = vmatprep.subr.bf16.mxu1 %v15885_v4  ;;  %15579 = vmatprep.subr.bf16.mxu0 %v15885_v4 }
 0xdaa   : > { %15564 = vmatmul.mubr.msk.bf16.vlgmr.msra.gmra.mxu1 %vm217_vm2, %v13844_v35  ;;  %15570 = vmatmul.mubr.msk.bf16.vlgmr.msra.gmra.mxu0 %vm217_vm2, %v13847_v63 }
 0xdab   : > { %15574 = vmatpush3.bf16.msra.mxu1 %v12017_v17  ;;  %15580 = vmatpush3.bf16.msra.mxu0 %v12067_v38 }
 0xdac   : > { %15575 = vmatprep.mubr.msk.bf16.mxu1 %vm15886_vm0, %v15885_v4  ;;  %15581 = vmatprep.mubr.msk.bf16.mxu0 %vm15886_vm0, %v15885_v4 }
 0xdad   : > { %15585 = vmatprep.subr.mxu1 %v15885_v4  ;;  %15599 = vmatprep.subr.mxu0 %v15885_v4 }
 0xdb2   : > { %15576 = vmatmul.mubr.msk.bf16.vlgmr.msra.gmra.mxu1 %vm217_vm2, %v13849_v36  ;;  %15582 = vmatmul.mubr.msk.bf16.vlgmr.msra.gmra.mxu0 %vm217_vm2, %v13851_v40 }
 0xdb3   : > { %15586 = vmatpush3.msk.msra.mxu1 %vm16123_vm3, %v15889_v58  ;;  %15600 = vmatpush3.msk.msra.mxu0 %vm16123_vm3, %v15889_v58 }
 0xdb4   : > { %15587 = vmatprep.subr.mxu1 %v15885_v4  ;;  %15601 = vmatprep.subr.mxu0 %v15885_v4 }
 0xdb5   : > { %15588 = vmatpush3.msk.msra.mxu1 %vm16134_vm4, %v15889_v58  ;;  %15589 = vmatprep.mubr.msk.f32.mxu1 %vm15886_vm0, %v15885_v4 }
 0xdb6   : > { %15602 = vmatpush3.msk.msra.mxu0 %vm16134_vm4, %v15889_v58  ;;  %15603 = vmatprep.mubr.msk.f32.mxu0 %vm15886_vm0, %v15885_v4 }
 0xdb7   : > { %15592 = vmatprep.subr.mxu1 %v15885_v4  ;;  %15613 = vmatprep.subr.bf16.mxu0 %v15885_v4 }
 0xe4d   : > { %v11364_v2 = vpop.f32.mrf.mxu1  ;;  %v11536_v39 = vpop.f32.mrf.mxu0 }
 0xe4f   : > { %v15509_v5 = vpop.f32.mrf.mxu1  ;;  %v15523_v18 = vpop.f32.mrf.mxu0 }
 0xe51   : > { %v11436_v41 = vpop.f32.mrf.mxu1 }
 0xe52   : > { %v11437_v9 = vadd.f32 %v11436_v41, %v11364_v2  ;;  %v11693_v21 = vpop.f32.mrf.mxu0 }
 0xe53   : > { %v15516_v43 = vpop.f32.mrf.mxu1 }
 0xe54   : > { %v11447_v46 = vrot.slane %v11437_v9, %v16317_v33  ;;  %v15535_v44 = vpop.f32.mrf.mxu0 }
 0xe55   : > { %v11609_v47 = vpop.f32.mrf.mxu1 }
 0xe56   : > { %v11448_v14 = vcombine.high %v11447_v46, %v11447_v46  ;;  %v11455_v3 = vrot.slane %v11447_v46, %v16317_v33  ;;  %v11610_v48 = vadd.f32 %v11609_v47, %v11536_v39  ;;  %v11696_v25 = vpop.f32.mrf.mxu0  ;;  %v12468_v39 = vpop.permute.xlu0 %12467 }
 0xe57   : > { %v15530_v50 = vpop.f32.mrf.mxu1  ;;  %v12473_v44 = vsel %vm221_vm1, %v12468_v39, 0 }
 0xe58   : > { %v11462_v53 = vrot.slane %v11448_v14, %v16317_v33  ;;  %11465 = vst.msk [vmem:[%s16323_s16 + $0x1a] sm:$0x1] %vm856_vm8, %v11455_v3  ;;  %v11620_v51 = vrot.slane %v11610_v48, %v16317_v33  ;;  %v15536_v55 = vpop.f32.mrf.mxu0  ;;  %v13866_v3 = vld [vmem:[%s18542_s1 + $0x4] sm:$0xf]  ;;  %v12563_v48 = vpop.permute.xlu1 %12562 }
 0xe59   : > { %v12568_v25 = vsel %vm221_vm1, %v12563_v48, 0  ;;  %v12457_v55 = vld [vmem:[%s18542_s1] sm:$0xf] }
 0xe5a   : > { %11466 = vst.msk [vmem:[%s16323_s16 + $0x3a] sm:$0x1] %vm856_vm8, %v11462_v53  ;;  %v11621_v28 = vcombine.high %v11620_v51, %v11620_v51  ;;  %v11628_v54 = vrot.slane %v11620_v51, %v16317_v33  ;;  %v11739_v57 = vpop.f32.mrf.mxu1  ;;  %v11788_v34 = vpop.f32.mrf.mxu0  ;;  %v12519_v53 = vsel %vm221_vm1, %v18150_v15, 0  ;;  %v13869_v15 = vld [vmem:[%s18542_s1 + $0x8] sm:$0xf] }
 0xe5b   : > { %v11740_v11 = vadd.f32 %v11739_v57, %v11693_v21  ;;  %v12670_v51 = vpop.permute.xlu0 %12669 }
 0xe5c   : > { %v11635_v0 = vrot.slane %v11621_v28, %v16317_v33  ;;  %11638 = vst.msk [vmem:[%s16323_s16 + $0x1b] sm:$0x1] %vm856_vm8, %v11628_v54  ;;  %v15541_v7 = vpop.f32.mrf.mxu1  ;;  %v15547_v1 = vpop.f32.mrf.mxu0  ;;  %v12617_v28 = vsel %vm221_vm1, %v18153_v16, 0  ;;  %v12675_v54 = vsel %vm221_vm1, %v12670_v51, 0  ;;  %v13872_v16 = vld [vmem:[%s18542_s1 + $0xc] sm:$0xf] }
 0xe5d   : > { %v11794_v19 = vadd.f32 %v11788_v34, %v11740_v11  ;;  %v12720_v57 = vpop.permute.xlu1 %12719  ;;  %v13874_v34 = vld [vmem:[%s18542_s1 + $0x10] sm:$0xf]  ;;  %v12775_v7 = vsel %vm221_vm1, %v18162_v26, 0  ;;  %v13876_v26 = vld [vmem:[%s18542_s1 + $0x14] sm:$0xf] }
 0xe5e   : > { %11639 = vst.msk [vmem:[%s16323_s16 + $0x3b] sm:$0x1] %vm856_vm8, %v11635_v0  ;;  %v11742_v10 = vpop.f32.mrf.mxu1  ;;  %v11791_v6 = vpop.f32.mrf.mxu0  ;;  %v12725_v0 = vsel %vm221_vm1, %v12720_v57, 0  ;;  %v13881_v11 = vld [vmem:[%s18542_s1 + $0x1c] sm:$0xf] }
 0xe5f   : > { %v12828_v1 = vpop.permute.xlu0 %12827  ;;  %v13879_v6 = vld [vmem:[%s18542_s1 + $0x18] sm:$0xf] }
 0xe60   : > { %v15542_v37 = vpop.f32.mrf.mxu1  ;;  %v15548_v8 = vpop.f32.mrf.mxu0 }
 0xe61   : > { %v12878_v10 = vpop.permute.xlu1 %12877  ;;  %v12833_v37 = vsel %vm221_vm1, %v12828_v1, 0 }
 0xe62   : > { %v11837_v42 = vpop.f32.mrf.mxu1  ;;  %v11895_v12 = vpop.f32.mrf.mxu0  ;;  %v12883_v8 = vsel %vm221_vm1, %v12878_v10, 0 }
 0xe63   : > { %v11843_v29 = vadd.f32 %v11837_v42, %v11794_v19  ;;  %v13883_v42 = vld [vmem:[%s18542_s1 + $0x20] sm:$0xf] }
 0xe64   : > { %v15553_v22 = vpop.f32.mrf.mxu1  ;;  %v15559_v13 = vpop.f32.mrf.mxu0 }
 0xe65   : > { %v11901_v31 = vadd.f32 %v11895_v12, %v11843_v29 }
 0xe66   : > { %v11840_v45 = vpop.f32.mrf.mxu1  ;;  %v11898_v23 = vpop.f32.mrf.mxu0 }
 0xe68   : > { %v15554_v20 = vpop.f32.mrf.mxu1  ;;  %v15560_v49 = vpop.f32.mrf.mxu0 }
 0xe6a   : > { %v11945_v27 = vpop.f32.mrf.mxu1  ;;  %v11995_v30 = vpop.f32.mrf.mxu0 }
 0xe6b   : > { %v11951_v52 = vadd.f32 %v11945_v27, %v11901_v31 }
 0xe6c   : > { %v15565_v24 = vpop.f32.mrf.mxu1  ;;  %v15571_v62 = vpop.f32.mrf.mxu0 }
 0xe6d   : > { %v12001_v38 = vadd.f32 %v11995_v30, %v11951_v52 }
 0xe6e   : > { %v11948_v32 = vpop.f32.mrf.mxu1  ;;  %v11998_v35 = vpop.f32.mrf.mxu0 }
 0xe70   : > { %v15566_v63 = vpop.f32.mrf.mxu1  ;;  %v15572_v17 = vpop.f32.mrf.mxu0 }
 0xe72   : > { %v12053_v36 = vpop.f32.mrf.mxu1  ;;  %v12103_v40 = vpop.f32.mrf.mxu0 }
 0xe73   : > { %v12059_v2 = vadd.f32 %v12053_v36, %v12001_v38 }
 0xe74   : > { %v15577_v5 = vpop.f32.mrf.mxu1  ;;  %v15583_v18 = vpop.f32.mrf.mxu0 }
 0xe75   : > { %v12109_v41 = vadd.f32 %v12103_v40, %v12059_v2 }
 0xe76   : > { %v12056_v9 = vpop.f32.mrf.mxu1  ;;  %v12106_v21 = vpop.f32.mrf.mxu0 }
 0xe77   : > { %v12111_v43 = vrot.slane %v12109_v41, 2  ;;  %v12283_v46 = vrot.slane %v12109_v41, 6  ;;  %v12356_v50 = vrot.slane %v12109_v41, 4 }
 0xe78   : > { %v15578_v47 = vpop.f32.mrf.mxu1  ;;  %v15584_v14 = vpop.f32.mrf.mxu0 }
 0xe79   : > { %15590 = vmatmul.mubr.msk.f32.vlgmr.msra.gmra.mxu1 %vm686_vm7, %v12111_v43  ;;  %15604 = vmatmul.mubr.msk.f32.vlgmr.msra.gmra.mxu0 %vm686_vm7, %v12283_v46 }
 0xe7a   : > { %15593 = vmatpush3.msk.msra.mxu1 %vm16147_vm5, %v15889_v58  ;;  %15614 = vmatpush3.bf16.msra.mxu0 %v12473_v44 }
 0xe7b   : > { %15594 = vmatprep.subr.mxu1 %v15885_v4  ;;  %15596 = vmatprep.mubr.msk.f32.mxu1 %vm15886_vm0, %v15885_v4 }
 0xe7c   : > { %15595 = vmatpush3.msk.msra.mxu1 %vm16151_vm6, %v15889_v58  ;;  %15615 = vmatprep.mubr.msk.bf16.mxu0 %vm15886_vm0, %v15885_v4 }
 0xe7d   : > { %15597 = vmatmul.mubr.msk.f32.vlgmr.msra.gmra.mxu1 %vm686_vm7, %v12109_v41  ;;  %15606 = vmatprep.subr.mxu1 %v15885_v4 }
 0xe7e   : > { %15616 = vmatmul.mubr.msk.bf16.vlgmr.msra.gmra.mxu0 %vm217_vm2, %v13866_v3  ;;  %15607 = vmatpush3.msk.msra.mxu1 %vm16147_vm5, %v15889_v58 }
 0xe7f   : > { %15608 = vmatprep.subr.mxu1 %v15885_v4  ;;  %15625 = vmatprep.subr.bf16.mxu0 %v15885_v4 }
 0xe80   : > { %15609 = vmatpush3.msk.msra.mxu1 %vm16151_vm6, %v15889_v58  ;;  %15610 = vmatprep.mubr.msk.f32.mxu1 %vm15886_vm0, %v15885_v4 }
 0xe81   : > { %15626 = vmatpush3.bf16.msra.mxu0 %v12568_v25  ;;  %15611 = vmatmul.mubr.msk.f32.vlgmr.msra.gmra.mxu1 %vm686_vm7, %v12356_v50 }
 0xe82   : > { %15619 = vmatprep.subr.bf16.mxu1 %v15885_v4  ;;  %15621 = vmatprep.mubr.msk.bf16.mxu1 %vm15886_vm0, %v15885_v4 }
 0xe83   : > { %15620 = vmatpush3.bf16.msra.mxu1 %v12519_v53  ;;  %15627 = vmatprep.mubr.msk.bf16.mxu0 %vm15886_vm0, %v15885_v4 }
 0xe84   : > { %15631 = vmatprep.subr.bf16.mxu1 %v15885_v4  ;;  %15637 = vmatprep.subr.bf16.mxu0 %v15885_v4 }
 0xe86   : > { %15622 = vmatmul.mubr.msk.bf16.vlgmr.msra.gmra.mxu1 %vm217_vm2, %v12457_v55  ;;  %15628 = vmatmul.mubr.msk.bf16.vlgmr.msra.gmra.mxu0 %vm217_vm2, %v13869_v15 }
 0xe87   : > { %15632 = vmatpush3.bf16.msra.mxu1 %v12617_v28  ;;  %15638 = vmatpush3.bf16.msra.mxu0 %v12675_v54 }
 0xe88   : > { %15633 = vmatprep.mubr.msk.bf16.mxu1 %vm15886_vm0, %v15885_v4  ;;  %15639 = vmatprep.mubr.msk.bf16.mxu0 %vm15886_vm0, %v15885_v4 }
 0xe89   : > { %15643 = vmatprep.subr.bf16.mxu1 %v15885_v4  ;;  %15649 = vmatprep.subr.bf16.mxu0 %v15885_v4 }
 0xe8e   : > { %15634 = vmatmul.mubr.msk.bf16.vlgmr.msra.gmra.mxu1 %vm217_vm2, %v13872_v16  ;;  %15640 = vmatmul.mubr.msk.bf16.vlgmr.msra.gmra.mxu0 %vm217_vm2, %v13874_v34 }
 0xe8f   : > { %15644 = vmatpush3.bf16.msra.mxu1 %v12725_v0  ;;  %15650 = vmatpush3.bf16.msra.mxu0 %v12775_v7 }
 0xe90   : > { %15645 = vmatprep.mubr.msk.bf16.mxu1 %vm15886_vm0, %v15885_v4  ;;  %15651 = vmatprep.mubr.msk.bf16.mxu0 %vm15886_vm0, %v15885_v4 }
 0xe91   : > { %15655 = vmatprep.subr.bf16.mxu1 %v15885_v4  ;;  %15661 = vmatprep.subr.bf16.mxu0 %v15885_v4 }
 0xe96   : > { %15646 = vmatmul.mubr.msk.bf16.vlgmr.msra.gmra.mxu1 %vm217_vm2, %v13876_v26  ;;  %15652 = vmatmul.mubr.msk.bf16.vlgmr.msra.gmra.mxu0 %vm217_vm2, %v13879_v6 }
 0xe97   : > { %15656 = vmatpush3.bf16.msra.mxu1 %v12833_v37  ;;  %15662 = vmatpush3.bf16.msra.mxu0 %v12883_v8 }
 0xe98   : > { %15657 = vmatprep.mubr.msk.bf16.mxu1 %vm15886_vm0, %v15885_v4  ;;  %15663 = vmatprep.mubr.msk.bf16.mxu0 %vm15886_vm0, %v15885_v4 }
 0xe99   : > { %15667 = vmatprep.subr.mxu1 %v15885_v4  ;;  %15681 = vmatprep.subr.mxu0 %v15885_v4 }
 0xe9e   : > { %15658 = vmatmul.mubr.msk.bf16.vlgmr.msra.gmra.mxu1 %vm217_vm2, %v13881_v11  ;;  %15664 = vmatmul.mubr.msk.bf16.vlgmr.msra.gmra.mxu0 %vm217_vm2, %v13883_v42 }
 0xe9f   : > { %15668 = vmatpush3.msk.msra.mxu1 %vm16123_vm3, %v15889_v58  ;;  %15682 = vmatpush3.msk.msra.mxu0 %vm16123_vm3, %v15889_v58 }
 0xea0   : > { %15669 = vmatprep.subr.mxu1 %v15885_v4  ;;  %15683 = vmatprep.subr.mxu0 %v15885_v4 }
 0xea1   : > { %15670 = vmatpush3.msk.msra.mxu1 %vm16134_vm4, %v15889_v58  ;;  %15671 = vmatprep.mubr.msk.f32.mxu1 %vm15886_vm0, %v15885_v4 }
 0xea2   : > { %15684 = vmatpush3.msk.msra.mxu0 %vm16134_vm4, %v15889_v58  ;;  %15685 = vmatprep.mubr.msk.f32.mxu0 %vm15886_vm0, %v15885_v4 }
 0xea3   : > { %15674 = vmatprep.subr.mxu1 %v15885_v4 }
 0xf39   : > { %v12180_v56 = vpop.f32.mrf.mxu1  ;;  %v12352_v12 = vpop.f32.mrf.mxu0 }
 0xf3b   : > { %v15591_v22 = vpop.f32.mrf.mxu1  ;;  %v15605_v13 = vpop.f32.mrf.mxu0 }
 0xf3d   : > { %v12252_v19 = vpop.f32.mrf.mxu1 }
 0xf3e   : > { %v12253_v45 = vadd.f32 %v12252_v19, %v12180_v56  ;;  %v12509_v23 = vpop.f32.mrf.mxu0 }
 0xf3f   : > { %v15598_v29 = vpop.f32.mrf.mxu1 }
 0xf40   : > { %v12263_v20 = vrot.slane %v12253_v45, %v16317_v33  ;;  %v15617_v49 = vpop.f32.mrf.mxu0 }
 0xf41   : > { %v12425_v59 = vpop.f32.mrf.mxu1 }
 0xf42   : > { %v12264_v27 = vcombine.high %v12263_v20, %v12263_v20  ;;  %v12271_v30 = vrot.slane %v12263_v20, %v16317_v33  ;;  %v12426_v31 = vadd.f32 %v12425_v59, %v12352_v12  ;;  %v12512_v24 = vpop.f32.mrf.mxu0 }
 0xf43   : > { %v15612_v62 = vpop.f32.mrf.mxu1 }
 0xf44   : > { %v12278_v52 = vrot.slane %v12264_v27, %v16317_v33  ;;  %12281 = vst.msk [vmem:[%s16323_s16 + $0x1c] sm:$0x1] %vm856_vm8, %v12271_v30  ;;  %v12436_v32 = vrot.slane %v12426_v31, %v16317_v33  ;;  %v15618_v35 = vpop.f32.mrf.mxu0 }
 0xf46   : > { %12282 = vst.msk [vmem:[%s16323_s16 + $0x3c] sm:$0x1] %vm856_vm8, %v12278_v52  ;;  %v12437_v63 = vcombine.high %v12436_v32, %v12436_v32  ;;  %v12444_v17 = vrot.slane %v12436_v32, %v16317_v33  ;;  %v12555_v38 = vpop.f32.mrf.mxu1  ;;  %v12604_v36 = vpop.f32.mrf.mxu0 }
 0xf47   : > { %v12556_v21 = vadd.f32 %v12555_v38, %v12509_v23 }
 0xf48   : > { %v12451_v40 = vrot.slane %v12437_v63, %v16317_v33  ;;  %12454 = vst.msk [vmem:[%s16323_s16 + $0x1d] sm:$0x1] %vm856_vm8, %v12444_v17  ;;  %v15623_v2 = vpop.f32.mrf.mxu1  ;;  %v15629_v39 = vpop.f32.mrf.mxu0 }
 0xf49   : > { %v12610_v14 = vadd.f32 %v12604_v36, %v12556_v21 }
 0xf4a   : > { %12455 = vst.msk [vmem:[%s16323_s16 + $0x3d] sm:$0x1] %vm856_vm8, %v12451_v40  ;;  %v12558_v5 = vpop.f32.mrf.mxu1  ;;  %v12607_v18 = vpop.f32.mrf.mxu0 }
 0xf4c   : > { %v15624_v41 = vpop.f32.mrf.mxu1  ;;  %v15630_v9 = vpop.f32.mrf.mxu0 }
 0xf4e   : > { %v12653_v43 = vpop.f32.mrf.mxu1  ;;  %v12711_v46 = vpop.f32.mrf.mxu0 }
 0xf4f   : > { %v12659_v25 = vadd.f32 %v12653_v43, %v12610_v14 }
 0xf50   : > { %v15635_v44 = vpop.f32.mrf.mxu1  ;;  %v15641_v47 = vpop.f32.mrf.mxu0 }
 0xf51   : > { %v12717_v15 = vadd.f32 %v12711_v46, %v12659_v25 }
 0xf52   : > { %v12656_v3 = vpop.f32.mrf.mxu1  ;;  %v12714_v48 = vpop.f32.mrf.mxu0 }
 0xf54   : > { %v15636_v50 = vpop.f32.mrf.mxu1  ;;  %v15642_v53 = vpop.f32.mrf.mxu0 }
 0xf56   : > { %v12761_v51 = vpop.f32.mrf.mxu1  ;;  %v12811_v55 = vpop.f32.mrf.mxu0 }
 0xf57   : > { %v12767_v57 = vadd.f32 %v12761_v51, %v12717_v15 }
 0xf58   : > { %v15647_v28 = vpop.f32.mrf.mxu1  ;;  %v15653_v54 = vpop.f32.mrf.mxu0 }
 0xf59   : > { %v12817_v1 = vadd.f32 %v12811_v55, %v12767_v57 }
 0xf5a   : > { %v12764_v16 = vpop.f32.mrf.mxu1  ;;  %v12814_v34 = vpop.f32.mrf.mxu0 }
 0xf5c   : > { %v15648_v0 = vpop.f32.mrf.mxu1  ;;  %v15654_v7 = vpop.f32.mrf.mxu0 }
 0xf5e   : > { %v12869_v10 = vpop.f32.mrf.mxu1  ;;  %v12919_v26 = vpop.f32.mrf.mxu0 }
 0xf5f   : > { %v12875_v6 = vadd.f32 %v12869_v10, %v12817_v1 }
 0xf60   : > { %v15659_v37 = vpop.f32.mrf.mxu1  ;;  %v15665_v8 = vpop.f32.mrf.mxu0 }
 0xf61   : > { %v12925_v11 = vadd.f32 %v12919_v26, %v12875_v6 }
 0xf62   : > { %v12872_v42 = vpop.f32.mrf.mxu1  ;;  %v12922_v56 = vpop.f32.mrf.mxu0 }
 0xf63   : > { %v12927_v12 = vrot.slane %v12925_v11, 2  ;;  %v13099_v22 = vrot.slane %v12925_v11, 6  ;;  %v13172_v45 = vrot.slane %v12925_v11, 4 }
 0xf64   : > { %v15660_v13 = vpop.f32.mrf.mxu1  ;;  %v15666_v19 = vpop.f32.mrf.mxu0 }
 0xf65   : > { %15672 = vmatmul.mubr.msk.f32.vlgmr.msra.gmra.mxu1 %vm686_vm7, %v12927_v12  ;;  %15686 = vmatmul.mubr.msk.f32.vlgmr.msra.gmra.mxu0 %vm686_vm7, %v13099_v22 }
 0xf66   : > { %15675 = vmatpush3.msk.msra.mxu1 %vm16147_vm5, %v15889_v58  ;;  %15678 = vmatprep.mubr.msk.f32.mxu1 %vm15886_vm0, %v15885_v4 }
 0xf67   : > { %15676 = vmatprep.subr.mxu1 %v15885_v4 }
 0xf68   : > { %15677 = vmatpush3.msk.msra.mxu1 %vm16151_vm6, %v15889_v58 }
 0xf69   : > { %15679 = vmatmul.mubr.msk.f32.vlgmr.msra.gmra.mxu1 %vm686_vm7, %v12925_v11  ;;  %15688 = vmatprep.subr.mxu1 %v15885_v4 }
 0xf6a   : > { %15689 = vmatpush3.msk.msra.mxu1 %vm16147_vm5, %v15889_v58  ;;  %15692 = vmatprep.mubr.msk.f32.mxu1 %vm15886_vm0, %v15885_v4 }
 0xf6b   : > { %15690 = vmatprep.subr.mxu1 %v15885_v4 }
 0xf6c   : > { %15691 = vmatpush3.msk.msra.mxu1 %vm16151_vm6, %v15889_v58 }
 0xf6d   : > { %15693 = vmatmul.mubr.msk.f32.vlgmr.msra.gmra.mxu1 %vm686_vm7, %v13172_v45 }
0x1025   : > { %v12996_v23 = vpop.f32.mrf.mxu1  ;;  %v13168_v29 = vpop.f32.mrf.mxu0 }
0x1027   : > { %v15673_v20 = vpop.f32.mrf.mxu1  ;;  %v15687_v60 = vpop.f32.mrf.mxu0 }
0x1029   : > { %v13068_v49 = vpop.f32.mrf.mxu1 }
0x102a   : > { %v13069_v59 = vadd.f32 %v13068_v49, %v12996_v23 }
0x102b   : > { %v15680_v27 = vpop.f32.mrf.mxu1 }
0x102c   : > { %v13079_v30 = vrot.slane %v13069_v59, %v16317_v33 }
0x102d   : > { %v13241_v4 = vpop.f32.mrf.mxu1 }
0x102e   : > { %v13080_v31 = vcombine.high %v13079_v30, %v13079_v30  ;;  %v13087_v58 = vrot.slane %v13079_v30, %v16317_v33  ;;  %v13242_v61 = vadd.f32 %v13241_v4, %v13168_v29 }
0x102f   : > { %v15694_v24 = vpop.f32.mrf.mxu1 }
0x1030   : > { %v13094_v62 = vrot.slane %v13080_v31, %v16317_v33  ;;  %13097 = vst.msk [vmem:[%s16323_s16 + $0x1e] sm:$0x1] %vm856_vm8, %v13087_v58  ;;  %v13252_v52 = vrot.slane %v13242_v61, %v16317_v33 }
0x1032   : > { %13098 = vst.msk [vmem:[%s16323_s16 + $0x3e] sm:$0x1] %vm856_vm8, %v13094_v62  ;;  %v13253_v32 = vcombine.high %v13252_v52, %v13252_v52  ;;  %v13260_v35 = vrot.slane %v13252_v52, %v16317_v33 }
0x1034   : > { %v13267_v63 = vrot.slane %v13253_v32, %v16317_v33  ;;  %13270 = vst.msk [vmem:[%s16323_s16 + $0x1f] sm:$0x1] %vm856_vm8, %v13260_v35 }
0x1036   : > { %13271 = vst.msk [vmem:[%s16323_s16 + $0x3f] sm:$0x1] %vm856_vm8, %v13267_v63 }
0x1037   : > { %15812 = shalt.err (!%p15809_p6)
}
0x1038   : > { %s15813_s16 = scalar_lea.hbm %s18486_s18, 1024  ;;  %s15817_s4 = scalar_lea.hbm %s18543_s2, 2048 }
0x1039   : > { %p15814_p4 = scmp.ne.s32.totalorder %s18486_s18, %s15813_s16  ;;  %p15818_p13 = scmp.lt.s32.totalorder %s18486_s18, %s18543_s2 }
0x103a   : > { %p15819_p2 = scmp.lt.s32.totalorder %s15817_s4, %s15813_s16 }
0x103b   : > { %p15815_p7 = pnand %p15814_p4, %p15960_p9 }
0x103c   : > { %p15820_p8 = por %p15819_p2, %p15818_p13 }
0x103d   : > { %p15816_p10 = pneg %p15815_p7 }
0x103f   : > { %p15821_p12 = pnand %p15820_p8, %p15816_p10 }
0x1041   : > { %15824 = shalt.err (!%p15821_p12)
}
0x1042   : > { %s15892_s30 = smov 128   ;;  %s15893_s5 = smov 8  }
0x1043   : > { %15700 = dma.vmem_to_hbm [thread:$0]  (%p15960_p9), %s18488_s7, 1024, %s18486_s18, %s13273_s12, %s15892_s30, %s15892_s30, %s15893_s5  }
0x1044 PF: > { %s13303_s6 = sand.u32 1, %s15859_s9   ;;  %p18557_p0 = scmp.ge.s32.totalorder %s15879_s14, 2 }
0x1045   : > { %s13304_s8 = scalar_lea.sflag [#allocation4], %s13303_s6 }
0x1046   : > { %p15707_p1 = pnand %p18557_p0, %p15967_p11 }
0x1048   : > { %p15708_p3 = pneg %p15707_p1 }
0x104a   : > { %15854 = dma.done.wait (%p15708_p3), %s13304_s8, 1024  }
0x104b   : > { %15856 = vsyncadd (%p15708_p3), %s13304_s8, 4294966272  ;;  %s18_s14 = sadd.s32 1, %s15879_s14   ;;  %s18558_s9 = smov %s15863_s10 }
0x104c   : > { %p15_p5 = scmp.ge.s32.totalorder %s18_s14, 4   ;;  %s18559_s10 = smov %s15867_s11 }
0x104d   : > { %s18560_s11 = smov %s15965_s23  ;;  %s18561_s12 = smov %s15875_s13 }
0x104e   : > { %s18562_s13 = smov %s18564_s17  ;;  %17 = sbr.rel (!%p15_p5) target bundleno = 6 (0x6), region = 98 }
0x1053   :  { %13309 = vsyncpa [#allocation3], 1 }
0x1054   :  { %13311 = vsyncpa [#allocation3 + $0x1], 1 }
0x1055   :  { %13312 = vsyncpa [#allocation4], 1 }
0x1056   :  { %13314 = vsyncpa [#allocation4 + $0x1], 1 }

</bundles_post_ra>
